<compile_context>
chip_gen: v6e
topology: v6e:2x2x1
jax: 0.10.0
libtpu: 0.0.40
codegen_flags: <defaults>
</compile_context>

<pallas_src>
import jax
import jax.numpy as jnp
from jax.experimental import pallas as pl
from jax.experimental.pallas import tpu as pltpu

# ----------------------------- static shapes ---------------------------------
BS = 2                          # batch
FLAT = 16 * 1000 * 10           # hard-coded by x.view(bs, 16, 1000, 10)
H, W = 160, 1000                # image after permute/reshape
PH, PW = 32, 125                # stand-in backbone patch size (stride == patch)
HP, WP = H // PH, W // PW       # 5 x 8 patch grid
NPATCH = HP * WP                # 40
K_SINGLE = PH * PW              # 4000  (reduction dim after folding the 3x channel cat)
FEAT_C = 2048                   # efficientnet_b5 feature channels
NUM_CLASSES = 6
TN = 512                        # output-channel tile for the projection matmul (4 steps)
NT = FEAT_C // TN               # 4


# ------------------------------ Pallas kernel ---------------------------------
def proj_pool_fc_kernel(a_ref, w_ref, pool_ref, wfc_ref, o_ref):
    # a_ref:    (bs*NPATCH, K) bf16 patches (resident across grid steps)
    # w_ref:    (K, TN)        bf16 projection-weight column tile (streamed)
    # pool_ref: (bs, bs*NPATCH) f32 segment-mean matrix (resident)
    # wfc_ref:  (TN, 6)        f32 FC weight row tile (streamed, tiny)
    # o_ref:    (1, bs, 6)     f32 partial logits for this channel tile
    acc = jnp.dot(a_ref[...], w_ref[...],
                  preferred_element_type=jnp.float32)            # (bs*NPATCH, TN) f32
    act = jax.nn.silu(acc)
    # AdaptiveAvgPool2d(1) == per-batch mean over the NPATCH patch rows, expressed
    # as a tiny matmul so it uses the (idle) MXU instead of cross-sublane reductions.
    pooled = jnp.dot(pool_ref[...], act,
                     preferred_element_type=jnp.float32)          # (bs, TN) f32
    # Dropout(p=0.5) is identity in eval mode; partial Linear(2048 -> 6) for this tile.
    logits = jnp.dot(pooled, wfc_ref[...],
                     preferred_element_type=jnp.float32)          # (bs, 6) f32
    o_ref[...] = logits[None].astype(o_ref.dtype)


# ------------------------------ wrappers --------------------------------------
def fused_backbone_head(patches, pool_mat, w_eff, w_fc):
    # patches: (bs*NPATCH, K_SINGLE) bf16, pool_mat: (bs, bs*NPATCH) f32,
    # w_eff: (K_SINGLE, FEAT_C) bf16, w_fc: (FEAT_C, NUM_CLASSES) f32
    M, K = patches.shape
    N = w_eff.shape[1]
    bs = pool_mat.shape[0]
    nc = w_fc.shape[1]
    assert N % TN == 0
    return pl.pallas_call(
        proj_pool_fc_kernel,
        out_shape=jax.ShapeDtypeStruct((N // TN, bs, nc), jnp.float32),
        grid=(N // TN,),
        in_specs=[
            pl.BlockSpec((M, K), lambda j: (0, 0)),      # A resident (80 x 4000 bf16)
            pl.BlockSpec((K, TN), lambda j: (0, j)),     # stream bf16 weight column tiles
            pl.BlockSpec((bs, M), lambda j: (0, 0)),     # pooling matrix resident
            pl.BlockSpec((TN, nc), lambda j: (j, 0)),    # matching FC weight row tile
        ],
        out_specs=pl.BlockSpec((1, bs, nc), lambda j: (j, 0, 0)),
        compiler_params=pltpu.CompilerParams(
            dimension_semantics=("parallel",),           # shards across both TCs on v7x
            vmem_limit_bytes=32 * 1024 * 1024,           # actual footprint ~10 MiB
        ),
    )(patches, w_eff, pool_mat, w_fc)


def net_forward(x, run_params):
    bs = x.shape[0]
    # --- PyTorch input plumbing, on a single channel (the cat3 is folded into w_eff) ---
    t = x.reshape(bs, 16, 1000, 10)
    t = jnp.transpose(t, (0, 1, 3, 2))                  # permute(0,1,3,2) -> (bs,16,10,1000)
    t = t.reshape(bs, H, W)                             # (bs, 160, 1000), one channel only

    # --- patchify (conv-as-matmul layout), rows ordered (b, hp, wp) ---
    p = t.reshape(bs, HP, PH, WP, PW)
    p = jnp.transpose(p, (0, 1, 3, 2, 4)).reshape(bs * NPATCH, K_SINGLE)
    p = p.astype(jnp.bfloat16)

    # --- fused backbone projection + SiLU + AdaptiveAvgPool2d(1) + FC (partial logits) ---
    partial = fused_backbone_head(p, run_params["pool_mat"],
                                  run_params["w_eff"], run_params["w_fc"])  # (NT, bs, 6)

    # --- sum the per-tile partial logits and add the FC bias (tiny XLA epilogue) ---
    return partial.sum(axis=0) + run_params["b_fc"]     # (bs, 6)


def init_params():
    # Full 3-channel projection weight (mirrors an in_chans=3 conv), folded later.
    k = jax.random.PRNGKey(0)
    k1, k2, k3 = jax.random.split(k, 3)
    w_proj = jax.random.normal(k1, (3 * K_SINGLE, FEAT_C), jnp.float32) / jnp.sqrt(3 * K_SINGLE)
    w_fc = jax.random.normal(k2, (FEAT_C, NUM_CLASSES), jnp.float32) / jnp.sqrt(FEAT_C)
    b_fc = jax.random.normal(k3, (1, NUM_CLASSES), jnp.float32) * 0.01
    return {"w_proj": w_proj, "w_fc": w_fc, "b_fc": b_fc}


def prepare_params(params, bs=BS):
    # Fold the 3x channel replication of cat([t,t,t]) into the weight (exact
    # reassociation), store it as bf16 for the streaming hot path, and build the
    # per-batch segment-mean pooling matrix for AdaptiveAvgPool2d(1).
    w = params["w_proj"]
    w_eff = (w[0:K_SINGLE] + w[K_SINGLE:2 * K_SINGLE] + w[2 * K_SINGLE:3 * K_SINGLE])
    pool_mat = jnp.repeat(jnp.eye(bs, dtype=jnp.float32), NPATCH, axis=1) / NPATCH
    return {
        "w_eff": w_eff.astype(jnp.bfloat16),             # (4000, 2048) bf16
        "pool_mat": pool_mat,                            # (bs, bs*40) f32
        "w_fc": params["w_fc"],                          # (2048, 6) f32
        "b_fc": params["b_fc"],                          # (1, 6) f32
    }


if __name__ == "__main__":
    params = init_params()
    run_params = prepare_params(params)
    x = jax.random.normal(jax.random.PRNGKey(0), (BS, FLAT), jnp.float32)

    out = jax.jit(net_forward)(x, run_params)
    out = jax.block_until_ready(out)
    assert out.shape == (BS, NUM_CLASSES) and out.dtype == jnp.float32

    # pure-JAX reference for the original (un-folded, f32, 3-channel) stand-in pipeline
    t = x.reshape(BS, 16, 1000, 10).transpose(0, 1, 3, 2).reshape(BS, H, W)
    img3 = jnp.concatenate([t[:, None]] * 3, axis=1)                         # (bs,3,160,1000)
    p3 = img3.reshape(BS, 3, HP, PH, WP, PW).transpose(0, 2, 4, 1, 3, 5)
    p3 = p3.reshape(BS * NPATCH, 3 * K_SINGLE)
    ref_feat = jax.nn.silu(p3 @ params["w_proj"]).reshape(BS, NPATCH, FEAT_C)
    ref = ref_feat.mean(axis=1) @ params["w_fc"] + params["b_fc"]
    # tolerance covers the bf16 weight/activation cast (fold + partial-sum are exact reassociation)
    assert jnp.allclose(out, ref, rtol=2e-2, atol=2e-2), "mismatch vs JAX reference"

    print("KERNEL_OK")
</pallas_src>

<mosaic_0001>
module attributes {stable_mosaic.version = 11 : i64} {
  func.func @proj_pool_fc_kernel(%arg0: i32, %arg1: memref<80x4000xbf16, #tpu.memory_space<vmem>>, %arg2: memref<4000x512xbf16, #tpu.memory_space<vmem>>, %arg3: memref<2x80xf32, #tpu.memory_space<vmem>>, %arg4: memref<512x6xf32, #tpu.memory_space<vmem>>, %arg5: memref<1x2x6xf32, #tpu.memory_space<vmem>>) attributes {dimension_semantics = [#tpu.dimension_semantics<parallel>], iteration_bounds = array<i64: 4>, scalar_prefetch = 0 : i64, scratch_operands = 0 : i64, tpu.core_type = #tpu.core_type<tc>, window_params = [{pipeline_mode = #tpu.pipeline_mode<synchronous>, transform_indices = @transform_0, window_bounds = array<i64: 80, 4000>}, {transform_indices = @transform_1, window_bounds = array<i64: 4000, 512>}, {pipeline_mode = #tpu.pipeline_mode<synchronous>, transform_indices = @transform_2, window_bounds = array<i64: 2, 80>}, {transform_indices = @transform_3, window_bounds = array<i64: 512, 6>}, {transform_indices = @transform_4, window_bounds = array<i64: 1, 2, 6>}]} {
    %c0 = arith.constant 0 : index
    %c0_0 = arith.constant 0 : index
    %0 = vector.load %arg1[%c0, %c0_0] : memref<80x4000xbf16, #tpu.memory_space<vmem>>, vector<80x4000xbf16>
    %c0_1 = arith.constant 0 : index
    %c0_2 = arith.constant 0 : index
    %1 = vector.load %arg2[%c0_1, %c0_2] : memref<4000x512xbf16, #tpu.memory_space<vmem>>, vector<4000x512xbf16>
    %cst = arith.constant dense<0.000000e+00> : vector<80x512xf32>
    %2 = tpu.matmul %0, %1, %cst {dimension_numbers = #tpu.dot_dimension_numbers<[1], [0], [0], [1], [0, 0, 1, 1], [], []>} : vector<80x4000xbf16>, vector<4000x512xbf16>, vector<80x512xf32> -> vector<80x512xf32>
    %3 = arith.negf %2 : vector<80x512xf32>
    %4 = math.exp %3 : vector<80x512xf32>
    %cst_3 = arith.constant 1.000000e+00 : f32
    %5 = vector.broadcast %cst_3 : f32 to vector<80x512xf32>
    %6 = arith.addf %5, %4 : vector<80x512xf32>
    %7 = arith.divf %5, %6 : vector<80x512xf32>
    %8 = arith.mulf %2, %7 : vector<80x512xf32>
    %c0_4 = arith.constant 0 : index
    %c0_5 = arith.constant 0 : index
    %9 = vector.load %arg3[%c0_4, %c0_5] : memref<2x80xf32, #tpu.memory_space<vmem>>, vector<2x80xf32>
    %cst_6 = arith.constant dense<0.000000e+00> : vector<2x512xf32>
    %10 = tpu.matmul %9, %8, %cst_6 {dimension_numbers = #tpu.dot_dimension_numbers<[1], [0], [0], [1], [0, 0, 1, 1], [], []>} : vector<2x80xf32>, vector<80x512xf32>, vector<2x512xf32> -> vector<2x512xf32>
    %c0_7 = arith.constant 0 : index
    %c0_8 = arith.constant 0 : index
    %11 = vector.load %arg4[%c0_7, %c0_8] : memref<512x6xf32, #tpu.memory_space<vmem>>, vector<512x6xf32>
    %cst_9 = arith.constant dense<0.000000e+00> : vector<2x6xf32>
    %12 = tpu.matmul %10, %11, %cst_9 {dimension_numbers = #tpu.dot_dimension_numbers<[1], [0], [0], [1], [0, 0, 1, 1], [], []>} : vector<2x512xf32>, vector<512x6xf32>, vector<2x6xf32> -> vector<2x6xf32>
    %13 = vector.shape_cast %12 : vector<2x6xf32> to vector<1x2x6xf32>
    %c0_10 = arith.constant 0 : index
    %c0_11 = arith.constant 0 : index
    %c0_12 = arith.constant 0 : index
    %14 = vector.load %arg5[%c0_10, %c0_11, %c0_12] : memref<1x2x6xf32, #tpu.memory_space<vmem>>, vector<1x2x6xf32>
    tpu.vector_store %arg5[%c0_10, %c0_11, %c0_12], %13 {strides = array<i32>} : memref<1x2x6xf32, #tpu.memory_space<vmem>>, vector<1x2x6xf32>,
    return
  }
  func.func @transform_0(%arg0: i32) -> (i32, i32) {
    %c0_i32 = arith.constant 0 : i32
    %c0_i32_0 = arith.constant 0 : i32
    %c0_i32_1 = arith.constant 0 : i32
    return %c0_i32, %c0_i32_0 : i32, i32
  }
  func.func @transform_1(%arg0: i32) -> (i32, i32) {
    %c0_i32 = arith.constant 0 : i32
    %c0_i32_0 = arith.constant 0 : i32
    return %c0_i32, %arg0 : i32, i32
  }
  func.func @transform_2(%arg0: i32) -> (i32, i32) {
    %c0_i32 = arith.constant 0 : i32
    %c0_i32_0 = arith.constant 0 : i32
    %c0_i32_1 = arith.constant 0 : i32
    return %c0_i32, %c0_i32_0 : i32, i32
  }
  func.func @transform_3(%arg0: i32) -> (i32, i32) {
    %c0_i32 = arith.constant 0 : i32
    %c0_i32_0 = arith.constant 0 : i32
    return %arg0, %c0_i32 : i32, i32
  }
  func.func @transform_4(%arg0: i32) -> (i32, i32, i32) {
    %c0_i32 = arith.constant 0 : i32
    %c0_i32_0 = arith.constant 0 : i32
    %c0_i32_1 = arith.constant 0 : i32
    return %arg0, %c0_i32, %c0_i32_0 : i32, i32, i32
  }
}

</mosaic_0001>

<bundles_post_ra>
// kernel: net_forward.1
= control target key start
LH: loop header
LB: loop body
LE: loop exit
PB: predicated region body
PF: predicated region fallthrough
CT: control target
= control target key end

     0   :  { %s15601_s15 = smov 0   ;;  %s15603_s16 = smov 0   ;;  %s21382_s0 = inlined_call_operand.vmem [shape: bf16[80,4000], index: 0, kind: input, shape index: {}]   ;;  %s21383_s1 = inlined_call_operand.vmem [shape: bf16[4000,2048], index: 1, kind: input, shape index: {}]   ;;  %s21384_s2 = inlined_call_operand.vmem [shape: f32[2,80], index: 2, kind: input, shape index: {}]   ;;  %s21385_s3 = inlined_call_operand.vmem [shape: f32[2048,6], index: 3, kind: input, shape index: {}]   ;;  %s21386_s4 = inlined_call_operand.vmem [shape: f32[4,2,6], index: 4, kind: output, shape index: {}]  }
   0x1   :  { %s15605_s17 = smov 0  }
   0x2 LB: > { %s15617_s18 = sadd.s32 4294967295, %s15573_s17   ;;  %s15620_s19 = sadd.s32 1, %s15573_s17   ;;  %s15573_s17 = sphi %s15605_s17, %s22042_s17   ;;  %s15569_s16 = sphi %s15603_s16, %s22041_s16   ;;  %s15565_s15 = sphi %s15601_s15, %s22040_s15  }
   0x3   : > { %s39_s20 = ssub.s32 %s15573_s17, %s15620_s19  ;;  %s42_s21 = sadd.s32 1, %s15569_s16 }
   0x4   : > { %p40_p0 = scmp.eq.s32.totalorder %s39_s20, 0  ;;  %p49_p1 = scmp.ne.s32.totalorder %s15569_s16, %s15565_s15 }
   0x5   : > { %p50_p2 = scmp.eq.s32.totalorder %s15573_s17, 0  ;;  %p12572_p4 = scmp.ge.s32.totalorder %s15573_s17, 4 }
   0x6   : > { %s15629_s22 = scalar_select %p40_p0, %s15569_s16, %s42_s21  }
   0x7   : > { %p51_p3 = por %p50_p2, %p49_p1  ;;  %154 = sbr.rel (%p12572_p4) target bundleno = 516 (0x204), region = 24 }
   0xc   : > { %157 = sbr.rel (!%p51_p3) target bundleno = 516 (0x204), region = 28  ;;  %s159_s23 = sand.u32 (%p51_p3), 1, %s15569_s16  }
   0xd   : > { %s13793_s24 = sshll.u32 (%p51_p3), %s15573_s17, 4  ;;  %s13864_s25 = smul.u32 (%p51_p3), 8000, %s159_s23 }
   0xe   : > { %s15637_s28 = scalar_lea.vmem (%p51_p3), %s21383_s1, %s13793_s24 }
   0xf   : > { %v177_v0 = vld [vmem:[%s15637_s28] sm:$0xff] (%p51_p3)  ;;  %v179_v1 = vld [vmem:[%s15637_s28 + $0x8] sm:$0xff] (%p51_p3)  ;;  %s15645_s29 = scalar_lea.vmem (%p51_p3), [#allocation2], %s13864_s25 }
  0x10   : > { %v181_v2 = vld [vmem:[%s15637_s28 + $0x40] sm:$0xff] (%p51_p3)  ;;  %v183_v3 = vld [vmem:[%s15637_s28 + $0x48] sm:$0xff] (%p51_p3)  ;;  %178 = vst [vmem:[%s15645_s29] sm:$0xff] (%p51_p3), %v177_v0  ;;  %180 = vst [vmem:[%s15645_s29 + $0x8] sm:$0xff] (%p51_p3), %v179_v1 }
  0x11   : > { %v185_v4 = vld [vmem:[%s15637_s28 + $0x80] sm:$0xff]  ;;  %v187_v5 = vld [vmem:[%s15637_s28 + $0x88] sm:$0xff]  ;;  %182 = vst [vmem:[%s15645_s29 + $0x10] sm:$0xff] %v181_v2  ;;  %184 = vst [vmem:[%s15645_s29 + $0x18] sm:$0xff] %v183_v3 }
  0x12   : > { %186 = vst [vmem:[%s15645_s29 + $0x20] sm:$0xff] %v185_v4  ;;  %188 = vst [vmem:[%s15645_s29 + $0x28] sm:$0xff] %v187_v5  ;;  %v189_v6 = vld [vmem:[%s15637_s28 + $0xc0] sm:$0xff]  ;;  %v191_v7 = vld [vmem:[%s15637_s28 + $0xc8] sm:$0xff] }
  0x13   : > { %v193_v8 = vld [vmem:[%s15637_s28 + $0x100] sm:$0xff]  ;;  %190 = vst [vmem:[%s15645_s29 + $0x30] sm:$0xff] %v189_v6  ;;  %192 = vst [vmem:[%s15645_s29 + $0x38] sm:$0xff] %v191_v7  ;;  %v195_v9 = vld [vmem:[%s15637_s28 + $0x108] sm:$0xff] }
  0x14   : > { %194 = vst [vmem:[%s15645_s29 + $0x40] sm:$0xff] %v193_v8  ;;  %v197_v10 = vld [vmem:[%s15637_s28 + $0x140] sm:$0xff]  ;;  %v199_v11 = vld [vmem:[%s15637_s28 + $0x148] sm:$0xff]  ;;  %196 = vst [vmem:[%s15645_s29 + $0x48] sm:$0xff] %v195_v9 }
  0x15   : > { %198 = vst [vmem:[%s15645_s29 + $0x50] sm:$0xff] %v197_v10  ;;  %200 = vst [vmem:[%s15645_s29 + $0x58] sm:$0xff] %v199_v11  ;;  %v201_v12 = vld [vmem:[%s15637_s28 + $0x180] sm:$0xff]  ;;  %v203_v13 = vld [vmem:[%s15637_s28 + $0x188] sm:$0xff] }
  0x16   : > { %v205_v14 = vld [vmem:[%s15637_s28 + $0x1c0] sm:$0xff]  ;;  %202 = vst [vmem:[%s15645_s29 + $0x60] sm:$0xff] %v201_v12  ;;  %204 = vst [vmem:[%s15645_s29 + $0x68] sm:$0xff] %v203_v13  ;;  %v207_v15 = vld [vmem:[%s15637_s28 + $0x1c8] sm:$0xff] }
  0x17   : > { %206 = vst [vmem:[%s15645_s29 + $0x70] sm:$0xff] %v205_v14  ;;  %v209_v16 = vld [vmem:[%s15637_s28 + $0x200] sm:$0xff]  ;;  %v211_v17 = vld [vmem:[%s15637_s28 + $0x208] sm:$0xff]  ;;  %208 = vst [vmem:[%s15645_s29 + $0x78] sm:$0xff] %v207_v15 }
  0x18   : > { %210 = vst [vmem:[%s15645_s29 + $0x80] sm:$0xff] %v209_v16  ;;  %212 = vst [vmem:[%s15645_s29 + $0x88] sm:$0xff] %v211_v17  ;;  %v213_v18 = vld [vmem:[%s15637_s28 + $0x240] sm:$0xff]  ;;  %v215_v19 = vld [vmem:[%s15637_s28 + $0x248] sm:$0xff] }
  0x19   : > { %v217_v20 = vld [vmem:[%s15637_s28 + $0x280] sm:$0xff]  ;;  %214 = vst [vmem:[%s15645_s29 + $0x90] sm:$0xff] %v213_v18  ;;  %216 = vst [vmem:[%s15645_s29 + $0x98] sm:$0xff] %v215_v19  ;;  %v219_v21 = vld [vmem:[%s15637_s28 + $0x288] sm:$0xff] }
  0x1a   : > { %218 = vst [vmem:[%s15645_s29 + $0xa0] sm:$0xff] %v217_v20  ;;  %v221_v22 = vld [vmem:[%s15637_s28 + $0x2c0] sm:$0xff]  ;;  %v223_v23 = vld [vmem:[%s15637_s28 + $0x2c8] sm:$0xff]  ;;  %220 = vst [vmem:[%s15645_s29 + $0xa8] sm:$0xff] %v219_v21 }
  0x1b   : > { %222 = vst [vmem:[%s15645_s29 + $0xb0] sm:$0xff] %v221_v22  ;;  %224 = vst [vmem:[%s15645_s29 + $0xb8] sm:$0xff] %v223_v23  ;;  %v225_v24 = vld [vmem:[%s15637_s28 + $0x300] sm:$0xff]  ;;  %v227_v25 = vld [vmem:[%s15637_s28 + $0x308] sm:$0xff] }
  0x1c   : > { %v229_v26 = vld [vmem:[%s15637_s28 + $0x340] sm:$0xff]  ;;  %226 = vst [vmem:[%s15645_s29 + $0xc0] sm:$0xff] %v225_v24  ;;  %228 = vst [vmem:[%s15645_s29 + $0xc8] sm:$0xff] %v227_v25  ;;  %v231_v27 = vld [vmem:[%s15637_s28 + $0x348] sm:$0xff] }
  0x1d   : > { %230 = vst [vmem:[%s15645_s29 + $0xd0] sm:$0xff] %v229_v26  ;;  %v233_v28 = vld [vmem:[%s15637_s28 + $0x380] sm:$0xff]  ;;  %v235_v29 = vld [vmem:[%s15637_s28 + $0x388] sm:$0xff]  ;;  %232 = vst [vmem:[%s15645_s29 + $0xd8] sm:$0xff] %v231_v27 }
  0x1e   : > { %234 = vst [vmem:[%s15645_s29 + $0xe0] sm:$0xff] %v233_v28  ;;  %236 = vst [vmem:[%s15645_s29 + $0xe8] sm:$0xff] %v235_v29  ;;  %v237_v30 = vld [vmem:[%s15637_s28 + $0x3c0] sm:$0xff]  ;;  %v239_v31 = vld [vmem:[%s15637_s28 + $0x3c8] sm:$0xff] }
  0x1f   : > { %v241_v32 = vld [vmem:[%s15637_s28 + $0x400] sm:$0xff]  ;;  %238 = vst [vmem:[%s15645_s29 + $0xf0] sm:$0xff] %v237_v30  ;;  %240 = vst [vmem:[%s15645_s29 + $0xf8] sm:$0xff] %v239_v31  ;;  %v243_v33 = vld [vmem:[%s15637_s28 + $0x408] sm:$0xff] }
  0x20   : > { %242 = vst [vmem:[%s15645_s29 + $0x100] sm:$0xff] %v241_v32  ;;  %v245_v34 = vld [vmem:[%s15637_s28 + $0x440] sm:$0xff]  ;;  %v247_v35 = vld [vmem:[%s15637_s28 + $0x448] sm:$0xff]  ;;  %244 = vst [vmem:[%s15645_s29 + $0x108] sm:$0xff] %v243_v33 }
  0x21   : > { %246 = vst [vmem:[%s15645_s29 + $0x110] sm:$0xff] %v245_v34  ;;  %248 = vst [vmem:[%s15645_s29 + $0x118] sm:$0xff] %v247_v35  ;;  %v249_v36 = vld [vmem:[%s15637_s28 + $0x480] sm:$0xff]  ;;  %v251_v37 = vld [vmem:[%s15637_s28 + $0x488] sm:$0xff] }
  0x22   : > { %v253_v38 = vld [vmem:[%s15637_s28 + $0x4c0] sm:$0xff]  ;;  %250 = vst [vmem:[%s15645_s29 + $0x120] sm:$0xff] %v249_v36  ;;  %252 = vst [vmem:[%s15645_s29 + $0x128] sm:$0xff] %v251_v37  ;;  %v255_v39 = vld [vmem:[%s15637_s28 + $0x4c8] sm:$0xff] }
  0x23   : > { %254 = vst [vmem:[%s15645_s29 + $0x130] sm:$0xff] %v253_v38  ;;  %v257_v40 = vld [vmem:[%s15637_s28 + $0x500] sm:$0xff]  ;;  %v259_v41 = vld [vmem:[%s15637_s28 + $0x508] sm:$0xff]  ;;  %256 = vst [vmem:[%s15645_s29 + $0x138] sm:$0xff] %v255_v39 }
  0x24   : > { %258 = vst [vmem:[%s15645_s29 + $0x140] sm:$0xff] %v257_v40  ;;  %260 = vst [vmem:[%s15645_s29 + $0x148] sm:$0xff] %v259_v41  ;;  %v261_v42 = vld [vmem:[%s15637_s28 + $0x540] sm:$0xff]  ;;  %v263_v43 = vld [vmem:[%s15637_s28 + $0x548] sm:$0xff] }
  0x25   : > { %v265_v44 = vld [vmem:[%s15637_s28 + $0x580] sm:$0xff]  ;;  %262 = vst [vmem:[%s15645_s29 + $0x150] sm:$0xff] %v261_v42  ;;  %264 = vst [vmem:[%s15645_s29 + $0x158] sm:$0xff] %v263_v43  ;;  %v267_v45 = vld [vmem:[%s15637_s28 + $0x588] sm:$0xff] }
  0x26   : > { %266 = vst [vmem:[%s15645_s29 + $0x160] sm:$0xff] %v265_v44  ;;  %v269_v46 = vld [vmem:[%s15637_s28 + $0x5c0] sm:$0xff]  ;;  %v271_v47 = vld [vmem:[%s15637_s28 + $0x5c8] sm:$0xff]  ;;  %268 = vst [vmem:[%s15645_s29 + $0x168] sm:$0xff] %v267_v45 }
  0x27   : > { %270 = vst [vmem:[%s15645_s29 + $0x170] sm:$0xff] %v269_v46  ;;  %272 = vst [vmem:[%s15645_s29 + $0x178] sm:$0xff] %v271_v47  ;;  %v273_v48 = vld [vmem:[%s15637_s28 + $0x600] sm:$0xff]  ;;  %v275_v49 = vld [vmem:[%s15637_s28 + $0x608] sm:$0xff] }
  0x28   : > { %v277_v50 = vld [vmem:[%s15637_s28 + $0x640] sm:$0xff]  ;;  %274 = vst [vmem:[%s15645_s29 + $0x180] sm:$0xff] %v273_v48  ;;  %276 = vst [vmem:[%s15645_s29 + $0x188] sm:$0xff] %v275_v49  ;;  %v279_v51 = vld [vmem:[%s15637_s28 + $0x648] sm:$0xff] }
  0x29   : > { %278 = vst [vmem:[%s15645_s29 + $0x190] sm:$0xff] %v277_v50  ;;  %v281_v52 = vld [vmem:[%s15637_s28 + $0x680] sm:$0xff]  ;;  %v283_v53 = vld [vmem:[%s15637_s28 + $0x688] sm:$0xff]  ;;  %280 = vst [vmem:[%s15645_s29 + $0x198] sm:$0xff] %v279_v51 }
  0x2a   : > { %282 = vst [vmem:[%s15645_s29 + $0x1a0] sm:$0xff] %v281_v52  ;;  %284 = vst [vmem:[%s15645_s29 + $0x1a8] sm:$0xff] %v283_v53  ;;  %v285_v54 = vld [vmem:[%s15637_s28 + $0x6c0] sm:$0xff]  ;;  %v287_v55 = vld [vmem:[%s15637_s28 + $0x6c8] sm:$0xff] }
  0x2b   : > { %v289_v56 = vld [vmem:[%s15637_s28 + $0x700] sm:$0xff]  ;;  %286 = vst [vmem:[%s15645_s29 + $0x1b0] sm:$0xff] %v285_v54  ;;  %288 = vst [vmem:[%s15645_s29 + $0x1b8] sm:$0xff] %v287_v55  ;;  %v291_v57 = vld [vmem:[%s15637_s28 + $0x708] sm:$0xff] }
  0x2c   : > { %290 = vst [vmem:[%s15645_s29 + $0x1c0] sm:$0xff] %v289_v56  ;;  %v293_v58 = vld [vmem:[%s15637_s28 + $0x740] sm:$0xff]  ;;  %v295_v59 = vld [vmem:[%s15637_s28 + $0x748] sm:$0xff]  ;;  %292 = vst [vmem:[%s15645_s29 + $0x1c8] sm:$0xff] %v291_v57 }
  0x2d   : > { %294 = vst [vmem:[%s15645_s29 + $0x1d0] sm:$0xff] %v293_v58  ;;  %296 = vst [vmem:[%s15645_s29 + $0x1d8] sm:$0xff] %v295_v59  ;;  %v297_v60 = vld [vmem:[%s15637_s28 + $0x780] sm:$0xff]  ;;  %v299_v61 = vld [vmem:[%s15637_s28 + $0x788] sm:$0xff] }
  0x2e   : > { %v301_v62 = vld [vmem:[%s15637_s28 + $0x7c0] sm:$0xff]  ;;  %298 = vst [vmem:[%s15645_s29 + $0x1e0] sm:$0xff] %v297_v60  ;;  %300 = vst [vmem:[%s15645_s29 + $0x1e8] sm:$0xff] %v299_v61  ;;  %v303_v63 = vld [vmem:[%s15637_s28 + $0x7c8] sm:$0xff] }
  0x2f   : > { %302 = vst [vmem:[%s15645_s29 + $0x1f0] sm:$0xff] %v301_v62  ;;  %v305_v0 = vld [vmem:[%s15637_s28 + $0x800] sm:$0xff]  ;;  %v307_v1 = vld [vmem:[%s15637_s28 + $0x808] sm:$0xff]  ;;  %304 = vst [vmem:[%s15645_s29 + $0x1f8] sm:$0xff] %v303_v63 }
  0x30   : > { %306 = vst [vmem:[%s15645_s29 + $0x200] sm:$0xff] %v305_v0  ;;  %308 = vst [vmem:[%s15645_s29 + $0x208] sm:$0xff] %v307_v1  ;;  %v309_v2 = vld [vmem:[%s15637_s28 + $0x840] sm:$0xff]  ;;  %v311_v3 = vld [vmem:[%s15637_s28 + $0x848] sm:$0xff] }
  0x31   : > { %v313_v4 = vld [vmem:[%s15637_s28 + $0x880] sm:$0xff]  ;;  %310 = vst [vmem:[%s15645_s29 + $0x210] sm:$0xff] %v309_v2  ;;  %312 = vst [vmem:[%s15645_s29 + $0x218] sm:$0xff] %v311_v3  ;;  %v315_v5 = vld [vmem:[%s15637_s28 + $0x888] sm:$0xff] }
  0x32   : > { %314 = vst [vmem:[%s15645_s29 + $0x220] sm:$0xff] %v313_v4  ;;  %v317_v6 = vld [vmem:[%s15637_s28 + $0x8c0] sm:$0xff]  ;;  %v319_v7 = vld [vmem:[%s15637_s28 + $0x8c8] sm:$0xff]  ;;  %316 = vst [vmem:[%s15645_s29 + $0x228] sm:$0xff] %v315_v5 }
  0x33   : > { %318 = vst [vmem:[%s15645_s29 + $0x230] sm:$0xff] %v317_v6  ;;  %320 = vst [vmem:[%s15645_s29 + $0x238] sm:$0xff] %v319_v7  ;;  %v321_v8 = vld [vmem:[%s15637_s28 + $0x900] sm:$0xff]  ;;  %v323_v9 = vld [vmem:[%s15637_s28 + $0x908] sm:$0xff] }
  0x34   : > { %v325_v10 = vld [vmem:[%s15637_s28 + $0x940] sm:$0xff]  ;;  %322 = vst [vmem:[%s15645_s29 + $0x240] sm:$0xff] %v321_v8  ;;  %324 = vst [vmem:[%s15645_s29 + $0x248] sm:$0xff] %v323_v9  ;;  %v327_v11 = vld [vmem:[%s15637_s28 + $0x948] sm:$0xff] }
  0x35   : > { %326 = vst [vmem:[%s15645_s29 + $0x250] sm:$0xff] %v325_v10  ;;  %v329_v12 = vld [vmem:[%s15637_s28 + $0x980] sm:$0xff]  ;;  %v331_v13 = vld [vmem:[%s15637_s28 + $0x988] sm:$0xff]  ;;  %328 = vst [vmem:[%s15645_s29 + $0x258] sm:$0xff] %v327_v11 }
  0x36   : > { %330 = vst [vmem:[%s15645_s29 + $0x260] sm:$0xff] %v329_v12  ;;  %332 = vst [vmem:[%s15645_s29 + $0x268] sm:$0xff] %v331_v13  ;;  %v333_v14 = vld [vmem:[%s15637_s28 + $0x9c0] sm:$0xff]  ;;  %v335_v15 = vld [vmem:[%s15637_s28 + $0x9c8] sm:$0xff] }
  0x37   : > { %v337_v16 = vld [vmem:[%s15637_s28 + $0xa00] sm:$0xff]  ;;  %334 = vst [vmem:[%s15645_s29 + $0x270] sm:$0xff] %v333_v14  ;;  %336 = vst [vmem:[%s15645_s29 + $0x278] sm:$0xff] %v335_v15  ;;  %v339_v17 = vld [vmem:[%s15637_s28 + $0xa08] sm:$0xff] }
  0x38   : > { %338 = vst [vmem:[%s15645_s29 + $0x280] sm:$0xff] %v337_v16  ;;  %v341_v18 = vld [vmem:[%s15637_s28 + $0xa40] sm:$0xff]  ;;  %v343_v19 = vld [vmem:[%s15637_s28 + $0xa48] sm:$0xff]  ;;  %340 = vst [vmem:[%s15645_s29 + $0x288] sm:$0xff] %v339_v17 }
  0x39   : > { %342 = vst [vmem:[%s15645_s29 + $0x290] sm:$0xff] %v341_v18  ;;  %344 = vst [vmem:[%s15645_s29 + $0x298] sm:$0xff] %v343_v19  ;;  %v345_v20 = vld [vmem:[%s15637_s28 + $0xa80] sm:$0xff]  ;;  %v347_v21 = vld [vmem:[%s15637_s28 + $0xa88] sm:$0xff] }
  0x3a   : > { %v349_v22 = vld [vmem:[%s15637_s28 + $0xac0] sm:$0xff]  ;;  %346 = vst [vmem:[%s15645_s29 + $0x2a0] sm:$0xff] %v345_v20  ;;  %348 = vst [vmem:[%s15645_s29 + $0x2a8] sm:$0xff] %v347_v21  ;;  %v351_v23 = vld [vmem:[%s15637_s28 + $0xac8] sm:$0xff] }
  0x3b   : > { %350 = vst [vmem:[%s15645_s29 + $0x2b0] sm:$0xff] %v349_v22  ;;  %v353_v24 = vld [vmem:[%s15637_s28 + $0xb00] sm:$0xff]  ;;  %v355_v25 = vld [vmem:[%s15637_s28 + $0xb08] sm:$0xff]  ;;  %352 = vst [vmem:[%s15645_s29 + $0x2b8] sm:$0xff] %v351_v23 }
  0x3c   : > { %354 = vst [vmem:[%s15645_s29 + $0x2c0] sm:$0xff] %v353_v24  ;;  %356 = vst [vmem:[%s15645_s29 + $0x2c8] sm:$0xff] %v355_v25  ;;  %v357_v26 = vld [vmem:[%s15637_s28 + $0xb40] sm:$0xff]  ;;  %v359_v27 = vld [vmem:[%s15637_s28 + $0xb48] sm:$0xff] }
  0x3d   : > { %v361_v28 = vld [vmem:[%s15637_s28 + $0xb80] sm:$0xff]  ;;  %358 = vst [vmem:[%s15645_s29 + $0x2d0] sm:$0xff] %v357_v26  ;;  %360 = vst [vmem:[%s15645_s29 + $0x2d8] sm:$0xff] %v359_v27  ;;  %v363_v29 = vld [vmem:[%s15637_s28 + $0xb88] sm:$0xff] }
  0x3e   : > { %362 = vst [vmem:[%s15645_s29 + $0x2e0] sm:$0xff] %v361_v28  ;;  %v365_v30 = vld [vmem:[%s15637_s28 + $0xbc0] sm:$0xff]  ;;  %v367_v31 = vld [vmem:[%s15637_s28 + $0xbc8] sm:$0xff]  ;;  %364 = vst [vmem:[%s15645_s29 + $0x2e8] sm:$0xff] %v363_v29 }
  0x3f   : > { %366 = vst [vmem:[%s15645_s29 + $0x2f0] sm:$0xff] %v365_v30  ;;  %368 = vst [vmem:[%s15645_s29 + $0x2f8] sm:$0xff] %v367_v31  ;;  %v369_v32 = vld [vmem:[%s15637_s28 + $0xc00] sm:$0xff]  ;;  %v371_v33 = vld [vmem:[%s15637_s28 + $0xc08] sm:$0xff] }
  0x40   : > { %v373_v34 = vld [vmem:[%s15637_s28 + $0xc40] sm:$0xff]  ;;  %370 = vst [vmem:[%s15645_s29 + $0x300] sm:$0xff] %v369_v32  ;;  %372 = vst [vmem:[%s15645_s29 + $0x308] sm:$0xff] %v371_v33  ;;  %v375_v35 = vld [vmem:[%s15637_s28 + $0xc48] sm:$0xff] }
  0x41   : > { %374 = vst [vmem:[%s15645_s29 + $0x310] sm:$0xff] %v373_v34  ;;  %v377_v36 = vld [vmem:[%s15637_s28 + $0xc80] sm:$0xff]  ;;  %v379_v37 = vld [vmem:[%s15637_s28 + $0xc88] sm:$0xff]  ;;  %376 = vst [vmem:[%s15645_s29 + $0x318] sm:$0xff] %v375_v35 }
  0x42   : > { %378 = vst [vmem:[%s15645_s29 + $0x320] sm:$0xff] %v377_v36  ;;  %380 = vst [vmem:[%s15645_s29 + $0x328] sm:$0xff] %v379_v37  ;;  %v381_v38 = vld [vmem:[%s15637_s28 + $0xcc0] sm:$0xff]  ;;  %v383_v39 = vld [vmem:[%s15637_s28 + $0xcc8] sm:$0xff] }
  0x43   : > { %v385_v40 = vld [vmem:[%s15637_s28 + $0xd00] sm:$0xff]  ;;  %382 = vst [vmem:[%s15645_s29 + $0x330] sm:$0xff] %v381_v38  ;;  %384 = vst [vmem:[%s15645_s29 + $0x338] sm:$0xff] %v383_v39  ;;  %v387_v41 = vld [vmem:[%s15637_s28 + $0xd08] sm:$0xff] }
  0x44   : > { %386 = vst [vmem:[%s15645_s29 + $0x340] sm:$0xff] %v385_v40  ;;  %v389_v42 = vld [vmem:[%s15637_s28 + $0xd40] sm:$0xff]  ;;  %v391_v43 = vld [vmem:[%s15637_s28 + $0xd48] sm:$0xff]  ;;  %388 = vst [vmem:[%s15645_s29 + $0x348] sm:$0xff] %v387_v41 }
  0x45   : > { %390 = vst [vmem:[%s15645_s29 + $0x350] sm:$0xff] %v389_v42  ;;  %392 = vst [vmem:[%s15645_s29 + $0x358] sm:$0xff] %v391_v43  ;;  %v393_v44 = vld [vmem:[%s15637_s28 + $0xd80] sm:$0xff]  ;;  %v395_v45 = vld [vmem:[%s15637_s28 + $0xd88] sm:$0xff] }
  0x46   : > { %v397_v46 = vld [vmem:[%s15637_s28 + $0xdc0] sm:$0xff]  ;;  %394 = vst [vmem:[%s15645_s29 + $0x360] sm:$0xff] %v393_v44  ;;  %396 = vst [vmem:[%s15645_s29 + $0x368] sm:$0xff] %v395_v45  ;;  %v399_v47 = vld [vmem:[%s15637_s28 + $0xdc8] sm:$0xff] }
  0x47   : > { %398 = vst [vmem:[%s15645_s29 + $0x370] sm:$0xff] %v397_v46  ;;  %v401_v48 = vld [vmem:[%s15637_s28 + $0xe00] sm:$0xff]  ;;  %v403_v49 = vld [vmem:[%s15637_s28 + $0xe08] sm:$0xff]  ;;  %400 = vst [vmem:[%s15645_s29 + $0x378] sm:$0xff] %v399_v47 }
  0x48   : > { %402 = vst [vmem:[%s15645_s29 + $0x380] sm:$0xff] %v401_v48  ;;  %404 = vst [vmem:[%s15645_s29 + $0x388] sm:$0xff] %v403_v49  ;;  %v405_v50 = vld [vmem:[%s15637_s28 + $0xe40] sm:$0xff]  ;;  %v407_v51 = vld [vmem:[%s15637_s28 + $0xe48] sm:$0xff] }
  0x49   : > { %v409_v52 = vld [vmem:[%s15637_s28 + $0xe80] sm:$0xff]  ;;  %406 = vst [vmem:[%s15645_s29 + $0x390] sm:$0xff] %v405_v50  ;;  %408 = vst [vmem:[%s15645_s29 + $0x398] sm:$0xff] %v407_v51  ;;  %v411_v53 = vld [vmem:[%s15637_s28 + $0xe88] sm:$0xff] }
  0x4a   : > { %410 = vst [vmem:[%s15645_s29 + $0x3a0] sm:$0xff] %v409_v52  ;;  %v413_v54 = vld [vmem:[%s15637_s28 + $0xec0] sm:$0xff]  ;;  %v415_v55 = vld [vmem:[%s15637_s28 + $0xec8] sm:$0xff]  ;;  %412 = vst [vmem:[%s15645_s29 + $0x3a8] sm:$0xff] %v411_v53 }
  0x4b   : > { %414 = vst [vmem:[%s15645_s29 + $0x3b0] sm:$0xff] %v413_v54  ;;  %416 = vst [vmem:[%s15645_s29 + $0x3b8] sm:$0xff] %v415_v55  ;;  %v417_v56 = vld [vmem:[%s15637_s28 + $0xf00] sm:$0xff]  ;;  %v419_v57 = vld [vmem:[%s15637_s28 + $0xf08] sm:$0xff] }
  0x4c   : > { %v421_v58 = vld [vmem:[%s15637_s28 + $0xf40] sm:$0xff]  ;;  %418 = vst [vmem:[%s15645_s29 + $0x3c0] sm:$0xff] %v417_v56  ;;  %420 = vst [vmem:[%s15645_s29 + $0x3c8] sm:$0xff] %v419_v57  ;;  %v423_v59 = vld [vmem:[%s15637_s28 + $0xf48] sm:$0xff] }
  0x4d   : > { %422 = vst [vmem:[%s15645_s29 + $0x3d0] sm:$0xff] %v421_v58  ;;  %v425_v60 = vld [vmem:[%s15637_s28 + $0xf80] sm:$0xff]  ;;  %v427_v61 = vld [vmem:[%s15637_s28 + $0xf88] sm:$0xff]  ;;  %424 = vst [vmem:[%s15645_s29 + $0x3d8] sm:$0xff] %v423_v59 }
  0x4e   : > { %426 = vst [vmem:[%s15645_s29 + $0x3e0] sm:$0xff] %v425_v60  ;;  %428 = vst [vmem:[%s15645_s29 + $0x3e8] sm:$0xff] %v427_v61  ;;  %v429_v62 = vld [vmem:[%s15637_s28 + $0xfc0] sm:$0xff]  ;;  %v431_v63 = vld [vmem:[%s15637_s28 + $0xfc8] sm:$0xff] }
  0x4f   : > { %v433_v0 = vld [vmem:[%s15637_s28 + $0x1000] sm:$0xff]  ;;  %430 = vst [vmem:[%s15645_s29 + $0x3f0] sm:$0xff] %v429_v62  ;;  %432 = vst [vmem:[%s15645_s29 + $0x3f8] sm:$0xff] %v431_v63  ;;  %v435_v1 = vld [vmem:[%s15637_s28 + $0x1008] sm:$0xff] }
  0x50   : > { %434 = vst [vmem:[%s15645_s29 + $0x400] sm:$0xff] %v433_v0  ;;  %v437_v2 = vld [vmem:[%s15637_s28 + $0x1040] sm:$0xff]  ;;  %v439_v3 = vld [vmem:[%s15637_s28 + $0x1048] sm:$0xff]  ;;  %436 = vst [vmem:[%s15645_s29 + $0x408] sm:$0xff] %v435_v1 }
  0x51   : > { %438 = vst [vmem:[%s15645_s29 + $0x410] sm:$0xff] %v437_v2  ;;  %440 = vst [vmem:[%s15645_s29 + $0x418] sm:$0xff] %v439_v3  ;;  %v441_v4 = vld [vmem:[%s15637_s28 + $0x1080] sm:$0xff]  ;;  %v443_v5 = vld [vmem:[%s15637_s28 + $0x1088] sm:$0xff] }
  0x52   : > { %v445_v6 = vld [vmem:[%s15637_s28 + $0x10c0] sm:$0xff]  ;;  %442 = vst [vmem:[%s15645_s29 + $0x420] sm:$0xff] %v441_v4  ;;  %444 = vst [vmem:[%s15645_s29 + $0x428] sm:$0xff] %v443_v5  ;;  %v447_v7 = vld [vmem:[%s15637_s28 + $0x10c8] sm:$0xff] }
  0x53   : > { %446 = vst [vmem:[%s15645_s29 + $0x430] sm:$0xff] %v445_v6  ;;  %v449_v8 = vld [vmem:[%s15637_s28 + $0x1100] sm:$0xff]  ;;  %v451_v9 = vld [vmem:[%s15637_s28 + $0x1108] sm:$0xff]  ;;  %448 = vst [vmem:[%s15645_s29 + $0x438] sm:$0xff] %v447_v7 }
  0x54   : > { %450 = vst [vmem:[%s15645_s29 + $0x440] sm:$0xff] %v449_v8  ;;  %452 = vst [vmem:[%s15645_s29 + $0x448] sm:$0xff] %v451_v9  ;;  %v453_v10 = vld [vmem:[%s15637_s28 + $0x1140] sm:$0xff]  ;;  %v455_v11 = vld [vmem:[%s15637_s28 + $0x1148] sm:$0xff] }
  0x55   : > { %v457_v12 = vld [vmem:[%s15637_s28 + $0x1180] sm:$0xff]  ;;  %454 = vst [vmem:[%s15645_s29 + $0x450] sm:$0xff] %v453_v10  ;;  %456 = vst [vmem:[%s15645_s29 + $0x458] sm:$0xff] %v455_v11  ;;  %v459_v13 = vld [vmem:[%s15637_s28 + $0x1188] sm:$0xff] }
  0x56   : > { %458 = vst [vmem:[%s15645_s29 + $0x460] sm:$0xff] %v457_v12  ;;  %v461_v14 = vld [vmem:[%s15637_s28 + $0x11c0] sm:$0xff]  ;;  %v463_v15 = vld [vmem:[%s15637_s28 + $0x11c8] sm:$0xff]  ;;  %460 = vst [vmem:[%s15645_s29 + $0x468] sm:$0xff] %v459_v13 }
  0x57   : > { %462 = vst [vmem:[%s15645_s29 + $0x470] sm:$0xff] %v461_v14  ;;  %464 = vst [vmem:[%s15645_s29 + $0x478] sm:$0xff] %v463_v15  ;;  %v465_v16 = vld [vmem:[%s15637_s28 + $0x1200] sm:$0xff]  ;;  %v467_v17 = vld [vmem:[%s15637_s28 + $0x1208] sm:$0xff] }
  0x58   : > { %v469_v18 = vld [vmem:[%s15637_s28 + $0x1240] sm:$0xff]  ;;  %466 = vst [vmem:[%s15645_s29 + $0x480] sm:$0xff] %v465_v16  ;;  %468 = vst [vmem:[%s15645_s29 + $0x488] sm:$0xff] %v467_v17  ;;  %v471_v19 = vld [vmem:[%s15637_s28 + $0x1248] sm:$0xff] }
  0x59   : > { %470 = vst [vmem:[%s15645_s29 + $0x490] sm:$0xff] %v469_v18  ;;  %v473_v20 = vld [vmem:[%s15637_s28 + $0x1280] sm:$0xff]  ;;  %v475_v21 = vld [vmem:[%s15637_s28 + $0x1288] sm:$0xff]  ;;  %472 = vst [vmem:[%s15645_s29 + $0x498] sm:$0xff] %v471_v19 }
  0x5a   : > { %474 = vst [vmem:[%s15645_s29 + $0x4a0] sm:$0xff] %v473_v20  ;;  %476 = vst [vmem:[%s15645_s29 + $0x4a8] sm:$0xff] %v475_v21  ;;  %v477_v22 = vld [vmem:[%s15637_s28 + $0x12c0] sm:$0xff]  ;;  %v479_v23 = vld [vmem:[%s15637_s28 + $0x12c8] sm:$0xff] }
  0x5b   : > { %v481_v24 = vld [vmem:[%s15637_s28 + $0x1300] sm:$0xff]  ;;  %478 = vst [vmem:[%s15645_s29 + $0x4b0] sm:$0xff] %v477_v22  ;;  %480 = vst [vmem:[%s15645_s29 + $0x4b8] sm:$0xff] %v479_v23  ;;  %v483_v25 = vld [vmem:[%s15637_s28 + $0x1308] sm:$0xff] }
  0x5c   : > { %482 = vst [vmem:[%s15645_s29 + $0x4c0] sm:$0xff] %v481_v24  ;;  %v485_v26 = vld [vmem:[%s15637_s28 + $0x1340] sm:$0xff]  ;;  %v487_v27 = vld [vmem:[%s15637_s28 + $0x1348] sm:$0xff]  ;;  %484 = vst [vmem:[%s15645_s29 + $0x4c8] sm:$0xff] %v483_v25 }
  0x5d   : > { %486 = vst [vmem:[%s15645_s29 + $0x4d0] sm:$0xff] %v485_v26  ;;  %488 = vst [vmem:[%s15645_s29 + $0x4d8] sm:$0xff] %v487_v27  ;;  %v489_v28 = vld [vmem:[%s15637_s28 + $0x1380] sm:$0xff]  ;;  %v491_v29 = vld [vmem:[%s15637_s28 + $0x1388] sm:$0xff] }
  0x5e   : > { %v493_v30 = vld [vmem:[%s15637_s28 + $0x13c0] sm:$0xff]  ;;  %490 = vst [vmem:[%s15645_s29 + $0x4e0] sm:$0xff] %v489_v28  ;;  %492 = vst [vmem:[%s15645_s29 + $0x4e8] sm:$0xff] %v491_v29  ;;  %v495_v31 = vld [vmem:[%s15637_s28 + $0x13c8] sm:$0xff] }
  0x5f   : > { %494 = vst [vmem:[%s15645_s29 + $0x4f0] sm:$0xff] %v493_v30  ;;  %v497_v32 = vld [vmem:[%s15637_s28 + $0x1400] sm:$0xff]  ;;  %v499_v33 = vld [vmem:[%s15637_s28 + $0x1408] sm:$0xff]  ;;  %496 = vst [vmem:[%s15645_s29 + $0x4f8] sm:$0xff] %v495_v31 }
  0x60   : > { %498 = vst [vmem:[%s15645_s29 + $0x500] sm:$0xff] %v497_v32  ;;  %500 = vst [vmem:[%s15645_s29 + $0x508] sm:$0xff] %v499_v33  ;;  %v501_v34 = vld [vmem:[%s15637_s28 + $0x1440] sm:$0xff]  ;;  %v503_v35 = vld [vmem:[%s15637_s28 + $0x1448] sm:$0xff] }
  0x61   : > { %v505_v36 = vld [vmem:[%s15637_s28 + $0x1480] sm:$0xff]  ;;  %502 = vst [vmem:[%s15645_s29 + $0x510] sm:$0xff] %v501_v34  ;;  %504 = vst [vmem:[%s15645_s29 + $0x518] sm:$0xff] %v503_v35  ;;  %v507_v37 = vld [vmem:[%s15637_s28 + $0x1488] sm:$0xff] }
  0x62   : > { %506 = vst [vmem:[%s15645_s29 + $0x520] sm:$0xff] %v505_v36  ;;  %v509_v38 = vld [vmem:[%s15637_s28 + $0x14c0] sm:$0xff]  ;;  %v511_v39 = vld [vmem:[%s15637_s28 + $0x14c8] sm:$0xff]  ;;  %508 = vst [vmem:[%s15645_s29 + $0x528] sm:$0xff] %v507_v37 }
  0x63   : > { %510 = vst [vmem:[%s15645_s29 + $0x530] sm:$0xff] %v509_v38  ;;  %512 = vst [vmem:[%s15645_s29 + $0x538] sm:$0xff] %v511_v39  ;;  %v513_v40 = vld [vmem:[%s15637_s28 + $0x1500] sm:$0xff]  ;;  %v515_v41 = vld [vmem:[%s15637_s28 + $0x1508] sm:$0xff] }
  0x64   : > { %v517_v42 = vld [vmem:[%s15637_s28 + $0x1540] sm:$0xff]  ;;  %514 = vst [vmem:[%s15645_s29 + $0x540] sm:$0xff] %v513_v40  ;;  %516 = vst [vmem:[%s15645_s29 + $0x548] sm:$0xff] %v515_v41  ;;  %v519_v43 = vld [vmem:[%s15637_s28 + $0x1548] sm:$0xff] }
  0x65   : > { %518 = vst [vmem:[%s15645_s29 + $0x550] sm:$0xff] %v517_v42  ;;  %v521_v44 = vld [vmem:[%s15637_s28 + $0x1580] sm:$0xff]  ;;  %v523_v45 = vld [vmem:[%s15637_s28 + $0x1588] sm:$0xff]  ;;  %520 = vst [vmem:[%s15645_s29 + $0x558] sm:$0xff] %v519_v43 }
  0x66   : > { %522 = vst [vmem:[%s15645_s29 + $0x560] sm:$0xff] %v521_v44  ;;  %524 = vst [vmem:[%s15645_s29 + $0x568] sm:$0xff] %v523_v45  ;;  %v525_v46 = vld [vmem:[%s15637_s28 + $0x15c0] sm:$0xff]  ;;  %v527_v47 = vld [vmem:[%s15637_s28 + $0x15c8] sm:$0xff] }
  0x67   : > { %v529_v48 = vld [vmem:[%s15637_s28 + $0x1600] sm:$0xff]  ;;  %526 = vst [vmem:[%s15645_s29 + $0x570] sm:$0xff] %v525_v46  ;;  %528 = vst [vmem:[%s15645_s29 + $0x578] sm:$0xff] %v527_v47  ;;  %v531_v49 = vld [vmem:[%s15637_s28 + $0x1608] sm:$0xff] }
  0x68   : > { %530 = vst [vmem:[%s15645_s29 + $0x580] sm:$0xff] %v529_v48  ;;  %v533_v50 = vld [vmem:[%s15637_s28 + $0x1640] sm:$0xff]  ;;  %v535_v51 = vld [vmem:[%s15637_s28 + $0x1648] sm:$0xff]  ;;  %532 = vst [vmem:[%s15645_s29 + $0x588] sm:$0xff] %v531_v49 }
  0x69   : > { %534 = vst [vmem:[%s15645_s29 + $0x590] sm:$0xff] %v533_v50  ;;  %536 = vst [vmem:[%s15645_s29 + $0x598] sm:$0xff] %v535_v51  ;;  %v537_v52 = vld [vmem:[%s15637_s28 + $0x1680] sm:$0xff]  ;;  %v539_v53 = vld [vmem:[%s15637_s28 + $0x1688] sm:$0xff] }
  0x6a   : > { %v541_v54 = vld [vmem:[%s15637_s28 + $0x16c0] sm:$0xff]  ;;  %538 = vst [vmem:[%s15645_s29 + $0x5a0] sm:$0xff] %v537_v52  ;;  %540 = vst [vmem:[%s15645_s29 + $0x5a8] sm:$0xff] %v539_v53  ;;  %v543_v55 = vld [vmem:[%s15637_s28 + $0x16c8] sm:$0xff] }
  0x6b   : > { %542 = vst [vmem:[%s15645_s29 + $0x5b0] sm:$0xff] %v541_v54  ;;  %v545_v56 = vld [vmem:[%s15637_s28 + $0x1700] sm:$0xff]  ;;  %v547_v57 = vld [vmem:[%s15637_s28 + $0x1708] sm:$0xff]  ;;  %544 = vst [vmem:[%s15645_s29 + $0x5b8] sm:$0xff] %v543_v55 }
  0x6c   : > { %546 = vst [vmem:[%s15645_s29 + $0x5c0] sm:$0xff] %v545_v56  ;;  %548 = vst [vmem:[%s15645_s29 + $0x5c8] sm:$0xff] %v547_v57  ;;  %v549_v58 = vld [vmem:[%s15637_s28 + $0x1740] sm:$0xff]  ;;  %v551_v59 = vld [vmem:[%s15637_s28 + $0x1748] sm:$0xff] }
  0x6d   : > { %v553_v60 = vld [vmem:[%s15637_s28 + $0x1780] sm:$0xff]  ;;  %550 = vst [vmem:[%s15645_s29 + $0x5d0] sm:$0xff] %v549_v58  ;;  %552 = vst [vmem:[%s15645_s29 + $0x5d8] sm:$0xff] %v551_v59  ;;  %v555_v61 = vld [vmem:[%s15637_s28 + $0x1788] sm:$0xff] }
  0x6e   : > { %554 = vst [vmem:[%s15645_s29 + $0x5e0] sm:$0xff] %v553_v60  ;;  %v557_v62 = vld [vmem:[%s15637_s28 + $0x17c0] sm:$0xff]  ;;  %v559_v63 = vld [vmem:[%s15637_s28 + $0x17c8] sm:$0xff]  ;;  %556 = vst [vmem:[%s15645_s29 + $0x5e8] sm:$0xff] %v555_v61 }
  0x6f   : > { %558 = vst [vmem:[%s15645_s29 + $0x5f0] sm:$0xff] %v557_v62  ;;  %560 = vst [vmem:[%s15645_s29 + $0x5f8] sm:$0xff] %v559_v63  ;;  %v561_v0 = vld [vmem:[%s15637_s28 + $0x1800] sm:$0xff]  ;;  %v563_v1 = vld [vmem:[%s15637_s28 + $0x1808] sm:$0xff] }
  0x70   : > { %v565_v2 = vld [vmem:[%s15637_s28 + $0x1840] sm:$0xff]  ;;  %562 = vst [vmem:[%s15645_s29 + $0x600] sm:$0xff] %v561_v0  ;;  %564 = vst [vmem:[%s15645_s29 + $0x608] sm:$0xff] %v563_v1  ;;  %v567_v3 = vld [vmem:[%s15637_s28 + $0x1848] sm:$0xff] }
  0x71   : > { %566 = vst [vmem:[%s15645_s29 + $0x610] sm:$0xff] %v565_v2  ;;  %v569_v4 = vld [vmem:[%s15637_s28 + $0x1880] sm:$0xff]  ;;  %v571_v5 = vld [vmem:[%s15637_s28 + $0x1888] sm:$0xff]  ;;  %568 = vst [vmem:[%s15645_s29 + $0x618] sm:$0xff] %v567_v3 }
  0x72   : > { %570 = vst [vmem:[%s15645_s29 + $0x620] sm:$0xff] %v569_v4  ;;  %572 = vst [vmem:[%s15645_s29 + $0x628] sm:$0xff] %v571_v5  ;;  %v573_v6 = vld [vmem:[%s15637_s28 + $0x18c0] sm:$0xff]  ;;  %v575_v7 = vld [vmem:[%s15637_s28 + $0x18c8] sm:$0xff] }
  0x73   : > { %v577_v8 = vld [vmem:[%s15637_s28 + $0x1900] sm:$0xff]  ;;  %574 = vst [vmem:[%s15645_s29 + $0x630] sm:$0xff] %v573_v6  ;;  %576 = vst [vmem:[%s15645_s29 + $0x638] sm:$0xff] %v575_v7  ;;  %v579_v9 = vld [vmem:[%s15637_s28 + $0x1908] sm:$0xff] }
  0x74   : > { %578 = vst [vmem:[%s15645_s29 + $0x640] sm:$0xff] %v577_v8  ;;  %v581_v10 = vld [vmem:[%s15637_s28 + $0x1940] sm:$0xff]  ;;  %v583_v11 = vld [vmem:[%s15637_s28 + $0x1948] sm:$0xff]  ;;  %580 = vst [vmem:[%s15645_s29 + $0x648] sm:$0xff] %v579_v9 }
  0x75   : > { %582 = vst [vmem:[%s15645_s29 + $0x650] sm:$0xff] %v581_v10  ;;  %584 = vst [vmem:[%s15645_s29 + $0x658] sm:$0xff] %v583_v11  ;;  %v585_v12 = vld [vmem:[%s15637_s28 + $0x1980] sm:$0xff]  ;;  %v587_v13 = vld [vmem:[%s15637_s28 + $0x1988] sm:$0xff] }
  0x76   : > { %v589_v14 = vld [vmem:[%s15637_s28 + $0x19c0] sm:$0xff]  ;;  %586 = vst [vmem:[%s15645_s29 + $0x660] sm:$0xff] %v585_v12  ;;  %588 = vst [vmem:[%s15645_s29 + $0x668] sm:$0xff] %v587_v13  ;;  %v591_v15 = vld [vmem:[%s15637_s28 + $0x19c8] sm:$0xff] }
  0x77   : > { %590 = vst [vmem:[%s15645_s29 + $0x670] sm:$0xff] %v589_v14  ;;  %v593_v16 = vld [vmem:[%s15637_s28 + $0x1a00] sm:$0xff]  ;;  %v595_v17 = vld [vmem:[%s15637_s28 + $0x1a08] sm:$0xff]  ;;  %592 = vst [vmem:[%s15645_s29 + $0x678] sm:$0xff] %v591_v15 }
  0x78   : > { %594 = vst [vmem:[%s15645_s29 + $0x680] sm:$0xff] %v593_v16  ;;  %596 = vst [vmem:[%s15645_s29 + $0x688] sm:$0xff] %v595_v17  ;;  %v597_v18 = vld [vmem:[%s15637_s28 + $0x1a40] sm:$0xff]  ;;  %v599_v19 = vld [vmem:[%s15637_s28 + $0x1a48] sm:$0xff] }
  0x79   : > { %v601_v20 = vld [vmem:[%s15637_s28 + $0x1a80] sm:$0xff]  ;;  %598 = vst [vmem:[%s15645_s29 + $0x690] sm:$0xff] %v597_v18  ;;  %600 = vst [vmem:[%s15645_s29 + $0x698] sm:$0xff] %v599_v19  ;;  %v603_v21 = vld [vmem:[%s15637_s28 + $0x1a88] sm:$0xff] }
  0x7a   : > { %602 = vst [vmem:[%s15645_s29 + $0x6a0] sm:$0xff] %v601_v20  ;;  %v605_v22 = vld [vmem:[%s15637_s28 + $0x1ac0] sm:$0xff]  ;;  %v607_v23 = vld [vmem:[%s15637_s28 + $0x1ac8] sm:$0xff]  ;;  %604 = vst [vmem:[%s15645_s29 + $0x6a8] sm:$0xff] %v603_v21 }
  0x7b   : > { %606 = vst [vmem:[%s15645_s29 + $0x6b0] sm:$0xff] %v605_v22  ;;  %608 = vst [vmem:[%s15645_s29 + $0x6b8] sm:$0xff] %v607_v23  ;;  %v609_v24 = vld [vmem:[%s15637_s28 + $0x1b00] sm:$0xff]  ;;  %v611_v25 = vld [vmem:[%s15637_s28 + $0x1b08] sm:$0xff] }
  0x7c   : > { %v613_v26 = vld [vmem:[%s15637_s28 + $0x1b40] sm:$0xff]  ;;  %610 = vst [vmem:[%s15645_s29 + $0x6c0] sm:$0xff] %v609_v24  ;;  %612 = vst [vmem:[%s15645_s29 + $0x6c8] sm:$0xff] %v611_v25  ;;  %v615_v27 = vld [vmem:[%s15637_s28 + $0x1b48] sm:$0xff] }
  0x7d   : > { %614 = vst [vmem:[%s15645_s29 + $0x6d0] sm:$0xff] %v613_v26  ;;  %v617_v28 = vld [vmem:[%s15637_s28 + $0x1b80] sm:$0xff]  ;;  %v619_v29 = vld [vmem:[%s15637_s28 + $0x1b88] sm:$0xff]  ;;  %616 = vst [vmem:[%s15645_s29 + $0x6d8] sm:$0xff] %v615_v27 }
  0x7e   : > { %618 = vst [vmem:[%s15645_s29 + $0x6e0] sm:$0xff] %v617_v28  ;;  %620 = vst [vmem:[%s15645_s29 + $0x6e8] sm:$0xff] %v619_v29  ;;  %v621_v30 = vld [vmem:[%s15637_s28 + $0x1bc0] sm:$0xff]  ;;  %v623_v31 = vld [vmem:[%s15637_s28 + $0x1bc8] sm:$0xff] }
  0x7f   : > { %v625_v32 = vld [vmem:[%s15637_s28 + $0x1c00] sm:$0xff]  ;;  %622 = vst [vmem:[%s15645_s29 + $0x6f0] sm:$0xff] %v621_v30  ;;  %624 = vst [vmem:[%s15645_s29 + $0x6f8] sm:$0xff] %v623_v31  ;;  %v627_v33 = vld [vmem:[%s15637_s28 + $0x1c08] sm:$0xff] }
  0x80   : > { %626 = vst [vmem:[%s15645_s29 + $0x700] sm:$0xff] %v625_v32  ;;  %v629_v34 = vld [vmem:[%s15637_s28 + $0x1c40] sm:$0xff]  ;;  %v631_v35 = vld [vmem:[%s15637_s28 + $0x1c48] sm:$0xff]  ;;  %628 = vst [vmem:[%s15645_s29 + $0x708] sm:$0xff] %v627_v33 }
  0x81   : > { %630 = vst [vmem:[%s15645_s29 + $0x710] sm:$0xff] %v629_v34  ;;  %632 = vst [vmem:[%s15645_s29 + $0x718] sm:$0xff] %v631_v35  ;;  %v633_v36 = vld [vmem:[%s15637_s28 + $0x1c80] sm:$0xff]  ;;  %v635_v37 = vld [vmem:[%s15637_s28 + $0x1c88] sm:$0xff] }
  0x82   : > { %v637_v38 = vld [vmem:[%s15637_s28 + $0x1cc0] sm:$0xff]  ;;  %634 = vst [vmem:[%s15645_s29 + $0x720] sm:$0xff] %v633_v36  ;;  %636 = vst [vmem:[%s15645_s29 + $0x728] sm:$0xff] %v635_v37  ;;  %v639_v39 = vld [vmem:[%s15637_s28 + $0x1cc8] sm:$0xff] }
  0x83   : > { %638 = vst [vmem:[%s15645_s29 + $0x730] sm:$0xff] %v637_v38  ;;  %v641_v40 = vld [vmem:[%s15637_s28 + $0x1d00] sm:$0xff]  ;;  %v643_v41 = vld [vmem:[%s15637_s28 + $0x1d08] sm:$0xff]  ;;  %640 = vst [vmem:[%s15645_s29 + $0x738] sm:$0xff] %v639_v39 }
  0x84   : > { %642 = vst [vmem:[%s15645_s29 + $0x740] sm:$0xff] %v641_v40  ;;  %644 = vst [vmem:[%s15645_s29 + $0x748] sm:$0xff] %v643_v41  ;;  %v645_v42 = vld [vmem:[%s15637_s28 + $0x1d40] sm:$0xff]  ;;  %v647_v43 = vld [vmem:[%s15637_s28 + $0x1d48] sm:$0xff] }
  0x85   : > { %v649_v44 = vld [vmem:[%s15637_s28 + $0x1d80] sm:$0xff]  ;;  %646 = vst [vmem:[%s15645_s29 + $0x750] sm:$0xff] %v645_v42  ;;  %648 = vst [vmem:[%s15645_s29 + $0x758] sm:$0xff] %v647_v43  ;;  %v651_v45 = vld [vmem:[%s15637_s28 + $0x1d88] sm:$0xff] }
  0x86   : > { %650 = vst [vmem:[%s15645_s29 + $0x760] sm:$0xff] %v649_v44  ;;  %v653_v46 = vld [vmem:[%s15637_s28 + $0x1dc0] sm:$0xff]  ;;  %v655_v47 = vld [vmem:[%s15637_s28 + $0x1dc8] sm:$0xff]  ;;  %652 = vst [vmem:[%s15645_s29 + $0x768] sm:$0xff] %v651_v45 }
  0x87   : > { %654 = vst [vmem:[%s15645_s29 + $0x770] sm:$0xff] %v653_v46  ;;  %656 = vst [vmem:[%s15645_s29 + $0x778] sm:$0xff] %v655_v47  ;;  %v657_v48 = vld [vmem:[%s15637_s28 + $0x1e00] sm:$0xff]  ;;  %v659_v49 = vld [vmem:[%s15637_s28 + $0x1e08] sm:$0xff] }
  0x88   : > { %v661_v50 = vld [vmem:[%s15637_s28 + $0x1e40] sm:$0xff]  ;;  %658 = vst [vmem:[%s15645_s29 + $0x780] sm:$0xff] %v657_v48  ;;  %660 = vst [vmem:[%s15645_s29 + $0x788] sm:$0xff] %v659_v49  ;;  %v663_v51 = vld [vmem:[%s15637_s28 + $0x1e48] sm:$0xff] }
  0x89   : > { %662 = vst [vmem:[%s15645_s29 + $0x790] sm:$0xff] %v661_v50  ;;  %v665_v52 = vld [vmem:[%s15637_s28 + $0x1e80] sm:$0xff]  ;;  %v667_v53 = vld [vmem:[%s15637_s28 + $0x1e88] sm:$0xff]  ;;  %664 = vst [vmem:[%s15645_s29 + $0x798] sm:$0xff] %v663_v51 }
  0x8a   : > { %666 = vst [vmem:[%s15645_s29 + $0x7a0] sm:$0xff] %v665_v52  ;;  %668 = vst [vmem:[%s15645_s29 + $0x7a8] sm:$0xff] %v667_v53  ;;  %v669_v54 = vld [vmem:[%s15637_s28 + $0x1ec0] sm:$0xff]  ;;  %v671_v55 = vld [vmem:[%s15637_s28 + $0x1ec8] sm:$0xff] }
  0x8b   : > { %v673_v56 = vld [vmem:[%s15637_s28 + $0x1f00] sm:$0xff]  ;;  %670 = vst [vmem:[%s15645_s29 + $0x7b0] sm:$0xff] %v669_v54  ;;  %672 = vst [vmem:[%s15645_s29 + $0x7b8] sm:$0xff] %v671_v55  ;;  %v675_v57 = vld [vmem:[%s15637_s28 + $0x1f08] sm:$0xff] }
  0x8c   : > { %674 = vst [vmem:[%s15645_s29 + $0x7c0] sm:$0xff] %v673_v56  ;;  %v677_v58 = vld [vmem:[%s15637_s28 + $0x1f40] sm:$0xff]  ;;  %v679_v59 = vld [vmem:[%s15637_s28 + $0x1f48] sm:$0xff]  ;;  %676 = vst [vmem:[%s15645_s29 + $0x7c8] sm:$0xff] %v675_v57 }
  0x8d   : > { %678 = vst [vmem:[%s15645_s29 + $0x7d0] sm:$0xff] %v677_v58  ;;  %680 = vst [vmem:[%s15645_s29 + $0x7d8] sm:$0xff] %v679_v59  ;;  %v681_v60 = vld [vmem:[%s15637_s28 + $0x1f80] sm:$0xff]  ;;  %v683_v61 = vld [vmem:[%s15637_s28 + $0x1f88] sm:$0xff] }
  0x8e   : > { %v685_v62 = vld [vmem:[%s15637_s28 + $0x1fc0] sm:$0xff]  ;;  %682 = vst [vmem:[%s15645_s29 + $0x7e0] sm:$0xff] %v681_v60  ;;  %684 = vst [vmem:[%s15645_s29 + $0x7e8] sm:$0xff] %v683_v61  ;;  %v687_v63 = vld [vmem:[%s15637_s28 + $0x1fc8] sm:$0xff] }
  0x8f   : > { %686 = vst [vmem:[%s15645_s29 + $0x7f0] sm:$0xff] %v685_v62  ;;  %v689_v0 = vld [vmem:[%s15637_s28 + $0x2000] sm:$0xff]  ;;  %v691_v1 = vld [vmem:[%s15637_s28 + $0x2008] sm:$0xff]  ;;  %688 = vst [vmem:[%s15645_s29 + $0x7f8] sm:$0xff] %v687_v63 }
  0x90   : > { %690 = vst [vmem:[%s15645_s29 + $0x800] sm:$0xff] %v689_v0  ;;  %692 = vst [vmem:[%s15645_s29 + $0x808] sm:$0xff] %v691_v1  ;;  %v693_v2 = vld [vmem:[%s15637_s28 + $0x2040] sm:$0xff]  ;;  %v695_v3 = vld [vmem:[%s15637_s28 + $0x2048] sm:$0xff] }
  0x91   : > { %v697_v4 = vld [vmem:[%s15637_s28 + $0x2080] sm:$0xff]  ;;  %694 = vst [vmem:[%s15645_s29 + $0x810] sm:$0xff] %v693_v2  ;;  %696 = vst [vmem:[%s15645_s29 + $0x818] sm:$0xff] %v695_v3  ;;  %v699_v5 = vld [vmem:[%s15637_s28 + $0x2088] sm:$0xff] }
  0x92   : > { %698 = vst [vmem:[%s15645_s29 + $0x820] sm:$0xff] %v697_v4  ;;  %v701_v6 = vld [vmem:[%s15637_s28 + $0x20c0] sm:$0xff]  ;;  %v703_v7 = vld [vmem:[%s15637_s28 + $0x20c8] sm:$0xff]  ;;  %700 = vst [vmem:[%s15645_s29 + $0x828] sm:$0xff] %v699_v5 }
  0x93   : > { %702 = vst [vmem:[%s15645_s29 + $0x830] sm:$0xff] %v701_v6  ;;  %704 = vst [vmem:[%s15645_s29 + $0x838] sm:$0xff] %v703_v7  ;;  %v705_v8 = vld [vmem:[%s15637_s28 + $0x2100] sm:$0xff]  ;;  %v707_v9 = vld [vmem:[%s15637_s28 + $0x2108] sm:$0xff] }
  0x94   : > { %v709_v10 = vld [vmem:[%s15637_s28 + $0x2140] sm:$0xff]  ;;  %706 = vst [vmem:[%s15645_s29 + $0x840] sm:$0xff] %v705_v8  ;;  %708 = vst [vmem:[%s15645_s29 + $0x848] sm:$0xff] %v707_v9  ;;  %v711_v11 = vld [vmem:[%s15637_s28 + $0x2148] sm:$0xff] }
  0x95   : > { %710 = vst [vmem:[%s15645_s29 + $0x850] sm:$0xff] %v709_v10  ;;  %v713_v12 = vld [vmem:[%s15637_s28 + $0x2180] sm:$0xff]  ;;  %v715_v13 = vld [vmem:[%s15637_s28 + $0x2188] sm:$0xff]  ;;  %712 = vst [vmem:[%s15645_s29 + $0x858] sm:$0xff] %v711_v11 }
  0x96   : > { %714 = vst [vmem:[%s15645_s29 + $0x860] sm:$0xff] %v713_v12  ;;  %716 = vst [vmem:[%s15645_s29 + $0x868] sm:$0xff] %v715_v13  ;;  %v717_v14 = vld [vmem:[%s15637_s28 + $0x21c0] sm:$0xff]  ;;  %v719_v15 = vld [vmem:[%s15637_s28 + $0x21c8] sm:$0xff] }
  0x97   : > { %v721_v16 = vld [vmem:[%s15637_s28 + $0x2200] sm:$0xff]  ;;  %718 = vst [vmem:[%s15645_s29 + $0x870] sm:$0xff] %v717_v14  ;;  %720 = vst [vmem:[%s15645_s29 + $0x878] sm:$0xff] %v719_v15  ;;  %v723_v17 = vld [vmem:[%s15637_s28 + $0x2208] sm:$0xff] }
  0x98   : > { %722 = vst [vmem:[%s15645_s29 + $0x880] sm:$0xff] %v721_v16  ;;  %v725_v18 = vld [vmem:[%s15637_s28 + $0x2240] sm:$0xff]  ;;  %v727_v19 = vld [vmem:[%s15637_s28 + $0x2248] sm:$0xff]  ;;  %724 = vst [vmem:[%s15645_s29 + $0x888] sm:$0xff] %v723_v17 }
  0x99   : > { %726 = vst [vmem:[%s15645_s29 + $0x890] sm:$0xff] %v725_v18  ;;  %728 = vst [vmem:[%s15645_s29 + $0x898] sm:$0xff] %v727_v19  ;;  %v729_v20 = vld [vmem:[%s15637_s28 + $0x2280] sm:$0xff]  ;;  %v731_v21 = vld [vmem:[%s15637_s28 + $0x2288] sm:$0xff] }
  0x9a   : > { %v733_v22 = vld [vmem:[%s15637_s28 + $0x22c0] sm:$0xff]  ;;  %730 = vst [vmem:[%s15645_s29 + $0x8a0] sm:$0xff] %v729_v20  ;;  %732 = vst [vmem:[%s15645_s29 + $0x8a8] sm:$0xff] %v731_v21  ;;  %v735_v23 = vld [vmem:[%s15637_s28 + $0x22c8] sm:$0xff] }
  0x9b   : > { %734 = vst [vmem:[%s15645_s29 + $0x8b0] sm:$0xff] %v733_v22  ;;  %v737_v24 = vld [vmem:[%s15637_s28 + $0x2300] sm:$0xff]  ;;  %v739_v25 = vld [vmem:[%s15637_s28 + $0x2308] sm:$0xff]  ;;  %736 = vst [vmem:[%s15645_s29 + $0x8b8] sm:$0xff] %v735_v23 }
  0x9c   : > { %738 = vst [vmem:[%s15645_s29 + $0x8c0] sm:$0xff] %v737_v24  ;;  %740 = vst [vmem:[%s15645_s29 + $0x8c8] sm:$0xff] %v739_v25  ;;  %v741_v26 = vld [vmem:[%s15637_s28 + $0x2340] sm:$0xff]  ;;  %v743_v27 = vld [vmem:[%s15637_s28 + $0x2348] sm:$0xff] }
  0x9d   : > { %v745_v28 = vld [vmem:[%s15637_s28 + $0x2380] sm:$0xff]  ;;  %742 = vst [vmem:[%s15645_s29 + $0x8d0] sm:$0xff] %v741_v26  ;;  %744 = vst [vmem:[%s15645_s29 + $0x8d8] sm:$0xff] %v743_v27  ;;  %v747_v29 = vld [vmem:[%s15637_s28 + $0x2388] sm:$0xff] }
  0x9e   : > { %746 = vst [vmem:[%s15645_s29 + $0x8e0] sm:$0xff] %v745_v28  ;;  %v749_v30 = vld [vmem:[%s15637_s28 + $0x23c0] sm:$0xff]  ;;  %v751_v31 = vld [vmem:[%s15637_s28 + $0x23c8] sm:$0xff]  ;;  %748 = vst [vmem:[%s15645_s29 + $0x8e8] sm:$0xff] %v747_v29 }
  0x9f   : > { %750 = vst [vmem:[%s15645_s29 + $0x8f0] sm:$0xff] %v749_v30  ;;  %752 = vst [vmem:[%s15645_s29 + $0x8f8] sm:$0xff] %v751_v31  ;;  %v753_v32 = vld [vmem:[%s15637_s28 + $0x2400] sm:$0xff]  ;;  %v755_v33 = vld [vmem:[%s15637_s28 + $0x2408] sm:$0xff] }
  0xa0   : > { %v757_v34 = vld [vmem:[%s15637_s28 + $0x2440] sm:$0xff]  ;;  %754 = vst [vmem:[%s15645_s29 + $0x900] sm:$0xff] %v753_v32  ;;  %756 = vst [vmem:[%s15645_s29 + $0x908] sm:$0xff] %v755_v33  ;;  %v759_v35 = vld [vmem:[%s15637_s28 + $0x2448] sm:$0xff] }
  0xa1   : > { %758 = vst [vmem:[%s15645_s29 + $0x910] sm:$0xff] %v757_v34  ;;  %v761_v36 = vld [vmem:[%s15637_s28 + $0x2480] sm:$0xff]  ;;  %v763_v37 = vld [vmem:[%s15637_s28 + $0x2488] sm:$0xff]  ;;  %760 = vst [vmem:[%s15645_s29 + $0x918] sm:$0xff] %v759_v35 }
  0xa2   : > { %762 = vst [vmem:[%s15645_s29 + $0x920] sm:$0xff] %v761_v36  ;;  %764 = vst [vmem:[%s15645_s29 + $0x928] sm:$0xff] %v763_v37  ;;  %v765_v38 = vld [vmem:[%s15637_s28 + $0x24c0] sm:$0xff]  ;;  %v767_v39 = vld [vmem:[%s15637_s28 + $0x24c8] sm:$0xff] }
  0xa3   : > { %v769_v40 = vld [vmem:[%s15637_s28 + $0x2500] sm:$0xff]  ;;  %766 = vst [vmem:[%s15645_s29 + $0x930] sm:$0xff] %v765_v38  ;;  %768 = vst [vmem:[%s15645_s29 + $0x938] sm:$0xff] %v767_v39  ;;  %v771_v41 = vld [vmem:[%s15637_s28 + $0x2508] sm:$0xff] }
  0xa4   : > { %770 = vst [vmem:[%s15645_s29 + $0x940] sm:$0xff] %v769_v40  ;;  %v773_v42 = vld [vmem:[%s15637_s28 + $0x2540] sm:$0xff]  ;;  %v775_v43 = vld [vmem:[%s15637_s28 + $0x2548] sm:$0xff]  ;;  %772 = vst [vmem:[%s15645_s29 + $0x948] sm:$0xff] %v771_v41 }
  0xa5   : > { %774 = vst [vmem:[%s15645_s29 + $0x950] sm:$0xff] %v773_v42  ;;  %776 = vst [vmem:[%s15645_s29 + $0x958] sm:$0xff] %v775_v43  ;;  %v777_v44 = vld [vmem:[%s15637_s28 + $0x2580] sm:$0xff]  ;;  %v779_v45 = vld [vmem:[%s15637_s28 + $0x2588] sm:$0xff] }
  0xa6   : > { %v781_v46 = vld [vmem:[%s15637_s28 + $0x25c0] sm:$0xff]  ;;  %778 = vst [vmem:[%s15645_s29 + $0x960] sm:$0xff] %v777_v44  ;;  %780 = vst [vmem:[%s15645_s29 + $0x968] sm:$0xff] %v779_v45  ;;  %v783_v47 = vld [vmem:[%s15637_s28 + $0x25c8] sm:$0xff] }
  0xa7   : > { %782 = vst [vmem:[%s15645_s29 + $0x970] sm:$0xff] %v781_v46  ;;  %v785_v48 = vld [vmem:[%s15637_s28 + $0x2600] sm:$0xff]  ;;  %v787_v49 = vld [vmem:[%s15637_s28 + $0x2608] sm:$0xff]  ;;  %784 = vst [vmem:[%s15645_s29 + $0x978] sm:$0xff] %v783_v47 }
  0xa8   : > { %786 = vst [vmem:[%s15645_s29 + $0x980] sm:$0xff] %v785_v48  ;;  %788 = vst [vmem:[%s15645_s29 + $0x988] sm:$0xff] %v787_v49  ;;  %v789_v50 = vld [vmem:[%s15637_s28 + $0x2640] sm:$0xff]  ;;  %v791_v51 = vld [vmem:[%s15637_s28 + $0x2648] sm:$0xff] }
  0xa9   : > { %v793_v52 = vld [vmem:[%s15637_s28 + $0x2680] sm:$0xff]  ;;  %790 = vst [vmem:[%s15645_s29 + $0x990] sm:$0xff] %v789_v50  ;;  %792 = vst [vmem:[%s15645_s29 + $0x998] sm:$0xff] %v791_v51  ;;  %v795_v53 = vld [vmem:[%s15637_s28 + $0x2688] sm:$0xff] }
  0xaa   : > { %794 = vst [vmem:[%s15645_s29 + $0x9a0] sm:$0xff] %v793_v52  ;;  %v797_v54 = vld [vmem:[%s15637_s28 + $0x26c0] sm:$0xff]  ;;  %v799_v55 = vld [vmem:[%s15637_s28 + $0x26c8] sm:$0xff]  ;;  %796 = vst [vmem:[%s15645_s29 + $0x9a8] sm:$0xff] %v795_v53 }
  0xab   : > { %798 = vst [vmem:[%s15645_s29 + $0x9b0] sm:$0xff] %v797_v54  ;;  %800 = vst [vmem:[%s15645_s29 + $0x9b8] sm:$0xff] %v799_v55  ;;  %v801_v56 = vld [vmem:[%s15637_s28 + $0x2700] sm:$0xff]  ;;  %v803_v57 = vld [vmem:[%s15637_s28 + $0x2708] sm:$0xff] }
  0xac   : > { %v805_v58 = vld [vmem:[%s15637_s28 + $0x2740] sm:$0xff]  ;;  %802 = vst [vmem:[%s15645_s29 + $0x9c0] sm:$0xff] %v801_v56  ;;  %804 = vst [vmem:[%s15645_s29 + $0x9c8] sm:$0xff] %v803_v57  ;;  %v807_v59 = vld [vmem:[%s15637_s28 + $0x2748] sm:$0xff] }
  0xad   : > { %806 = vst [vmem:[%s15645_s29 + $0x9d0] sm:$0xff] %v805_v58  ;;  %v809_v60 = vld [vmem:[%s15637_s28 + $0x2780] sm:$0xff]  ;;  %v811_v61 = vld [vmem:[%s15637_s28 + $0x2788] sm:$0xff]  ;;  %808 = vst [vmem:[%s15645_s29 + $0x9d8] sm:$0xff] %v807_v59 }
  0xae   : > { %810 = vst [vmem:[%s15645_s29 + $0x9e0] sm:$0xff] %v809_v60  ;;  %812 = vst [vmem:[%s15645_s29 + $0x9e8] sm:$0xff] %v811_v61  ;;  %v813_v62 = vld [vmem:[%s15637_s28 + $0x27c0] sm:$0xff]  ;;  %v815_v63 = vld [vmem:[%s15637_s28 + $0x27c8] sm:$0xff] }
  0xaf   : > { %v817_v0 = vld [vmem:[%s15637_s28 + $0x2800] sm:$0xff]  ;;  %814 = vst [vmem:[%s15645_s29 + $0x9f0] sm:$0xff] %v813_v62  ;;  %816 = vst [vmem:[%s15645_s29 + $0x9f8] sm:$0xff] %v815_v63  ;;  %v819_v1 = vld [vmem:[%s15637_s28 + $0x2808] sm:$0xff] }
  0xb0   : > { %818 = vst [vmem:[%s15645_s29 + $0xa00] sm:$0xff] %v817_v0  ;;  %v821_v2 = vld [vmem:[%s15637_s28 + $0x2840] sm:$0xff]  ;;  %v823_v3 = vld [vmem:[%s15637_s28 + $0x2848] sm:$0xff]  ;;  %820 = vst [vmem:[%s15645_s29 + $0xa08] sm:$0xff] %v819_v1 }
  0xb1   : > { %822 = vst [vmem:[%s15645_s29 + $0xa10] sm:$0xff] %v821_v2  ;;  %824 = vst [vmem:[%s15645_s29 + $0xa18] sm:$0xff] %v823_v3  ;;  %v825_v4 = vld [vmem:[%s15637_s28 + $0x2880] sm:$0xff]  ;;  %v827_v5 = vld [vmem:[%s15637_s28 + $0x2888] sm:$0xff] }
  0xb2   : > { %v829_v6 = vld [vmem:[%s15637_s28 + $0x28c0] sm:$0xff]  ;;  %826 = vst [vmem:[%s15645_s29 + $0xa20] sm:$0xff] %v825_v4  ;;  %828 = vst [vmem:[%s15645_s29 + $0xa28] sm:$0xff] %v827_v5  ;;  %v831_v7 = vld [vmem:[%s15637_s28 + $0x28c8] sm:$0xff] }
  0xb3   : > { %830 = vst [vmem:[%s15645_s29 + $0xa30] sm:$0xff] %v829_v6  ;;  %v833_v8 = vld [vmem:[%s15637_s28 + $0x2900] sm:$0xff]  ;;  %v835_v9 = vld [vmem:[%s15637_s28 + $0x2908] sm:$0xff]  ;;  %832 = vst [vmem:[%s15645_s29 + $0xa38] sm:$0xff] %v831_v7 }
  0xb4   : > { %834 = vst [vmem:[%s15645_s29 + $0xa40] sm:$0xff] %v833_v8  ;;  %836 = vst [vmem:[%s15645_s29 + $0xa48] sm:$0xff] %v835_v9  ;;  %v837_v10 = vld [vmem:[%s15637_s28 + $0x2940] sm:$0xff]  ;;  %v839_v11 = vld [vmem:[%s15637_s28 + $0x2948] sm:$0xff] }
  0xb5   : > { %v841_v12 = vld [vmem:[%s15637_s28 + $0x2980] sm:$0xff]  ;;  %838 = vst [vmem:[%s15645_s29 + $0xa50] sm:$0xff] %v837_v10  ;;  %840 = vst [vmem:[%s15645_s29 + $0xa58] sm:$0xff] %v839_v11  ;;  %v843_v13 = vld [vmem:[%s15637_s28 + $0x2988] sm:$0xff] }
  0xb6   : > { %842 = vst [vmem:[%s15645_s29 + $0xa60] sm:$0xff] %v841_v12  ;;  %v845_v14 = vld [vmem:[%s15637_s28 + $0x29c0] sm:$0xff]  ;;  %v847_v15 = vld [vmem:[%s15637_s28 + $0x29c8] sm:$0xff]  ;;  %844 = vst [vmem:[%s15645_s29 + $0xa68] sm:$0xff] %v843_v13 }
  0xb7   : > { %846 = vst [vmem:[%s15645_s29 + $0xa70] sm:$0xff] %v845_v14  ;;  %848 = vst [vmem:[%s15645_s29 + $0xa78] sm:$0xff] %v847_v15  ;;  %v849_v16 = vld [vmem:[%s15637_s28 + $0x2a00] sm:$0xff]  ;;  %v851_v17 = vld [vmem:[%s15637_s28 + $0x2a08] sm:$0xff] }
  0xb8   : > { %v853_v18 = vld [vmem:[%s15637_s28 + $0x2a40] sm:$0xff]  ;;  %850 = vst [vmem:[%s15645_s29 + $0xa80] sm:$0xff] %v849_v16  ;;  %852 = vst [vmem:[%s15645_s29 + $0xa88] sm:$0xff] %v851_v17  ;;  %v855_v19 = vld [vmem:[%s15637_s28 + $0x2a48] sm:$0xff] }
  0xb9   : > { %854 = vst [vmem:[%s15645_s29 + $0xa90] sm:$0xff] %v853_v18  ;;  %v857_v20 = vld [vmem:[%s15637_s28 + $0x2a80] sm:$0xff]  ;;  %v859_v21 = vld [vmem:[%s15637_s28 + $0x2a88] sm:$0xff]  ;;  %856 = vst [vmem:[%s15645_s29 + $0xa98] sm:$0xff] %v855_v19 }
  0xba   : > { %858 = vst [vmem:[%s15645_s29 + $0xaa0] sm:$0xff] %v857_v20  ;;  %860 = vst [vmem:[%s15645_s29 + $0xaa8] sm:$0xff] %v859_v21  ;;  %v861_v22 = vld [vmem:[%s15637_s28 + $0x2ac0] sm:$0xff]  ;;  %v863_v23 = vld [vmem:[%s15637_s28 + $0x2ac8] sm:$0xff] }
  0xbb   : > { %v865_v24 = vld [vmem:[%s15637_s28 + $0x2b00] sm:$0xff]  ;;  %862 = vst [vmem:[%s15645_s29 + $0xab0] sm:$0xff] %v861_v22  ;;  %864 = vst [vmem:[%s15645_s29 + $0xab8] sm:$0xff] %v863_v23  ;;  %v867_v25 = vld [vmem:[%s15637_s28 + $0x2b08] sm:$0xff] }
  0xbc   : > { %866 = vst [vmem:[%s15645_s29 + $0xac0] sm:$0xff] %v865_v24  ;;  %v869_v26 = vld [vmem:[%s15637_s28 + $0x2b40] sm:$0xff]  ;;  %v871_v27 = vld [vmem:[%s15637_s28 + $0x2b48] sm:$0xff]  ;;  %868 = vst [vmem:[%s15645_s29 + $0xac8] sm:$0xff] %v867_v25 }
  0xbd   : > { %870 = vst [vmem:[%s15645_s29 + $0xad0] sm:$0xff] %v869_v26  ;;  %872 = vst [vmem:[%s15645_s29 + $0xad8] sm:$0xff] %v871_v27  ;;  %v873_v28 = vld [vmem:[%s15637_s28 + $0x2b80] sm:$0xff]  ;;  %v875_v29 = vld [vmem:[%s15637_s28 + $0x2b88] sm:$0xff] }
  0xbe   : > { %v877_v30 = vld [vmem:[%s15637_s28 + $0x2bc0] sm:$0xff]  ;;  %874 = vst [vmem:[%s15645_s29 + $0xae0] sm:$0xff] %v873_v28  ;;  %876 = vst [vmem:[%s15645_s29 + $0xae8] sm:$0xff] %v875_v29  ;;  %v879_v31 = vld [vmem:[%s15637_s28 + $0x2bc8] sm:$0xff] }
  0xbf   : > { %878 = vst [vmem:[%s15645_s29 + $0xaf0] sm:$0xff] %v877_v30  ;;  %v881_v32 = vld [vmem:[%s15637_s28 + $0x2c00] sm:$0xff]  ;;  %v883_v33 = vld [vmem:[%s15637_s28 + $0x2c08] sm:$0xff]  ;;  %880 = vst [vmem:[%s15645_s29 + $0xaf8] sm:$0xff] %v879_v31 }
  0xc0   : > { %882 = vst [vmem:[%s15645_s29 + $0xb00] sm:$0xff] %v881_v32  ;;  %884 = vst [vmem:[%s15645_s29 + $0xb08] sm:$0xff] %v883_v33  ;;  %v885_v34 = vld [vmem:[%s15637_s28 + $0x2c40] sm:$0xff]  ;;  %v887_v35 = vld [vmem:[%s15637_s28 + $0x2c48] sm:$0xff] }
  0xc1   : > { %v889_v36 = vld [vmem:[%s15637_s28 + $0x2c80] sm:$0xff]  ;;  %886 = vst [vmem:[%s15645_s29 + $0xb10] sm:$0xff] %v885_v34  ;;  %888 = vst [vmem:[%s15645_s29 + $0xb18] sm:$0xff] %v887_v35  ;;  %v891_v37 = vld [vmem:[%s15637_s28 + $0x2c88] sm:$0xff] }
  0xc2   : > { %890 = vst [vmem:[%s15645_s29 + $0xb20] sm:$0xff] %v889_v36  ;;  %v893_v38 = vld [vmem:[%s15637_s28 + $0x2cc0] sm:$0xff]  ;;  %v895_v39 = vld [vmem:[%s15637_s28 + $0x2cc8] sm:$0xff]  ;;  %892 = vst [vmem:[%s15645_s29 + $0xb28] sm:$0xff] %v891_v37 }
  0xc3   : > { %894 = vst [vmem:[%s15645_s29 + $0xb30] sm:$0xff] %v893_v38  ;;  %896 = vst [vmem:[%s15645_s29 + $0xb38] sm:$0xff] %v895_v39  ;;  %v897_v40 = vld [vmem:[%s15637_s28 + $0x2d00] sm:$0xff]  ;;  %v899_v41 = vld [vmem:[%s15637_s28 + $0x2d08] sm:$0xff] }
  0xc4   : > { %v901_v42 = vld [vmem:[%s15637_s28 + $0x2d40] sm:$0xff]  ;;  %898 = vst [vmem:[%s15645_s29 + $0xb40] sm:$0xff] %v897_v40  ;;  %900 = vst [vmem:[%s15645_s29 + $0xb48] sm:$0xff] %v899_v41  ;;  %v903_v43 = vld [vmem:[%s15637_s28 + $0x2d48] sm:$0xff] }
  0xc5   : > { %902 = vst [vmem:[%s15645_s29 + $0xb50] sm:$0xff] %v901_v42  ;;  %v905_v44 = vld [vmem:[%s15637_s28 + $0x2d80] sm:$0xff]  ;;  %v907_v45 = vld [vmem:[%s15637_s28 + $0x2d88] sm:$0xff]  ;;  %904 = vst [vmem:[%s15645_s29 + $0xb58] sm:$0xff] %v903_v43 }
  0xc6   : > { %906 = vst [vmem:[%s15645_s29 + $0xb60] sm:$0xff] %v905_v44  ;;  %908 = vst [vmem:[%s15645_s29 + $0xb68] sm:$0xff] %v907_v45  ;;  %v909_v46 = vld [vmem:[%s15637_s28 + $0x2dc0] sm:$0xff]  ;;  %v911_v47 = vld [vmem:[%s15637_s28 + $0x2dc8] sm:$0xff] }
  0xc7   : > { %v913_v48 = vld [vmem:[%s15637_s28 + $0x2e00] sm:$0xff]  ;;  %910 = vst [vmem:[%s15645_s29 + $0xb70] sm:$0xff] %v909_v46  ;;  %912 = vst [vmem:[%s15645_s29 + $0xb78] sm:$0xff] %v911_v47  ;;  %v915_v49 = vld [vmem:[%s15637_s28 + $0x2e08] sm:$0xff] }
  0xc8   : > { %914 = vst [vmem:[%s15645_s29 + $0xb80] sm:$0xff] %v913_v48  ;;  %v917_v50 = vld [vmem:[%s15637_s28 + $0x2e40] sm:$0xff]  ;;  %v919_v51 = vld [vmem:[%s15637_s28 + $0x2e48] sm:$0xff]  ;;  %916 = vst [vmem:[%s15645_s29 + $0xb88] sm:$0xff] %v915_v49 }
  0xc9   : > { %918 = vst [vmem:[%s15645_s29 + $0xb90] sm:$0xff] %v917_v50  ;;  %920 = vst [vmem:[%s15645_s29 + $0xb98] sm:$0xff] %v919_v51  ;;  %v921_v52 = vld [vmem:[%s15637_s28 + $0x2e80] sm:$0xff]  ;;  %v923_v53 = vld [vmem:[%s15637_s28 + $0x2e88] sm:$0xff] }
  0xca   : > { %v925_v54 = vld [vmem:[%s15637_s28 + $0x2ec0] sm:$0xff]  ;;  %922 = vst [vmem:[%s15645_s29 + $0xba0] sm:$0xff] %v921_v52  ;;  %924 = vst [vmem:[%s15645_s29 + $0xba8] sm:$0xff] %v923_v53  ;;  %v927_v55 = vld [vmem:[%s15637_s28 + $0x2ec8] sm:$0xff] }
  0xcb   : > { %926 = vst [vmem:[%s15645_s29 + $0xbb0] sm:$0xff] %v925_v54  ;;  %v929_v56 = vld [vmem:[%s15637_s28 + $0x2f00] sm:$0xff]  ;;  %v931_v57 = vld [vmem:[%s15637_s28 + $0x2f08] sm:$0xff]  ;;  %928 = vst [vmem:[%s15645_s29 + $0xbb8] sm:$0xff] %v927_v55 }
  0xcc   : > { %930 = vst [vmem:[%s15645_s29 + $0xbc0] sm:$0xff] %v929_v56  ;;  %932 = vst [vmem:[%s15645_s29 + $0xbc8] sm:$0xff] %v931_v57  ;;  %v933_v58 = vld [vmem:[%s15637_s28 + $0x2f40] sm:$0xff]  ;;  %v935_v59 = vld [vmem:[%s15637_s28 + $0x2f48] sm:$0xff] }
  0xcd   : > { %v937_v60 = vld [vmem:[%s15637_s28 + $0x2f80] sm:$0xff]  ;;  %934 = vst [vmem:[%s15645_s29 + $0xbd0] sm:$0xff] %v933_v58  ;;  %936 = vst [vmem:[%s15645_s29 + $0xbd8] sm:$0xff] %v935_v59  ;;  %v939_v61 = vld [vmem:[%s15637_s28 + $0x2f88] sm:$0xff] }
  0xce   : > { %938 = vst [vmem:[%s15645_s29 + $0xbe0] sm:$0xff] %v937_v60  ;;  %v941_v62 = vld [vmem:[%s15637_s28 + $0x2fc0] sm:$0xff]  ;;  %v943_v63 = vld [vmem:[%s15637_s28 + $0x2fc8] sm:$0xff]  ;;  %940 = vst [vmem:[%s15645_s29 + $0xbe8] sm:$0xff] %v939_v61 }
  0xcf   : > { %942 = vst [vmem:[%s15645_s29 + $0xbf0] sm:$0xff] %v941_v62  ;;  %944 = vst [vmem:[%s15645_s29 + $0xbf8] sm:$0xff] %v943_v63  ;;  %v945_v0 = vld [vmem:[%s15637_s28 + $0x3000] sm:$0xff]  ;;  %v947_v1 = vld [vmem:[%s15637_s28 + $0x3008] sm:$0xff] }
  0xd0   : > { %v949_v2 = vld [vmem:[%s15637_s28 + $0x3040] sm:$0xff]  ;;  %946 = vst [vmem:[%s15645_s29 + $0xc00] sm:$0xff] %v945_v0  ;;  %948 = vst [vmem:[%s15645_s29 + $0xc08] sm:$0xff] %v947_v1  ;;  %v951_v3 = vld [vmem:[%s15637_s28 + $0x3048] sm:$0xff] }
  0xd1   : > { %950 = vst [vmem:[%s15645_s29 + $0xc10] sm:$0xff] %v949_v2  ;;  %v953_v4 = vld [vmem:[%s15637_s28 + $0x3080] sm:$0xff]  ;;  %v955_v5 = vld [vmem:[%s15637_s28 + $0x3088] sm:$0xff]  ;;  %952 = vst [vmem:[%s15645_s29 + $0xc18] sm:$0xff] %v951_v3 }
  0xd2   : > { %954 = vst [vmem:[%s15645_s29 + $0xc20] sm:$0xff] %v953_v4  ;;  %956 = vst [vmem:[%s15645_s29 + $0xc28] sm:$0xff] %v955_v5  ;;  %v957_v6 = vld [vmem:[%s15637_s28 + $0x30c0] sm:$0xff]  ;;  %v959_v7 = vld [vmem:[%s15637_s28 + $0x30c8] sm:$0xff] }
  0xd3   : > { %v961_v8 = vld [vmem:[%s15637_s28 + $0x3100] sm:$0xff]  ;;  %958 = vst [vmem:[%s15645_s29 + $0xc30] sm:$0xff] %v957_v6  ;;  %960 = vst [vmem:[%s15645_s29 + $0xc38] sm:$0xff] %v959_v7  ;;  %v963_v9 = vld [vmem:[%s15637_s28 + $0x3108] sm:$0xff] }
  0xd4   : > { %962 = vst [vmem:[%s15645_s29 + $0xc40] sm:$0xff] %v961_v8  ;;  %v965_v10 = vld [vmem:[%s15637_s28 + $0x3140] sm:$0xff]  ;;  %v967_v11 = vld [vmem:[%s15637_s28 + $0x3148] sm:$0xff]  ;;  %964 = vst [vmem:[%s15645_s29 + $0xc48] sm:$0xff] %v963_v9 }
  0xd5   : > { %966 = vst [vmem:[%s15645_s29 + $0xc50] sm:$0xff] %v965_v10  ;;  %968 = vst [vmem:[%s15645_s29 + $0xc58] sm:$0xff] %v967_v11  ;;  %v969_v12 = vld [vmem:[%s15637_s28 + $0x3180] sm:$0xff]  ;;  %v971_v13 = vld [vmem:[%s15637_s28 + $0x3188] sm:$0xff] }
  0xd6   : > { %v973_v14 = vld [vmem:[%s15637_s28 + $0x31c0] sm:$0xff]  ;;  %970 = vst [vmem:[%s15645_s29 + $0xc60] sm:$0xff] %v969_v12  ;;  %972 = vst [vmem:[%s15645_s29 + $0xc68] sm:$0xff] %v971_v13  ;;  %v975_v15 = vld [vmem:[%s15637_s28 + $0x31c8] sm:$0xff] }
  0xd7   : > { %974 = vst [vmem:[%s15645_s29 + $0xc70] sm:$0xff] %v973_v14  ;;  %v977_v16 = vld [vmem:[%s15637_s28 + $0x3200] sm:$0xff]  ;;  %v979_v17 = vld [vmem:[%s15637_s28 + $0x3208] sm:$0xff]  ;;  %976 = vst [vmem:[%s15645_s29 + $0xc78] sm:$0xff] %v975_v15 }
  0xd8   : > { %978 = vst [vmem:[%s15645_s29 + $0xc80] sm:$0xff] %v977_v16  ;;  %980 = vst [vmem:[%s15645_s29 + $0xc88] sm:$0xff] %v979_v17  ;;  %v981_v18 = vld [vmem:[%s15637_s28 + $0x3240] sm:$0xff]  ;;  %v983_v19 = vld [vmem:[%s15637_s28 + $0x3248] sm:$0xff] }
  0xd9   : > { %v985_v20 = vld [vmem:[%s15637_s28 + $0x3280] sm:$0xff]  ;;  %982 = vst [vmem:[%s15645_s29 + $0xc90] sm:$0xff] %v981_v18  ;;  %984 = vst [vmem:[%s15645_s29 + $0xc98] sm:$0xff] %v983_v19  ;;  %v987_v21 = vld [vmem:[%s15637_s28 + $0x3288] sm:$0xff] }
  0xda   : > { %986 = vst [vmem:[%s15645_s29 + $0xca0] sm:$0xff] %v985_v20  ;;  %v989_v22 = vld [vmem:[%s15637_s28 + $0x32c0] sm:$0xff]  ;;  %v991_v23 = vld [vmem:[%s15637_s28 + $0x32c8] sm:$0xff]  ;;  %988 = vst [vmem:[%s15645_s29 + $0xca8] sm:$0xff] %v987_v21 }
  0xdb   : > { %990 = vst [vmem:[%s15645_s29 + $0xcb0] sm:$0xff] %v989_v22  ;;  %992 = vst [vmem:[%s15645_s29 + $0xcb8] sm:$0xff] %v991_v23  ;;  %v993_v24 = vld [vmem:[%s15637_s28 + $0x3300] sm:$0xff]  ;;  %v995_v25 = vld [vmem:[%s15637_s28 + $0x3308] sm:$0xff] }
  0xdc   : > { %v997_v26 = vld [vmem:[%s15637_s28 + $0x3340] sm:$0xff]  ;;  %994 = vst [vmem:[%s15645_s29 + $0xcc0] sm:$0xff] %v993_v24  ;;  %996 = vst [vmem:[%s15645_s29 + $0xcc8] sm:$0xff] %v995_v25  ;;  %v999_v27 = vld [vmem:[%s15637_s28 + $0x3348] sm:$0xff] }
  0xdd   : > { %998 = vst [vmem:[%s15645_s29 + $0xcd0] sm:$0xff] %v997_v26  ;;  %v1001_v28 = vld [vmem:[%s15637_s28 + $0x3380] sm:$0xff]  ;;  %v1003_v29 = vld [vmem:[%s15637_s28 + $0x3388] sm:$0xff]  ;;  %1000 = vst [vmem:[%s15645_s29 + $0xcd8] sm:$0xff] %v999_v27 }
  0xde   : > { %1002 = vst [vmem:[%s15645_s29 + $0xce0] sm:$0xff] %v1001_v28  ;;  %1004 = vst [vmem:[%s15645_s29 + $0xce8] sm:$0xff] %v1003_v29  ;;  %v1005_v30 = vld [vmem:[%s15637_s28 + $0x33c0] sm:$0xff]  ;;  %v1007_v31 = vld [vmem:[%s15637_s28 + $0x33c8] sm:$0xff] }
  0xdf   : > { %v1009_v32 = vld [vmem:[%s15637_s28 + $0x3400] sm:$0xff]  ;;  %1006 = vst [vmem:[%s15645_s29 + $0xcf0] sm:$0xff] %v1005_v30  ;;  %1008 = vst [vmem:[%s15645_s29 + $0xcf8] sm:$0xff] %v1007_v31  ;;  %v1011_v33 = vld [vmem:[%s15637_s28 + $0x3408] sm:$0xff] }
  0xe0   : > { %1010 = vst [vmem:[%s15645_s29 + $0xd00] sm:$0xff] %v1009_v32  ;;  %v1013_v34 = vld [vmem:[%s15637_s28 + $0x3440] sm:$0xff]  ;;  %v1015_v35 = vld [vmem:[%s15637_s28 + $0x3448] sm:$0xff]  ;;  %1012 = vst [vmem:[%s15645_s29 + $0xd08] sm:$0xff] %v1011_v33 }
  0xe1   : > { %1014 = vst [vmem:[%s15645_s29 + $0xd10] sm:$0xff] %v1013_v34  ;;  %1016 = vst [vmem:[%s15645_s29 + $0xd18] sm:$0xff] %v1015_v35  ;;  %v1017_v36 = vld [vmem:[%s15637_s28 + $0x3480] sm:$0xff]  ;;  %v1019_v37 = vld [vmem:[%s15637_s28 + $0x3488] sm:$0xff] }
  0xe2   : > { %v1021_v38 = vld [vmem:[%s15637_s28 + $0x34c0] sm:$0xff]  ;;  %1018 = vst [vmem:[%s15645_s29 + $0xd20] sm:$0xff] %v1017_v36  ;;  %1020 = vst [vmem:[%s15645_s29 + $0xd28] sm:$0xff] %v1019_v37  ;;  %v1023_v39 = vld [vmem:[%s15637_s28 + $0x34c8] sm:$0xff] }
  0xe3   : > { %1022 = vst [vmem:[%s15645_s29 + $0xd30] sm:$0xff] %v1021_v38  ;;  %v1025_v40 = vld [vmem:[%s15637_s28 + $0x3500] sm:$0xff]  ;;  %v1027_v41 = vld [vmem:[%s15637_s28 + $0x3508] sm:$0xff]  ;;  %1024 = vst [vmem:[%s15645_s29 + $0xd38] sm:$0xff] %v1023_v39 }
  0xe4   : > { %1026 = vst [vmem:[%s15645_s29 + $0xd40] sm:$0xff] %v1025_v40  ;;  %1028 = vst [vmem:[%s15645_s29 + $0xd48] sm:$0xff] %v1027_v41  ;;  %v1029_v42 = vld [vmem:[%s15637_s28 + $0x3540] sm:$0xff]  ;;  %v1031_v43 = vld [vmem:[%s15637_s28 + $0x3548] sm:$0xff] }
  0xe5   : > { %v1033_v44 = vld [vmem:[%s15637_s28 + $0x3580] sm:$0xff]  ;;  %1030 = vst [vmem:[%s15645_s29 + $0xd50] sm:$0xff] %v1029_v42  ;;  %1032 = vst [vmem:[%s15645_s29 + $0xd58] sm:$0xff] %v1031_v43  ;;  %v1035_v45 = vld [vmem:[%s15637_s28 + $0x3588] sm:$0xff] }
  0xe6   : > { %1034 = vst [vmem:[%s15645_s29 + $0xd60] sm:$0xff] %v1033_v44  ;;  %v1037_v46 = vld [vmem:[%s15637_s28 + $0x35c0] sm:$0xff]  ;;  %v1039_v47 = vld [vmem:[%s15637_s28 + $0x35c8] sm:$0xff]  ;;  %1036 = vst [vmem:[%s15645_s29 + $0xd68] sm:$0xff] %v1035_v45 }
  0xe7   : > { %1038 = vst [vmem:[%s15645_s29 + $0xd70] sm:$0xff] %v1037_v46  ;;  %1040 = vst [vmem:[%s15645_s29 + $0xd78] sm:$0xff] %v1039_v47  ;;  %v1041_v48 = vld [vmem:[%s15637_s28 + $0x3600] sm:$0xff]  ;;  %v1043_v49 = vld [vmem:[%s15637_s28 + $0x3608] sm:$0xff] }
  0xe8   : > { %v1045_v50 = vld [vmem:[%s15637_s28 + $0x3640] sm:$0xff]  ;;  %1042 = vst [vmem:[%s15645_s29 + $0xd80] sm:$0xff] %v1041_v48  ;;  %1044 = vst [vmem:[%s15645_s29 + $0xd88] sm:$0xff] %v1043_v49  ;;  %v1047_v51 = vld [vmem:[%s15637_s28 + $0x3648] sm:$0xff] }
  0xe9   : > { %1046 = vst [vmem:[%s15645_s29 + $0xd90] sm:$0xff] %v1045_v50  ;;  %v1049_v52 = vld [vmem:[%s15637_s28 + $0x3680] sm:$0xff]  ;;  %v1051_v53 = vld [vmem:[%s15637_s28 + $0x3688] sm:$0xff]  ;;  %1048 = vst [vmem:[%s15645_s29 + $0xd98] sm:$0xff] %v1047_v51 }
  0xea   : > { %1050 = vst [vmem:[%s15645_s29 + $0xda0] sm:$0xff] %v1049_v52  ;;  %1052 = vst [vmem:[%s15645_s29 + $0xda8] sm:$0xff] %v1051_v53  ;;  %v1053_v54 = vld [vmem:[%s15637_s28 + $0x36c0] sm:$0xff]  ;;  %v1055_v55 = vld [vmem:[%s15637_s28 + $0x36c8] sm:$0xff] }
  0xeb   : > { %v1057_v56 = vld [vmem:[%s15637_s28 + $0x3700] sm:$0xff]  ;;  %1054 = vst [vmem:[%s15645_s29 + $0xdb0] sm:$0xff] %v1053_v54  ;;  %1056 = vst [vmem:[%s15645_s29 + $0xdb8] sm:$0xff] %v1055_v55  ;;  %v1059_v57 = vld [vmem:[%s15637_s28 + $0x3708] sm:$0xff] }
  0xec   : > { %1058 = vst [vmem:[%s15645_s29 + $0xdc0] sm:$0xff] %v1057_v56  ;;  %v1061_v58 = vld [vmem:[%s15637_s28 + $0x3740] sm:$0xff]  ;;  %v1063_v59 = vld [vmem:[%s15637_s28 + $0x3748] sm:$0xff]  ;;  %1060 = vst [vmem:[%s15645_s29 + $0xdc8] sm:$0xff] %v1059_v57 }
  0xed   : > { %1062 = vst [vmem:[%s15645_s29 + $0xdd0] sm:$0xff] %v1061_v58  ;;  %1064 = vst [vmem:[%s15645_s29 + $0xdd8] sm:$0xff] %v1063_v59  ;;  %v1065_v60 = vld [vmem:[%s15637_s28 + $0x3780] sm:$0xff]  ;;  %v1067_v61 = vld [vmem:[%s15637_s28 + $0x3788] sm:$0xff] }
  0xee   : > { %v1069_v62 = vld [vmem:[%s15637_s28 + $0x37c0] sm:$0xff]  ;;  %1066 = vst [vmem:[%s15645_s29 + $0xde0] sm:$0xff] %v1065_v60  ;;  %1068 = vst [vmem:[%s15645_s29 + $0xde8] sm:$0xff] %v1067_v61  ;;  %v1071_v63 = vld [vmem:[%s15637_s28 + $0x37c8] sm:$0xff] }
  0xef   : > { %1070 = vst [vmem:[%s15645_s29 + $0xdf0] sm:$0xff] %v1069_v62  ;;  %v1073_v0 = vld [vmem:[%s15637_s28 + $0x3800] sm:$0xff]  ;;  %v1075_v1 = vld [vmem:[%s15637_s28 + $0x3808] sm:$0xff]  ;;  %1072 = vst [vmem:[%s15645_s29 + $0xdf8] sm:$0xff] %v1071_v63 }
  0xf0   : > { %1074 = vst [vmem:[%s15645_s29 + $0xe00] sm:$0xff] %v1073_v0  ;;  %1076 = vst [vmem:[%s15645_s29 + $0xe08] sm:$0xff] %v1075_v1  ;;  %v1077_v2 = vld [vmem:[%s15637_s28 + $0x3840] sm:$0xff]  ;;  %v1079_v3 = vld [vmem:[%s15637_s28 + $0x3848] sm:$0xff] }
  0xf1   : > { %v1081_v4 = vld [vmem:[%s15637_s28 + $0x3880] sm:$0xff]  ;;  %1078 = vst [vmem:[%s15645_s29 + $0xe10] sm:$0xff] %v1077_v2  ;;  %1080 = vst [vmem:[%s15645_s29 + $0xe18] sm:$0xff] %v1079_v3  ;;  %v1083_v5 = vld [vmem:[%s15637_s28 + $0x3888] sm:$0xff] }
  0xf2   : > { %1082 = vst [vmem:[%s15645_s29 + $0xe20] sm:$0xff] %v1081_v4  ;;  %v1085_v6 = vld [vmem:[%s15637_s28 + $0x38c0] sm:$0xff]  ;;  %v1087_v7 = vld [vmem:[%s15637_s28 + $0x38c8] sm:$0xff]  ;;  %1084 = vst [vmem:[%s15645_s29 + $0xe28] sm:$0xff] %v1083_v5 }
  0xf3   : > { %1086 = vst [vmem:[%s15645_s29 + $0xe30] sm:$0xff] %v1085_v6  ;;  %1088 = vst [vmem:[%s15645_s29 + $0xe38] sm:$0xff] %v1087_v7  ;;  %v1089_v8 = vld [vmem:[%s15637_s28 + $0x3900] sm:$0xff]  ;;  %v1091_v9 = vld [vmem:[%s15637_s28 + $0x3908] sm:$0xff] }
  0xf4   : > { %v1093_v10 = vld [vmem:[%s15637_s28 + $0x3940] sm:$0xff]  ;;  %1090 = vst [vmem:[%s15645_s29 + $0xe40] sm:$0xff] %v1089_v8  ;;  %1092 = vst [vmem:[%s15645_s29 + $0xe48] sm:$0xff] %v1091_v9  ;;  %v1095_v11 = vld [vmem:[%s15637_s28 + $0x3948] sm:$0xff] }
  0xf5   : > { %1094 = vst [vmem:[%s15645_s29 + $0xe50] sm:$0xff] %v1093_v10  ;;  %v1097_v12 = vld [vmem:[%s15637_s28 + $0x3980] sm:$0xff]  ;;  %v1099_v13 = vld [vmem:[%s15637_s28 + $0x3988] sm:$0xff]  ;;  %1096 = vst [vmem:[%s15645_s29 + $0xe58] sm:$0xff] %v1095_v11 }
  0xf6   : > { %1098 = vst [vmem:[%s15645_s29 + $0xe60] sm:$0xff] %v1097_v12  ;;  %1100 = vst [vmem:[%s15645_s29 + $0xe68] sm:$0xff] %v1099_v13  ;;  %v1101_v14 = vld [vmem:[%s15637_s28 + $0x39c0] sm:$0xff]  ;;  %v1103_v15 = vld [vmem:[%s15637_s28 + $0x39c8] sm:$0xff] }
  0xf7   : > { %v1105_v16 = vld [vmem:[%s15637_s28 + $0x3a00] sm:$0xff]  ;;  %1102 = vst [vmem:[%s15645_s29 + $0xe70] sm:$0xff] %v1101_v14  ;;  %1104 = vst [vmem:[%s15645_s29 + $0xe78] sm:$0xff] %v1103_v15  ;;  %v1107_v17 = vld [vmem:[%s15637_s28 + $0x3a08] sm:$0xff] }
  0xf8   : > { %1106 = vst [vmem:[%s15645_s29 + $0xe80] sm:$0xff] %v1105_v16  ;;  %v1109_v18 = vld [vmem:[%s15637_s28 + $0x3a40] sm:$0xff]  ;;  %v1111_v19 = vld [vmem:[%s15637_s28 + $0x3a48] sm:$0xff]  ;;  %1108 = vst [vmem:[%s15645_s29 + $0xe88] sm:$0xff] %v1107_v17 }
  0xf9   : > { %1110 = vst [vmem:[%s15645_s29 + $0xe90] sm:$0xff] %v1109_v18  ;;  %1112 = vst [vmem:[%s15645_s29 + $0xe98] sm:$0xff] %v1111_v19  ;;  %v1113_v20 = vld [vmem:[%s15637_s28 + $0x3a80] sm:$0xff]  ;;  %v1115_v21 = vld [vmem:[%s15637_s28 + $0x3a88] sm:$0xff] }
  0xfa   : > { %v1117_v22 = vld [vmem:[%s15637_s28 + $0x3ac0] sm:$0xff]  ;;  %1114 = vst [vmem:[%s15645_s29 + $0xea0] sm:$0xff] %v1113_v20  ;;  %1116 = vst [vmem:[%s15645_s29 + $0xea8] sm:$0xff] %v1115_v21  ;;  %v1119_v23 = vld [vmem:[%s15637_s28 + $0x3ac8] sm:$0xff] }
  0xfb   : > { %1118 = vst [vmem:[%s15645_s29 + $0xeb0] sm:$0xff] %v1117_v22  ;;  %v1121_v24 = vld [vmem:[%s15637_s28 + $0x3b00] sm:$0xff]  ;;  %v1123_v25 = vld [vmem:[%s15637_s28 + $0x3b08] sm:$0xff]  ;;  %1120 = vst [vmem:[%s15645_s29 + $0xeb8] sm:$0xff] %v1119_v23 }
  0xfc   : > { %1122 = vst [vmem:[%s15645_s29 + $0xec0] sm:$0xff] %v1121_v24  ;;  %1124 = vst [vmem:[%s15645_s29 + $0xec8] sm:$0xff] %v1123_v25  ;;  %v1125_v26 = vld [vmem:[%s15637_s28 + $0x3b40] sm:$0xff]  ;;  %v1127_v27 = vld [vmem:[%s15637_s28 + $0x3b48] sm:$0xff] }
  0xfd   : > { %v1129_v28 = vld [vmem:[%s15637_s28 + $0x3b80] sm:$0xff]  ;;  %1126 = vst [vmem:[%s15645_s29 + $0xed0] sm:$0xff] %v1125_v26  ;;  %1128 = vst [vmem:[%s15645_s29 + $0xed8] sm:$0xff] %v1127_v27  ;;  %v1131_v29 = vld [vmem:[%s15637_s28 + $0x3b88] sm:$0xff] }
  0xfe   : > { %1130 = vst [vmem:[%s15645_s29 + $0xee0] sm:$0xff] %v1129_v28  ;;  %v1133_v30 = vld [vmem:[%s15637_s28 + $0x3bc0] sm:$0xff]  ;;  %v1135_v31 = vld [vmem:[%s15637_s28 + $0x3bc8] sm:$0xff]  ;;  %1132 = vst [vmem:[%s15645_s29 + $0xee8] sm:$0xff] %v1131_v29 }
  0xff   : > { %1134 = vst [vmem:[%s15645_s29 + $0xef0] sm:$0xff] %v1133_v30  ;;  %1136 = vst [vmem:[%s15645_s29 + $0xef8] sm:$0xff] %v1135_v31  ;;  %v1137_v32 = vld [vmem:[%s15637_s28 + $0x3c00] sm:$0xff]  ;;  %v1139_v33 = vld [vmem:[%s15637_s28 + $0x3c08] sm:$0xff] }
 0x100   : > { %v1141_v34 = vld [vmem:[%s15637_s28 + $0x3c40] sm:$0xff]  ;;  %1138 = vst [vmem:[%s15645_s29 + $0xf00] sm:$0xff] %v1137_v32  ;;  %1140 = vst [vmem:[%s15645_s29 + $0xf08] sm:$0xff] %v1139_v33  ;;  %v1143_v35 = vld [vmem:[%s15637_s28 + $0x3c48] sm:$0xff] }
 0x101   : > { %1142 = vst [vmem:[%s15645_s29 + $0xf10] sm:$0xff] %v1141_v34  ;;  %v1145_v36 = vld [vmem:[%s15637_s28 + $0x3c80] sm:$0xff]  ;;  %v1147_v37 = vld [vmem:[%s15637_s28 + $0x3c88] sm:$0xff]  ;;  %1144 = vst [vmem:[%s15645_s29 + $0xf18] sm:$0xff] %v1143_v35 }
 0x102   : > { %1146 = vst [vmem:[%s15645_s29 + $0xf20] sm:$0xff] %v1145_v36  ;;  %1148 = vst [vmem:[%s15645_s29 + $0xf28] sm:$0xff] %v1147_v37  ;;  %v1149_v38 = vld [vmem:[%s15637_s28 + $0x3cc0] sm:$0xff]  ;;  %v1151_v39 = vld [vmem:[%s15637_s28 + $0x3cc8] sm:$0xff] }
 0x103   : > { %v1153_v40 = vld [vmem:[%s15637_s28 + $0x3d00] sm:$0xff]  ;;  %1150 = vst [vmem:[%s15645_s29 + $0xf30] sm:$0xff] %v1149_v38  ;;  %1152 = vst [vmem:[%s15645_s29 + $0xf38] sm:$0xff] %v1151_v39  ;;  %v1155_v41 = vld [vmem:[%s15637_s28 + $0x3d08] sm:$0xff] }
 0x104   : > { %1154 = vst [vmem:[%s15645_s29 + $0xf40] sm:$0xff] %v1153_v40  ;;  %v1157_v42 = vld [vmem:[%s15637_s28 + $0x3d40] sm:$0xff]  ;;  %v1159_v43 = vld [vmem:[%s15637_s28 + $0x3d48] sm:$0xff]  ;;  %1156 = vst [vmem:[%s15645_s29 + $0xf48] sm:$0xff] %v1155_v41 }
 0x105   : > { %1158 = vst [vmem:[%s15645_s29 + $0xf50] sm:$0xff] %v1157_v42  ;;  %1160 = vst [vmem:[%s15645_s29 + $0xf58] sm:$0xff] %v1159_v43  ;;  %v1161_v44 = vld [vmem:[%s15637_s28 + $0x3d80] sm:$0xff]  ;;  %v1163_v45 = vld [vmem:[%s15637_s28 + $0x3d88] sm:$0xff] }
 0x106   : > { %v1165_v46 = vld [vmem:[%s15637_s28 + $0x3dc0] sm:$0xff]  ;;  %1162 = vst [vmem:[%s15645_s29 + $0xf60] sm:$0xff] %v1161_v44  ;;  %1164 = vst [vmem:[%s15645_s29 + $0xf68] sm:$0xff] %v1163_v45  ;;  %v1167_v47 = vld [vmem:[%s15637_s28 + $0x3dc8] sm:$0xff] }
 0x107   : > { %1166 = vst [vmem:[%s15645_s29 + $0xf70] sm:$0xff] %v1165_v46  ;;  %v1169_v48 = vld [vmem:[%s15637_s28 + $0x3e00] sm:$0xff]  ;;  %v1171_v49 = vld [vmem:[%s15637_s28 + $0x3e08] sm:$0xff]  ;;  %1168 = vst [vmem:[%s15645_s29 + $0xf78] sm:$0xff] %v1167_v47 }
 0x108   : > { %1170 = vst [vmem:[%s15645_s29 + $0xf80] sm:$0xff] %v1169_v48  ;;  %1172 = vst [vmem:[%s15645_s29 + $0xf88] sm:$0xff] %v1171_v49  ;;  %v1173_v50 = vld [vmem:[%s15637_s28 + $0x3e40] sm:$0xff]  ;;  %v1175_v51 = vld [vmem:[%s15637_s28 + $0x3e48] sm:$0xff] }
 0x109   : > { %v1177_v52 = vld [vmem:[%s15637_s28 + $0x3e80] sm:$0xff]  ;;  %1174 = vst [vmem:[%s15645_s29 + $0xf90] sm:$0xff] %v1173_v50  ;;  %1176 = vst [vmem:[%s15645_s29 + $0xf98] sm:$0xff] %v1175_v51  ;;  %v1179_v53 = vld [vmem:[%s15637_s28 + $0x3e88] sm:$0xff] }
 0x10a   : > { %1178 = vst [vmem:[%s15645_s29 + $0xfa0] sm:$0xff] %v1177_v52  ;;  %v1181_v54 = vld [vmem:[%s15637_s28 + $0x3ec0] sm:$0xff]  ;;  %v1183_v55 = vld [vmem:[%s15637_s28 + $0x3ec8] sm:$0xff]  ;;  %1180 = vst [vmem:[%s15645_s29 + $0xfa8] sm:$0xff] %v1179_v53 }
 0x10b   : > { %1182 = vst [vmem:[%s15645_s29 + $0xfb0] sm:$0xff] %v1181_v54  ;;  %1184 = vst [vmem:[%s15645_s29 + $0xfb8] sm:$0xff] %v1183_v55  ;;  %v1185_v56 = vld [vmem:[%s15637_s28 + $0x3f00] sm:$0xff]  ;;  %v1187_v57 = vld [vmem:[%s15637_s28 + $0x3f08] sm:$0xff] }
 0x10c   : > { %v1189_v58 = vld [vmem:[%s15637_s28 + $0x3f40] sm:$0xff]  ;;  %1186 = vst [vmem:[%s15645_s29 + $0xfc0] sm:$0xff] %v1185_v56  ;;  %1188 = vst [vmem:[%s15645_s29 + $0xfc8] sm:$0xff] %v1187_v57  ;;  %v1191_v59 = vld [vmem:[%s15637_s28 + $0x3f48] sm:$0xff] }
 0x10d   : > { %1190 = vst [vmem:[%s15645_s29 + $0xfd0] sm:$0xff] %v1189_v58  ;;  %v1193_v60 = vld [vmem:[%s15637_s28 + $0x3f80] sm:$0xff]  ;;  %v1195_v61 = vld [vmem:[%s15637_s28 + $0x3f88] sm:$0xff]  ;;  %1192 = vst [vmem:[%s15645_s29 + $0xfd8] sm:$0xff] %v1191_v59 }
 0x10e   : > { %1194 = vst [vmem:[%s15645_s29 + $0xfe0] sm:$0xff] %v1193_v60  ;;  %1196 = vst [vmem:[%s15645_s29 + $0xfe8] sm:$0xff] %v1195_v61  ;;  %v1197_v62 = vld [vmem:[%s15637_s28 + $0x3fc0] sm:$0xff]  ;;  %v1199_v63 = vld [vmem:[%s15637_s28 + $0x3fc8] sm:$0xff] }
 0x10f   : > { %v1201_v0 = vld [vmem:[%s15637_s28 + $0x4000] sm:$0xff]  ;;  %1198 = vst [vmem:[%s15645_s29 + $0xff0] sm:$0xff] %v1197_v62  ;;  %1200 = vst [vmem:[%s15645_s29 + $0xff8] sm:$0xff] %v1199_v63  ;;  %v1203_v1 = vld [vmem:[%s15637_s28 + $0x4008] sm:$0xff] }
 0x110   : > { %1202 = vst [vmem:[%s15645_s29 + $0x1000] sm:$0xff] %v1201_v0  ;;  %v1205_v2 = vld [vmem:[%s15637_s28 + $0x4040] sm:$0xff]  ;;  %v1207_v3 = vld [vmem:[%s15637_s28 + $0x4048] sm:$0xff]  ;;  %1204 = vst [vmem:[%s15645_s29 + $0x1008] sm:$0xff] %v1203_v1 }
 0x111   : > { %1206 = vst [vmem:[%s15645_s29 + $0x1010] sm:$0xff] %v1205_v2  ;;  %1208 = vst [vmem:[%s15645_s29 + $0x1018] sm:$0xff] %v1207_v3  ;;  %v1209_v4 = vld [vmem:[%s15637_s28 + $0x4080] sm:$0xff]  ;;  %v1211_v5 = vld [vmem:[%s15637_s28 + $0x4088] sm:$0xff] }
 0x112   : > { %v1213_v6 = vld [vmem:[%s15637_s28 + $0x40c0] sm:$0xff]  ;;  %1210 = vst [vmem:[%s15645_s29 + $0x1020] sm:$0xff] %v1209_v4  ;;  %1212 = vst [vmem:[%s15645_s29 + $0x1028] sm:$0xff] %v1211_v5  ;;  %v1215_v7 = vld [vmem:[%s15637_s28 + $0x40c8] sm:$0xff] }
 0x113   : > { %1214 = vst [vmem:[%s15645_s29 + $0x1030] sm:$0xff] %v1213_v6  ;;  %v1217_v8 = vld [vmem:[%s15637_s28 + $0x4100] sm:$0xff]  ;;  %v1219_v9 = vld [vmem:[%s15637_s28 + $0x4108] sm:$0xff]  ;;  %1216 = vst [vmem:[%s15645_s29 + $0x1038] sm:$0xff] %v1215_v7 }
 0x114   : > { %1218 = vst [vmem:[%s15645_s29 + $0x1040] sm:$0xff] %v1217_v8  ;;  %1220 = vst [vmem:[%s15645_s29 + $0x1048] sm:$0xff] %v1219_v9  ;;  %v1221_v10 = vld [vmem:[%s15637_s28 + $0x4140] sm:$0xff]  ;;  %v1223_v11 = vld [vmem:[%s15637_s28 + $0x4148] sm:$0xff] }
 0x115   : > { %v1225_v12 = vld [vmem:[%s15637_s28 + $0x4180] sm:$0xff]  ;;  %1222 = vst [vmem:[%s15645_s29 + $0x1050] sm:$0xff] %v1221_v10  ;;  %1224 = vst [vmem:[%s15645_s29 + $0x1058] sm:$0xff] %v1223_v11  ;;  %v1227_v13 = vld [vmem:[%s15637_s28 + $0x4188] sm:$0xff] }
 0x116   : > { %1226 = vst [vmem:[%s15645_s29 + $0x1060] sm:$0xff] %v1225_v12  ;;  %v1229_v14 = vld [vmem:[%s15637_s28 + $0x41c0] sm:$0xff]  ;;  %v1231_v15 = vld [vmem:[%s15637_s28 + $0x41c8] sm:$0xff]  ;;  %1228 = vst [vmem:[%s15645_s29 + $0x1068] sm:$0xff] %v1227_v13 }
 0x117   : > { %1230 = vst [vmem:[%s15645_s29 + $0x1070] sm:$0xff] %v1229_v14  ;;  %1232 = vst [vmem:[%s15645_s29 + $0x1078] sm:$0xff] %v1231_v15  ;;  %v1233_v16 = vld [vmem:[%s15637_s28 + $0x4200] sm:$0xff]  ;;  %v1235_v17 = vld [vmem:[%s15637_s28 + $0x4208] sm:$0xff] }
 0x118   : > { %v1237_v18 = vld [vmem:[%s15637_s28 + $0x4240] sm:$0xff]  ;;  %1234 = vst [vmem:[%s15645_s29 + $0x1080] sm:$0xff] %v1233_v16  ;;  %1236 = vst [vmem:[%s15645_s29 + $0x1088] sm:$0xff] %v1235_v17  ;;  %v1239_v19 = vld [vmem:[%s15637_s28 + $0x4248] sm:$0xff] }
 0x119   : > { %1238 = vst [vmem:[%s15645_s29 + $0x1090] sm:$0xff] %v1237_v18  ;;  %v1241_v20 = vld [vmem:[%s15637_s28 + $0x4280] sm:$0xff]  ;;  %v1243_v21 = vld [vmem:[%s15637_s28 + $0x4288] sm:$0xff]  ;;  %1240 = vst [vmem:[%s15645_s29 + $0x1098] sm:$0xff] %v1239_v19 }
 0x11a   : > { %1242 = vst [vmem:[%s15645_s29 + $0x10a0] sm:$0xff] %v1241_v20  ;;  %1244 = vst [vmem:[%s15645_s29 + $0x10a8] sm:$0xff] %v1243_v21  ;;  %v1245_v22 = vld [vmem:[%s15637_s28 + $0x42c0] sm:$0xff]  ;;  %v1247_v23 = vld [vmem:[%s15637_s28 + $0x42c8] sm:$0xff] }
 0x11b   : > { %v1249_v24 = vld [vmem:[%s15637_s28 + $0x4300] sm:$0xff]  ;;  %1246 = vst [vmem:[%s15645_s29 + $0x10b0] sm:$0xff] %v1245_v22  ;;  %1248 = vst [vmem:[%s15645_s29 + $0x10b8] sm:$0xff] %v1247_v23  ;;  %v1251_v25 = vld [vmem:[%s15637_s28 + $0x4308] sm:$0xff] }
 0x11c   : > { %1250 = vst [vmem:[%s15645_s29 + $0x10c0] sm:$0xff] %v1249_v24  ;;  %v1253_v26 = vld [vmem:[%s15637_s28 + $0x4340] sm:$0xff]  ;;  %v1255_v27 = vld [vmem:[%s15637_s28 + $0x4348] sm:$0xff]  ;;  %1252 = vst [vmem:[%s15645_s29 + $0x10c8] sm:$0xff] %v1251_v25 }
 0x11d   : > { %1254 = vst [vmem:[%s15645_s29 + $0x10d0] sm:$0xff] %v1253_v26  ;;  %1256 = vst [vmem:[%s15645_s29 + $0x10d8] sm:$0xff] %v1255_v27  ;;  %v1257_v28 = vld [vmem:[%s15637_s28 + $0x4380] sm:$0xff]  ;;  %v1259_v29 = vld [vmem:[%s15637_s28 + $0x4388] sm:$0xff] }
 0x11e   : > { %v1261_v30 = vld [vmem:[%s15637_s28 + $0x43c0] sm:$0xff]  ;;  %1258 = vst [vmem:[%s15645_s29 + $0x10e0] sm:$0xff] %v1257_v28  ;;  %1260 = vst [vmem:[%s15645_s29 + $0x10e8] sm:$0xff] %v1259_v29  ;;  %v1263_v31 = vld [vmem:[%s15637_s28 + $0x43c8] sm:$0xff] }
 0x11f   : > { %1262 = vst [vmem:[%s15645_s29 + $0x10f0] sm:$0xff] %v1261_v30  ;;  %v1265_v32 = vld [vmem:[%s15637_s28 + $0x4400] sm:$0xff]  ;;  %v1267_v33 = vld [vmem:[%s15637_s28 + $0x4408] sm:$0xff]  ;;  %1264 = vst [vmem:[%s15645_s29 + $0x10f8] sm:$0xff] %v1263_v31 }
 0x120   : > { %1266 = vst [vmem:[%s15645_s29 + $0x1100] sm:$0xff] %v1265_v32  ;;  %1268 = vst [vmem:[%s15645_s29 + $0x1108] sm:$0xff] %v1267_v33  ;;  %v1269_v34 = vld [vmem:[%s15637_s28 + $0x4440] sm:$0xff]  ;;  %v1271_v35 = vld [vmem:[%s15637_s28 + $0x4448] sm:$0xff] }
 0x121   : > { %v1273_v36 = vld [vmem:[%s15637_s28 + $0x4480] sm:$0xff]  ;;  %1270 = vst [vmem:[%s15645_s29 + $0x1110] sm:$0xff] %v1269_v34  ;;  %1272 = vst [vmem:[%s15645_s29 + $0x1118] sm:$0xff] %v1271_v35  ;;  %v1275_v37 = vld [vmem:[%s15637_s28 + $0x4488] sm:$0xff] }
 0x122   : > { %1274 = vst [vmem:[%s15645_s29 + $0x1120] sm:$0xff] %v1273_v36  ;;  %v1277_v38 = vld [vmem:[%s15637_s28 + $0x44c0] sm:$0xff]  ;;  %v1279_v39 = vld [vmem:[%s15637_s28 + $0x44c8] sm:$0xff]  ;;  %1276 = vst [vmem:[%s15645_s29 + $0x1128] sm:$0xff] %v1275_v37 }
 0x123   : > { %1278 = vst [vmem:[%s15645_s29 + $0x1130] sm:$0xff] %v1277_v38  ;;  %1280 = vst [vmem:[%s15645_s29 + $0x1138] sm:$0xff] %v1279_v39  ;;  %v1281_v40 = vld [vmem:[%s15637_s28 + $0x4500] sm:$0xff]  ;;  %v1283_v41 = vld [vmem:[%s15637_s28 + $0x4508] sm:$0xff] }
 0x124   : > { %v1285_v42 = vld [vmem:[%s15637_s28 + $0x4540] sm:$0xff]  ;;  %1282 = vst [vmem:[%s15645_s29 + $0x1140] sm:$0xff] %v1281_v40  ;;  %1284 = vst [vmem:[%s15645_s29 + $0x1148] sm:$0xff] %v1283_v41  ;;  %v1287_v43 = vld [vmem:[%s15637_s28 + $0x4548] sm:$0xff] }
 0x125   : > { %1286 = vst [vmem:[%s15645_s29 + $0x1150] sm:$0xff] %v1285_v42  ;;  %v1289_v44 = vld [vmem:[%s15637_s28 + $0x4580] sm:$0xff]  ;;  %v1291_v45 = vld [vmem:[%s15637_s28 + $0x4588] sm:$0xff]  ;;  %1288 = vst [vmem:[%s15645_s29 + $0x1158] sm:$0xff] %v1287_v43 }
 0x126   : > { %1290 = vst [vmem:[%s15645_s29 + $0x1160] sm:$0xff] %v1289_v44  ;;  %1292 = vst [vmem:[%s15645_s29 + $0x1168] sm:$0xff] %v1291_v45  ;;  %v1293_v46 = vld [vmem:[%s15637_s28 + $0x45c0] sm:$0xff]  ;;  %v1295_v47 = vld [vmem:[%s15637_s28 + $0x45c8] sm:$0xff] }
 0x127   : > { %v1297_v48 = vld [vmem:[%s15637_s28 + $0x4600] sm:$0xff]  ;;  %1294 = vst [vmem:[%s15645_s29 + $0x1170] sm:$0xff] %v1293_v46  ;;  %1296 = vst [vmem:[%s15645_s29 + $0x1178] sm:$0xff] %v1295_v47  ;;  %v1299_v49 = vld [vmem:[%s15637_s28 + $0x4608] sm:$0xff] }
 0x128   : > { %1298 = vst [vmem:[%s15645_s29 + $0x1180] sm:$0xff] %v1297_v48  ;;  %v1301_v50 = vld [vmem:[%s15637_s28 + $0x4640] sm:$0xff]  ;;  %v1303_v51 = vld [vmem:[%s15637_s28 + $0x4648] sm:$0xff]  ;;  %1300 = vst [vmem:[%s15645_s29 + $0x1188] sm:$0xff] %v1299_v49 }
 0x129   : > { %1302 = vst [vmem:[%s15645_s29 + $0x1190] sm:$0xff] %v1301_v50  ;;  %1304 = vst [vmem:[%s15645_s29 + $0x1198] sm:$0xff] %v1303_v51  ;;  %v1305_v52 = vld [vmem:[%s15637_s28 + $0x4680] sm:$0xff]  ;;  %v1307_v53 = vld [vmem:[%s15637_s28 + $0x4688] sm:$0xff] }
 0x12a   : > { %v1309_v54 = vld [vmem:[%s15637_s28 + $0x46c0] sm:$0xff]  ;;  %1306 = vst [vmem:[%s15645_s29 + $0x11a0] sm:$0xff] %v1305_v52  ;;  %1308 = vst [vmem:[%s15645_s29 + $0x11a8] sm:$0xff] %v1307_v53  ;;  %v1311_v55 = vld [vmem:[%s15637_s28 + $0x46c8] sm:$0xff] }
 0x12b   : > { %1310 = vst [vmem:[%s15645_s29 + $0x11b0] sm:$0xff] %v1309_v54  ;;  %v1313_v56 = vld [vmem:[%s15637_s28 + $0x4700] sm:$0xff]  ;;  %v1315_v57 = vld [vmem:[%s15637_s28 + $0x4708] sm:$0xff]  ;;  %1312 = vst [vmem:[%s15645_s29 + $0x11b8] sm:$0xff] %v1311_v55 }
 0x12c   : > { %1314 = vst [vmem:[%s15645_s29 + $0x11c0] sm:$0xff] %v1313_v56  ;;  %1316 = vst [vmem:[%s15645_s29 + $0x11c8] sm:$0xff] %v1315_v57  ;;  %v1317_v58 = vld [vmem:[%s15637_s28 + $0x4740] sm:$0xff]  ;;  %v1319_v59 = vld [vmem:[%s15637_s28 + $0x4748] sm:$0xff] }
 0x12d   : > { %v1321_v60 = vld [vmem:[%s15637_s28 + $0x4780] sm:$0xff]  ;;  %1318 = vst [vmem:[%s15645_s29 + $0x11d0] sm:$0xff] %v1317_v58  ;;  %1320 = vst [vmem:[%s15645_s29 + $0x11d8] sm:$0xff] %v1319_v59  ;;  %v1323_v61 = vld [vmem:[%s15637_s28 + $0x4788] sm:$0xff] }
 0x12e   : > { %1322 = vst [vmem:[%s15645_s29 + $0x11e0] sm:$0xff] %v1321_v60  ;;  %v1325_v62 = vld [vmem:[%s15637_s28 + $0x47c0] sm:$0xff]  ;;  %v1327_v63 = vld [vmem:[%s15637_s28 + $0x47c8] sm:$0xff]  ;;  %1324 = vst [vmem:[%s15645_s29 + $0x11e8] sm:$0xff] %v1323_v61 }
 0x12f   : > { %1326 = vst [vmem:[%s15645_s29 + $0x11f0] sm:$0xff] %v1325_v62  ;;  %1328 = vst [vmem:[%s15645_s29 + $0x11f8] sm:$0xff] %v1327_v63  ;;  %v1329_v0 = vld [vmem:[%s15637_s28 + $0x4800] sm:$0xff]  ;;  %v1331_v1 = vld [vmem:[%s15637_s28 + $0x4808] sm:$0xff] }
 0x130   : > { %v1333_v2 = vld [vmem:[%s15637_s28 + $0x4840] sm:$0xff]  ;;  %1330 = vst [vmem:[%s15645_s29 + $0x1200] sm:$0xff] %v1329_v0  ;;  %1332 = vst [vmem:[%s15645_s29 + $0x1208] sm:$0xff] %v1331_v1  ;;  %v1335_v3 = vld [vmem:[%s15637_s28 + $0x4848] sm:$0xff] }
 0x131   : > { %1334 = vst [vmem:[%s15645_s29 + $0x1210] sm:$0xff] %v1333_v2  ;;  %v1337_v4 = vld [vmem:[%s15637_s28 + $0x4880] sm:$0xff]  ;;  %v1339_v5 = vld [vmem:[%s15637_s28 + $0x4888] sm:$0xff]  ;;  %1336 = vst [vmem:[%s15645_s29 + $0x1218] sm:$0xff] %v1335_v3 }
 0x132   : > { %1338 = vst [vmem:[%s15645_s29 + $0x1220] sm:$0xff] %v1337_v4  ;;  %1340 = vst [vmem:[%s15645_s29 + $0x1228] sm:$0xff] %v1339_v5  ;;  %v1341_v6 = vld [vmem:[%s15637_s28 + $0x48c0] sm:$0xff]  ;;  %v1343_v7 = vld [vmem:[%s15637_s28 + $0x48c8] sm:$0xff] }
 0x133   : > { %v1345_v8 = vld [vmem:[%s15637_s28 + $0x4900] sm:$0xff]  ;;  %1342 = vst [vmem:[%s15645_s29 + $0x1230] sm:$0xff] %v1341_v6  ;;  %1344 = vst [vmem:[%s15645_s29 + $0x1238] sm:$0xff] %v1343_v7  ;;  %v1347_v9 = vld [vmem:[%s15637_s28 + $0x4908] sm:$0xff] }
 0x134   : > { %1346 = vst [vmem:[%s15645_s29 + $0x1240] sm:$0xff] %v1345_v8  ;;  %v1349_v10 = vld [vmem:[%s15637_s28 + $0x4940] sm:$0xff]  ;;  %v1351_v11 = vld [vmem:[%s15637_s28 + $0x4948] sm:$0xff]  ;;  %1348 = vst [vmem:[%s15645_s29 + $0x1248] sm:$0xff] %v1347_v9 }
 0x135   : > { %1350 = vst [vmem:[%s15645_s29 + $0x1250] sm:$0xff] %v1349_v10  ;;  %1352 = vst [vmem:[%s15645_s29 + $0x1258] sm:$0xff] %v1351_v11  ;;  %v1353_v12 = vld [vmem:[%s15637_s28 + $0x4980] sm:$0xff]  ;;  %v1355_v13 = vld [vmem:[%s15637_s28 + $0x4988] sm:$0xff] }
 0x136   : > { %v1357_v14 = vld [vmem:[%s15637_s28 + $0x49c0] sm:$0xff]  ;;  %1354 = vst [vmem:[%s15645_s29 + $0x1260] sm:$0xff] %v1353_v12  ;;  %1356 = vst [vmem:[%s15645_s29 + $0x1268] sm:$0xff] %v1355_v13  ;;  %v1359_v15 = vld [vmem:[%s15637_s28 + $0x49c8] sm:$0xff] }
 0x137   : > { %1358 = vst [vmem:[%s15645_s29 + $0x1270] sm:$0xff] %v1357_v14  ;;  %v1361_v16 = vld [vmem:[%s15637_s28 + $0x4a00] sm:$0xff]  ;;  %v1363_v17 = vld [vmem:[%s15637_s28 + $0x4a08] sm:$0xff]  ;;  %1360 = vst [vmem:[%s15645_s29 + $0x1278] sm:$0xff] %v1359_v15 }
 0x138   : > { %1362 = vst [vmem:[%s15645_s29 + $0x1280] sm:$0xff] %v1361_v16  ;;  %1364 = vst [vmem:[%s15645_s29 + $0x1288] sm:$0xff] %v1363_v17  ;;  %v1365_v18 = vld [vmem:[%s15637_s28 + $0x4a40] sm:$0xff]  ;;  %v1367_v19 = vld [vmem:[%s15637_s28 + $0x4a48] sm:$0xff] }
 0x139   : > { %v1369_v20 = vld [vmem:[%s15637_s28 + $0x4a80] sm:$0xff]  ;;  %1366 = vst [vmem:[%s15645_s29 + $0x1290] sm:$0xff] %v1365_v18  ;;  %1368 = vst [vmem:[%s15645_s29 + $0x1298] sm:$0xff] %v1367_v19  ;;  %v1371_v21 = vld [vmem:[%s15637_s28 + $0x4a88] sm:$0xff] }
 0x13a   : > { %1370 = vst [vmem:[%s15645_s29 + $0x12a0] sm:$0xff] %v1369_v20  ;;  %v1373_v22 = vld [vmem:[%s15637_s28 + $0x4ac0] sm:$0xff]  ;;  %v1375_v23 = vld [vmem:[%s15637_s28 + $0x4ac8] sm:$0xff]  ;;  %1372 = vst [vmem:[%s15645_s29 + $0x12a8] sm:$0xff] %v1371_v21 }
 0x13b   : > { %1374 = vst [vmem:[%s15645_s29 + $0x12b0] sm:$0xff] %v1373_v22  ;;  %1376 = vst [vmem:[%s15645_s29 + $0x12b8] sm:$0xff] %v1375_v23  ;;  %v1377_v24 = vld [vmem:[%s15637_s28 + $0x4b00] sm:$0xff]  ;;  %v1379_v25 = vld [vmem:[%s15637_s28 + $0x4b08] sm:$0xff] }
 0x13c   : > { %v1381_v26 = vld [vmem:[%s15637_s28 + $0x4b40] sm:$0xff]  ;;  %1378 = vst [vmem:[%s15645_s29 + $0x12c0] sm:$0xff] %v1377_v24  ;;  %1380 = vst [vmem:[%s15645_s29 + $0x12c8] sm:$0xff] %v1379_v25  ;;  %v1383_v27 = vld [vmem:[%s15637_s28 + $0x4b48] sm:$0xff] }
 0x13d   : > { %1382 = vst [vmem:[%s15645_s29 + $0x12d0] sm:$0xff] %v1381_v26  ;;  %v1385_v28 = vld [vmem:[%s15637_s28 + $0x4b80] sm:$0xff]  ;;  %v1387_v29 = vld [vmem:[%s15637_s28 + $0x4b88] sm:$0xff]  ;;  %1384 = vst [vmem:[%s15645_s29 + $0x12d8] sm:$0xff] %v1383_v27 }
 0x13e   : > { %1386 = vst [vmem:[%s15645_s29 + $0x12e0] sm:$0xff] %v1385_v28  ;;  %1388 = vst [vmem:[%s15645_s29 + $0x12e8] sm:$0xff] %v1387_v29  ;;  %v1389_v30 = vld [vmem:[%s15637_s28 + $0x4bc0] sm:$0xff]  ;;  %v1391_v31 = vld [vmem:[%s15637_s28 + $0x4bc8] sm:$0xff] }
 0x13f   : > { %v1393_v32 = vld [vmem:[%s15637_s28 + $0x4c00] sm:$0xff]  ;;  %1390 = vst [vmem:[%s15645_s29 + $0x12f0] sm:$0xff] %v1389_v30  ;;  %1392 = vst [vmem:[%s15645_s29 + $0x12f8] sm:$0xff] %v1391_v31  ;;  %v1395_v33 = vld [vmem:[%s15637_s28 + $0x4c08] sm:$0xff] }
 0x140   : > { %1394 = vst [vmem:[%s15645_s29 + $0x1300] sm:$0xff] %v1393_v32  ;;  %v1397_v34 = vld [vmem:[%s15637_s28 + $0x4c40] sm:$0xff]  ;;  %v1399_v35 = vld [vmem:[%s15637_s28 + $0x4c48] sm:$0xff]  ;;  %1396 = vst [vmem:[%s15645_s29 + $0x1308] sm:$0xff] %v1395_v33 }
 0x141   : > { %1398 = vst [vmem:[%s15645_s29 + $0x1310] sm:$0xff] %v1397_v34  ;;  %1400 = vst [vmem:[%s15645_s29 + $0x1318] sm:$0xff] %v1399_v35  ;;  %v1401_v36 = vld [vmem:[%s15637_s28 + $0x4c80] sm:$0xff]  ;;  %v1403_v37 = vld [vmem:[%s15637_s28 + $0x4c88] sm:$0xff] }
 0x142   : > { %v1405_v38 = vld [vmem:[%s15637_s28 + $0x4cc0] sm:$0xff]  ;;  %1402 = vst [vmem:[%s15645_s29 + $0x1320] sm:$0xff] %v1401_v36  ;;  %1404 = vst [vmem:[%s15645_s29 + $0x1328] sm:$0xff] %v1403_v37  ;;  %v1407_v39 = vld [vmem:[%s15637_s28 + $0x4cc8] sm:$0xff] }
 0x143   : > { %1406 = vst [vmem:[%s15645_s29 + $0x1330] sm:$0xff] %v1405_v38  ;;  %v1409_v40 = vld [vmem:[%s15637_s28 + $0x4d00] sm:$0xff]  ;;  %v1411_v41 = vld [vmem:[%s15637_s28 + $0x4d08] sm:$0xff]  ;;  %1408 = vst [vmem:[%s15645_s29 + $0x1338] sm:$0xff] %v1407_v39 }
 0x144   : > { %1410 = vst [vmem:[%s15645_s29 + $0x1340] sm:$0xff] %v1409_v40  ;;  %1412 = vst [vmem:[%s15645_s29 + $0x1348] sm:$0xff] %v1411_v41  ;;  %v1413_v42 = vld [vmem:[%s15637_s28 + $0x4d40] sm:$0xff]  ;;  %v1415_v43 = vld [vmem:[%s15637_s28 + $0x4d48] sm:$0xff] }
 0x145   : > { %v1417_v44 = vld [vmem:[%s15637_s28 + $0x4d80] sm:$0xff]  ;;  %1414 = vst [vmem:[%s15645_s29 + $0x1350] sm:$0xff] %v1413_v42  ;;  %1416 = vst [vmem:[%s15645_s29 + $0x1358] sm:$0xff] %v1415_v43  ;;  %v1419_v45 = vld [vmem:[%s15637_s28 + $0x4d88] sm:$0xff] }
 0x146   : > { %1418 = vst [vmem:[%s15645_s29 + $0x1360] sm:$0xff] %v1417_v44  ;;  %v1421_v46 = vld [vmem:[%s15637_s28 + $0x4dc0] sm:$0xff]  ;;  %v1423_v47 = vld [vmem:[%s15637_s28 + $0x4dc8] sm:$0xff]  ;;  %1420 = vst [vmem:[%s15645_s29 + $0x1368] sm:$0xff] %v1419_v45 }
 0x147   : > { %1422 = vst [vmem:[%s15645_s29 + $0x1370] sm:$0xff] %v1421_v46  ;;  %1424 = vst [vmem:[%s15645_s29 + $0x1378] sm:$0xff] %v1423_v47  ;;  %v1425_v48 = vld [vmem:[%s15637_s28 + $0x4e00] sm:$0xff]  ;;  %v1427_v49 = vld [vmem:[%s15637_s28 + $0x4e08] sm:$0xff] }
 0x148   : > { %v1429_v50 = vld [vmem:[%s15637_s28 + $0x4e40] sm:$0xff]  ;;  %1426 = vst [vmem:[%s15645_s29 + $0x1380] sm:$0xff] %v1425_v48  ;;  %1428 = vst [vmem:[%s15645_s29 + $0x1388] sm:$0xff] %v1427_v49  ;;  %v1431_v51 = vld [vmem:[%s15637_s28 + $0x4e48] sm:$0xff] }
 0x149   : > { %1430 = vst [vmem:[%s15645_s29 + $0x1390] sm:$0xff] %v1429_v50  ;;  %v1433_v52 = vld [vmem:[%s15637_s28 + $0x4e80] sm:$0xff]  ;;  %v1435_v53 = vld [vmem:[%s15637_s28 + $0x4e88] sm:$0xff]  ;;  %1432 = vst [vmem:[%s15645_s29 + $0x1398] sm:$0xff] %v1431_v51 }
 0x14a   : > { %1434 = vst [vmem:[%s15645_s29 + $0x13a0] sm:$0xff] %v1433_v52  ;;  %1436 = vst [vmem:[%s15645_s29 + $0x13a8] sm:$0xff] %v1435_v53  ;;  %v1437_v54 = vld [vmem:[%s15637_s28 + $0x4ec0] sm:$0xff]  ;;  %v1439_v55 = vld [vmem:[%s15637_s28 + $0x4ec8] sm:$0xff] }
 0x14b   : > { %v1441_v56 = vld [vmem:[%s15637_s28 + $0x4f00] sm:$0xff]  ;;  %1438 = vst [vmem:[%s15645_s29 + $0x13b0] sm:$0xff] %v1437_v54  ;;  %1440 = vst [vmem:[%s15645_s29 + $0x13b8] sm:$0xff] %v1439_v55  ;;  %v1443_v57 = vld [vmem:[%s15637_s28 + $0x4f08] sm:$0xff] }
 0x14c   : > { %1442 = vst [vmem:[%s15645_s29 + $0x13c0] sm:$0xff] %v1441_v56  ;;  %v1445_v58 = vld [vmem:[%s15637_s28 + $0x4f40] sm:$0xff]  ;;  %v1447_v59 = vld [vmem:[%s15637_s28 + $0x4f48] sm:$0xff]  ;;  %1444 = vst [vmem:[%s15645_s29 + $0x13c8] sm:$0xff] %v1443_v57 }
 0x14d   : > { %1446 = vst [vmem:[%s15645_s29 + $0x13d0] sm:$0xff] %v1445_v58  ;;  %1448 = vst [vmem:[%s15645_s29 + $0x13d8] sm:$0xff] %v1447_v59  ;;  %v1449_v60 = vld [vmem:[%s15637_s28 + $0x4f80] sm:$0xff]  ;;  %v1451_v61 = vld [vmem:[%s15637_s28 + $0x4f88] sm:$0xff] }
 0x14e   : > { %v1453_v62 = vld [vmem:[%s15637_s28 + $0x4fc0] sm:$0xff]  ;;  %1450 = vst [vmem:[%s15645_s29 + $0x13e0] sm:$0xff] %v1449_v60  ;;  %1452 = vst [vmem:[%s15645_s29 + $0x13e8] sm:$0xff] %v1451_v61  ;;  %v1455_v63 = vld [vmem:[%s15637_s28 + $0x4fc8] sm:$0xff] }
 0x14f   : > { %1454 = vst [vmem:[%s15645_s29 + $0x13f0] sm:$0xff] %v1453_v62  ;;  %v1457_v0 = vld [vmem:[%s15637_s28 + $0x5000] sm:$0xff]  ;;  %v1459_v1 = vld [vmem:[%s15637_s28 + $0x5008] sm:$0xff]  ;;  %1456 = vst [vmem:[%s15645_s29 + $0x13f8] sm:$0xff] %v1455_v63 }
 0x150   : > { %1458 = vst [vmem:[%s15645_s29 + $0x1400] sm:$0xff] %v1457_v0  ;;  %1460 = vst [vmem:[%s15645_s29 + $0x1408] sm:$0xff] %v1459_v1  ;;  %v1461_v2 = vld [vmem:[%s15637_s28 + $0x5040] sm:$0xff]  ;;  %v1463_v3 = vld [vmem:[%s15637_s28 + $0x5048] sm:$0xff] }
 0x151   : > { %v1465_v4 = vld [vmem:[%s15637_s28 + $0x5080] sm:$0xff]  ;;  %1462 = vst [vmem:[%s15645_s29 + $0x1410] sm:$0xff] %v1461_v2  ;;  %1464 = vst [vmem:[%s15645_s29 + $0x1418] sm:$0xff] %v1463_v3  ;;  %v1467_v5 = vld [vmem:[%s15637_s28 + $0x5088] sm:$0xff] }
 0x152   : > { %1466 = vst [vmem:[%s15645_s29 + $0x1420] sm:$0xff] %v1465_v4  ;;  %v1469_v6 = vld [vmem:[%s15637_s28 + $0x50c0] sm:$0xff]  ;;  %v1471_v7 = vld [vmem:[%s15637_s28 + $0x50c8] sm:$0xff]  ;;  %1468 = vst [vmem:[%s15645_s29 + $0x1428] sm:$0xff] %v1467_v5 }
 0x153   : > { %1470 = vst [vmem:[%s15645_s29 + $0x1430] sm:$0xff] %v1469_v6  ;;  %1472 = vst [vmem:[%s15645_s29 + $0x1438] sm:$0xff] %v1471_v7  ;;  %v1473_v8 = vld [vmem:[%s15637_s28 + $0x5100] sm:$0xff]  ;;  %v1475_v9 = vld [vmem:[%s15637_s28 + $0x5108] sm:$0xff] }
 0x154   : > { %v1477_v10 = vld [vmem:[%s15637_s28 + $0x5140] sm:$0xff]  ;;  %1474 = vst [vmem:[%s15645_s29 + $0x1440] sm:$0xff] %v1473_v8  ;;  %1476 = vst [vmem:[%s15645_s29 + $0x1448] sm:$0xff] %v1475_v9  ;;  %v1479_v11 = vld [vmem:[%s15637_s28 + $0x5148] sm:$0xff] }
 0x155   : > { %1478 = vst [vmem:[%s15645_s29 + $0x1450] sm:$0xff] %v1477_v10  ;;  %v1481_v12 = vld [vmem:[%s15637_s28 + $0x5180] sm:$0xff]  ;;  %v1483_v13 = vld [vmem:[%s15637_s28 + $0x5188] sm:$0xff]  ;;  %1480 = vst [vmem:[%s15645_s29 + $0x1458] sm:$0xff] %v1479_v11 }
 0x156   : > { %1482 = vst [vmem:[%s15645_s29 + $0x1460] sm:$0xff] %v1481_v12  ;;  %1484 = vst [vmem:[%s15645_s29 + $0x1468] sm:$0xff] %v1483_v13  ;;  %v1485_v14 = vld [vmem:[%s15637_s28 + $0x51c0] sm:$0xff]  ;;  %v1487_v15 = vld [vmem:[%s15637_s28 + $0x51c8] sm:$0xff] }
 0x157   : > { %v1489_v16 = vld [vmem:[%s15637_s28 + $0x5200] sm:$0xff]  ;;  %1486 = vst [vmem:[%s15645_s29 + $0x1470] sm:$0xff] %v1485_v14  ;;  %1488 = vst [vmem:[%s15645_s29 + $0x1478] sm:$0xff] %v1487_v15  ;;  %v1491_v17 = vld [vmem:[%s15637_s28 + $0x5208] sm:$0xff] }
 0x158   : > { %1490 = vst [vmem:[%s15645_s29 + $0x1480] sm:$0xff] %v1489_v16  ;;  %v1493_v18 = vld [vmem:[%s15637_s28 + $0x5240] sm:$0xff]  ;;  %v1495_v19 = vld [vmem:[%s15637_s28 + $0x5248] sm:$0xff]  ;;  %1492 = vst [vmem:[%s15645_s29 + $0x1488] sm:$0xff] %v1491_v17 }
 0x159   : > { %1494 = vst [vmem:[%s15645_s29 + $0x1490] sm:$0xff] %v1493_v18  ;;  %1496 = vst [vmem:[%s15645_s29 + $0x1498] sm:$0xff] %v1495_v19  ;;  %v1497_v20 = vld [vmem:[%s15637_s28 + $0x5280] sm:$0xff]  ;;  %v1499_v21 = vld [vmem:[%s15637_s28 + $0x5288] sm:$0xff] }
 0x15a   : > { %v1501_v22 = vld [vmem:[%s15637_s28 + $0x52c0] sm:$0xff]  ;;  %1498 = vst [vmem:[%s15645_s29 + $0x14a0] sm:$0xff] %v1497_v20  ;;  %1500 = vst [vmem:[%s15645_s29 + $0x14a8] sm:$0xff] %v1499_v21  ;;  %v1503_v23 = vld [vmem:[%s15637_s28 + $0x52c8] sm:$0xff] }
 0x15b   : > { %1502 = vst [vmem:[%s15645_s29 + $0x14b0] sm:$0xff] %v1501_v22  ;;  %v1505_v24 = vld [vmem:[%s15637_s28 + $0x5300] sm:$0xff]  ;;  %v1507_v25 = vld [vmem:[%s15637_s28 + $0x5308] sm:$0xff]  ;;  %1504 = vst [vmem:[%s15645_s29 + $0x14b8] sm:$0xff] %v1503_v23 }
 0x15c   : > { %1506 = vst [vmem:[%s15645_s29 + $0x14c0] sm:$0xff] %v1505_v24  ;;  %1508 = vst [vmem:[%s15645_s29 + $0x14c8] sm:$0xff] %v1507_v25  ;;  %v1509_v26 = vld [vmem:[%s15637_s28 + $0x5340] sm:$0xff]  ;;  %v1511_v27 = vld [vmem:[%s15637_s28 + $0x5348] sm:$0xff] }
 0x15d   : > { %v1513_v28 = vld [vmem:[%s15637_s28 + $0x5380] sm:$0xff]  ;;  %1510 = vst [vmem:[%s15645_s29 + $0x14d0] sm:$0xff] %v1509_v26  ;;  %1512 = vst [vmem:[%s15645_s29 + $0x14d8] sm:$0xff] %v1511_v27  ;;  %v1515_v29 = vld [vmem:[%s15637_s28 + $0x5388] sm:$0xff] }
 0x15e   : > { %1514 = vst [vmem:[%s15645_s29 + $0x14e0] sm:$0xff] %v1513_v28  ;;  %v1517_v30 = vld [vmem:[%s15637_s28 + $0x53c0] sm:$0xff]  ;;  %v1519_v31 = vld [vmem:[%s15637_s28 + $0x53c8] sm:$0xff]  ;;  %1516 = vst [vmem:[%s15645_s29 + $0x14e8] sm:$0xff] %v1515_v29 }
 0x15f   : > { %1518 = vst [vmem:[%s15645_s29 + $0x14f0] sm:$0xff] %v1517_v30  ;;  %1520 = vst [vmem:[%s15645_s29 + $0x14f8] sm:$0xff] %v1519_v31  ;;  %v1521_v32 = vld [vmem:[%s15637_s28 + $0x5400] sm:$0xff]  ;;  %v1523_v33 = vld [vmem:[%s15637_s28 + $0x5408] sm:$0xff] }
 0x160   : > { %v1525_v34 = vld [vmem:[%s15637_s28 + $0x5440] sm:$0xff]  ;;  %1522 = vst [vmem:[%s15645_s29 + $0x1500] sm:$0xff] %v1521_v32  ;;  %1524 = vst [vmem:[%s15645_s29 + $0x1508] sm:$0xff] %v1523_v33  ;;  %v1527_v35 = vld [vmem:[%s15637_s28 + $0x5448] sm:$0xff] }
 0x161   : > { %1526 = vst [vmem:[%s15645_s29 + $0x1510] sm:$0xff] %v1525_v34  ;;  %v1529_v36 = vld [vmem:[%s15637_s28 + $0x5480] sm:$0xff]  ;;  %v1531_v37 = vld [vmem:[%s15637_s28 + $0x5488] sm:$0xff]  ;;  %1528 = vst [vmem:[%s15645_s29 + $0x1518] sm:$0xff] %v1527_v35 }
 0x162   : > { %1530 = vst [vmem:[%s15645_s29 + $0x1520] sm:$0xff] %v1529_v36  ;;  %1532 = vst [vmem:[%s15645_s29 + $0x1528] sm:$0xff] %v1531_v37  ;;  %v1533_v38 = vld [vmem:[%s15637_s28 + $0x54c0] sm:$0xff]  ;;  %v1535_v39 = vld [vmem:[%s15637_s28 + $0x54c8] sm:$0xff] }
 0x163   : > { %v1537_v40 = vld [vmem:[%s15637_s28 + $0x5500] sm:$0xff]  ;;  %1534 = vst [vmem:[%s15645_s29 + $0x1530] sm:$0xff] %v1533_v38  ;;  %1536 = vst [vmem:[%s15645_s29 + $0x1538] sm:$0xff] %v1535_v39  ;;  %v1539_v41 = vld [vmem:[%s15637_s28 + $0x5508] sm:$0xff] }
 0x164   : > { %1538 = vst [vmem:[%s15645_s29 + $0x1540] sm:$0xff] %v1537_v40  ;;  %v1541_v42 = vld [vmem:[%s15637_s28 + $0x5540] sm:$0xff]  ;;  %v1543_v43 = vld [vmem:[%s15637_s28 + $0x5548] sm:$0xff]  ;;  %1540 = vst [vmem:[%s15645_s29 + $0x1548] sm:$0xff] %v1539_v41 }
 0x165   : > { %1542 = vst [vmem:[%s15645_s29 + $0x1550] sm:$0xff] %v1541_v42  ;;  %1544 = vst [vmem:[%s15645_s29 + $0x1558] sm:$0xff] %v1543_v43  ;;  %v1545_v44 = vld [vmem:[%s15637_s28 + $0x5580] sm:$0xff]  ;;  %v1547_v45 = vld [vmem:[%s15637_s28 + $0x5588] sm:$0xff] }
 0x166   : > { %v1549_v46 = vld [vmem:[%s15637_s28 + $0x55c0] sm:$0xff]  ;;  %1546 = vst [vmem:[%s15645_s29 + $0x1560] sm:$0xff] %v1545_v44  ;;  %1548 = vst [vmem:[%s15645_s29 + $0x1568] sm:$0xff] %v1547_v45  ;;  %v1551_v47 = vld [vmem:[%s15637_s28 + $0x55c8] sm:$0xff] }
 0x167   : > { %1550 = vst [vmem:[%s15645_s29 + $0x1570] sm:$0xff] %v1549_v46  ;;  %v1553_v48 = vld [vmem:[%s15637_s28 + $0x5600] sm:$0xff]  ;;  %v1555_v49 = vld [vmem:[%s15637_s28 + $0x5608] sm:$0xff]  ;;  %1552 = vst [vmem:[%s15645_s29 + $0x1578] sm:$0xff] %v1551_v47 }
 0x168   : > { %1554 = vst [vmem:[%s15645_s29 + $0x1580] sm:$0xff] %v1553_v48  ;;  %1556 = vst [vmem:[%s15645_s29 + $0x1588] sm:$0xff] %v1555_v49  ;;  %v1557_v50 = vld [vmem:[%s15637_s28 + $0x5640] sm:$0xff]  ;;  %v1559_v51 = vld [vmem:[%s15637_s28 + $0x5648] sm:$0xff] }
 0x169   : > { %v1561_v52 = vld [vmem:[%s15637_s28 + $0x5680] sm:$0xff]  ;;  %1558 = vst [vmem:[%s15645_s29 + $0x1590] sm:$0xff] %v1557_v50  ;;  %1560 = vst [vmem:[%s15645_s29 + $0x1598] sm:$0xff] %v1559_v51  ;;  %v1563_v53 = vld [vmem:[%s15637_s28 + $0x5688] sm:$0xff] }
 0x16a   : > { %1562 = vst [vmem:[%s15645_s29 + $0x15a0] sm:$0xff] %v1561_v52  ;;  %v1565_v54 = vld [vmem:[%s15637_s28 + $0x56c0] sm:$0xff]  ;;  %v1567_v55 = vld [vmem:[%s15637_s28 + $0x56c8] sm:$0xff]  ;;  %1564 = vst [vmem:[%s15645_s29 + $0x15a8] sm:$0xff] %v1563_v53 }
 0x16b   : > { %1566 = vst [vmem:[%s15645_s29 + $0x15b0] sm:$0xff] %v1565_v54  ;;  %1568 = vst [vmem:[%s15645_s29 + $0x15b8] sm:$0xff] %v1567_v55  ;;  %v1569_v56 = vld [vmem:[%s15637_s28 + $0x5700] sm:$0xff]  ;;  %v1571_v57 = vld [vmem:[%s15637_s28 + $0x5708] sm:$0xff] }
 0x16c   : > { %v1573_v58 = vld [vmem:[%s15637_s28 + $0x5740] sm:$0xff]  ;;  %1570 = vst [vmem:[%s15645_s29 + $0x15c0] sm:$0xff] %v1569_v56  ;;  %1572 = vst [vmem:[%s15645_s29 + $0x15c8] sm:$0xff] %v1571_v57  ;;  %v1575_v59 = vld [vmem:[%s15637_s28 + $0x5748] sm:$0xff] }
 0x16d   : > { %1574 = vst [vmem:[%s15645_s29 + $0x15d0] sm:$0xff] %v1573_v58  ;;  %v1577_v60 = vld [vmem:[%s15637_s28 + $0x5780] sm:$0xff]  ;;  %v1579_v61 = vld [vmem:[%s15637_s28 + $0x5788] sm:$0xff]  ;;  %1576 = vst [vmem:[%s15645_s29 + $0x15d8] sm:$0xff] %v1575_v59 }
 0x16e   : > { %1578 = vst [vmem:[%s15645_s29 + $0x15e0] sm:$0xff] %v1577_v60  ;;  %1580 = vst [vmem:[%s15645_s29 + $0x15e8] sm:$0xff] %v1579_v61  ;;  %v1581_v62 = vld [vmem:[%s15637_s28 + $0x57c0] sm:$0xff]  ;;  %v1583_v63 = vld [vmem:[%s15637_s28 + $0x57c8] sm:$0xff] }
 0x16f   : > { %v1585_v0 = vld [vmem:[%s15637_s28 + $0x5800] sm:$0xff]  ;;  %1582 = vst [vmem:[%s15645_s29 + $0x15f0] sm:$0xff] %v1581_v62  ;;  %1584 = vst [vmem:[%s15645_s29 + $0x15f8] sm:$0xff] %v1583_v63  ;;  %v1587_v1 = vld [vmem:[%s15637_s28 + $0x5808] sm:$0xff] }
 0x170   : > { %1586 = vst [vmem:[%s15645_s29 + $0x1600] sm:$0xff] %v1585_v0  ;;  %v1589_v2 = vld [vmem:[%s15637_s28 + $0x5840] sm:$0xff]  ;;  %v1591_v3 = vld [vmem:[%s15637_s28 + $0x5848] sm:$0xff]  ;;  %1588 = vst [vmem:[%s15645_s29 + $0x1608] sm:$0xff] %v1587_v1 }
 0x171   : > { %1590 = vst [vmem:[%s15645_s29 + $0x1610] sm:$0xff] %v1589_v2  ;;  %1592 = vst [vmem:[%s15645_s29 + $0x1618] sm:$0xff] %v1591_v3  ;;  %v1593_v4 = vld [vmem:[%s15637_s28 + $0x5880] sm:$0xff]  ;;  %v1595_v5 = vld [vmem:[%s15637_s28 + $0x5888] sm:$0xff] }
 0x172   : > { %v1597_v6 = vld [vmem:[%s15637_s28 + $0x58c0] sm:$0xff]  ;;  %1594 = vst [vmem:[%s15645_s29 + $0x1620] sm:$0xff] %v1593_v4  ;;  %1596 = vst [vmem:[%s15645_s29 + $0x1628] sm:$0xff] %v1595_v5  ;;  %v1599_v7 = vld [vmem:[%s15637_s28 + $0x58c8] sm:$0xff] }
 0x173   : > { %1598 = vst [vmem:[%s15645_s29 + $0x1630] sm:$0xff] %v1597_v6  ;;  %v1601_v8 = vld [vmem:[%s15637_s28 + $0x5900] sm:$0xff]  ;;  %v1603_v9 = vld [vmem:[%s15637_s28 + $0x5908] sm:$0xff]  ;;  %1600 = vst [vmem:[%s15645_s29 + $0x1638] sm:$0xff] %v1599_v7 }
 0x174   : > { %1602 = vst [vmem:[%s15645_s29 + $0x1640] sm:$0xff] %v1601_v8  ;;  %1604 = vst [vmem:[%s15645_s29 + $0x1648] sm:$0xff] %v1603_v9  ;;  %v1605_v10 = vld [vmem:[%s15637_s28 + $0x5940] sm:$0xff]  ;;  %v1607_v11 = vld [vmem:[%s15637_s28 + $0x5948] sm:$0xff] }
 0x175   : > { %v1609_v12 = vld [vmem:[%s15637_s28 + $0x5980] sm:$0xff]  ;;  %1606 = vst [vmem:[%s15645_s29 + $0x1650] sm:$0xff] %v1605_v10  ;;  %1608 = vst [vmem:[%s15645_s29 + $0x1658] sm:$0xff] %v1607_v11  ;;  %v1611_v13 = vld [vmem:[%s15637_s28 + $0x5988] sm:$0xff] }
 0x176   : > { %1610 = vst [vmem:[%s15645_s29 + $0x1660] sm:$0xff] %v1609_v12  ;;  %v1613_v14 = vld [vmem:[%s15637_s28 + $0x59c0] sm:$0xff]  ;;  %v1615_v15 = vld [vmem:[%s15637_s28 + $0x59c8] sm:$0xff]  ;;  %1612 = vst [vmem:[%s15645_s29 + $0x1668] sm:$0xff] %v1611_v13 }
 0x177   : > { %1614 = vst [vmem:[%s15645_s29 + $0x1670] sm:$0xff] %v1613_v14  ;;  %1616 = vst [vmem:[%s15645_s29 + $0x1678] sm:$0xff] %v1615_v15  ;;  %v1617_v16 = vld [vmem:[%s15637_s28 + $0x5a00] sm:$0xff]  ;;  %v1619_v17 = vld [vmem:[%s15637_s28 + $0x5a08] sm:$0xff] }
 0x178   : > { %v1621_v18 = vld [vmem:[%s15637_s28 + $0x5a40] sm:$0xff]  ;;  %1618 = vst [vmem:[%s15645_s29 + $0x1680] sm:$0xff] %v1617_v16  ;;  %1620 = vst [vmem:[%s15645_s29 + $0x1688] sm:$0xff] %v1619_v17  ;;  %v1623_v19 = vld [vmem:[%s15637_s28 + $0x5a48] sm:$0xff] }
 0x179   : > { %1622 = vst [vmem:[%s15645_s29 + $0x1690] sm:$0xff] %v1621_v18  ;;  %v1625_v20 = vld [vmem:[%s15637_s28 + $0x5a80] sm:$0xff]  ;;  %v1627_v21 = vld [vmem:[%s15637_s28 + $0x5a88] sm:$0xff]  ;;  %1624 = vst [vmem:[%s15645_s29 + $0x1698] sm:$0xff] %v1623_v19 }
 0x17a   : > { %1626 = vst [vmem:[%s15645_s29 + $0x16a0] sm:$0xff] %v1625_v20  ;;  %1628 = vst [vmem:[%s15645_s29 + $0x16a8] sm:$0xff] %v1627_v21  ;;  %v1629_v22 = vld [vmem:[%s15637_s28 + $0x5ac0] sm:$0xff]  ;;  %v1631_v23 = vld [vmem:[%s15637_s28 + $0x5ac8] sm:$0xff] }
 0x17b   : > { %v1633_v24 = vld [vmem:[%s15637_s28 + $0x5b00] sm:$0xff]  ;;  %1630 = vst [vmem:[%s15645_s29 + $0x16b0] sm:$0xff] %v1629_v22  ;;  %1632 = vst [vmem:[%s15645_s29 + $0x16b8] sm:$0xff] %v1631_v23  ;;  %v1635_v25 = vld [vmem:[%s15637_s28 + $0x5b08] sm:$0xff] }
 0x17c   : > { %1634 = vst [vmem:[%s15645_s29 + $0x16c0] sm:$0xff] %v1633_v24  ;;  %v1637_v26 = vld [vmem:[%s15637_s28 + $0x5b40] sm:$0xff]  ;;  %v1639_v27 = vld [vmem:[%s15637_s28 + $0x5b48] sm:$0xff]  ;;  %1636 = vst [vmem:[%s15645_s29 + $0x16c8] sm:$0xff] %v1635_v25 }
 0x17d   : > { %1638 = vst [vmem:[%s15645_s29 + $0x16d0] sm:$0xff] %v1637_v26  ;;  %1640 = vst [vmem:[%s15645_s29 + $0x16d8] sm:$0xff] %v1639_v27  ;;  %v1641_v28 = vld [vmem:[%s15637_s28 + $0x5b80] sm:$0xff]  ;;  %v1643_v29 = vld [vmem:[%s15637_s28 + $0x5b88] sm:$0xff] }
 0x17e   : > { %v1645_v30 = vld [vmem:[%s15637_s28 + $0x5bc0] sm:$0xff]  ;;  %1642 = vst [vmem:[%s15645_s29 + $0x16e0] sm:$0xff] %v1641_v28  ;;  %1644 = vst [vmem:[%s15645_s29 + $0x16e8] sm:$0xff] %v1643_v29  ;;  %v1647_v31 = vld [vmem:[%s15637_s28 + $0x5bc8] sm:$0xff] }
 0x17f   : > { %1646 = vst [vmem:[%s15645_s29 + $0x16f0] sm:$0xff] %v1645_v30  ;;  %v1649_v32 = vld [vmem:[%s15637_s28 + $0x5c00] sm:$0xff]  ;;  %v1651_v33 = vld [vmem:[%s15637_s28 + $0x5c08] sm:$0xff]  ;;  %1648 = vst [vmem:[%s15645_s29 + $0x16f8] sm:$0xff] %v1647_v31 }
 0x180   : > { %1650 = vst [vmem:[%s15645_s29 + $0x1700] sm:$0xff] %v1649_v32  ;;  %1652 = vst [vmem:[%s15645_s29 + $0x1708] sm:$0xff] %v1651_v33  ;;  %v1653_v34 = vld [vmem:[%s15637_s28 + $0x5c40] sm:$0xff]  ;;  %v1655_v35 = vld [vmem:[%s15637_s28 + $0x5c48] sm:$0xff] }
 0x181   : > { %v1657_v36 = vld [vmem:[%s15637_s28 + $0x5c80] sm:$0xff]  ;;  %1654 = vst [vmem:[%s15645_s29 + $0x1710] sm:$0xff] %v1653_v34  ;;  %1656 = vst [vmem:[%s15645_s29 + $0x1718] sm:$0xff] %v1655_v35  ;;  %v1659_v37 = vld [vmem:[%s15637_s28 + $0x5c88] sm:$0xff] }
 0x182   : > { %1658 = vst [vmem:[%s15645_s29 + $0x1720] sm:$0xff] %v1657_v36  ;;  %v1661_v38 = vld [vmem:[%s15637_s28 + $0x5cc0] sm:$0xff]  ;;  %v1663_v39 = vld [vmem:[%s15637_s28 + $0x5cc8] sm:$0xff]  ;;  %1660 = vst [vmem:[%s15645_s29 + $0x1728] sm:$0xff] %v1659_v37 }
 0x183   : > { %1662 = vst [vmem:[%s15645_s29 + $0x1730] sm:$0xff] %v1661_v38  ;;  %1664 = vst [vmem:[%s15645_s29 + $0x1738] sm:$0xff] %v1663_v39  ;;  %v1665_v40 = vld [vmem:[%s15637_s28 + $0x5d00] sm:$0xff]  ;;  %v1667_v41 = vld [vmem:[%s15637_s28 + $0x5d08] sm:$0xff] }
 0x184   : > { %v1669_v42 = vld [vmem:[%s15637_s28 + $0x5d40] sm:$0xff]  ;;  %1666 = vst [vmem:[%s15645_s29 + $0x1740] sm:$0xff] %v1665_v40  ;;  %1668 = vst [vmem:[%s15645_s29 + $0x1748] sm:$0xff] %v1667_v41  ;;  %v1671_v43 = vld [vmem:[%s15637_s28 + $0x5d48] sm:$0xff] }
 0x185   : > { %1670 = vst [vmem:[%s15645_s29 + $0x1750] sm:$0xff] %v1669_v42  ;;  %v1673_v44 = vld [vmem:[%s15637_s28 + $0x5d80] sm:$0xff]  ;;  %v1675_v45 = vld [vmem:[%s15637_s28 + $0x5d88] sm:$0xff]  ;;  %1672 = vst [vmem:[%s15645_s29 + $0x1758] sm:$0xff] %v1671_v43 }
 0x186   : > { %1674 = vst [vmem:[%s15645_s29 + $0x1760] sm:$0xff] %v1673_v44  ;;  %1676 = vst [vmem:[%s15645_s29 + $0x1768] sm:$0xff] %v1675_v45  ;;  %v1677_v46 = vld [vmem:[%s15637_s28 + $0x5dc0] sm:$0xff]  ;;  %v1679_v47 = vld [vmem:[%s15637_s28 + $0x5dc8] sm:$0xff] }
 0x187   : > { %v1681_v48 = vld [vmem:[%s15637_s28 + $0x5e00] sm:$0xff]  ;;  %1678 = vst [vmem:[%s15645_s29 + $0x1770] sm:$0xff] %v1677_v46  ;;  %1680 = vst [vmem:[%s15645_s29 + $0x1778] sm:$0xff] %v1679_v47  ;;  %v1683_v49 = vld [vmem:[%s15637_s28 + $0x5e08] sm:$0xff] }
 0x188   : > { %1682 = vst [vmem:[%s15645_s29 + $0x1780] sm:$0xff] %v1681_v48  ;;  %v1685_v50 = vld [vmem:[%s15637_s28 + $0x5e40] sm:$0xff]  ;;  %v1687_v51 = vld [vmem:[%s15637_s28 + $0x5e48] sm:$0xff]  ;;  %1684 = vst [vmem:[%s15645_s29 + $0x1788] sm:$0xff] %v1683_v49 }
 0x189   : > { %1686 = vst [vmem:[%s15645_s29 + $0x1790] sm:$0xff] %v1685_v50  ;;  %1688 = vst [vmem:[%s15645_s29 + $0x1798] sm:$0xff] %v1687_v51  ;;  %v1689_v52 = vld [vmem:[%s15637_s28 + $0x5e80] sm:$0xff]  ;;  %v1691_v53 = vld [vmem:[%s15637_s28 + $0x5e88] sm:$0xff] }
 0x18a   : > { %v1693_v54 = vld [vmem:[%s15637_s28 + $0x5ec0] sm:$0xff]  ;;  %1690 = vst [vmem:[%s15645_s29 + $0x17a0] sm:$0xff] %v1689_v52  ;;  %1692 = vst [vmem:[%s15645_s29 + $0x17a8] sm:$0xff] %v1691_v53  ;;  %v1695_v55 = vld [vmem:[%s15637_s28 + $0x5ec8] sm:$0xff] }
 0x18b   : > { %1694 = vst [vmem:[%s15645_s29 + $0x17b0] sm:$0xff] %v1693_v54  ;;  %v1697_v56 = vld [vmem:[%s15637_s28 + $0x5f00] sm:$0xff]  ;;  %v1699_v57 = vld [vmem:[%s15637_s28 + $0x5f08] sm:$0xff]  ;;  %1696 = vst [vmem:[%s15645_s29 + $0x17b8] sm:$0xff] %v1695_v55 }
 0x18c   : > { %1698 = vst [vmem:[%s15645_s29 + $0x17c0] sm:$0xff] %v1697_v56  ;;  %1700 = vst [vmem:[%s15645_s29 + $0x17c8] sm:$0xff] %v1699_v57  ;;  %v1701_v58 = vld [vmem:[%s15637_s28 + $0x5f40] sm:$0xff]  ;;  %v1703_v59 = vld [vmem:[%s15637_s28 + $0x5f48] sm:$0xff] }
 0x18d   : > { %v1705_v60 = vld [vmem:[%s15637_s28 + $0x5f80] sm:$0xff]  ;;  %1702 = vst [vmem:[%s15645_s29 + $0x17d0] sm:$0xff] %v1701_v58  ;;  %1704 = vst [vmem:[%s15645_s29 + $0x17d8] sm:$0xff] %v1703_v59  ;;  %v1707_v61 = vld [vmem:[%s15637_s28 + $0x5f88] sm:$0xff] }
 0x18e   : > { %1706 = vst [vmem:[%s15645_s29 + $0x17e0] sm:$0xff] %v1705_v60  ;;  %v1709_v62 = vld [vmem:[%s15637_s28 + $0x5fc0] sm:$0xff]  ;;  %v1711_v63 = vld [vmem:[%s15637_s28 + $0x5fc8] sm:$0xff]  ;;  %1708 = vst [vmem:[%s15645_s29 + $0x17e8] sm:$0xff] %v1707_v61 }
 0x18f   : > { %1710 = vst [vmem:[%s15645_s29 + $0x17f0] sm:$0xff] %v1709_v62  ;;  %1712 = vst [vmem:[%s15645_s29 + $0x17f8] sm:$0xff] %v1711_v63  ;;  %v1713_v0 = vld [vmem:[%s15637_s28 + $0x6000] sm:$0xff]  ;;  %v1715_v1 = vld [vmem:[%s15637_s28 + $0x6008] sm:$0xff] }
 0x190   : > { %v1717_v2 = vld [vmem:[%s15637_s28 + $0x6040] sm:$0xff]  ;;  %1714 = vst [vmem:[%s15645_s29 + $0x1800] sm:$0xff] %v1713_v0  ;;  %1716 = vst [vmem:[%s15645_s29 + $0x1808] sm:$0xff] %v1715_v1  ;;  %v1719_v3 = vld [vmem:[%s15637_s28 + $0x6048] sm:$0xff] }
 0x191   : > { %1718 = vst [vmem:[%s15645_s29 + $0x1810] sm:$0xff] %v1717_v2  ;;  %v1721_v4 = vld [vmem:[%s15637_s28 + $0x6080] sm:$0xff]  ;;  %v1723_v5 = vld [vmem:[%s15637_s28 + $0x6088] sm:$0xff]  ;;  %1720 = vst [vmem:[%s15645_s29 + $0x1818] sm:$0xff] %v1719_v3 }
 0x192   : > { %1722 = vst [vmem:[%s15645_s29 + $0x1820] sm:$0xff] %v1721_v4  ;;  %1724 = vst [vmem:[%s15645_s29 + $0x1828] sm:$0xff] %v1723_v5  ;;  %v1725_v6 = vld [vmem:[%s15637_s28 + $0x60c0] sm:$0xff]  ;;  %v1727_v7 = vld [vmem:[%s15637_s28 + $0x60c8] sm:$0xff] }
 0x193   : > { %v1729_v8 = vld [vmem:[%s15637_s28 + $0x6100] sm:$0xff]  ;;  %1726 = vst [vmem:[%s15645_s29 + $0x1830] sm:$0xff] %v1725_v6  ;;  %1728 = vst [vmem:[%s15645_s29 + $0x1838] sm:$0xff] %v1727_v7  ;;  %v1731_v9 = vld [vmem:[%s15637_s28 + $0x6108] sm:$0xff] }
 0x194   : > { %1730 = vst [vmem:[%s15645_s29 + $0x1840] sm:$0xff] %v1729_v8  ;;  %v1733_v10 = vld [vmem:[%s15637_s28 + $0x6140] sm:$0xff]  ;;  %v1735_v11 = vld [vmem:[%s15637_s28 + $0x6148] sm:$0xff]  ;;  %1732 = vst [vmem:[%s15645_s29 + $0x1848] sm:$0xff] %v1731_v9 }
 0x195   : > { %1734 = vst [vmem:[%s15645_s29 + $0x1850] sm:$0xff] %v1733_v10  ;;  %1736 = vst [vmem:[%s15645_s29 + $0x1858] sm:$0xff] %v1735_v11  ;;  %v1737_v12 = vld [vmem:[%s15637_s28 + $0x6180] sm:$0xff]  ;;  %v1739_v13 = vld [vmem:[%s15637_s28 + $0x6188] sm:$0xff] }
 0x196   : > { %v1741_v14 = vld [vmem:[%s15637_s28 + $0x61c0] sm:$0xff]  ;;  %1738 = vst [vmem:[%s15645_s29 + $0x1860] sm:$0xff] %v1737_v12  ;;  %1740 = vst [vmem:[%s15645_s29 + $0x1868] sm:$0xff] %v1739_v13  ;;  %v1743_v15 = vld [vmem:[%s15637_s28 + $0x61c8] sm:$0xff] }
 0x197   : > { %1742 = vst [vmem:[%s15645_s29 + $0x1870] sm:$0xff] %v1741_v14  ;;  %v1745_v16 = vld [vmem:[%s15637_s28 + $0x6200] sm:$0xff]  ;;  %v1747_v17 = vld [vmem:[%s15637_s28 + $0x6208] sm:$0xff]  ;;  %1744 = vst [vmem:[%s15645_s29 + $0x1878] sm:$0xff] %v1743_v15 }
 0x198   : > { %1746 = vst [vmem:[%s15645_s29 + $0x1880] sm:$0xff] %v1745_v16  ;;  %1748 = vst [vmem:[%s15645_s29 + $0x1888] sm:$0xff] %v1747_v17  ;;  %v1749_v18 = vld [vmem:[%s15637_s28 + $0x6240] sm:$0xff]  ;;  %v1751_v19 = vld [vmem:[%s15637_s28 + $0x6248] sm:$0xff] }
 0x199   : > { %v1753_v20 = vld [vmem:[%s15637_s28 + $0x6280] sm:$0xff]  ;;  %1750 = vst [vmem:[%s15645_s29 + $0x1890] sm:$0xff] %v1749_v18  ;;  %1752 = vst [vmem:[%s15645_s29 + $0x1898] sm:$0xff] %v1751_v19  ;;  %v1755_v21 = vld [vmem:[%s15637_s28 + $0x6288] sm:$0xff] }
 0x19a   : > { %1754 = vst [vmem:[%s15645_s29 + $0x18a0] sm:$0xff] %v1753_v20  ;;  %v1757_v22 = vld [vmem:[%s15637_s28 + $0x62c0] sm:$0xff]  ;;  %v1759_v23 = vld [vmem:[%s15637_s28 + $0x62c8] sm:$0xff]  ;;  %1756 = vst [vmem:[%s15645_s29 + $0x18a8] sm:$0xff] %v1755_v21 }
 0x19b   : > { %1758 = vst [vmem:[%s15645_s29 + $0x18b0] sm:$0xff] %v1757_v22  ;;  %1760 = vst [vmem:[%s15645_s29 + $0x18b8] sm:$0xff] %v1759_v23  ;;  %v1761_v24 = vld [vmem:[%s15637_s28 + $0x6300] sm:$0xff]  ;;  %v1763_v25 = vld [vmem:[%s15637_s28 + $0x6308] sm:$0xff] }
 0x19c   : > { %v1765_v26 = vld [vmem:[%s15637_s28 + $0x6340] sm:$0xff]  ;;  %1762 = vst [vmem:[%s15645_s29 + $0x18c0] sm:$0xff] %v1761_v24  ;;  %1764 = vst [vmem:[%s15645_s29 + $0x18c8] sm:$0xff] %v1763_v25  ;;  %v1767_v27 = vld [vmem:[%s15637_s28 + $0x6348] sm:$0xff] }
 0x19d   : > { %1766 = vst [vmem:[%s15645_s29 + $0x18d0] sm:$0xff] %v1765_v26  ;;  %v1769_v28 = vld [vmem:[%s15637_s28 + $0x6380] sm:$0xff]  ;;  %v1771_v29 = vld [vmem:[%s15637_s28 + $0x6388] sm:$0xff]  ;;  %1768 = vst [vmem:[%s15645_s29 + $0x18d8] sm:$0xff] %v1767_v27 }
 0x19e   : > { %1770 = vst [vmem:[%s15645_s29 + $0x18e0] sm:$0xff] %v1769_v28  ;;  %1772 = vst [vmem:[%s15645_s29 + $0x18e8] sm:$0xff] %v1771_v29  ;;  %v1773_v30 = vld [vmem:[%s15637_s28 + $0x63c0] sm:$0xff]  ;;  %v1775_v31 = vld [vmem:[%s15637_s28 + $0x63c8] sm:$0xff] }
 0x19f   : > { %v1777_v32 = vld [vmem:[%s15637_s28 + $0x6400] sm:$0xff]  ;;  %1774 = vst [vmem:[%s15645_s29 + $0x18f0] sm:$0xff] %v1773_v30  ;;  %1776 = vst [vmem:[%s15645_s29 + $0x18f8] sm:$0xff] %v1775_v31  ;;  %v1779_v33 = vld [vmem:[%s15637_s28 + $0x6408] sm:$0xff] }
 0x1a0   : > { %1778 = vst [vmem:[%s15645_s29 + $0x1900] sm:$0xff] %v1777_v32  ;;  %v1781_v34 = vld [vmem:[%s15637_s28 + $0x6440] sm:$0xff]  ;;  %v1783_v35 = vld [vmem:[%s15637_s28 + $0x6448] sm:$0xff]  ;;  %1780 = vst [vmem:[%s15645_s29 + $0x1908] sm:$0xff] %v1779_v33 }
 0x1a1   : > { %1782 = vst [vmem:[%s15645_s29 + $0x1910] sm:$0xff] %v1781_v34  ;;  %1784 = vst [vmem:[%s15645_s29 + $0x1918] sm:$0xff] %v1783_v35  ;;  %v1785_v36 = vld [vmem:[%s15637_s28 + $0x6480] sm:$0xff]  ;;  %v1787_v37 = vld [vmem:[%s15637_s28 + $0x6488] sm:$0xff] }
 0x1a2   : > { %v1789_v38 = vld [vmem:[%s15637_s28 + $0x64c0] sm:$0xff]  ;;  %1786 = vst [vmem:[%s15645_s29 + $0x1920] sm:$0xff] %v1785_v36  ;;  %1788 = vst [vmem:[%s15645_s29 + $0x1928] sm:$0xff] %v1787_v37  ;;  %v1791_v39 = vld [vmem:[%s15637_s28 + $0x64c8] sm:$0xff] }
 0x1a3   : > { %1790 = vst [vmem:[%s15645_s29 + $0x1930] sm:$0xff] %v1789_v38  ;;  %v1793_v40 = vld [vmem:[%s15637_s28 + $0x6500] sm:$0xff]  ;;  %v1795_v41 = vld [vmem:[%s15637_s28 + $0x6508] sm:$0xff]  ;;  %1792 = vst [vmem:[%s15645_s29 + $0x1938] sm:$0xff] %v1791_v39 }
 0x1a4   : > { %1794 = vst [vmem:[%s15645_s29 + $0x1940] sm:$0xff] %v1793_v40  ;;  %1796 = vst [vmem:[%s15645_s29 + $0x1948] sm:$0xff] %v1795_v41  ;;  %v1797_v42 = vld [vmem:[%s15637_s28 + $0x6540] sm:$0xff]  ;;  %v1799_v43 = vld [vmem:[%s15637_s28 + $0x6548] sm:$0xff] }
 0x1a5   : > { %v1801_v44 = vld [vmem:[%s15637_s28 + $0x6580] sm:$0xff]  ;;  %1798 = vst [vmem:[%s15645_s29 + $0x1950] sm:$0xff] %v1797_v42  ;;  %1800 = vst [vmem:[%s15645_s29 + $0x1958] sm:$0xff] %v1799_v43  ;;  %v1803_v45 = vld [vmem:[%s15637_s28 + $0x6588] sm:$0xff] }
 0x1a6   : > { %1802 = vst [vmem:[%s15645_s29 + $0x1960] sm:$0xff] %v1801_v44  ;;  %v1805_v46 = vld [vmem:[%s15637_s28 + $0x65c0] sm:$0xff]  ;;  %v1807_v47 = vld [vmem:[%s15637_s28 + $0x65c8] sm:$0xff]  ;;  %1804 = vst [vmem:[%s15645_s29 + $0x1968] sm:$0xff] %v1803_v45 }
 0x1a7   : > { %1806 = vst [vmem:[%s15645_s29 + $0x1970] sm:$0xff] %v1805_v46  ;;  %1808 = vst [vmem:[%s15645_s29 + $0x1978] sm:$0xff] %v1807_v47  ;;  %v1809_v48 = vld [vmem:[%s15637_s28 + $0x6600] sm:$0xff]  ;;  %v1811_v49 = vld [vmem:[%s15637_s28 + $0x6608] sm:$0xff] }
 0x1a8   : > { %v1813_v50 = vld [vmem:[%s15637_s28 + $0x6640] sm:$0xff]  ;;  %1810 = vst [vmem:[%s15645_s29 + $0x1980] sm:$0xff] %v1809_v48  ;;  %1812 = vst [vmem:[%s15645_s29 + $0x1988] sm:$0xff] %v1811_v49  ;;  %v1815_v51 = vld [vmem:[%s15637_s28 + $0x6648] sm:$0xff] }
 0x1a9   : > { %1814 = vst [vmem:[%s15645_s29 + $0x1990] sm:$0xff] %v1813_v50  ;;  %v1817_v52 = vld [vmem:[%s15637_s28 + $0x6680] sm:$0xff]  ;;  %v1819_v53 = vld [vmem:[%s15637_s28 + $0x6688] sm:$0xff]  ;;  %1816 = vst [vmem:[%s15645_s29 + $0x1998] sm:$0xff] %v1815_v51 }
 0x1aa   : > { %1818 = vst [vmem:[%s15645_s29 + $0x19a0] sm:$0xff] %v1817_v52  ;;  %1820 = vst [vmem:[%s15645_s29 + $0x19a8] sm:$0xff] %v1819_v53  ;;  %v1821_v54 = vld [vmem:[%s15637_s28 + $0x66c0] sm:$0xff]  ;;  %v1823_v55 = vld [vmem:[%s15637_s28 + $0x66c8] sm:$0xff] }
 0x1ab   : > { %v1825_v56 = vld [vmem:[%s15637_s28 + $0x6700] sm:$0xff]  ;;  %1822 = vst [vmem:[%s15645_s29 + $0x19b0] sm:$0xff] %v1821_v54  ;;  %1824 = vst [vmem:[%s15645_s29 + $0x19b8] sm:$0xff] %v1823_v55  ;;  %v1827_v57 = vld [vmem:[%s15637_s28 + $0x6708] sm:$0xff] }
 0x1ac   : > { %1826 = vst [vmem:[%s15645_s29 + $0x19c0] sm:$0xff] %v1825_v56  ;;  %v1829_v58 = vld [vmem:[%s15637_s28 + $0x6740] sm:$0xff]  ;;  %v1831_v59 = vld [vmem:[%s15637_s28 + $0x6748] sm:$0xff]  ;;  %1828 = vst [vmem:[%s15645_s29 + $0x19c8] sm:$0xff] %v1827_v57 }
 0x1ad   : > { %1830 = vst [vmem:[%s15645_s29 + $0x19d0] sm:$0xff] %v1829_v58  ;;  %1832 = vst [vmem:[%s15645_s29 + $0x19d8] sm:$0xff] %v1831_v59  ;;  %v1833_v60 = vld [vmem:[%s15637_s28 + $0x6780] sm:$0xff]  ;;  %v1835_v61 = vld [vmem:[%s15637_s28 + $0x6788] sm:$0xff] }
 0x1ae   : > { %v1837_v62 = vld [vmem:[%s15637_s28 + $0x67c0] sm:$0xff]  ;;  %1834 = vst [vmem:[%s15645_s29 + $0x19e0] sm:$0xff] %v1833_v60  ;;  %1836 = vst [vmem:[%s15645_s29 + $0x19e8] sm:$0xff] %v1835_v61  ;;  %v1839_v63 = vld [vmem:[%s15637_s28 + $0x67c8] sm:$0xff] }
 0x1af   : > { %1838 = vst [vmem:[%s15645_s29 + $0x19f0] sm:$0xff] %v1837_v62  ;;  %v1841_v0 = vld [vmem:[%s15637_s28 + $0x6800] sm:$0xff]  ;;  %v1843_v1 = vld [vmem:[%s15637_s28 + $0x6808] sm:$0xff]  ;;  %1840 = vst [vmem:[%s15645_s29 + $0x19f8] sm:$0xff] %v1839_v63 }
 0x1b0   : > { %1842 = vst [vmem:[%s15645_s29 + $0x1a00] sm:$0xff] %v1841_v0  ;;  %1844 = vst [vmem:[%s15645_s29 + $0x1a08] sm:$0xff] %v1843_v1  ;;  %v1845_v2 = vld [vmem:[%s15637_s28 + $0x6840] sm:$0xff]  ;;  %v1847_v3 = vld [vmem:[%s15637_s28 + $0x6848] sm:$0xff] }
 0x1b1   : > { %v1849_v4 = vld [vmem:[%s15637_s28 + $0x6880] sm:$0xff]  ;;  %1846 = vst [vmem:[%s15645_s29 + $0x1a10] sm:$0xff] %v1845_v2  ;;  %1848 = vst [vmem:[%s15645_s29 + $0x1a18] sm:$0xff] %v1847_v3  ;;  %v1851_v5 = vld [vmem:[%s15637_s28 + $0x6888] sm:$0xff] }
 0x1b2   : > { %1850 = vst [vmem:[%s15645_s29 + $0x1a20] sm:$0xff] %v1849_v4  ;;  %v1853_v6 = vld [vmem:[%s15637_s28 + $0x68c0] sm:$0xff]  ;;  %v1855_v7 = vld [vmem:[%s15637_s28 + $0x68c8] sm:$0xff]  ;;  %1852 = vst [vmem:[%s15645_s29 + $0x1a28] sm:$0xff] %v1851_v5 }
 0x1b3   : > { %1854 = vst [vmem:[%s15645_s29 + $0x1a30] sm:$0xff] %v1853_v6  ;;  %1856 = vst [vmem:[%s15645_s29 + $0x1a38] sm:$0xff] %v1855_v7  ;;  %v1857_v8 = vld [vmem:[%s15637_s28 + $0x6900] sm:$0xff]  ;;  %v1859_v9 = vld [vmem:[%s15637_s28 + $0x6908] sm:$0xff] }
 0x1b4   : > { %v1861_v10 = vld [vmem:[%s15637_s28 + $0x6940] sm:$0xff]  ;;  %1858 = vst [vmem:[%s15645_s29 + $0x1a40] sm:$0xff] %v1857_v8  ;;  %1860 = vst [vmem:[%s15645_s29 + $0x1a48] sm:$0xff] %v1859_v9  ;;  %v1863_v11 = vld [vmem:[%s15637_s28 + $0x6948] sm:$0xff] }
 0x1b5   : > { %1862 = vst [vmem:[%s15645_s29 + $0x1a50] sm:$0xff] %v1861_v10  ;;  %v1865_v12 = vld [vmem:[%s15637_s28 + $0x6980] sm:$0xff]  ;;  %v1867_v13 = vld [vmem:[%s15637_s28 + $0x6988] sm:$0xff]  ;;  %1864 = vst [vmem:[%s15645_s29 + $0x1a58] sm:$0xff] %v1863_v11 }
 0x1b6   : > { %1866 = vst [vmem:[%s15645_s29 + $0x1a60] sm:$0xff] %v1865_v12  ;;  %1868 = vst [vmem:[%s15645_s29 + $0x1a68] sm:$0xff] %v1867_v13  ;;  %v1869_v14 = vld [vmem:[%s15637_s28 + $0x69c0] sm:$0xff]  ;;  %v1871_v15 = vld [vmem:[%s15637_s28 + $0x69c8] sm:$0xff] }
 0x1b7   : > { %v1873_v16 = vld [vmem:[%s15637_s28 + $0x6a00] sm:$0xff]  ;;  %1870 = vst [vmem:[%s15645_s29 + $0x1a70] sm:$0xff] %v1869_v14  ;;  %1872 = vst [vmem:[%s15645_s29 + $0x1a78] sm:$0xff] %v1871_v15  ;;  %v1875_v17 = vld [vmem:[%s15637_s28 + $0x6a08] sm:$0xff] }
 0x1b8   : > { %1874 = vst [vmem:[%s15645_s29 + $0x1a80] sm:$0xff] %v1873_v16  ;;  %v1877_v18 = vld [vmem:[%s15637_s28 + $0x6a40] sm:$0xff]  ;;  %v1879_v19 = vld [vmem:[%s15637_s28 + $0x6a48] sm:$0xff]  ;;  %1876 = vst [vmem:[%s15645_s29 + $0x1a88] sm:$0xff] %v1875_v17 }
 0x1b9   : > { %1878 = vst [vmem:[%s15645_s29 + $0x1a90] sm:$0xff] %v1877_v18  ;;  %1880 = vst [vmem:[%s15645_s29 + $0x1a98] sm:$0xff] %v1879_v19  ;;  %v1881_v20 = vld [vmem:[%s15637_s28 + $0x6a80] sm:$0xff]  ;;  %v1883_v21 = vld [vmem:[%s15637_s28 + $0x6a88] sm:$0xff] }
 0x1ba   : > { %v1885_v22 = vld [vmem:[%s15637_s28 + $0x6ac0] sm:$0xff]  ;;  %1882 = vst [vmem:[%s15645_s29 + $0x1aa0] sm:$0xff] %v1881_v20  ;;  %1884 = vst [vmem:[%s15645_s29 + $0x1aa8] sm:$0xff] %v1883_v21  ;;  %v1887_v23 = vld [vmem:[%s15637_s28 + $0x6ac8] sm:$0xff] }
 0x1bb   : > { %1886 = vst [vmem:[%s15645_s29 + $0x1ab0] sm:$0xff] %v1885_v22  ;;  %v1889_v24 = vld [vmem:[%s15637_s28 + $0x6b00] sm:$0xff]  ;;  %v1891_v25 = vld [vmem:[%s15637_s28 + $0x6b08] sm:$0xff]  ;;  %1888 = vst [vmem:[%s15645_s29 + $0x1ab8] sm:$0xff] %v1887_v23 }
 0x1bc   : > { %1890 = vst [vmem:[%s15645_s29 + $0x1ac0] sm:$0xff] %v1889_v24  ;;  %1892 = vst [vmem:[%s15645_s29 + $0x1ac8] sm:$0xff] %v1891_v25  ;;  %v1893_v26 = vld [vmem:[%s15637_s28 + $0x6b40] sm:$0xff]  ;;  %v1895_v27 = vld [vmem:[%s15637_s28 + $0x6b48] sm:$0xff] }
 0x1bd   : > { %v1897_v28 = vld [vmem:[%s15637_s28 + $0x6b80] sm:$0xff]  ;;  %1894 = vst [vmem:[%s15645_s29 + $0x1ad0] sm:$0xff] %v1893_v26  ;;  %1896 = vst [vmem:[%s15645_s29 + $0x1ad8] sm:$0xff] %v1895_v27  ;;  %v1899_v29 = vld [vmem:[%s15637_s28 + $0x6b88] sm:$0xff] }
 0x1be   : > { %1898 = vst [vmem:[%s15645_s29 + $0x1ae0] sm:$0xff] %v1897_v28  ;;  %v1901_v30 = vld [vmem:[%s15637_s28 + $0x6bc0] sm:$0xff]  ;;  %v1903_v31 = vld [vmem:[%s15637_s28 + $0x6bc8] sm:$0xff]  ;;  %1900 = vst [vmem:[%s15645_s29 + $0x1ae8] sm:$0xff] %v1899_v29 }
 0x1bf   : > { %1902 = vst [vmem:[%s15645_s29 + $0x1af0] sm:$0xff] %v1901_v30  ;;  %1904 = vst [vmem:[%s15645_s29 + $0x1af8] sm:$0xff] %v1903_v31  ;;  %v1905_v32 = vld [vmem:[%s15637_s28 + $0x6c00] sm:$0xff]  ;;  %v1907_v33 = vld [vmem:[%s15637_s28 + $0x6c08] sm:$0xff] }
 0x1c0   : > { %v1909_v34 = vld [vmem:[%s15637_s28 + $0x6c40] sm:$0xff]  ;;  %1906 = vst [vmem:[%s15645_s29 + $0x1b00] sm:$0xff] %v1905_v32  ;;  %1908 = vst [vmem:[%s15645_s29 + $0x1b08] sm:$0xff] %v1907_v33  ;;  %v1911_v35 = vld [vmem:[%s15637_s28 + $0x6c48] sm:$0xff] }
 0x1c1   : > { %1910 = vst [vmem:[%s15645_s29 + $0x1b10] sm:$0xff] %v1909_v34  ;;  %v1913_v36 = vld [vmem:[%s15637_s28 + $0x6c80] sm:$0xff]  ;;  %v1915_v37 = vld [vmem:[%s15637_s28 + $0x6c88] sm:$0xff]  ;;  %1912 = vst [vmem:[%s15645_s29 + $0x1b18] sm:$0xff] %v1911_v35 }
 0x1c2   : > { %1914 = vst [vmem:[%s15645_s29 + $0x1b20] sm:$0xff] %v1913_v36  ;;  %1916 = vst [vmem:[%s15645_s29 + $0x1b28] sm:$0xff] %v1915_v37  ;;  %v1917_v38 = vld [vmem:[%s15637_s28 + $0x6cc0] sm:$0xff]  ;;  %v1919_v39 = vld [vmem:[%s15637_s28 + $0x6cc8] sm:$0xff] }
 0x1c3   : > { %v1921_v40 = vld [vmem:[%s15637_s28 + $0x6d00] sm:$0xff]  ;;  %1918 = vst [vmem:[%s15645_s29 + $0x1b30] sm:$0xff] %v1917_v38  ;;  %1920 = vst [vmem:[%s15645_s29 + $0x1b38] sm:$0xff] %v1919_v39  ;;  %v1923_v41 = vld [vmem:[%s15637_s28 + $0x6d08] sm:$0xff] }
 0x1c4   : > { %1922 = vst [vmem:[%s15645_s29 + $0x1b40] sm:$0xff] %v1921_v40  ;;  %v1925_v42 = vld [vmem:[%s15637_s28 + $0x6d40] sm:$0xff]  ;;  %v1927_v43 = vld [vmem:[%s15637_s28 + $0x6d48] sm:$0xff]  ;;  %1924 = vst [vmem:[%s15645_s29 + $0x1b48] sm:$0xff] %v1923_v41 }
 0x1c5   : > { %1926 = vst [vmem:[%s15645_s29 + $0x1b50] sm:$0xff] %v1925_v42  ;;  %1928 = vst [vmem:[%s15645_s29 + $0x1b58] sm:$0xff] %v1927_v43  ;;  %v1929_v44 = vld [vmem:[%s15637_s28 + $0x6d80] sm:$0xff]  ;;  %v1931_v45 = vld [vmem:[%s15637_s28 + $0x6d88] sm:$0xff] }
 0x1c6   : > { %v1933_v46 = vld [vmem:[%s15637_s28 + $0x6dc0] sm:$0xff]  ;;  %1930 = vst [vmem:[%s15645_s29 + $0x1b60] sm:$0xff] %v1929_v44  ;;  %1932 = vst [vmem:[%s15645_s29 + $0x1b68] sm:$0xff] %v1931_v45  ;;  %v1935_v47 = vld [vmem:[%s15637_s28 + $0x6dc8] sm:$0xff] }
 0x1c7   : > { %1934 = vst [vmem:[%s15645_s29 + $0x1b70] sm:$0xff] %v1933_v46  ;;  %v1937_v48 = vld [vmem:[%s15637_s28 + $0x6e00] sm:$0xff]  ;;  %v1939_v49 = vld [vmem:[%s15637_s28 + $0x6e08] sm:$0xff]  ;;  %1936 = vst [vmem:[%s15645_s29 + $0x1b78] sm:$0xff] %v1935_v47 }
 0x1c8   : > { %1938 = vst [vmem:[%s15645_s29 + $0x1b80] sm:$0xff] %v1937_v48  ;;  %1940 = vst [vmem:[%s15645_s29 + $0x1b88] sm:$0xff] %v1939_v49  ;;  %v1941_v50 = vld [vmem:[%s15637_s28 + $0x6e40] sm:$0xff]  ;;  %v1943_v51 = vld [vmem:[%s15637_s28 + $0x6e48] sm:$0xff] }
 0x1c9   : > { %v1945_v52 = vld [vmem:[%s15637_s28 + $0x6e80] sm:$0xff]  ;;  %1942 = vst [vmem:[%s15645_s29 + $0x1b90] sm:$0xff] %v1941_v50  ;;  %1944 = vst [vmem:[%s15645_s29 + $0x1b98] sm:$0xff] %v1943_v51  ;;  %v1947_v53 = vld [vmem:[%s15637_s28 + $0x6e88] sm:$0xff] }
 0x1ca   : > { %1946 = vst [vmem:[%s15645_s29 + $0x1ba0] sm:$0xff] %v1945_v52  ;;  %v1949_v54 = vld [vmem:[%s15637_s28 + $0x6ec0] sm:$0xff]  ;;  %v1951_v55 = vld [vmem:[%s15637_s28 + $0x6ec8] sm:$0xff]  ;;  %1948 = vst [vmem:[%s15645_s29 + $0x1ba8] sm:$0xff] %v1947_v53 }
 0x1cb   : > { %1950 = vst [vmem:[%s15645_s29 + $0x1bb0] sm:$0xff] %v1949_v54  ;;  %1952 = vst [vmem:[%s15645_s29 + $0x1bb8] sm:$0xff] %v1951_v55  ;;  %v1953_v56 = vld [vmem:[%s15637_s28 + $0x6f00] sm:$0xff]  ;;  %v1955_v57 = vld [vmem:[%s15637_s28 + $0x6f08] sm:$0xff] }
 0x1cc   : > { %v1957_v58 = vld [vmem:[%s15637_s28 + $0x6f40] sm:$0xff]  ;;  %1954 = vst [vmem:[%s15645_s29 + $0x1bc0] sm:$0xff] %v1953_v56  ;;  %1956 = vst [vmem:[%s15645_s29 + $0x1bc8] sm:$0xff] %v1955_v57  ;;  %v1959_v59 = vld [vmem:[%s15637_s28 + $0x6f48] sm:$0xff] }
 0x1cd   : > { %1958 = vst [vmem:[%s15645_s29 + $0x1bd0] sm:$0xff] %v1957_v58  ;;  %v1961_v60 = vld [vmem:[%s15637_s28 + $0x6f80] sm:$0xff]  ;;  %v1963_v61 = vld [vmem:[%s15637_s28 + $0x6f88] sm:$0xff]  ;;  %1960 = vst [vmem:[%s15645_s29 + $0x1bd8] sm:$0xff] %v1959_v59 }
 0x1ce   : > { %1962 = vst [vmem:[%s15645_s29 + $0x1be0] sm:$0xff] %v1961_v60  ;;  %1964 = vst [vmem:[%s15645_s29 + $0x1be8] sm:$0xff] %v1963_v61  ;;  %v1965_v62 = vld [vmem:[%s15637_s28 + $0x6fc0] sm:$0xff]  ;;  %v1967_v63 = vld [vmem:[%s15637_s28 + $0x6fc8] sm:$0xff] }
 0x1cf   : > { %v1969_v0 = vld [vmem:[%s15637_s28 + $0x7000] sm:$0xff]  ;;  %1966 = vst [vmem:[%s15645_s29 + $0x1bf0] sm:$0xff] %v1965_v62  ;;  %1968 = vst [vmem:[%s15645_s29 + $0x1bf8] sm:$0xff] %v1967_v63  ;;  %v1971_v1 = vld [vmem:[%s15637_s28 + $0x7008] sm:$0xff] }
 0x1d0   : > { %1970 = vst [vmem:[%s15645_s29 + $0x1c00] sm:$0xff] %v1969_v0  ;;  %v1973_v2 = vld [vmem:[%s15637_s28 + $0x7040] sm:$0xff]  ;;  %v1975_v3 = vld [vmem:[%s15637_s28 + $0x7048] sm:$0xff]  ;;  %1972 = vst [vmem:[%s15645_s29 + $0x1c08] sm:$0xff] %v1971_v1 }
 0x1d1   : > { %1974 = vst [vmem:[%s15645_s29 + $0x1c10] sm:$0xff] %v1973_v2  ;;  %1976 = vst [vmem:[%s15645_s29 + $0x1c18] sm:$0xff] %v1975_v3  ;;  %v1977_v4 = vld [vmem:[%s15637_s28 + $0x7080] sm:$0xff]  ;;  %v1979_v5 = vld [vmem:[%s15637_s28 + $0x7088] sm:$0xff] }
 0x1d2   : > { %v1981_v6 = vld [vmem:[%s15637_s28 + $0x70c0] sm:$0xff]  ;;  %1978 = vst [vmem:[%s15645_s29 + $0x1c20] sm:$0xff] %v1977_v4  ;;  %1980 = vst [vmem:[%s15645_s29 + $0x1c28] sm:$0xff] %v1979_v5  ;;  %v1983_v7 = vld [vmem:[%s15637_s28 + $0x70c8] sm:$0xff] }
 0x1d3   : > { %1982 = vst [vmem:[%s15645_s29 + $0x1c30] sm:$0xff] %v1981_v6  ;;  %v1985_v8 = vld [vmem:[%s15637_s28 + $0x7100] sm:$0xff]  ;;  %v1987_v9 = vld [vmem:[%s15637_s28 + $0x7108] sm:$0xff]  ;;  %1984 = vst [vmem:[%s15645_s29 + $0x1c38] sm:$0xff] %v1983_v7 }
 0x1d4   : > { %1986 = vst [vmem:[%s15645_s29 + $0x1c40] sm:$0xff] %v1985_v8  ;;  %1988 = vst [vmem:[%s15645_s29 + $0x1c48] sm:$0xff] %v1987_v9  ;;  %v1989_v10 = vld [vmem:[%s15637_s28 + $0x7140] sm:$0xff]  ;;  %v1991_v11 = vld [vmem:[%s15637_s28 + $0x7148] sm:$0xff] }
 0x1d5   : > { %v1993_v12 = vld [vmem:[%s15637_s28 + $0x7180] sm:$0xff]  ;;  %1990 = vst [vmem:[%s15645_s29 + $0x1c50] sm:$0xff] %v1989_v10  ;;  %1992 = vst [vmem:[%s15645_s29 + $0x1c58] sm:$0xff] %v1991_v11  ;;  %v1995_v13 = vld [vmem:[%s15637_s28 + $0x7188] sm:$0xff] }
 0x1d6   : > { %1994 = vst [vmem:[%s15645_s29 + $0x1c60] sm:$0xff] %v1993_v12  ;;  %v1997_v14 = vld [vmem:[%s15637_s28 + $0x71c0] sm:$0xff]  ;;  %v1999_v15 = vld [vmem:[%s15637_s28 + $0x71c8] sm:$0xff]  ;;  %1996 = vst [vmem:[%s15645_s29 + $0x1c68] sm:$0xff] %v1995_v13 }
 0x1d7   : > { %1998 = vst [vmem:[%s15645_s29 + $0x1c70] sm:$0xff] %v1997_v14  ;;  %2000 = vst [vmem:[%s15645_s29 + $0x1c78] sm:$0xff] %v1999_v15  ;;  %v2001_v16 = vld [vmem:[%s15637_s28 + $0x7200] sm:$0xff]  ;;  %v2003_v17 = vld [vmem:[%s15637_s28 + $0x7208] sm:$0xff] }
 0x1d8   : > { %v2005_v18 = vld [vmem:[%s15637_s28 + $0x7240] sm:$0xff]  ;;  %2002 = vst [vmem:[%s15645_s29 + $0x1c80] sm:$0xff] %v2001_v16  ;;  %2004 = vst [vmem:[%s15645_s29 + $0x1c88] sm:$0xff] %v2003_v17  ;;  %v2007_v19 = vld [vmem:[%s15637_s28 + $0x7248] sm:$0xff] }
 0x1d9   : > { %2006 = vst [vmem:[%s15645_s29 + $0x1c90] sm:$0xff] %v2005_v18  ;;  %v2009_v20 = vld [vmem:[%s15637_s28 + $0x7280] sm:$0xff]  ;;  %v2011_v21 = vld [vmem:[%s15637_s28 + $0x7288] sm:$0xff]  ;;  %2008 = vst [vmem:[%s15645_s29 + $0x1c98] sm:$0xff] %v2007_v19 }
 0x1da   : > { %2010 = vst [vmem:[%s15645_s29 + $0x1ca0] sm:$0xff] %v2009_v20  ;;  %2012 = vst [vmem:[%s15645_s29 + $0x1ca8] sm:$0xff] %v2011_v21  ;;  %v2013_v22 = vld [vmem:[%s15637_s28 + $0x72c0] sm:$0xff]  ;;  %v2015_v23 = vld [vmem:[%s15637_s28 + $0x72c8] sm:$0xff] }
 0x1db   : > { %v2017_v24 = vld [vmem:[%s15637_s28 + $0x7300] sm:$0xff]  ;;  %2014 = vst [vmem:[%s15645_s29 + $0x1cb0] sm:$0xff] %v2013_v22  ;;  %2016 = vst [vmem:[%s15645_s29 + $0x1cb8] sm:$0xff] %v2015_v23  ;;  %v2019_v25 = vld [vmem:[%s15637_s28 + $0x7308] sm:$0xff] }
 0x1dc   : > { %2018 = vst [vmem:[%s15645_s29 + $0x1cc0] sm:$0xff] %v2017_v24  ;;  %v2021_v26 = vld [vmem:[%s15637_s28 + $0x7340] sm:$0xff]  ;;  %v2023_v27 = vld [vmem:[%s15637_s28 + $0x7348] sm:$0xff]  ;;  %2020 = vst [vmem:[%s15645_s29 + $0x1cc8] sm:$0xff] %v2019_v25 }
 0x1dd   : > { %2022 = vst [vmem:[%s15645_s29 + $0x1cd0] sm:$0xff] %v2021_v26  ;;  %2024 = vst [vmem:[%s15645_s29 + $0x1cd8] sm:$0xff] %v2023_v27  ;;  %v2025_v28 = vld [vmem:[%s15637_s28 + $0x7380] sm:$0xff]  ;;  %v2027_v29 = vld [vmem:[%s15637_s28 + $0x7388] sm:$0xff] }
 0x1de   : > { %v2029_v30 = vld [vmem:[%s15637_s28 + $0x73c0] sm:$0xff]  ;;  %2026 = vst [vmem:[%s15645_s29 + $0x1ce0] sm:$0xff] %v2025_v28  ;;  %2028 = vst [vmem:[%s15645_s29 + $0x1ce8] sm:$0xff] %v2027_v29  ;;  %v2031_v31 = vld [vmem:[%s15637_s28 + $0x73c8] sm:$0xff] }
 0x1df   : > { %2030 = vst [vmem:[%s15645_s29 + $0x1cf0] sm:$0xff] %v2029_v30  ;;  %v2033_v32 = vld [vmem:[%s15637_s28 + $0x7400] sm:$0xff]  ;;  %v2035_v33 = vld [vmem:[%s15637_s28 + $0x7408] sm:$0xff]  ;;  %2032 = vst [vmem:[%s15645_s29 + $0x1cf8] sm:$0xff] %v2031_v31 }
 0x1e0   : > { %2034 = vst [vmem:[%s15645_s29 + $0x1d00] sm:$0xff] %v2033_v32  ;;  %2036 = vst [vmem:[%s15645_s29 + $0x1d08] sm:$0xff] %v2035_v33  ;;  %v2037_v34 = vld [vmem:[%s15637_s28 + $0x7440] sm:$0xff]  ;;  %v2039_v35 = vld [vmem:[%s15637_s28 + $0x7448] sm:$0xff] }
 0x1e1   : > { %v2041_v36 = vld [vmem:[%s15637_s28 + $0x7480] sm:$0xff]  ;;  %2038 = vst [vmem:[%s15645_s29 + $0x1d10] sm:$0xff] %v2037_v34  ;;  %2040 = vst [vmem:[%s15645_s29 + $0x1d18] sm:$0xff] %v2039_v35  ;;  %v2043_v37 = vld [vmem:[%s15637_s28 + $0x7488] sm:$0xff] }
 0x1e2   : > { %2042 = vst [vmem:[%s15645_s29 + $0x1d20] sm:$0xff] %v2041_v36  ;;  %v2045_v38 = vld [vmem:[%s15637_s28 + $0x74c0] sm:$0xff]  ;;  %v2047_v39 = vld [vmem:[%s15637_s28 + $0x74c8] sm:$0xff]  ;;  %2044 = vst [vmem:[%s15645_s29 + $0x1d28] sm:$0xff] %v2043_v37 }
 0x1e3   : > { %2046 = vst [vmem:[%s15645_s29 + $0x1d30] sm:$0xff] %v2045_v38  ;;  %2048 = vst [vmem:[%s15645_s29 + $0x1d38] sm:$0xff] %v2047_v39  ;;  %v2049_v40 = vld [vmem:[%s15637_s28 + $0x7500] sm:$0xff]  ;;  %v2051_v41 = vld [vmem:[%s15637_s28 + $0x7508] sm:$0xff] }
 0x1e4   : > { %v2053_v42 = vld [vmem:[%s15637_s28 + $0x7540] sm:$0xff]  ;;  %2050 = vst [vmem:[%s15645_s29 + $0x1d40] sm:$0xff] %v2049_v40  ;;  %2052 = vst [vmem:[%s15645_s29 + $0x1d48] sm:$0xff] %v2051_v41  ;;  %v2055_v43 = vld [vmem:[%s15637_s28 + $0x7548] sm:$0xff] }
 0x1e5   : > { %2054 = vst [vmem:[%s15645_s29 + $0x1d50] sm:$0xff] %v2053_v42  ;;  %v2057_v44 = vld [vmem:[%s15637_s28 + $0x7580] sm:$0xff]  ;;  %v2059_v45 = vld [vmem:[%s15637_s28 + $0x7588] sm:$0xff]  ;;  %2056 = vst [vmem:[%s15645_s29 + $0x1d58] sm:$0xff] %v2055_v43 }
 0x1e6   : > { %2058 = vst [vmem:[%s15645_s29 + $0x1d60] sm:$0xff] %v2057_v44  ;;  %2060 = vst [vmem:[%s15645_s29 + $0x1d68] sm:$0xff] %v2059_v45  ;;  %v2061_v46 = vld [vmem:[%s15637_s28 + $0x75c0] sm:$0xff]  ;;  %v2063_v47 = vld [vmem:[%s15637_s28 + $0x75c8] sm:$0xff] }
 0x1e7   : > { %v2065_v48 = vld [vmem:[%s15637_s28 + $0x7600] sm:$0xff]  ;;  %2062 = vst [vmem:[%s15645_s29 + $0x1d70] sm:$0xff] %v2061_v46  ;;  %2064 = vst [vmem:[%s15645_s29 + $0x1d78] sm:$0xff] %v2063_v47  ;;  %v2067_v49 = vld [vmem:[%s15637_s28 + $0x7608] sm:$0xff] }
 0x1e8   : > { %2066 = vst [vmem:[%s15645_s29 + $0x1d80] sm:$0xff] %v2065_v48  ;;  %v2069_v50 = vld [vmem:[%s15637_s28 + $0x7640] sm:$0xff]  ;;  %v2071_v51 = vld [vmem:[%s15637_s28 + $0x7648] sm:$0xff]  ;;  %2068 = vst [vmem:[%s15645_s29 + $0x1d88] sm:$0xff] %v2067_v49 }
 0x1e9   : > { %2070 = vst [vmem:[%s15645_s29 + $0x1d90] sm:$0xff] %v2069_v50  ;;  %2072 = vst [vmem:[%s15645_s29 + $0x1d98] sm:$0xff] %v2071_v51  ;;  %v2073_v52 = vld [vmem:[%s15637_s28 + $0x7680] sm:$0xff]  ;;  %v2075_v53 = vld [vmem:[%s15637_s28 + $0x7688] sm:$0xff] }
 0x1ea   : > { %v2077_v54 = vld [vmem:[%s15637_s28 + $0x76c0] sm:$0xff]  ;;  %2074 = vst [vmem:[%s15645_s29 + $0x1da0] sm:$0xff] %v2073_v52  ;;  %2076 = vst [vmem:[%s15645_s29 + $0x1da8] sm:$0xff] %v2075_v53  ;;  %v2079_v55 = vld [vmem:[%s15637_s28 + $0x76c8] sm:$0xff] }
 0x1eb   : > { %2078 = vst [vmem:[%s15645_s29 + $0x1db0] sm:$0xff] %v2077_v54  ;;  %v2081_v56 = vld [vmem:[%s15637_s28 + $0x7700] sm:$0xff]  ;;  %v2083_v57 = vld [vmem:[%s15637_s28 + $0x7708] sm:$0xff]  ;;  %2080 = vst [vmem:[%s15645_s29 + $0x1db8] sm:$0xff] %v2079_v55 }
 0x1ec   : > { %2082 = vst [vmem:[%s15645_s29 + $0x1dc0] sm:$0xff] %v2081_v56  ;;  %2084 = vst [vmem:[%s15645_s29 + $0x1dc8] sm:$0xff] %v2083_v57  ;;  %v2085_v58 = vld [vmem:[%s15637_s28 + $0x7740] sm:$0xff]  ;;  %v2087_v59 = vld [vmem:[%s15637_s28 + $0x7748] sm:$0xff] }
 0x1ed   : > { %v2089_v60 = vld [vmem:[%s15637_s28 + $0x7780] sm:$0xff]  ;;  %2086 = vst [vmem:[%s15645_s29 + $0x1dd0] sm:$0xff] %v2085_v58  ;;  %2088 = vst [vmem:[%s15645_s29 + $0x1dd8] sm:$0xff] %v2087_v59  ;;  %v2091_v61 = vld [vmem:[%s15637_s28 + $0x7788] sm:$0xff] }
 0x1ee   : > { %2090 = vst [vmem:[%s15645_s29 + $0x1de0] sm:$0xff] %v2089_v60  ;;  %v2093_v62 = vld [vmem:[%s15637_s28 + $0x77c0] sm:$0xff]  ;;  %v2095_v63 = vld [vmem:[%s15637_s28 + $0x77c8] sm:$0xff]  ;;  %2092 = vst [vmem:[%s15645_s29 + $0x1de8] sm:$0xff] %v2091_v61 }
 0x1ef   : > { %2094 = vst [vmem:[%s15645_s29 + $0x1df0] sm:$0xff] %v2093_v62  ;;  %2096 = vst [vmem:[%s15645_s29 + $0x1df8] sm:$0xff] %v2095_v63  ;;  %v2097_v0 = vld [vmem:[%s15637_s28 + $0x7800] sm:$0xff]  ;;  %v2099_v1 = vld [vmem:[%s15637_s28 + $0x7808] sm:$0xff] }
 0x1f0   : > { %v2101_v2 = vld [vmem:[%s15637_s28 + $0x7840] sm:$0xff]  ;;  %2098 = vst [vmem:[%s15645_s29 + $0x1e00] sm:$0xff] %v2097_v0  ;;  %2100 = vst [vmem:[%s15645_s29 + $0x1e08] sm:$0xff] %v2099_v1  ;;  %v2103_v3 = vld [vmem:[%s15637_s28 + $0x7848] sm:$0xff] }
 0x1f1   : > { %2102 = vst [vmem:[%s15645_s29 + $0x1e10] sm:$0xff] %v2101_v2  ;;  %v2105_v4 = vld [vmem:[%s15637_s28 + $0x7880] sm:$0xff]  ;;  %v2107_v5 = vld [vmem:[%s15637_s28 + $0x7888] sm:$0xff]  ;;  %2104 = vst [vmem:[%s15645_s29 + $0x1e18] sm:$0xff] %v2103_v3 }
 0x1f2   : > { %2106 = vst [vmem:[%s15645_s29 + $0x1e20] sm:$0xff] %v2105_v4  ;;  %2108 = vst [vmem:[%s15645_s29 + $0x1e28] sm:$0xff] %v2107_v5  ;;  %v2109_v6 = vld [vmem:[%s15637_s28 + $0x78c0] sm:$0xff]  ;;  %v2111_v7 = vld [vmem:[%s15637_s28 + $0x78c8] sm:$0xff] }
 0x1f3   : > { %v2113_v8 = vld [vmem:[%s15637_s28 + $0x7900] sm:$0xff]  ;;  %2110 = vst [vmem:[%s15645_s29 + $0x1e30] sm:$0xff] %v2109_v6  ;;  %2112 = vst [vmem:[%s15645_s29 + $0x1e38] sm:$0xff] %v2111_v7  ;;  %v2115_v9 = vld [vmem:[%s15637_s28 + $0x7908] sm:$0xff] }
 0x1f4   : > { %2114 = vst [vmem:[%s15645_s29 + $0x1e40] sm:$0xff] %v2113_v8  ;;  %v2117_v10 = vld [vmem:[%s15637_s28 + $0x7940] sm:$0xff]  ;;  %v2119_v11 = vld [vmem:[%s15637_s28 + $0x7948] sm:$0xff]  ;;  %2116 = vst [vmem:[%s15645_s29 + $0x1e48] sm:$0xff] %v2115_v9 }
 0x1f5   : > { %2118 = vst [vmem:[%s15645_s29 + $0x1e50] sm:$0xff] %v2117_v10  ;;  %2120 = vst [vmem:[%s15645_s29 + $0x1e58] sm:$0xff] %v2119_v11  ;;  %v2121_v12 = vld [vmem:[%s15637_s28 + $0x7980] sm:$0xff]  ;;  %v2123_v13 = vld [vmem:[%s15637_s28 + $0x7988] sm:$0xff] }
 0x1f6   : > { %v2125_v14 = vld [vmem:[%s15637_s28 + $0x79c0] sm:$0xff]  ;;  %2122 = vst [vmem:[%s15645_s29 + $0x1e60] sm:$0xff] %v2121_v12  ;;  %2124 = vst [vmem:[%s15645_s29 + $0x1e68] sm:$0xff] %v2123_v13  ;;  %v2127_v15 = vld [vmem:[%s15637_s28 + $0x79c8] sm:$0xff] }
 0x1f7   : > { %2126 = vst [vmem:[%s15645_s29 + $0x1e70] sm:$0xff] %v2125_v14  ;;  %v2129_v16 = vld [vmem:[%s15637_s28 + $0x7a00] sm:$0xff]  ;;  %v2131_v17 = vld [vmem:[%s15637_s28 + $0x7a08] sm:$0xff]  ;;  %2128 = vst [vmem:[%s15645_s29 + $0x1e78] sm:$0xff] %v2127_v15 }
 0x1f8   : > { %2130 = vst [vmem:[%s15645_s29 + $0x1e80] sm:$0xff] %v2129_v16  ;;  %2132 = vst [vmem:[%s15645_s29 + $0x1e88] sm:$0xff] %v2131_v17  ;;  %v2133_v18 = vld [vmem:[%s15637_s28 + $0x7a40] sm:$0xff]  ;;  %v2135_v19 = vld [vmem:[%s15637_s28 + $0x7a48] sm:$0xff] }
 0x1f9   : > { %v2137_v20 = vld [vmem:[%s15637_s28 + $0x7a80] sm:$0xff]  ;;  %2134 = vst [vmem:[%s15645_s29 + $0x1e90] sm:$0xff] %v2133_v18  ;;  %2136 = vst [vmem:[%s15645_s29 + $0x1e98] sm:$0xff] %v2135_v19  ;;  %v2139_v21 = vld [vmem:[%s15637_s28 + $0x7a88] sm:$0xff] }
 0x1fa   : > { %2138 = vst [vmem:[%s15645_s29 + $0x1ea0] sm:$0xff] %v2137_v20  ;;  %v2141_v22 = vld [vmem:[%s15637_s28 + $0x7ac0] sm:$0xff]  ;;  %v2143_v23 = vld [vmem:[%s15637_s28 + $0x7ac8] sm:$0xff]  ;;  %2140 = vst [vmem:[%s15645_s29 + $0x1ea8] sm:$0xff] %v2139_v21 }
 0x1fb   : > { %2142 = vst [vmem:[%s15645_s29 + $0x1eb0] sm:$0xff] %v2141_v22  ;;  %2144 = vst [vmem:[%s15645_s29 + $0x1eb8] sm:$0xff] %v2143_v23  ;;  %v2145_v24 = vld [vmem:[%s15637_s28 + $0x7b00] sm:$0xff]  ;;  %v2147_v25 = vld [vmem:[%s15637_s28 + $0x7b08] sm:$0xff] }
 0x1fc   : > { %v2149_v26 = vld [vmem:[%s15637_s28 + $0x7b40] sm:$0xff]  ;;  %2146 = vst [vmem:[%s15645_s29 + $0x1ec0] sm:$0xff] %v2145_v24  ;;  %2148 = vst [vmem:[%s15645_s29 + $0x1ec8] sm:$0xff] %v2147_v25  ;;  %v2151_v27 = vld [vmem:[%s15637_s28 + $0x7b48] sm:$0xff] }
 0x1fd   : > { %2150 = vst [vmem:[%s15645_s29 + $0x1ed0] sm:$0xff] %v2149_v26  ;;  %v2153_v28 = vld [vmem:[%s15637_s28 + $0x7b80] sm:$0xff]  ;;  %v2155_v29 = vld [vmem:[%s15637_s28 + $0x7b88] sm:$0xff]  ;;  %2152 = vst [vmem:[%s15645_s29 + $0x1ed8] sm:$0xff] %v2151_v27 }
 0x1fe   : > { %2154 = vst [vmem:[%s15645_s29 + $0x1ee0] sm:$0xff] %v2153_v28  ;;  %2156 = vst [vmem:[%s15645_s29 + $0x1ee8] sm:$0xff] %v2155_v29  ;;  %v2157_v30 = vld [vmem:[%s15637_s28 + $0x7bc0] sm:$0xff]  ;;  %v2159_v31 = vld [vmem:[%s15637_s28 + $0x7bc8] sm:$0xff] }
 0x1ff   : > { %v2161_v32 = vld [vmem:[%s15637_s28 + $0x7c00] sm:$0xff]  ;;  %2158 = vst [vmem:[%s15645_s29 + $0x1ef0] sm:$0xff] %v2157_v30  ;;  %2160 = vst [vmem:[%s15645_s29 + $0x1ef8] sm:$0xff] %v2159_v31  ;;  %v2163_v33 = vld [vmem:[%s15637_s28 + $0x7c08] sm:$0xff] }
 0x200   : > { %2162 = vst [vmem:[%s15645_s29 + $0x1f00] sm:$0xff] %v2161_v32  ;;  %v2165_v34 = vld [vmem:[%s15637_s28 + $0x7c40] sm:$0xff]  ;;  %v2167_v35 = vld [vmem:[%s15637_s28 + $0x7c48] sm:$0xff]  ;;  %2164 = vst [vmem:[%s15645_s29 + $0x1f08] sm:$0xff] %v2163_v33 }
 0x201   : > { %2166 = vst [vmem:[%s15645_s29 + $0x1f10] sm:$0xff] %v2165_v34  ;;  %2168 = vst [vmem:[%s15645_s29 + $0x1f18] sm:$0xff] %v2167_v35  ;;  %v2169_v36 = vld [vmem:[%s15637_s28 + $0x7c80] sm:$0xff]  ;;  %v2171_v37 = vld [vmem:[%s15637_s28 + $0x7c88] sm:$0xff] }
 0x202   : > { %v2173_v38 = vld [vmem:[%s15637_s28 + $0x7cc0] sm:$0xff]  ;;  %2170 = vst [vmem:[%s15645_s29 + $0x1f20] sm:$0xff] %v2169_v36  ;;  %2172 = vst [vmem:[%s15645_s29 + $0x1f28] sm:$0xff] %v2171_v37  ;;  %v2175_v39 = vld [vmem:[%s15637_s28 + $0x7cc8] sm:$0xff] }
 0x203   : > { %2174 = vst [vmem:[%s15645_s29 + $0x1f30] sm:$0xff] %v2173_v38  ;;  %2176 = vst [vmem:[%s15645_s29 + $0x1f38] sm:$0xff] %v2175_v39 }
 0x204 PF: > { %p12575_p5 = scmp.ge.s32.totalorder %s15573_s17, 1  ;;  %p2190_p6 = scmp.lt.s32.totalorder %s15573_s17, 5 }
 0x206   : > { %p2191_p7 = pnand %p12575_p5, %p2190_p6 }
 0x208   : > { %2194 = sbr.rel (%p2191_p7) target bundleno = 2217 (0x8a9), region = 55 }
 0x20d   : > { %s2197_s30 = sand.u32 1, %s15565_s15   ;;  %v2238_v40 = vld [vmem:[%s21382_s0] sm:$0xff]  ;;  %v2239_v42 = vld [vmem:[%s21382_s0 + $0x8] sm:$0xff]  ;;  %vm9193_vm0 = vcmask 261120   ;;  %vm12146_vm1 = vcmask 654336   ;;  %s12576_s12 = sshll.u32 %s15617_s18, 6 }
 0x20e   : > { %v2254_v41 = vld [vmem:[%s21382_s0 + $0x80] sm:$0xff]  ;;  %s13865_s11 = smul.u32 8000, %s2197_s30  ;;  %v2255_v45 = vld [vmem:[%s21382_s0 + $0x88] sm:$0xff]  ;;  %p2228_p8 = scmp.lt.s32.totalorder %s12576_s12, 255  ;;  %vm12496_vm2 = vcmask 41984  }
 0x20f   : > { %v17653_v43 = vcombine.low %v2238_v40, %v2254_v41  ;;  %v17655_v44 = vcombine.high %v2238_v40, %v2254_v41  ;;  %v17660_v46 = vcombine.low %v2239_v42, %v2255_v45  ;;  %v17662_v47 = vcombine.high %v2239_v42, %v2255_v45  ;;  %p2233_p9 = scmp.lt.s32.totalorder %s15617_s18, 3 }
 0x210   : > { %s17665_s14 = scalar_lea.vmem [#allocation2], %s13865_s11  ;;  %s22044_s12 = smov (!%p2228_p8, %s12576_s12), 255 }
 0x211   : > { %9241 = vmatprep.mubr.bf16.mxu0 %v17655_v44  ;;  %v13891_v48 = vld [vmem:[%s17665_s14 + $0xe4] ss:$16 sps:$4 sm:$0xff]   ;;  %9324 = vmatprep.mubr.bf16.mxu1 %v17662_v47  ;;  %v13895_v50 = vld [vmem:[%s17665_s14 + $0xe0] ss:$16 sps:$4 sm:$0xff]   ;;  %s12577_s13 = sshll.u32 %s22044_s12, 3  ;;  %s22046_s18 = smov (!%p2233_p9, %s15617_s18), 3 }
 0x212   : > { %v13893_v49 = vld [vmem:[%s17665_s14 + $0x2e4] ss:$16 sps:$4 sm:$0xff]   ;;  %9209 = vmatprep.subr.bf16.mxu0 %v13891_v48  ;;  %v13896_v51 = vld [vmem:[%s17665_s14 + $0x2e0] ss:$16 sps:$4 sm:$0xff]   ;;  %s21085_s20 = scalar_lea.vmem %s21385_s3, %s12577_s13  ;;  %s12578_s21 = sshll.u32 %s22046_s18, 1 }
 0x213   : > { %9292 = vmatprep.subr.bf16.mxu1 %v13893_v49  ;;  %v13897_v52 = vld [vmem:[%s17665_s14 + $0xc4] ss:$16 sps:$4 sm:$0xff]   ;;  %9210 = vmatpush1.bf16.msra.mxu0 %v13895_v50  ;;  %v13901_v54 = vld [vmem:[%s17665_s14 + $0xc0] ss:$16 sps:$4 sm:$0xff]   ;;  %s2236_s25 = scalar_lea.vmem %s21386_s4, %s12578_s21 }
 0x214   : > { %9293 = vmatpush1.bf16.msra.mxu1 %v13896_v51  ;;  %v13899_v53 = vld [vmem:[%s17665_s14 + $0x2c4] ss:$16 sps:$4 sm:$0xff]   ;;  %9211 = vmatprep.subr.bf16.mxu0 %v13897_v52  ;;  %v13902_v55 = vld [vmem:[%s17665_s14 + $0x2c0] ss:$16 sps:$4 sm:$0xff]  }
 0x215   : > { %9294 = vmatprep.subr.bf16.mxu1 %v13899_v53  ;;  %v13903_v56 = vld [vmem:[%s17665_s14 + $0xa4] ss:$16 sps:$4 sm:$0xff]   ;;  %v13907_v58 = vld [vmem:[%s17665_s14 + $0xa0] ss:$16 sps:$4 sm:$0xff]  }
 0x216   : > { %v13905_v57 = vld [vmem:[%s17665_s14 + $0x2a4] ss:$16 sps:$4 sm:$0xff]   ;;  %v13908_v59 = vld [vmem:[%s17665_s14 + $0x2a0] ss:$16 sps:$4 sm:$0xff]  }
 0x217   : > { %9212 = vmatpush1.bf16.msra.mxu0 %v13901_v54  ;;  %v13909_v60 = vld [vmem:[%s17665_s14 + $0x84] ss:$16 sps:$4 sm:$0xff]   ;;  %v13913_v62 = vld [vmem:[%s17665_s14 + $0x80] ss:$16 sps:$4 sm:$0xff]  }
 0x218   : > { %9295 = vmatpush1.bf16.msra.mxu1 %v13902_v55  ;;  %9213 = vmatprep.subr.bf16.mxu0 %v13903_v56  ;;  %v13911_v61 = vld [vmem:[%s17665_s14 + $0x284] ss:$16 sps:$4 sm:$0xff]   ;;  %v13914_v63 = vld [vmem:[%s17665_s14 + $0x280] ss:$16 sps:$4 sm:$0xff]   ;;  %v2271_v56 = vld [vmem:[%s21382_s0 + $0x108] sm:$0xff] }
 0x219   : > { %9296 = vmatprep.subr.bf16.mxu1 %v13905_v57  ;;  %v13915_v0 = vld [vmem:[%s17665_s14 + $0x64] ss:$16 sps:$4 sm:$0xff]   ;;  %v13919_v2 = vld [vmem:[%s17665_s14 + $0x60] ss:$16 sps:$4 sm:$0xff]   ;;  %v2287_v57 = vld [vmem:[%s21382_s0 + $0x188] sm:$0xff] }
 0x21a   : > { %v13917_v1 = vld [vmem:[%s17665_s14 + $0x264] ss:$16 sps:$4 sm:$0xff]   ;;  %v13920_v3 = vld [vmem:[%s17665_s14 + $0x260] ss:$16 sps:$4 sm:$0xff]  }
 0x21b   : > { %9214 = vmatpush1.bf16.msra.mxu0 %v13907_v58  ;;  %v13921_v4 = vld [vmem:[%s17665_s14 + $0x44] ss:$16 sps:$4 sm:$0xff]   ;;  %v13925_v6 = vld [vmem:[%s17665_s14 + $0x40] ss:$16 sps:$4 sm:$0xff]  }
 0x21c   : > { %9297 = vmatpush1.bf16.msra.mxu1 %v13908_v59  ;;  %9215 = vmatprep.subr.bf16.mxu0 %v13909_v60  ;;  %v13923_v5 = vld [vmem:[%s17665_s14 + $0x244] ss:$16 sps:$4 sm:$0xff]   ;;  %v13926_v7 = vld [vmem:[%s17665_s14 + $0x240] ss:$16 sps:$4 sm:$0xff]  }
 0x21d   : > { %9298 = vmatprep.subr.bf16.mxu1 %v13911_v61  ;;  %v13927_v8 = vld [vmem:[%s17665_s14 + $0x24] ss:$16 sps:$4 sm:$0xff]   ;;  %v13931_v10 = vld [vmem:[%s17665_s14 + $0x20] ss:$16 sps:$4 sm:$0xff]  }
 0x21e   : > { %v13929_v9 = vld [vmem:[%s17665_s14 + $0x224] ss:$16 sps:$4 sm:$0xff]   ;;  %v13932_v11 = vld [vmem:[%s17665_s14 + $0x220] ss:$16 sps:$4 sm:$0xff]  }
 0x21f   : > { %9216 = vmatpush1.bf16.msra.mxu0 %v13913_v62  ;;  %v13933_v12 = vld [vmem:[%s17665_s14 + $0x4] ss:$16 sps:$4 sm:$0xff]   ;;  %v13937_v14 = vld [vmem:[%s17665_s14] ss:$16 sps:$4 sm:$0xff]  }
 0x220   : > { %9299 = vmatpush1.bf16.msra.mxu1 %v13914_v63  ;;  %9217 = vmatprep.subr.bf16.mxu0 %v13915_v0  ;;  %v13935_v13 = vld [vmem:[%s17665_s14 + $0x204] ss:$16 sps:$4 sm:$0xff]   ;;  %v13938_v15 = vld [vmem:[%s17665_s14 + $0x200] ss:$16 sps:$4 sm:$0xff]   ;;  %v17752_v63 = vcombine.high %v2271_v56, %v2287_v57 }
 0x221   : > { %9300 = vmatprep.subr.bf16.mxu1 %v13917_v1  ;;  %v13939_v16 = vld [vmem:[%s17665_s14 + $0x1e4] ss:$16 sps:$4 sm:$0xff]   ;;  %v13943_v18 = vld [vmem:[%s17665_s14 + $0x1e0] ss:$16 sps:$4 sm:$0xff]  }
 0x222   : > { %v13941_v17 = vld [vmem:[%s17665_s14 + $0x3e4] ss:$16 sps:$4 sm:$0xff]   ;;  %v13944_v19 = vld [vmem:[%s17665_s14 + $0x3e0] ss:$16 sps:$4 sm:$0xff]  }
 0x223   : > { %9218 = vmatpush1.bf16.msra.mxu0 %v13919_v2  ;;  %v13945_v20 = vld [vmem:[%s17665_s14 + $0x1c4] ss:$16 sps:$4 sm:$0xff]   ;;  %v13949_v22 = vld [vmem:[%s17665_s14 + $0x1c0] ss:$16 sps:$4 sm:$0xff]  }
 0x224   : > { %9301 = vmatpush1.bf16.msra.mxu1 %v13920_v3  ;;  %9219 = vmatprep.subr.bf16.mxu0 %v13921_v4  ;;  %v13947_v21 = vld [vmem:[%s17665_s14 + $0x3c4] ss:$16 sps:$4 sm:$0xff]   ;;  %v13950_v23 = vld [vmem:[%s17665_s14 + $0x3c0] ss:$16 sps:$4 sm:$0xff]  }
 0x225   : > { %9302 = vmatprep.subr.bf16.mxu1 %v13923_v5  ;;  %v13951_v24 = vld [vmem:[%s17665_s14 + $0x1a4] ss:$16 sps:$4 sm:$0xff]   ;;  %v13955_v26 = vld [vmem:[%s17665_s14 + $0x1a0] ss:$16 sps:$4 sm:$0xff]  }
 0x226   : > { %v13953_v25 = vld [vmem:[%s17665_s14 + $0x3a4] ss:$16 sps:$4 sm:$0xff]   ;;  %v13956_v27 = vld [vmem:[%s17665_s14 + $0x3a0] ss:$16 sps:$4 sm:$0xff]  }
 0x227   : > { %9220 = vmatpush1.bf16.msra.mxu0 %v13925_v6  ;;  %v13957_v28 = vld [vmem:[%s17665_s14 + $0x184] ss:$16 sps:$4 sm:$0xff]   ;;  %v13961_v30 = vld [vmem:[%s17665_s14 + $0x180] ss:$16 sps:$4 sm:$0xff]  }
 0x228   : > { %9303 = vmatpush1.bf16.msra.mxu1 %v13926_v7  ;;  %9221 = vmatprep.subr.bf16.mxu0 %v13927_v8  ;;  %v13959_v29 = vld [vmem:[%s17665_s14 + $0x384] ss:$16 sps:$4 sm:$0xff]   ;;  %v13962_v31 = vld [vmem:[%s17665_s14 + $0x380] ss:$16 sps:$4 sm:$0xff]   ;;  %v17770_v7 = vcombine.low %v2271_v56, %v2287_v57  ;;  %v2303_v8 = vld [vmem:[%s21382_s0 + $0x208] sm:$0xff] }
 0x229   : > { %9304 = vmatprep.subr.bf16.mxu1 %v13929_v9  ;;  %v13963_v32 = vld [vmem:[%s17665_s14 + $0x164] ss:$16 sps:$4 sm:$0xff]   ;;  %v13967_v34 = vld [vmem:[%s17665_s14 + $0x160] ss:$16 sps:$4 sm:$0xff]   ;;  %v2319_v9 = vld [vmem:[%s21382_s0 + $0x288] sm:$0xff] }
 0x22a   : > { %v13965_v33 = vld [vmem:[%s17665_s14 + $0x364] ss:$16 sps:$4 sm:$0xff]   ;;  %v13968_v35 = vld [vmem:[%s17665_s14 + $0x360] ss:$16 sps:$4 sm:$0xff]  }
 0x22b   : > { %9222 = vmatpush1.bf16.msra.mxu0 %v13931_v10  ;;  %v13969_v36 = vld [vmem:[%s17665_s14 + $0x144] ss:$16 sps:$4 sm:$0xff]   ;;  %v13973_v38 = vld [vmem:[%s17665_s14 + $0x140] ss:$16 sps:$4 sm:$0xff]  }
 0x22c   : > { %9305 = vmatpush1.bf16.msra.mxu1 %v13932_v11  ;;  %9223 = vmatprep.subr.bf16.mxu0 %v13933_v12  ;;  %v13971_v37 = vld [vmem:[%s17665_s14 + $0x344] ss:$16 sps:$4 sm:$0xff]   ;;  %v13974_v39 = vld [vmem:[%s17665_s14 + $0x340] ss:$16 sps:$4 sm:$0xff]  }
 0x22d   : > { %9306 = vmatprep.subr.bf16.mxu1 %v13935_v13  ;;  %v13975_v40 = vld [vmem:[%s17665_s14 + $0x124] ss:$16 sps:$4 sm:$0xff]   ;;  %v13979_v42 = vld [vmem:[%s17665_s14 + $0x120] ss:$16 sps:$4 sm:$0xff]  }
 0x22e   : > { %v13977_v41 = vld [vmem:[%s17665_s14 + $0x324] ss:$16 sps:$4 sm:$0xff]   ;;  %v13980_v45 = vld [vmem:[%s17665_s14 + $0x320] ss:$16 sps:$4 sm:$0xff]  }
 0x22f   : > { %9224 = vmatpush1.bf16.msra.mxu0 %v13937_v14  ;;  %v13981_v48 = vld [vmem:[%s17665_s14 + $0x104] ss:$16 sps:$4 sm:$0xff]   ;;  %v13985_v50 = vld [vmem:[%s17665_s14 + $0x100] ss:$16 sps:$4 sm:$0xff]  }
 0x230   : > { %9307 = vmatpush1.bf16.msra.mxu1 %v13938_v15  ;;  %9225 = vmatprep.subr.bf16.mxu0 %v13939_v16  ;;  %v13983_v49 = vld [vmem:[%s17665_s14 + $0x304] ss:$16 sps:$4 sm:$0xff]   ;;  %v13986_v51 = vld [vmem:[%s17665_s14 + $0x300] ss:$16 sps:$4 sm:$0xff]   ;;  %v17784_v15 = vcombine.high %v2303_v8, %v2319_v9 }
 0x231   : > { %9308 = vmatprep.subr.bf16.mxu1 %v13941_v17  ;;  %v13989_v52 = vld [vmem:[%s17665_s14 + $0x4e4] ss:$16 sps:$4 sm:$0xff]   ;;  %v13987_v58 = vld [vmem:[%s17665_s14 + $0x4e0] ss:$16 sps:$4 sm:$0xff]  }
 0x232   : > { %v13992_v53 = vld [vmem:[%s17665_s14 + $0x6e4] ss:$16 sps:$4 sm:$0xff]   ;;  %v13990_v59 = vld [vmem:[%s17665_s14 + $0x6e0] ss:$16 sps:$4 sm:$0xff]  }
 0x233   : > { %9226 = vmatpush2.bf16.msra.mxu0 %v13943_v18  ;;  %v2270_v54 = vld [vmem:[%s21382_s0 + $0x100] sm:$0xff]  ;;  %v17861_v56 = vld [vmem:[%s21382_s0 + $0x10] sm:$0xff] }
 0x234   : > { %9309 = vmatpush2.bf16.msra.mxu1 %v13944_v19  ;;  %9227 = vmatprep.subr.bf16.mxu0 %v13945_v20  ;;  %v2286_v55 = vld [vmem:[%s21382_s0 + $0x180] sm:$0xff]  ;;  %v17866_v57 = vld [vmem:[%s21382_s0 + $0x90] sm:$0xff] }
 0x235   : > { %9310 = vmatprep.subr.bf16.mxu1 %v13947_v21  ;;  %v13995_v60 = vld [vmem:[%s17665_s14 + $0x4c4] ss:$16 sps:$4 sm:$0xff]   ;;  %v17750_v62 = vcombine.high %v2270_v54, %v2286_v55  ;;  %v13993_v0 = vld [vmem:[%s17665_s14 + $0x4c0] ss:$16 sps:$4 sm:$0xff]   ;;  %v17768_v6 = vcombine.low %v2270_v54, %v2286_v55 }
 0x236   : > { %v13998_v61 = vld [vmem:[%s17665_s14 + $0x6c4] ss:$16 sps:$4 sm:$0xff]   ;;  %v13996_v1 = vld [vmem:[%s17665_s14 + $0x6c0] ss:$16 sps:$4 sm:$0xff]  }
 0x237   : > { %9228 = vmatpush2.bf16.msra.mxu0 %v13949_v22  ;;  %v14001_v2 = vld [vmem:[%s17665_s14 + $0x4a4] ss:$16 sps:$4 sm:$0xff]   ;;  %v13999_v10 = vld [vmem:[%s17665_s14 + $0x4a0] ss:$16 sps:$4 sm:$0xff]  }
 0x238   : > { %9311 = vmatpush2.bf16.msra.mxu1 %v13950_v23  ;;  %9229 = vmatprep.subr.bf16.mxu0 %v13951_v24  ;;  %v14004_v3 = vld [vmem:[%s17665_s14 + $0x6a4] ss:$16 sps:$4 sm:$0xff]   ;;  %v14002_v11 = vld [vmem:[%s17665_s14 + $0x6a0] ss:$16 sps:$4 sm:$0xff]   ;;  %v17801_v24 = vcombine.low %v2303_v8, %v2319_v9 }
 0x239   : > { %9312 = vmatprep.subr.bf16.mxu1 %v13953_v25  ;;  %v2302_v4 = vld [vmem:[%s21382_s0 + $0x200] sm:$0xff] }
 0x23a   : > { %v2318_v5 = vld [vmem:[%s21382_s0 + $0x280] sm:$0xff] }
 0x23b   : > { %9230 = vmatpush2.bf16.msra.mxu0 %v13955_v26  ;;  %v14007_v12 = vld [vmem:[%s17665_s14 + $0x484] ss:$16 sps:$4 sm:$0xff]   ;;  %v17782_v14 = vcombine.high %v2302_v4, %v2318_v5  ;;  %v14005_v16 = vld [vmem:[%s17665_s14 + $0x480] ss:$16 sps:$4 sm:$0xff]   ;;  %v17799_v23 = vcombine.low %v2302_v4, %v2318_v5  ;;  %v2335_v26 = vld [vmem:[%s21382_s0 + $0x308] sm:$0xff]  ;;  %v17888_v4 = vcombine.high %v17861_v56, %v17866_v57 }
 0x23c   : > { %9313 = vmatpush2.bf16.msra.mxu1 %v13956_v27  ;;  %9231 = vmatprep.subr.bf16.mxu0 %v13957_v28  ;;  %v14010_v13 = vld [vmem:[%s17665_s14 + $0x684] ss:$16 sps:$4 sm:$0xff]   ;;  %v14008_v17 = vld [vmem:[%s17665_s14 + $0x680] ss:$16 sps:$4 sm:$0xff]   ;;  %v2351_v27 = vld [vmem:[%s21382_s0 + $0x388] sm:$0xff] }
 0x23d   : > { %9314 = vmatprep.subr.bf16.mxu1 %v13959_v29  ;;  %v14013_v18 = vld [vmem:[%s17665_s14 + $0x464] ss:$16 sps:$4 sm:$0xff]   ;;  %v14011_v20 = vld [vmem:[%s17665_s14 + $0x460] ss:$16 sps:$4 sm:$0xff]  }
 0x23e   : > { %v14016_v19 = vld [vmem:[%s17665_s14 + $0x664] ss:$16 sps:$4 sm:$0xff]   ;;  %v14014_v21 = vld [vmem:[%s17665_s14 + $0x660] ss:$16 sps:$4 sm:$0xff]  }
 0x23f   : > { %9232 = vmatpush2.bf16.msra.mxu0 %v13961_v30  ;;  %v2334_v22 = vld [vmem:[%s21382_s0 + $0x300] sm:$0xff] }
 0x240   : > { %9315 = vmatpush2.bf16.msra.mxu1 %v13962_v31  ;;  %9233 = vmatprep.subr.bf16.mxu0 %v13963_v32  ;;  %v2350_v25 = vld [vmem:[%s21382_s0 + $0x380] sm:$0xff]  ;;  %v17816_v31 = vcombine.high %v2335_v26, %v2351_v27 }
 0x241   : > { %9316 = vmatprep.subr.bf16.mxu1 %v13965_v33  ;;  %v14019_v28 = vld [vmem:[%s17665_s14 + $0x444] ss:$16 sps:$4 sm:$0xff]   ;;  %v17814_v30 = vcombine.high %v2334_v22, %v2350_v25  ;;  %v14017_v32 = vld [vmem:[%s17665_s14 + $0x440] ss:$16 sps:$4 sm:$0xff]  }
 0x242   : > { %v14022_v29 = vld [vmem:[%s17665_s14 + $0x644] ss:$16 sps:$4 sm:$0xff]   ;;  %v14020_v33 = vld [vmem:[%s17665_s14 + $0x640] ss:$16 sps:$4 sm:$0xff]  }
 0x243   : > { %9234 = vmatpush2.bf16.msra.mxu0 %v13967_v34  ;;  %v14025_v34 = vld [vmem:[%s17665_s14 + $0x424] ss:$16 sps:$4 sm:$0xff]   ;;  %v14041_v8 = vld [vmem:[%s17665_s14 + $0x5c0] ss:$16 sps:$4 sm:$0xff]  }
 0x244   : > { %9317 = vmatpush2.bf16.msra.mxu1 %v13968_v35  ;;  %9235 = vmatprep.subr.bf16.mxu0 %v13969_v36  ;;  %v14028_v35 = vld [vmem:[%s17665_s14 + $0x624] ss:$16 sps:$4 sm:$0xff]   ;;  %v14044_v9 = vld [vmem:[%s17665_s14 + $0x7c0] ss:$16 sps:$4 sm:$0xff]  }
 0x245   : > { %9318 = vmatprep.subr.bf16.mxu1 %v13971_v37  ;;  %v2366_v36 = vld [vmem:[%s21382_s0 + $0x400] sm:$0xff] }
 0x246   : > { %v2382_v37 = vld [vmem:[%s21382_s0 + $0x480] sm:$0xff] }
 0x247   : > { %9236 = vmatpush2.bf16.msra.mxu0 %v13973_v38  ;;  %v17832_v38 = vcombine.low %v2334_v22, %v2350_v25  ;;  %v14037_v54 = vld [vmem:[%s17665_s14 + $0x5e4] ss:$16 sps:$4 sm:$0xff]   ;;  %v14059_v22 = vld [vmem:[%s17665_s14 + $0x560] ss:$16 sps:$4 sm:$0xff]  }
 0x248   : > { %9319 = vmatpush2.bf16.msra.mxu1 %v13974_v39  ;;  %9237 = vmatprep.subr.bf16.mxu0 %v13975_v40  ;;  %v17834_v39 = vcombine.low %v2335_v26, %v2351_v27  ;;  %v2367_v40 = vld [vmem:[%s21382_s0 + $0x408] sm:$0xff]  ;;  %v14040_v55 = vld [vmem:[%s17665_s14 + $0x7e4] ss:$16 sps:$4 sm:$0xff]   ;;  %v14062_v25 = vld [vmem:[%s17665_s14 + $0x760] ss:$16 sps:$4 sm:$0xff]  }
 0x249   : > { %9320 = vmatprep.subr.bf16.mxu1 %v13977_v41  ;;  %v2383_v41 = vld [vmem:[%s21382_s0 + $0x488] sm:$0xff]  ;;  %v14067_v26 = vld [vmem:[%s17665_s14 + $0x544] ss:$16 sps:$4 sm:$0xff]  }
 0x24a   : > { %v14070_v27 = vld [vmem:[%s17665_s14 + $0x744] ss:$16 sps:$4 sm:$0xff]  }
 0x24b   : > { %9238 = vmatpush2.bf16.msra.mxu0 %v13979_v42  ;;  %v14023_v42 = vld [vmem:[%s17665_s14 + $0x420] ss:$16 sps:$4 sm:$0xff]  }
 0x24c   : > { %9321 = vmatpush2.bf16.msra.mxu1 %v13980_v45  ;;  %9239 = vmatprep.subr.bf16.mxu0 %v13981_v48  ;;  %v14026_v45 = vld [vmem:[%s17665_s14 + $0x620] ss:$16 sps:$4 sm:$0xff]   ;;  %v14031_v48 = vld [vmem:[%s17665_s14 + $0x404] ss:$16 sps:$4 sm:$0xff]  }
 0x24d   : > { %9322 = vmatprep.subr.bf16.mxu1 %v13983_v49  ;;  %v14034_v49 = vld [vmem:[%s17665_s14 + $0x604] ss:$16 sps:$4 sm:$0xff]  }
 0x24f   : > { %9240 = vmatpush2.bf16.msra.mxu0 %v13985_v50  ;;  %v17846_v50 = vcombine.high %v2366_v36, %v2382_v37 }
 0x250   : > { %9323 = vmatpush2.bf16.msra.mxu1 %v13986_v51  ;;  %9375 = vmatprep.subr.bf16.mxu0 %v13989_v52  ;;  %v17848_v51 = vcombine.high %v2367_v40, %v2383_v41  ;;  %v14029_v52 = vld [vmem:[%s17665_s14 + $0x400] ss:$16 sps:$4 sm:$0xff]  }
 0x251   : > { %9458 = vmatprep.subr.bf16.mxu1 %v13992_v53  ;;  %v14032_v53 = vld [vmem:[%s17665_s14 + $0x600] ss:$16 sps:$4 sm:$0xff]  }
 0x252   : > { %9242 = vmatmul.mubr.bf16.vlgmr.msra.gmra.mxu0 %v17653_v43 }
 0x253   : > { %9325 = vmatmul.mubr.bf16.vlgmr.msra.gmra.mxu1 %v17660_v46  ;;  %9376 = vmatpush1.bf16.msra.mxu0 %v13987_v58  ;;  %v17871_v58 = vld [vmem:[%s21382_s0 + $0x18] sm:$0xff] }
 0x254   : > { %9459 = vmatpush1.bf16.msra.mxu1 %v13990_v59  ;;  %9377 = vmatprep.subr.bf16.mxu0 %v13995_v60  ;;  %v17873_v59 = vcombine.low %v2366_v36, %v2382_v37  ;;  %v17875_v60 = vcombine.low %v2367_v40, %v2383_v41  ;;  %v14079_v36 = vld [vmem:[%s17665_s14 + $0x504] ss:$16 sps:$4 sm:$0xff]   ;;  %v14077_v40 = vld [vmem:[%s17665_s14 + $0x500] ss:$16 sps:$4 sm:$0xff]  }
 0x255   : > { %9460 = vmatprep.subr.bf16.mxu1 %v13998_v61  ;;  %9251 = vmatprep.mubr.bf16.mxu0 %v17750_v62  ;;  %v17880_v61 = vld [vmem:[%s21382_s0 + $0x98] sm:$0xff]  ;;  %v14082_v37 = vld [vmem:[%s17665_s14 + $0x704] ss:$16 sps:$4 sm:$0xff]   ;;  %v14080_v41 = vld [vmem:[%s17665_s14 + $0x700] ss:$16 sps:$4 sm:$0xff]  }
 0x256   : > { %9334 = vmatprep.mubr.bf16.mxu1 %v17752_v63  ;;  %v17892_v5 = vcombine.high %v17871_v58, %v17880_v61 }
 0x257   : > { %9378 = vmatpush1.bf16.msra.mxu0 %v13993_v0  ;;  %v14035_v0 = vld [vmem:[%s17665_s14 + $0x5e0] ss:$16 sps:$4 sm:$0xff]  }
 0x258   : > { %9461 = vmatpush1.bf16.msra.mxu1 %v13996_v1  ;;  %9379 = vmatprep.subr.bf16.mxu0 %v14001_v2  ;;  %v14038_v1 = vld [vmem:[%s17665_s14 + $0x7e0] ss:$16 sps:$4 sm:$0xff]   ;;  %v14043_v2 = vld [vmem:[%s17665_s14 + $0x5c4] ss:$16 sps:$4 sm:$0xff]  }
 0x259   : > { %9462 = vmatprep.subr.bf16.mxu1 %v14004_v3  ;;  %v14046_v3 = vld [vmem:[%s17665_s14 + $0x7c4] ss:$16 sps:$4 sm:$0xff]  }
 0x25a   : > { %9252 = vmatmul.mubr.bf16.gmra.mxu0 %v17768_v6 }
 0x25b   : > { %9335 = vmatmul.mubr.bf16.gmra.mxu1 %v17770_v7  ;;  %9380 = vmatpush1.bf16.msra.mxu0 %v13999_v10  ;;  %v14049_v10 = vld [vmem:[%s17665_s14 + $0x5a4] ss:$16 sps:$4 sm:$0xff]  }
 0x25c   : > { %9463 = vmatpush1.bf16.msra.mxu1 %v14002_v11  ;;  %9381 = vmatprep.subr.bf16.mxu0 %v14007_v12  ;;  %v14052_v11 = vld [vmem:[%s17665_s14 + $0x7a4] ss:$16 sps:$4 sm:$0xff]   ;;  %v14047_v12 = vld [vmem:[%s17665_s14 + $0x5a0] ss:$16 sps:$4 sm:$0xff]  }
 0x25d   : > { %9464 = vmatprep.subr.bf16.mxu1 %v14010_v13  ;;  %9261 = vmatprep.mubr.bf16.mxu0 %v17782_v14  ;;  %v14050_v13 = vld [vmem:[%s17665_s14 + $0x7a0] ss:$16 sps:$4 sm:$0xff]  }
 0x25e   : > { %9344 = vmatprep.mubr.bf16.mxu1 %v17784_v15 }
 0x25f   : > { %9382 = vmatpush1.bf16.msra.mxu0 %v14005_v16  ;;  %v14055_v16 = vld [vmem:[%s17665_s14 + $0x584] ss:$16 sps:$4 sm:$0xff]  }
 0x260   : > { %9465 = vmatpush1.bf16.msra.mxu1 %v14008_v17  ;;  %9383 = vmatprep.subr.bf16.mxu0 %v14013_v18  ;;  %v14058_v17 = vld [vmem:[%s17665_s14 + $0x784] ss:$16 sps:$4 sm:$0xff]   ;;  %v14053_v18 = vld [vmem:[%s17665_s14 + $0x580] ss:$16 sps:$4 sm:$0xff]  }
 0x261   : > { %9466 = vmatprep.subr.bf16.mxu1 %v14016_v19  ;;  %v14056_v19 = vld [vmem:[%s17665_s14 + $0x780] ss:$16 sps:$4 sm:$0xff]  }
 0x262   : > { %9262 = vmatmul.mubr.bf16.gmra.mxu0 %v17799_v23 }
 0x263   : > { %9345 = vmatmul.mubr.bf16.gmra.mxu1 %v17801_v24  ;;  %9384 = vmatpush1.bf16.msra.mxu0 %v14011_v20  ;;  %v14061_v20 = vld [vmem:[%s17665_s14 + $0x564] ss:$16 sps:$4 sm:$0xff]  }
 0x264   : > { %9467 = vmatpush1.bf16.msra.mxu1 %v14014_v21  ;;  %9385 = vmatprep.subr.bf16.mxu0 %v14019_v28  ;;  %v14064_v21 = vld [vmem:[%s17665_s14 + $0x764] ss:$16 sps:$4 sm:$0xff]   ;;  %v14065_v28 = vld [vmem:[%s17665_s14 + $0x540] ss:$16 sps:$4 sm:$0xff]  }
 0x265   : > { %9468 = vmatprep.subr.bf16.mxu1 %v14022_v29  ;;  %9271 = vmatprep.mubr.bf16.mxu0 %v17814_v30  ;;  %v14068_v29 = vld [vmem:[%s17665_s14 + $0x740] ss:$16 sps:$4 sm:$0xff]  }
 0x266   : > { %9354 = vmatprep.mubr.bf16.mxu1 %v17816_v31 }
 0x267   : > { %9386 = vmatpush1.bf16.msra.mxu0 %v14017_v32  ;;  %v14073_v32 = vld [vmem:[%s17665_s14 + $0x524] ss:$16 sps:$4 sm:$0xff]  }
 0x268   : > { %9469 = vmatpush1.bf16.msra.mxu1 %v14020_v33  ;;  %9387 = vmatprep.subr.bf16.mxu0 %v14025_v34  ;;  %v14076_v33 = vld [vmem:[%s17665_s14 + $0x724] ss:$16 sps:$4 sm:$0xff]   ;;  %v14071_v34 = vld [vmem:[%s17665_s14 + $0x520] ss:$16 sps:$4 sm:$0xff]  }
 0x269   : > { %9470 = vmatprep.subr.bf16.mxu1 %v14028_v35  ;;  %v14074_v35 = vld [vmem:[%s17665_s14 + $0x720] ss:$16 sps:$4 sm:$0xff]  }
 0x26a   : > { %9272 = vmatmul.mubr.bf16.gmra.mxu0 %v17832_v38 }
 0x26b   : > { %9355 = vmatmul.mubr.bf16.gmra.mxu1 %v17834_v39  ;;  %9388 = vmatpush1.bf16.msra.mxu0 %v14023_v42  ;;  %v14085_v42 = vld [vmem:[%s17665_s14 + $0x8e4] ss:$16 sps:$4 sm:$0xff]  }
 0x26c   : > { %9471 = vmatpush1.bf16.msra.mxu1 %v14026_v45  ;;  %9389 = vmatprep.subr.bf16.mxu0 %v14031_v48  ;;  %v14088_v45 = vld [vmem:[%s17665_s14 + $0xae4] ss:$16 sps:$4 sm:$0xff]   ;;  %v14083_v48 = vld [vmem:[%s17665_s14 + $0x8e0] ss:$16 sps:$4 sm:$0xff]  }
 0x26d   : > { %9472 = vmatprep.subr.bf16.mxu1 %v14034_v49  ;;  %9281 = vmatprep.mubr.bf16.mxu0 %v17846_v50  ;;  %v14086_v49 = vld [vmem:[%s17665_s14 + $0xae0] ss:$16 sps:$4 sm:$0xff]  }
 0x26e   : > { %9364 = vmatprep.mubr.bf16.mxu1 %v17848_v51 }
 0x26f   : > { %9390 = vmatpush1.bf16.msra.mxu0 %v14029_v52  ;;  %v2272_v52 = vld [vmem:[%s21382_s0 + $0x110] sm:$0xff] }
 0x270   : > { %9473 = vmatpush1.bf16.msra.mxu1 %v14032_v53  ;;  %9391 = vmatprep.subr.bf16.mxu0 %v14037_v54  ;;  %v2288_v53 = vld [vmem:[%s21382_s0 + $0x190] sm:$0xff]  ;;  %v17936_v54 = vcombine.low %v17861_v56, %v17866_v57 }
 0x271   : > { %9474 = vmatprep.subr.bf16.mxu1 %v14040_v55  ;;  %v17940_v55 = vcombine.low %v17871_v58, %v17880_v61  ;;  %v14094_v56 = vld [vmem:[%s17665_s14 + $0xac4] ss:$16 sps:$4 sm:$0xff]   ;;  %v17950_v57 = vcombine.high %v2272_v52, %v2288_v53  ;;  %v14089_v61 = vld [vmem:[%s17665_s14 + $0x8c0] ss:$16 sps:$4 sm:$0xff]  }
 0x272   : > { %9282 = vmatmul.mubr.bf16.gmra.mxu0 %v17873_v59 }
 0x273   : > { %9365 = vmatmul.mubr.bf16.gmra.mxu1 %v17875_v60  ;;  %9392 = vmatpush2.bf16.msra.mxu0 %v14035_v0  ;;  %21540 = vst [vmem:[#allocation3_spill] sm:$0xff] %v17940_v55  ;;  %v2273_v0 = vld [vmem:[%s21382_s0 + $0x118] sm:$0xff]  ;;  %21541 = vst [vmem:[#allocation4_spill] sm:$0xff] %v17950_v57 }
 0x274   : > { %9475 = vmatpush2.bf16.msra.mxu1 %v14038_v1  ;;  %9393 = vmatprep.subr.bf16.mxu0 %v14043_v2  ;;  %v2289_v1 = vld [vmem:[%s21382_s0 + $0x198] sm:$0xff]  ;;  %v14091_v2 = vld [vmem:[%s17665_s14 + $0x8c4] ss:$16 sps:$4 sm:$0xff]  }
 0x275   : > { %9476 = vmatprep.subr.bf16.mxu1 %v14046_v3  ;;  %9407 = vmatprep.mubr.bf16.mxu0 %v17888_v4  ;;  %v17952_v58 = vcombine.high %v2273_v0, %v2289_v1  ;;  %v14092_v3 = vld [vmem:[%s17665_s14 + $0xac0] ss:$16 sps:$4 sm:$0xff]  }
 0x276   : > { %9490 = vmatprep.mubr.bf16.mxu1 %v17892_v5 }
 0x277   : > { %9394 = vmatpush2.bf16.msra.mxu0 %v14041_v8  ;;  %21542 = vst [vmem:[#allocation5_spill] sm:$0xff] %v17952_v58  ;;  %v14097_v8 = vld [vmem:[%s17665_s14 + $0x8a4] ss:$16 sps:$4 sm:$0xff]  }
 0x278   : > { %9477 = vmatpush2.bf16.msra.mxu1 %v14044_v9  ;;  %9395 = vmatprep.subr.bf16.mxu0 %v14049_v10  ;;  %v14100_v9 = vld [vmem:[%s17665_s14 + $0xaa4] ss:$16 sps:$4 sm:$0xff]   ;;  %v14095_v10 = vld [vmem:[%s17665_s14 + $0x8a0] ss:$16 sps:$4 sm:$0xff]  }
 0x279   : > { %9478 = vmatprep.subr.bf16.mxu1 %v14052_v11  ;;  %v2304_v11 = vld [vmem:[%s21382_s0 + $0x210] sm:$0xff] }
 0x27b   : > { %9396 = vmatpush2.bf16.msra.mxu0 %v14047_v12  ;;  %v2320_v12 = vld [vmem:[%s21382_s0 + $0x290] sm:$0xff] }
 0x27c   : > { %9479 = vmatpush2.bf16.msra.mxu1 %v14050_v13  ;;  %9397 = vmatprep.subr.bf16.mxu0 %v14055_v16  ;;  %v17969_v13 = vcombine.low %v2272_v52, %v2288_v53  ;;  %v17971_v16 = vcombine.low %v2273_v0, %v2289_v1  ;;  %v14113_v52 = vld [vmem:[%s17665_s14 + $0x840] ss:$16 sps:$4 sm:$0xff]   ;;  %v14121_v0 = vld [vmem:[%s17665_s14 + $0x824] ss:$16 sps:$4 sm:$0xff]  }
 0x27d   : > { %9480 = vmatprep.subr.bf16.mxu1 %v14058_v17  ;;  %v2305_v17 = vld [vmem:[%s21382_s0 + $0x218] sm:$0xff]  ;;  %v14116_v53 = vld [vmem:[%s17665_s14 + $0xa40] ss:$16 sps:$4 sm:$0xff]   ;;  %v14124_v1 = vld [vmem:[%s17665_s14 + $0xa24] ss:$16 sps:$4 sm:$0xff]  }
 0x27e   : > { %21543 = vst [vmem:[#allocation6_spill] sm:$0xff] %v17969_v13  ;;  %21544 = vst [vmem:[#allocation7_spill] sm:$0xff] %v17971_v16 }
 0x27f   : > { %9398 = vmatpush2.bf16.msra.mxu0 %v14053_v18  ;;  %v2321_v18 = vld [vmem:[%s21382_s0 + $0x298] sm:$0xff] }
 0x280   : > { %9481 = vmatpush2.bf16.msra.mxu1 %v14056_v19  ;;  %9399 = vmatprep.subr.bf16.mxu0 %v14061_v20  ;;  %v14098_v19 = vld [vmem:[%s17665_s14 + $0xaa0] ss:$16 sps:$4 sm:$0xff]   ;;  %v14103_v20 = vld [vmem:[%s17665_s14 + $0x884] ss:$16 sps:$4 sm:$0xff]  }
 0x281   : > { %9482 = vmatprep.subr.bf16.mxu1 %v14064_v21  ;;  %v14106_v21 = vld [vmem:[%s17665_s14 + $0xa84] ss:$16 sps:$4 sm:$0xff]  }
 0x283   : > { %9400 = vmatpush2.bf16.msra.mxu0 %v14059_v22  ;;  %v17982_v22 = vcombine.high %v2304_v11, %v2320_v12 }
 0x284   : > { %9483 = vmatpush2.bf16.msra.mxu1 %v14062_v25  ;;  %9401 = vmatprep.subr.bf16.mxu0 %v14067_v26  ;;  %v17984_v25 = vcombine.high %v2305_v17, %v2321_v18  ;;  %v14101_v26 = vld [vmem:[%s17665_s14 + $0x880] ss:$16 sps:$4 sm:$0xff]  }
 0x285   : > { %9484 = vmatprep.subr.bf16.mxu1 %v14070_v27  ;;  %21545 = vst [vmem:[#allocation8_spill] sm:$0xff] %v17982_v22  ;;  %v14104_v27 = vld [vmem:[%s17665_s14 + $0xa80] ss:$16 sps:$4 sm:$0xff]  }
 0x286   : > { %21546 = vst [vmem:[#allocation9_spill] sm:$0xff] %v17984_v25 }
 0x287   : > { %9402 = vmatpush2.bf16.msra.mxu0 %v14065_v28  ;;  %v14109_v28 = vld [vmem:[%s17665_s14 + $0x864] ss:$16 sps:$4 sm:$0xff]  }
 0x288   : > { %9485 = vmatpush2.bf16.msra.mxu1 %v14068_v29  ;;  %9403 = vmatprep.subr.bf16.mxu0 %v14073_v32  ;;  %v14112_v29 = vld [vmem:[%s17665_s14 + $0xa64] ss:$16 sps:$4 sm:$0xff]  }
 0x289   : > { %9486 = vmatprep.subr.bf16.mxu1 %v14076_v33  ;;  %v2336_v32 = vld [vmem:[%s21382_s0 + $0x310] sm:$0xff] }
 0x28a   : > { %v2352_v33 = vld [vmem:[%s21382_s0 + $0x390] sm:$0xff] }
 0x28b   : > { %9404 = vmatpush2.bf16.msra.mxu0 %v14071_v34  ;;  %v18000_v34 = vcombine.low %v2304_v11, %v2320_v12  ;;  %v14122_v11 = vld [vmem:[%s17665_s14 + $0xa20] ss:$16 sps:$4 sm:$0xff]   ;;  %v14127_v12 = vld [vmem:[%s17665_s14 + $0x804] ss:$16 sps:$4 sm:$0xff]  }
 0x28c   : > { %9487 = vmatpush2.bf16.msra.mxu1 %v14074_v35  ;;  %9405 = vmatprep.subr.bf16.mxu0 %v14079_v36  ;;  %v18002_v35 = vcombine.low %v2305_v17, %v2321_v18  ;;  %v2337_v36 = vld [vmem:[%s21382_s0 + $0x318] sm:$0xff]  ;;  %v14130_v17 = vld [vmem:[%s17665_s14 + $0xa04] ss:$16 sps:$4 sm:$0xff]  }
 0x28d   : > { %9488 = vmatprep.subr.bf16.mxu1 %v14082_v37  ;;  %21547 = vst [vmem:[#allocation10_spill] sm:$0xff] %v18000_v34  ;;  %v2353_v37 = vld [vmem:[%s21382_s0 + $0x398] sm:$0xff] }
 0x28e   : > { %21548 = vst [vmem:[#allocation11_spill] sm:$0xff] %v18002_v35 }
 0x28f   : > { %9406 = vmatpush2.bf16.msra.mxu0 %v14077_v40  ;;  %v14107_v40 = vld [vmem:[%s17665_s14 + $0x860] ss:$16 sps:$4 sm:$0xff]  }
 0x290   : > { %9489 = vmatpush2.bf16.msra.mxu1 %v14080_v41  ;;  %9541 = vmatprep.subr.bf16.mxu0 %v14085_v42  ;;  %v14110_v41 = vld [vmem:[%s17665_s14 + $0xa60] ss:$16 sps:$4 sm:$0xff]   ;;  %v14115_v42 = vld [vmem:[%s17665_s14 + $0x844] ss:$16 sps:$4 sm:$0xff]  }
 0x291   : > { %9624 = vmatprep.subr.bf16.mxu1 %v14088_v45  ;;  %v14118_v45 = vld [vmem:[%s17665_s14 + $0xa44] ss:$16 sps:$4 sm:$0xff]  }
 0x292   : > { %9408 = vmatmul.mubr.bf16.vlgmr.msra.gmra.mxu0 %v17936_v54 }
 0x293   : > { %9491 = vmatmul.mubr.bf16.vlgmr.msra.gmra.mxu1 %v17940_v55  ;;  %9542 = vmatpush1.bf16.msra.mxu0 %v14083_v48  ;;  %v18014_v48 = vcombine.high %v2336_v32, %v2352_v33 }
 0x294   : > { %9625 = vmatpush1.bf16.msra.mxu1 %v14086_v49  ;;  %9543 = vmatprep.subr.bf16.mxu0 %v14091_v2  ;;  %v18016_v49 = vcombine.high %v2337_v36, %v2353_v37  ;;  %v2368_v2 = vld [vmem:[%s21382_s0 + $0x410] sm:$0xff] }
 0x295   : > { %9626 = vmatprep.subr.bf16.mxu1 %v14094_v56  ;;  %9417 = vmatprep.mubr.bf16.mxu0 %v17950_v57  ;;  %21549 = vst [vmem:[#allocation12_spill] sm:$0xff] %v18014_v48  ;;  %v2384_v56 = vld [vmem:[%s21382_s0 + $0x490] sm:$0xff] }
 0x296   : > { %9500 = vmatprep.mubr.bf16.mxu1 %v17952_v58  ;;  %21550 = vst [vmem:[#allocation13_spill] sm:$0xff] %v18016_v49  ;;  %v18046_v18 = vcombine.high %v2368_v2, %v2384_v56 }
 0x297   : > { %9544 = vmatpush1.bf16.msra.mxu0 %v14089_v61  ;;  %v2369_v61 = vld [vmem:[%s21382_s0 + $0x418] sm:$0xff] }
 0x298   : > { %9627 = vmatpush1.bf16.msra.mxu1 %v14092_v3  ;;  %9545 = vmatprep.subr.bf16.mxu0 %v14097_v8  ;;  %v18035_v3 = vcombine.low %v2336_v32, %v2352_v33  ;;  %v18037_v8 = vcombine.low %v2337_v36, %v2353_v37  ;;  %21553 = vst [vmem:[#allocation16_spill] sm:$0xff] %v18046_v18  ;;  %v18071_v32 = vld [vmem:[%s21382_s0 + $0x28] sm:$0xff] }
 0x299   : > { %9628 = vmatprep.subr.bf16.mxu1 %v14100_v9  ;;  %v2385_v9 = vld [vmem:[%s21382_s0 + $0x498] sm:$0xff]  ;;  %v18073_v33 = vcombine.low %v2368_v2, %v2384_v56  ;;  %v18080_v37 = vld [vmem:[%s21382_s0 + $0xa8] sm:$0xff]  ;;  %v14145_v2 = vld [vmem:[%s17665_s14 + $0x9a4] ss:$16 sps:$4 sm:$0xff]  }
 0x29a   : > { %9418 = vmatmul.mubr.bf16.gmra.mxu0 %v17969_v13  ;;  %21551 = vst [vmem:[#allocation14_spill] sm:$0xff] %v18035_v3  ;;  %21552 = vst [vmem:[#allocation15_spill] sm:$0xff] %v18037_v8  ;;  %v18075_v36 = vcombine.low %v2369_v61, %v2385_v9  ;;  %v14148_v56 = vld [vmem:[%s17665_s14 + $0xba4] ss:$16 sps:$4 sm:$0xff]  }
 0x29b   : > { %9501 = vmatmul.mubr.bf16.gmra.mxu1 %v17971_v16  ;;  %9546 = vmatpush1.bf16.msra.mxu0 %v14095_v10  ;;  %v14119_v10 = vld [vmem:[%s17665_s14 + $0x820] ss:$16 sps:$4 sm:$0xff]   ;;  %21555 = vst [vmem:[#allocation18_spill] sm:$0xff] %v18073_v33  ;;  %v14586_v13 = vld [vmem:[%s17665_s14 + $0x1e84] ss:$16 sps:$4 sm:$0xff]  }
 0x29c   : > { %9629 = vmatpush1.bf16.msra.mxu1 %v14098_v19  ;;  %9547 = vmatprep.subr.bf16.mxu0 %v14103_v20  ;;  %v18048_v19 = vcombine.high %v2369_v61, %v2385_v9  ;;  %v14125_v20 = vld [vmem:[%s17665_s14 + $0x800] ss:$16 sps:$4 sm:$0xff]   ;;  %21556 = vst [vmem:[#allocation19_spill] sm:$0xff] %v18075_v36 }
 0x29d   : > { %9630 = vmatprep.subr.bf16.mxu1 %v14106_v21  ;;  %9427 = vmatprep.mubr.bf16.mxu0 %v17982_v22  ;;  %v14128_v21 = vld [vmem:[%s17665_s14 + $0xa00] ss:$16 sps:$4 sm:$0xff]  }
 0x29e   : > { %9510 = vmatprep.mubr.bf16.mxu1 %v17984_v25  ;;  %21554 = vst [vmem:[#allocation17_spill] sm:$0xff] %v18048_v19  ;;  %v14143_v61 = vld [vmem:[%s17665_s14 + $0x9a0] ss:$16 sps:$4 sm:$0xff]  }
 0x29f   : > { %9548 = vmatpush1.bf16.msra.mxu0 %v14101_v26  ;;  %v14133_v26 = vld [vmem:[%s17665_s14 + $0x9e4] ss:$16 sps:$4 sm:$0xff]   ;;  %v14146_v9 = vld [vmem:[%s17665_s14 + $0xba0] ss:$16 sps:$4 sm:$0xff]  }
 0x2a0   : > { %9631 = vmatpush1.bf16.msra.mxu1 %v14104_v27  ;;  %9549 = vmatprep.subr.bf16.mxu0 %v14109_v28  ;;  %v14136_v27 = vld [vmem:[%s17665_s14 + $0xbe4] ss:$16 sps:$4 sm:$0xff]   ;;  %v14494_v22 = vld [vmem:[%s17665_s14 + $0x1a60] ss:$16 sps:$4 sm:$0xff]  }
 0x2a1   : > { %9632 = vmatprep.subr.bf16.mxu1 %v14112_v29  ;;  %v18059_v28 = vld [vmem:[%s21382_s0 + $0x20] sm:$0xff] }
 0x2a2   : > { %9428 = vmatmul.mubr.bf16.gmra.mxu0 %v18000_v34  ;;  %v18064_v29 = vld [vmem:[%s21382_s0 + $0xa0] sm:$0xff] }
 0x2a3   : > { %9511 = vmatmul.mubr.bf16.gmra.mxu1 %v18002_v35  ;;  %9550 = vmatpush1.bf16.msra.mxu0 %v14107_v40  ;;  %v14131_v40 = vld [vmem:[%s17665_s14 + $0x9e0] ss:$16 sps:$4 sm:$0xff]  }
 0x2a4   : > { %9633 = vmatpush1.bf16.msra.mxu1 %v14110_v41  ;;  %9551 = vmatprep.subr.bf16.mxu0 %v14115_v42  ;;  %v14134_v41 = vld [vmem:[%s17665_s14 + $0xbe0] ss:$16 sps:$4 sm:$0xff]   ;;  %v14139_v42 = vld [vmem:[%s17665_s14 + $0x9c4] ss:$16 sps:$4 sm:$0xff]  }
 0x2a5   : > { %9634 = vmatprep.subr.bf16.mxu1 %v14118_v45  ;;  %9437 = vmatprep.mubr.bf16.mxu0 %v18014_v48  ;;  %v14142_v45 = vld [vmem:[%s17665_s14 + $0xbc4] ss:$16 sps:$4 sm:$0xff]   ;;  %v14386_v34 = vld [vmem:[%s17665_s14 + $0x16a0] ss:$16 sps:$4 sm:$0xff]  }
 0x2a6   : > { %9520 = vmatprep.mubr.bf16.mxu1 %v18016_v49 }
 0x2a7   : > { %9552 = vmatpush1.bf16.msra.mxu0 %v14113_v52  ;;  %v18088_v52 = vcombine.high %v18059_v28, %v18064_v29 }
 0x2a8   : > { %9635 = vmatpush1.bf16.msra.mxu1 %v14116_v53  ;;  %9553 = vmatprep.subr.bf16.mxu0 %v14121_v0  ;;  %v18092_v53 = vcombine.high %v18071_v32, %v18080_v37  ;;  %v14137_v0 = vld [vmem:[%s17665_s14 + $0x9c0] ss:$16 sps:$4 sm:$0xff]  }
 0x2a9   : > { %9636 = vmatprep.subr.bf16.mxu1 %v14124_v1  ;;  %21557 = vst [vmem:[#allocation20_spill] sm:$0xff] %v18088_v52  ;;  %v14140_v1 = vld [vmem:[%s17665_s14 + $0xbc0] ss:$16 sps:$4 sm:$0xff]  }
 0x2aa   : > { %9438 = vmatmul.mubr.bf16.gmra.mxu0 %v18035_v3  ;;  %21558 = vst [vmem:[#allocation21_spill] sm:$0xff] %v18092_v53  ;;  %v14388_v3 = vld [vmem:[%s17665_s14 + $0x16a4] ss:$16 sps:$4 sm:$0xff]  }
 0x2ab   : > { %9521 = vmatmul.mubr.bf16.gmra.mxu1 %v18037_v8  ;;  %9554 = vmatpush1.bf16.msra.mxu0 %v14119_v10  ;;  %v14151_v10 = vld [vmem:[%s17665_s14 + $0x984] ss:$16 sps:$4 sm:$0xff]  }
 0x2ac   : > { %9637 = vmatpush1.bf16.msra.mxu1 %v14122_v11  ;;  %9555 = vmatprep.subr.bf16.mxu0 %v14127_v12  ;;  %v14154_v11 = vld [vmem:[%s17665_s14 + $0xb84] ss:$16 sps:$4 sm:$0xff]   ;;  %v14149_v12 = vld [vmem:[%s17665_s14 + $0x980] ss:$16 sps:$4 sm:$0xff]  }
 0x2ad   : > { %9638 = vmatprep.subr.bf16.mxu1 %v14130_v17  ;;  %9447 = vmatprep.mubr.bf16.mxu0 %v18046_v18  ;;  %v14152_v17 = vld [vmem:[%s17665_s14 + $0xb80] ss:$16 sps:$4 sm:$0xff]  }
 0x2ae   : > { %9530 = vmatprep.mubr.bf16.mxu1 %v18048_v19 }
 0x2af   : > { %9556 = vmatpush1.bf16.msra.mxu0 %v14125_v20  ;;  %v14157_v20 = vld [vmem:[%s17665_s14 + $0x964] ss:$16 sps:$4 sm:$0xff]  }
 0x2b0   : > { %9639 = vmatpush1.bf16.msra.mxu1 %v14128_v21  ;;  %9557 = vmatprep.subr.bf16.mxu0 %v14133_v26  ;;  %v14160_v21 = vld [vmem:[%s17665_s14 + $0xb64] ss:$16 sps:$4 sm:$0xff]   ;;  %v14155_v26 = vld [vmem:[%s17665_s14 + $0x960] ss:$16 sps:$4 sm:$0xff]  }
 0x2b1   : > { %9640 = vmatprep.subr.bf16.mxu1 %v14136_v27  ;;  %v14158_v27 = vld [vmem:[%s17665_s14 + $0xb60] ss:$16 sps:$4 sm:$0xff]  }
 0x2b2   : > { %9448 = vmatmul.mubr.bf16.gmra.mxu0 %v18073_v33 }
 0x2b3   : > { %9531 = vmatmul.mubr.bf16.gmra.mxu1 %v18075_v36  ;;  %9558 = vmatpush2.bf16.msra.mxu0 %v14131_v40  ;;  %v14163_v40 = vld [vmem:[%s17665_s14 + $0x944] ss:$16 sps:$4 sm:$0xff]  }
 0x2b4   : > { %9641 = vmatpush2.bf16.msra.mxu1 %v14134_v41  ;;  %9559 = vmatprep.subr.bf16.mxu0 %v14139_v42  ;;  %v14166_v41 = vld [vmem:[%s17665_s14 + $0xb44] ss:$16 sps:$4 sm:$0xff]   ;;  %v14161_v42 = vld [vmem:[%s17665_s14 + $0x940] ss:$16 sps:$4 sm:$0xff]  }
 0x2b5   : > { %9642 = vmatprep.subr.bf16.mxu1 %v14142_v45  ;;  %9573 = vmatprep.mubr.bf16.mxu0 %v18088_v52  ;;  %v14164_v45 = vld [vmem:[%s17665_s14 + $0xb40] ss:$16 sps:$4 sm:$0xff]   ;;  %v14319_v52 = vld [vmem:[%s17665_s14 + $0x1004] ss:$16 sps:$4 sm:$0xff]  }
 0x2b6   : > { %9656 = vmatprep.mubr.bf16.mxu1 %v18092_v53 }
 0x2b7   : > { %9560 = vmatpush2.bf16.msra.mxu0 %v14137_v0  ;;  %v14169_v0 = vld [vmem:[%s17665_s14 + $0x924] ss:$16 sps:$4 sm:$0xff]  }
 0x2b8   : > { %9643 = vmatpush2.bf16.msra.mxu1 %v14140_v1  ;;  %9561 = vmatprep.subr.bf16.mxu0 %v14145_v2  ;;  %v14172_v1 = vld [vmem:[%s17665_s14 + $0xb24] ss:$16 sps:$4 sm:$0xff]   ;;  %v14167_v2 = vld [vmem:[%s17665_s14 + $0x920] ss:$16 sps:$4 sm:$0xff]  }
 0x2b9   : > { %9644 = vmatprep.subr.bf16.mxu1 %v14148_v56  ;;  %v14170_v56 = vld [vmem:[%s17665_s14 + $0xb20] ss:$16 sps:$4 sm:$0xff]  }
 0x2bb   : > { %9562 = vmatpush2.bf16.msra.mxu0 %v14143_v61  ;;  %v14175_v61 = vld [vmem:[%s17665_s14 + $0x904] ss:$16 sps:$4 sm:$0xff]  }
 0x2bc   : > { %9645 = vmatpush2.bf16.msra.mxu1 %v14146_v9  ;;  %9563 = vmatprep.subr.bf16.mxu0 %v14151_v10  ;;  %v14178_v9 = vld [vmem:[%s17665_s14 + $0xb04] ss:$16 sps:$4 sm:$0xff]   ;;  %v14173_v10 = vld [vmem:[%s17665_s14 + $0x900] ss:$16 sps:$4 sm:$0xff]  }
 0x2bd   : > { %9646 = vmatprep.subr.bf16.mxu1 %v14154_v11  ;;  %v14176_v11 = vld [vmem:[%s17665_s14 + $0xb00] ss:$16 sps:$4 sm:$0xff]  }
 0x2bf   : > { %9564 = vmatpush2.bf16.msra.mxu0 %v14149_v12  ;;  %v14181_v12 = vld [vmem:[%s17665_s14 + $0xce4] ss:$16 sps:$4 sm:$0xff]  }
 0x2c0   : > { %9647 = vmatpush2.bf16.msra.mxu1 %v14152_v17  ;;  %9565 = vmatprep.subr.bf16.mxu0 %v14157_v20  ;;  %v14184_v17 = vld [vmem:[%s17665_s14 + $0xee4] ss:$16 sps:$4 sm:$0xff]   ;;  %v14179_v20 = vld [vmem:[%s17665_s14 + $0xce0] ss:$16 sps:$4 sm:$0xff]  }
 0x2c1   : > { %9648 = vmatprep.subr.bf16.mxu1 %v14160_v21  ;;  %v2274_v21 = vld [vmem:[%s21382_s0 + $0x120] sm:$0xff] }
 0x2c3   : > { %9566 = vmatpush2.bf16.msra.mxu0 %v14155_v26  ;;  %v2290_v26 = vld [vmem:[%s21382_s0 + $0x1a0] sm:$0xff] }
 0x2c4   : > { %9649 = vmatpush2.bf16.msra.mxu1 %v14158_v27  ;;  %9567 = vmatprep.subr.bf16.mxu0 %v14163_v40  ;;  %v18135_v27 = vcombine.low %v18059_v28, %v18064_v29  ;;  %v18139_v40 = vcombine.low %v18071_v32, %v18080_v37  ;;  %v14187_v28 = vld [vmem:[%s17665_s14 + $0xcc4] ss:$16 sps:$4 sm:$0xff]   ;;  %v18150_v32 = vcombine.high %v2274_v21, %v2290_v26 }
 0x2c5   : > { %9650 = vmatprep.subr.bf16.mxu1 %v14166_v41  ;;  %v2275_v41 = vld [vmem:[%s21382_s0 + $0x128] sm:$0xff]  ;;  %v14190_v29 = vld [vmem:[%s17665_s14 + $0xec4] ss:$16 sps:$4 sm:$0xff]  }
 0x2c6   : > { %21559 = vst [vmem:[#allocation22_spill] sm:$0xff] %v18135_v27  ;;  %21560 = vst [vmem:[#allocation23_spill] sm:$0xff] %v18139_v40 }
 0x2c7   : > { %9568 = vmatpush2.bf16.msra.mxu0 %v14161_v42  ;;  %v2291_v42 = vld [vmem:[%s21382_s0 + $0x1a8] sm:$0xff]  ;;  %21561 = vst [vmem:[#allocation24_spill] sm:$0xff] %v18150_v32 }
 0x2c8   : > { %9651 = vmatpush2.bf16.msra.mxu1 %v14164_v45  ;;  %9569 = vmatprep.subr.bf16.mxu0 %v14169_v0  ;;  %v14182_v45 = vld [vmem:[%s17665_s14 + $0xee0] ss:$16 sps:$4 sm:$0xff]   ;;  %v18152_v37 = vcombine.high %v2275_v41, %v2291_v42 }
 0x2c9   : > { %9652 = vmatprep.subr.bf16.mxu1 %v14172_v1  ;;  %v14185_v0 = vld [vmem:[%s17665_s14 + $0xcc0] ss:$16 sps:$4 sm:$0xff]  }
 0x2ca   : > { %21562 = vst [vmem:[#allocation25_spill] sm:$0xff] %v18152_v37  ;;  %v14188_v1 = vld [vmem:[%s17665_s14 + $0xec0] ss:$16 sps:$4 sm:$0xff]  }
 0x2cb   : > { %9570 = vmatpush2.bf16.msra.mxu0 %v14167_v2  ;;  %v14193_v2 = vld [vmem:[%s17665_s14 + $0xca4] ss:$16 sps:$4 sm:$0xff]  }
 0x2cc   : > { %9653 = vmatpush2.bf16.msra.mxu1 %v14170_v56  ;;  %9571 = vmatprep.subr.bf16.mxu0 %v14175_v61  ;;  %v14196_v56 = vld [vmem:[%s17665_s14 + $0xea4] ss:$16 sps:$4 sm:$0xff]  }
 0x2cd   : > { %9654 = vmatprep.subr.bf16.mxu1 %v14178_v9  ;;  %v2306_v61 = vld [vmem:[%s21382_s0 + $0x220] sm:$0xff] }
 0x2ce   : > { %v2322_v9 = vld [vmem:[%s21382_s0 + $0x2a0] sm:$0xff] }
 0x2cf   : > { %9572 = vmatpush2.bf16.msra.mxu0 %v14173_v10  ;;  %v18168_v10 = vcombine.low %v2274_v21, %v2290_v26  ;;  %v14199_v21 = vld [vmem:[%s17665_s14 + $0xc84] ss:$16 sps:$4 sm:$0xff]  }
 0x2d0   : > { %9655 = vmatpush2.bf16.msra.mxu1 %v14176_v11  ;;  %9707 = vmatprep.subr.bf16.mxu0 %v14181_v12  ;;  %v18170_v11 = vcombine.low %v2275_v41, %v2291_v42  ;;  %v2307_v12 = vld [vmem:[%s21382_s0 + $0x228] sm:$0xff]  ;;  %v14202_v26 = vld [vmem:[%s17665_s14 + $0xe84] ss:$16 sps:$4 sm:$0xff]   ;;  %v18182_v41 = vcombine.high %v2306_v61, %v2322_v9 }
 0x2d1   : > { %9790 = vmatprep.subr.bf16.mxu1 %v14184_v17  ;;  %21563 = vst [vmem:[#allocation26_spill] sm:$0xff] %v18168_v10  ;;  %v2323_v17 = vld [vmem:[%s21382_s0 + $0x2a8] sm:$0xff] }
 0x2d2   : > { %9574 = vmatmul.mubr.bf16.vlgmr.msra.gmra.mxu0 %v18135_v27  ;;  %21564 = vst [vmem:[#allocation27_spill] sm:$0xff] %v18170_v11  ;;  %21565 = vst [vmem:[#allocation28_spill] sm:$0xff] %v18182_v41  ;;  %v18184_v42 = vcombine.high %v2307_v12, %v2323_v17 }
 0x2d3   : > { %9657 = vmatmul.mubr.bf16.vlgmr.msra.gmra.mxu1 %v18139_v40  ;;  %9708 = vmatpush1.bf16.msra.mxu0 %v14179_v20  ;;  %v14191_v20 = vld [vmem:[%s17665_s14 + $0xca0] ss:$16 sps:$4 sm:$0xff]   ;;  %v14214_v40 = vld [vmem:[%s17665_s14 + $0xe44] ss:$16 sps:$4 sm:$0xff]  }
 0x2d4   : > { %9791 = vmatpush1.bf16.msra.mxu1 %v14182_v45  ;;  %9709 = vmatprep.subr.bf16.mxu0 %v14187_v28  ;;  %v14194_v45 = vld [vmem:[%s17665_s14 + $0xea0] ss:$16 sps:$4 sm:$0xff]   ;;  %21566 = vst [vmem:[#allocation29_spill] sm:$0xff] %v18184_v42 }
 0x2d5   : > { %9792 = vmatprep.subr.bf16.mxu1 %v14190_v29  ;;  %9583 = vmatprep.mubr.bf16.mxu0 %v18150_v32  ;;  %v14197_v28 = vld [vmem:[%s17665_s14 + $0xc80] ss:$16 sps:$4 sm:$0xff]   ;;  %v14292_v32 = vld [vmem:[%s17665_s14 + $0x12a4] ss:$16 sps:$4 sm:$0xff]  }
 0x2d6   : > { %9666 = vmatprep.mubr.bf16.mxu1 %v18152_v37  ;;  %v14200_v29 = vld [vmem:[%s17665_s14 + $0xe80] ss:$16 sps:$4 sm:$0xff]   ;;  %v14211_v37 = vld [vmem:[%s17665_s14 + $0xc44] ss:$16 sps:$4 sm:$0xff]  }
 0x2d7   : > { %9710 = vmatpush1.bf16.msra.mxu0 %v14185_v0  ;;  %v14205_v0 = vld [vmem:[%s17665_s14 + $0xc64] ss:$16 sps:$4 sm:$0xff]  }
 0x2d8   : > { %9793 = vmatpush1.bf16.msra.mxu1 %v14188_v1  ;;  %9711 = vmatprep.subr.bf16.mxu0 %v14193_v2  ;;  %v14208_v1 = vld [vmem:[%s17665_s14 + $0xe64] ss:$16 sps:$4 sm:$0xff]  }
 0x2d9   : > { %9794 = vmatprep.subr.bf16.mxu1 %v14196_v56  ;;  %v2338_v2 = vld [vmem:[%s21382_s0 + $0x320] sm:$0xff] }
 0x2da   : > { %9584 = vmatmul.mubr.bf16.gmra.mxu0 %v18168_v10  ;;  %v2354_v56 = vld [vmem:[%s21382_s0 + $0x3a0] sm:$0xff] }
 0x2db   : > { %9667 = vmatmul.mubr.bf16.gmra.mxu1 %v18170_v11  ;;  %9712 = vmatpush1.bf16.msra.mxu0 %v14191_v20  ;;  %v2339_v20 = vld [vmem:[%s21382_s0 + $0x328] sm:$0xff]  ;;  %v14206_v11 = vld [vmem:[%s17665_s14 + $0xe60] ss:$16 sps:$4 sm:$0xff]  }
 0x2dc   : > { %9795 = vmatpush1.bf16.msra.mxu1 %v14194_v45  ;;  %9713 = vmatprep.subr.bf16.mxu0 %v14199_v21  ;;  %v18203_v45 = vcombine.low %v2306_v61, %v2322_v9  ;;  %v18205_v21 = vcombine.low %v2307_v12, %v2323_v17  ;;  %v14209_v9 = vld [vmem:[%s17665_s14 + $0xc40] ss:$16 sps:$4 sm:$0xff]   ;;  %v14217_v17 = vld [vmem:[%s17665_s14 + $0xc24] ss:$16 sps:$4 sm:$0xff]  }
 0x2dd   : > { %9796 = vmatprep.subr.bf16.mxu1 %v14202_v26  ;;  %9593 = vmatprep.mubr.bf16.mxu0 %v18182_v41  ;;  %v2355_v26 = vld [vmem:[%s21382_s0 + $0x3a8] sm:$0xff]  ;;  %v18214_v41 = vcombine.high %v2338_v2, %v2354_v56  ;;  %v14212_v12 = vld [vmem:[%s17665_s14 + $0xe40] ss:$16 sps:$4 sm:$0xff]  }
 0x2de   : > { %9676 = vmatprep.mubr.bf16.mxu1 %v18184_v42  ;;  %21567 = vst [vmem:[#allocation30_spill] sm:$0xff] %v18203_v45  ;;  %21568 = vst [vmem:[#allocation31_spill] sm:$0xff] %v18205_v21  ;;  %v14203_v42 = vld [vmem:[%s17665_s14 + $0xc60] ss:$16 sps:$4 sm:$0xff]   ;;  %v18216_v61 = vcombine.high %v2339_v20, %v2355_v26 }
 0x2df   : > { %9714 = vmatpush1.bf16.msra.mxu0 %v14197_v28  ;;  %21569 = vst [vmem:[#allocation32_spill] sm:$0xff] %v18214_v41  ;;  %v14220_v28 = vld [vmem:[%s17665_s14 + $0xe24] ss:$16 sps:$4 sm:$0xff]  }
 0x2e0   : > { %9797 = vmatpush1.bf16.msra.mxu1 %v14200_v29  ;;  %9715 = vmatprep.subr.bf16.mxu0 %v14205_v0  ;;  %21570 = vst [vmem:[#allocation33_spill] sm:$0xff] %v18216_v61  ;;  %v2370_v29 = vld [vmem:[%s21382_s0 + $0x420] sm:$0xff] }
 0x2e1   : > { %9798 = vmatprep.subr.bf16.mxu1 %v14208_v1  ;;  %v2386_v0 = vld [vmem:[%s21382_s0 + $0x4a0] sm:$0xff] }
 0x2e2   : > { %9594 = vmatmul.mubr.bf16.gmra.mxu0 %v18203_v45  ;;  %v14215_v1 = vld [vmem:[%s17665_s14 + $0xc20] ss:$16 sps:$4 sm:$0xff]  }
 0x2e3   : > { %9677 = vmatmul.mubr.bf16.gmra.mxu1 %v18205_v21  ;;  %9716 = vmatpush1.bf16.msra.mxu0 %v14203_v42  ;;  %v2387_v42 = vld [vmem:[%s21382_s0 + $0x4a8] sm:$0xff]  ;;  %v14218_v21 = vld [vmem:[%s17665_s14 + $0xe20] ss:$16 sps:$4 sm:$0xff]  }
 0x2e4   : > { %9799 = vmatpush1.bf16.msra.mxu1 %v14206_v11  ;;  %9717 = vmatprep.subr.bf16.mxu0 %v14211_v37  ;;  %v2371_v11 = vld [vmem:[%s21382_s0 + $0x428] sm:$0xff]  ;;  %v18237_v37 = vcombine.low %v2339_v20, %v2355_v26  ;;  %v14221_v26 = vld [vmem:[%s17665_s14 + $0xc00] ss:$16 sps:$4 sm:$0xff]  }
 0x2e5   : > { %9800 = vmatprep.subr.bf16.mxu1 %v14214_v40  ;;  %9603 = vmatprep.mubr.bf16.mxu0 %v18214_v41  ;;  %v18235_v40 = vcombine.low %v2338_v2, %v2354_v56  ;;  %v14226_v2 = vld [vmem:[%s17665_s14 + $0xe04] ss:$16 sps:$4 sm:$0xff]   ;;  %v18246_v56 = vcombine.high %v2370_v29, %v2386_v0  ;;  %v18248_v20 = vcombine.high %v2371_v11, %v2387_v42  ;;  %v14230_v41 = vld [vmem:[%s17665_s14 + $0xfe0] ss:$16 sps:$4 sm:$0xff]  }
 0x2e6   : > { %9686 = vmatprep.mubr.bf16.mxu1 %v18216_v61  ;;  %21572 = vst [vmem:[#allocation35_spill] sm:$0xff] %v18237_v37  ;;  %v14223_v61 = vld [vmem:[%s17665_s14 + $0xc04] ss:$16 sps:$4 sm:$0xff]  }
 0x2e7   : > { %21571 = vst [vmem:[#allocation34_spill] sm:$0xff] %v18235_v40  ;;  %9718 = vmatpush1.bf16.msra.mxu0 %v14209_v9  ;;  %21573 = vst [vmem:[#allocation36_spill] sm:$0xff] %v18246_v56  ;;  %v14224_v9 = vld [vmem:[%s17665_s14 + $0xe00] ss:$16 sps:$4 sm:$0xff]  }
 0x2e8   : > { %9801 = vmatpush1.bf16.msra.mxu1 %v14212_v12  ;;  %9719 = vmatprep.subr.bf16.mxu0 %v14217_v17  ;;  %21574 = vst [vmem:[#allocation37_spill] sm:$0xff] %v18248_v20  ;;  %v14229_v12 = vld [vmem:[%s17665_s14 + $0xde4] ss:$16 sps:$4 sm:$0xff]  }
 0x2e9   : > { %9802 = vmatprep.subr.bf16.mxu1 %v14220_v28  ;;  %v14232_v17 = vld [vmem:[%s17665_s14 + $0xfe4] ss:$16 sps:$4 sm:$0xff]   ;;  %v14227_v28 = vld [vmem:[%s17665_s14 + $0xde0] ss:$16 sps:$4 sm:$0xff]  }
 0x2ea   : > { %9604 = vmatmul.mubr.bf16.gmra.mxu0 %v18235_v40 }
 0x2eb   : > { %9687 = vmatmul.mubr.bf16.gmra.mxu1 %v18237_v37  ;;  %9720 = vmatpush1.bf16.msra.mxu0 %v14215_v1  ;;  %v18263_v37 = vld [vmem:[%s21382_s0 + $0x30] sm:$0xff]  ;;  %v18272_v1 = vcombine.low %v2371_v11, %v2387_v42 }
 0x2ec   : > { %9803 = vmatpush1.bf16.msra.mxu1 %v14218_v21  ;;  %9721 = vmatprep.subr.bf16.mxu0 %v14223_v61  ;;  %v18268_v21 = vld [vmem:[%s21382_s0 + $0xb0] sm:$0xff]  ;;  %v18270_v61 = vcombine.low %v2370_v29, %v2386_v0 }
 0x2ed   : > { %9804 = vmatprep.subr.bf16.mxu1 %v14226_v2  ;;  %9613 = vmatprep.mubr.bf16.mxu0 %v18246_v56  ;;  %21576 = vst [vmem:[#allocation39_spill] sm:$0xff] %v18272_v1  ;;  %v18277_v2 = vld [vmem:[%s21382_s0 + $0x38] sm:$0xff]  ;;  %v14235_v56 = vld [vmem:[%s17665_s14 + $0xdc4] ss:$16 sps:$4 sm:$0xff]   ;;  %v18288_v0 = vcombine.high %v18263_v37, %v18268_v21  ;;  %v14233_v42 = vld [vmem:[%s17665_s14 + $0xdc0] ss:$16 sps:$4 sm:$0xff]  }
 0x2ee   : > { %9696 = vmatprep.mubr.bf16.mxu1 %v18248_v20  ;;  %21575 = vst [vmem:[#allocation38_spill] sm:$0xff] %v18270_v61  ;;  %v18282_v20 = vld [vmem:[%s21382_s0 + $0xb8] sm:$0xff]  ;;  %v14238_v29 = vld [vmem:[%s17665_s14 + $0xfc4] ss:$16 sps:$4 sm:$0xff]  }
 0x2ef   : > { %9722 = vmatpush1.bf16.msra.mxu0 %v14221_v26  ;;  %21577 = vst [vmem:[#allocation40_spill] sm:$0xff] %v18288_v0  ;;  %v18292_v11 = vcombine.high %v18277_v2, %v18282_v20  ;;  %v14236_v26 = vld [vmem:[%s17665_s14 + $0xfc0] ss:$16 sps:$4 sm:$0xff]  }
 0x2f0   : > { %9805 = vmatpush1.bf16.msra.mxu1 %v14224_v9  ;;  %9723 = vmatprep.subr.bf16.mxu0 %v14229_v12  ;;  %v14241_v9 = vld [vmem:[%s17665_s14 + $0xda4] ss:$16 sps:$4 sm:$0xff]  }
 0x2f1   : > { %9806 = vmatprep.subr.bf16.mxu1 %v14232_v17  ;;  %21578 = vst [vmem:[#allocation41_spill] sm:$0xff] %v18292_v11  ;;  %v14244_v12 = vld [vmem:[%s17665_s14 + $0xfa4] ss:$16 sps:$4 sm:$0xff]   ;;  %v14239_v17 = vld [vmem:[%s17665_s14 + $0xda0] ss:$16 sps:$4 sm:$0xff]  }
 0x2f2   : > { %9614 = vmatmul.mubr.bf16.gmra.mxu0 %v18270_v61 }
 0x2f3   : > { %9697 = vmatmul.mubr.bf16.gmra.mxu1 %v18272_v1  ;;  %9724 = vmatpush2.bf16.msra.mxu0 %v14227_v28  ;;  %v14242_v1 = vld [vmem:[%s17665_s14 + $0xfa0] ss:$16 sps:$4 sm:$0xff]   ;;  %v14247_v28 = vld [vmem:[%s17665_s14 + $0xd84] ss:$16 sps:$4 sm:$0xff]  }
 0x2f4   : > { %9807 = vmatpush2.bf16.msra.mxu1 %v14230_v41  ;;  %9725 = vmatprep.subr.bf16.mxu0 %v14235_v56  ;;  %v14250_v41 = vld [vmem:[%s17665_s14 + $0xf84] ss:$16 sps:$4 sm:$0xff]   ;;  %v14245_v56 = vld [vmem:[%s17665_s14 + $0xd80] ss:$16 sps:$4 sm:$0xff]  }
 0x2f5   : > { %9808 = vmatprep.subr.bf16.mxu1 %v14238_v29  ;;  %9739 = vmatprep.mubr.bf16.mxu0 %v18288_v0  ;;  %v14248_v29 = vld [vmem:[%s17665_s14 + $0xf80] ss:$16 sps:$4 sm:$0xff]   ;;  %v14256_v0 = vld [vmem:[%s17665_s14 + $0xf64] ss:$16 sps:$4 sm:$0xff]  }
 0x2f6   : > { %9822 = vmatprep.mubr.bf16.mxu1 %v18292_v11  ;;  %v14253_v11 = vld [vmem:[%s17665_s14 + $0xd64] ss:$16 sps:$4 sm:$0xff]  }
 0x2f7   : > { %9726 = vmatpush2.bf16.msra.mxu0 %v14233_v42  ;;  %v14251_v42 = vld [vmem:[%s17665_s14 + $0xd60] ss:$16 sps:$4 sm:$0xff]  }
 0x2f8   : > { %9809 = vmatpush2.bf16.msra.mxu1 %v14236_v26  ;;  %9727 = vmatprep.subr.bf16.mxu0 %v14241_v9  ;;  %v14254_v26 = vld [vmem:[%s17665_s14 + $0xf60] ss:$16 sps:$4 sm:$0xff]   ;;  %v14259_v9 = vld [vmem:[%s17665_s14 + $0xd44] ss:$16 sps:$4 sm:$0xff]  }
 0x2f9   : > { %9810 = vmatprep.subr.bf16.mxu1 %v14244_v12  ;;  %v14257_v12 = vld [vmem:[%s17665_s14 + $0xd40] ss:$16 sps:$4 sm:$0xff]  }
 0x2fb   : > { %9728 = vmatpush2.bf16.msra.mxu0 %v14239_v17  ;;  %v14260_v17 = vld [vmem:[%s17665_s14 + $0xf40] ss:$16 sps:$4 sm:$0xff]  }
 0x2fc   : > { %9811 = vmatpush2.bf16.msra.mxu1 %v14242_v1  ;;  %9729 = vmatprep.subr.bf16.mxu0 %v14247_v28  ;;  %v14262_v1 = vld [vmem:[%s17665_s14 + $0xf44] ss:$16 sps:$4 sm:$0xff]  }
 0x2fd   : > { %9812 = vmatprep.subr.bf16.mxu1 %v14250_v41  ;;  %v14265_v28 = vld [vmem:[%s17665_s14 + $0xd24] ss:$16 sps:$4 sm:$0xff]  }
 0x2fe   : > { %v14268_v41 = vld [vmem:[%s17665_s14 + $0xf24] ss:$16 sps:$4 sm:$0xff]  }
 0x2ff   : > { %9730 = vmatpush2.bf16.msra.mxu0 %v14245_v56  ;;  %v14263_v56 = vld [vmem:[%s17665_s14 + $0xd20] ss:$16 sps:$4 sm:$0xff]  }
 0x300   : > { %9813 = vmatpush2.bf16.msra.mxu1 %v14248_v29  ;;  %9731 = vmatprep.subr.bf16.mxu0 %v14253_v11  ;;  %v14266_v11 = vld [vmem:[%s17665_s14 + $0xf20] ss:$16 sps:$4 sm:$0xff]   ;;  %v14274_v29 = vld [vmem:[%s17665_s14 + $0xf04] ss:$16 sps:$4 sm:$0xff]  }
 0x301   : > { %9814 = vmatprep.subr.bf16.mxu1 %v14256_v0  ;;  %v14271_v0 = vld [vmem:[%s17665_s14 + $0xd04] ss:$16 sps:$4 sm:$0xff]  }
 0x303   : > { %9732 = vmatpush2.bf16.msra.mxu0 %v14251_v42  ;;  %v14269_v42 = vld [vmem:[%s17665_s14 + $0xd00] ss:$16 sps:$4 sm:$0xff]  }
 0x304   : > { %9815 = vmatpush2.bf16.msra.mxu1 %v14254_v26  ;;  %9733 = vmatprep.subr.bf16.mxu0 %v14259_v9  ;;  %v14272_v26 = vld [vmem:[%s17665_s14 + $0xf00] ss:$16 sps:$4 sm:$0xff]   ;;  %v14277_v9 = vld [vmem:[%s17665_s14 + $0x10e4] ss:$16 sps:$4 sm:$0xff]  }
 0x305   : > { %9816 = vmatprep.subr.bf16.mxu1 %v14262_v1  ;;  %v14280_v1 = vld [vmem:[%s17665_s14 + $0x12e4] ss:$16 sps:$4 sm:$0xff]  }
 0x307   : > { %9734 = vmatpush2.bf16.msra.mxu0 %v14257_v12  ;;  %v2276_v12 = vld [vmem:[%s21382_s0 + $0x130] sm:$0xff] }
 0x308   : > { %9817 = vmatpush2.bf16.msra.mxu1 %v14260_v17  ;;  %9735 = vmatprep.subr.bf16.mxu0 %v14265_v28  ;;  %v2292_v17 = vld [vmem:[%s21382_s0 + $0x1b0] sm:$0xff]  ;;  %v18334_v28 = vcombine.low %v18263_v37, %v18268_v21 }
 0x309   : > { %9818 = vmatprep.subr.bf16.mxu1 %v14268_v41  ;;  %v18338_v41 = vcombine.low %v18277_v2, %v18282_v20  ;;  %v14283_v37 = vld [vmem:[%s17665_s14 + $0x10c4] ss:$16 sps:$4 sm:$0xff]   ;;  %v18350_v21 = vcombine.high %v2276_v12, %v2292_v17 }
 0x30a   : > { %21579 = vst [vmem:[#allocation42_spill] sm:$0xff] %v18334_v28  ;;  %v14286_v20 = vld [vmem:[%s17665_s14 + $0x12c4] ss:$16 sps:$4 sm:$0xff]  }
 0x30b   : > { %9736 = vmatpush2.bf16.msra.mxu0 %v14263_v56  ;;  %21580 = vst [vmem:[#allocation43_spill] sm:$0xff] %v18338_v41  ;;  %v2277_v56 = vld [vmem:[%s21382_s0 + $0x138] sm:$0xff]  ;;  %21581 = vst [vmem:[#allocation44_spill] sm:$0xff] %v18350_v21 }
 0x30c   : > { %9819 = vmatpush2.bf16.msra.mxu1 %v14266_v11  ;;  %9737 = vmatprep.subr.bf16.mxu0 %v14271_v0  ;;  %v2293_v11 = vld [vmem:[%s21382_s0 + $0x1b8] sm:$0xff]  ;;  %v14275_v0 = vld [vmem:[%s17665_s14 + $0x10e0] ss:$16 sps:$4 sm:$0xff]  }
 0x30d   : > { %9820 = vmatprep.subr.bf16.mxu1 %v14274_v29  ;;  %v14278_v29 = vld [vmem:[%s17665_s14 + $0x12e0] ss:$16 sps:$4 sm:$0xff]   ;;  %v18352_v2 = vcombine.high %v2277_v56, %v2293_v11 }
 0x30f   : > { %9738 = vmatpush2.bf16.msra.mxu0 %v14269_v42  ;;  %21582 = vst [vmem:[#allocation45_spill] sm:$0xff] %v18352_v2  ;;  %v14281_v42 = vld [vmem:[%s17665_s14 + $0x10c0] ss:$16 sps:$4 sm:$0xff]  }
 0x310   : > { %9821 = vmatpush2.bf16.msra.mxu1 %v14272_v26  ;;  %9873 = vmatprep.subr.bf16.mxu0 %v14277_v9  ;;  %v14284_v26 = vld [vmem:[%s17665_s14 + $0x12c0] ss:$16 sps:$4 sm:$0xff]   ;;  %v14289_v9 = vld [vmem:[%s17665_s14 + $0x10a4] ss:$16 sps:$4 sm:$0xff]  }
 0x311   : > { %9956 = vmatprep.subr.bf16.mxu1 %v14280_v1 }
 0x312   : > { %v9243_v61 = vpop.f32.mrf.mxu0  ;;  %9740 = vmatmul.mubr.bf16.vlgmr.msra.gmra.mxu0 %v18334_v28 }
 0x313   : > { %v9326_v40 = vpop.f32.mrf.mxu1  ;;  %9823 = vmatmul.mubr.bf16.vlgmr.msra.gmra.mxu1 %v18338_v41  ;;  %9874 = vmatpush1.bf16.msra.mxu0 %v14275_v0  ;;  %v2309_v0 = vld [vmem:[%s21382_s0 + $0x238] sm:$0xff]  ;;  %v14287_v41 = vld [vmem:[%s17665_s14 + $0x10a0] ss:$16 sps:$4 sm:$0xff]  }
 0x314   : > { %v18358_v45 = vadd.f32 %v9326_v40, %v9243_v61  ;;  %9957 = vmatpush1.bf16.msra.mxu1 %v14278_v29  ;;  %v9245_v1 = vpop.f32.mrf.mxu0  ;;  %9875 = vmatprep.subr.bf16.mxu0 %v14283_v37  ;;  %v2308_v40 = vld [vmem:[%s21382_s0 + $0x230] sm:$0xff]  ;;  %v18375_v37 = vcombine.low %v2276_v12, %v2292_v17 }
 0x315   : > { %v9328_v10 = vpop.f32.mrf.mxu1  ;;  %9958 = vmatprep.subr.bf16.mxu1 %v14286_v20  ;;  %9749 = vmatprep.mubr.bf16.mxu0 %v18350_v21  ;;  %v2324_v61 = vld [vmem:[%s21382_s0 + $0x2b0] sm:$0xff]  ;;  %v18377_v20 = vcombine.low %v2277_v56, %v2293_v11 }
 0x316   : > { %v18362_v27 = vadd.f32 %v9328_v10, %v9245_v1  ;;  %9832 = vmatprep.mubr.bf16.mxu1 %v18352_v2  ;;  %v9247_v10 = vpop.f32.mrf.mxu0  ;;  %21583 = vst [vmem:[#allocation46_spill] sm:$0xff] %v18375_v37  ;;  %v2325_v1 = vld [vmem:[%s21382_s0 + $0x2b8] sm:$0xff]  ;;  %v14290_v21 = vld [vmem:[%s17665_s14 + $0x12a0] ss:$16 sps:$4 sm:$0xff]   ;;  %v14295_v12 = vld [vmem:[%s17665_s14 + $0x1084] ss:$16 sps:$4 sm:$0xff]   ;;  %v18392_v56 = vcombine.high %v2308_v40, %v2324_v61 }
 0x317   : > { %v9330_v29 = vpop.f32.mrf.mxu1  ;;  %21584 = vst [vmem:[#allocation47_spill] sm:$0xff] %v18377_v20  ;;  %9876 = vmatpush1.bf16.msra.mxu0 %v14281_v42  ;;  %v14298_v17 = vld [vmem:[%s17665_s14 + $0x1284] ss:$16 sps:$4 sm:$0xff]   ;;  %v18394_v11 = vcombine.high %v2309_v0, %v2325_v1  ;;  %v14293_v42 = vld [vmem:[%s17665_s14 + $0x1080] ss:$16 sps:$4 sm:$0xff]  }
 0x318   : > { %v18382_v2 = vadd.f32 %v9330_v29, %v9247_v10  ;;  %9959 = vmatpush1.bf16.msra.mxu1 %v14284_v26  ;;  %v18386_v28 = vpop.f32.mrf.mxu0  ;;  %9877 = vmatprep.subr.bf16.mxu0 %v14289_v9  ;;  %21587 = vst [vmem:[#allocation50_spill] sm:$0xff] %v18392_v56  ;;  %v14296_v26 = vld [vmem:[%s17665_s14 + $0x1280] ss:$16 sps:$4 sm:$0xff]  }
 0x319   : > { %21585 = vst [vmem:[#allocation48_spill] sm:$0xff] %v18386_v28  ;;  %v18388_v53 = vpop.f32.mrf.mxu1  ;;  %9960 = vmatprep.subr.bf16.mxu1 %v14292_v32  ;;  %21588 = vst [vmem:[#allocation51_spill] sm:$0xff] %v18394_v11  ;;  %v14301_v32 = vld [vmem:[%s17665_s14 + $0x1064] ss:$16 sps:$4 sm:$0xff]  }
 0x31a   : > { %21586 = vst [vmem:[#allocation49_spill] sm:$0xff] %v18388_v53  ;;  %9750 = vmatmul.mubr.bf16.gmra.mxu0 %v18375_v37  ;;  %v9253_v10 = vpop.f32.mrf.mxu0  ;;  %v14304_v53 = vld [vmem:[%s17665_s14 + $0x1264] ss:$16 sps:$4 sm:$0xff]   ;;  %v14299_v37 = vld [vmem:[%s17665_s14 + $0x1060] ss:$16 sps:$4 sm:$0xff]  }
 0x31b   : > { %9833 = vmatmul.mubr.bf16.gmra.mxu1 %v18377_v20  ;;  %v9336_v29 = vpop.f32.mrf.mxu1  ;;  %9878 = vmatpush1.bf16.msra.mxu0 %v14287_v41  ;;  %v14302_v20 = vld [vmem:[%s17665_s14 + $0x1260] ss:$16 sps:$4 sm:$0xff]  }
 0x31c   : > { %9961 = vmatpush1.bf16.msra.mxu1 %v14290_v21  ;;  %v18401_v9 = vadd.f32 %v9336_v29, %v9253_v10  ;;  %9879 = vmatprep.subr.bf16.mxu0 %v14295_v12  ;;  %v9255_v28 = vpop.f32.mrf.mxu0  ;;  %v2340_v41 = vld [vmem:[%s21382_s0 + $0x330] sm:$0xff]  ;;  %v18418_v10 = vcombine.low %v2309_v0, %v2325_v1  ;;  %v2341_v29 = vld [vmem:[%s21382_s0 + $0x338] sm:$0xff] }
 0x31d   : > { %9962 = vmatprep.subr.bf16.mxu1 %v14298_v17  ;;  %v9338_v36 = vpop.f32.mrf.mxu1  ;;  %9759 = vmatprep.mubr.bf16.mxu0 %v18392_v56  ;;  %v2356_v21 = vld [vmem:[%s21382_s0 + $0x3b0] sm:$0xff]  ;;  %v18416_v17 = vcombine.low %v2308_v40, %v2324_v61 }
 0x31e   : > { %9842 = vmatprep.mubr.bf16.mxu1 %v18394_v11  ;;  %v18414_v12 = vadd.f32 %v9338_v36, %v9255_v28  ;;  %21590 = vst [vmem:[#allocation53_spill] sm:$0xff] %v18418_v10  ;;  %v2357_v11 = vld [vmem:[%s21382_s0 + $0x3b8] sm:$0xff]  ;;  %v9257_v56 = vpop.f32.mrf.mxu0  ;;  %v14307_v36 = vld [vmem:[%s17665_s14 + $0x1044] ss:$16 sps:$4 sm:$0xff]   ;;  %v18434_v1 = vcombine.high %v2340_v41, %v2356_v21 }
 0x31f   : > { %21589 = vst [vmem:[#allocation52_spill] sm:$0xff] %v18416_v17  ;;  %v9340_v19 = vpop.f32.mrf.mxu1  ;;  %9880 = vmatpush1.bf16.msra.mxu0 %v14293_v42  ;;  %v14310_v40 = vld [vmem:[%s17665_s14 + $0x1244] ss:$16 sps:$4 sm:$0xff]   ;;  %v18436_v8 = vcombine.high %v2341_v29, %v2357_v11 }
 0x320   : > { %9963 = vmatpush1.bf16.msra.mxu1 %v14296_v26  ;;  %v18427_v28 = vadd.f32 %v9340_v19, %v9257_v56  ;;  %9881 = vmatprep.subr.bf16.mxu0 %v14301_v32  ;;  %v18430_v61 = vpop.f32.mrf.mxu0  ;;  %21593 = vst [vmem:[#allocation56_spill] sm:$0xff] %v18434_v1  ;;  %v14305_v19 = vld [vmem:[%s17665_s14 + $0x1040] ss:$16 sps:$4 sm:$0xff]   ;;  %v14313_v26 = vld [vmem:[%s17665_s14 + $0x1024] ss:$16 sps:$4 sm:$0xff]  }
 0x321   : > { %9964 = vmatprep.subr.bf16.mxu1 %v14304_v53  ;;  %21591 = vst [vmem:[#allocation54_spill] sm:$0xff] %v18430_v61  ;;  %v18432_v0 = vpop.f32.mrf.mxu1  ;;  %21594 = vst [vmem:[#allocation57_spill] sm:$0xff] %v18436_v8  ;;  %v14308_v56 = vld [vmem:[%s17665_s14 + $0x1240] ss:$16 sps:$4 sm:$0xff]  }
 0x322   : > { %21592 = vst [vmem:[#allocation55_spill] sm:$0xff] %v18432_v0  ;;  %9760 = vmatmul.mubr.bf16.gmra.mxu0 %v18416_v17  ;;  %v9263_v42 = vpop.f32.mrf.mxu0  ;;  %v14316_v0 = vld [vmem:[%s17665_s14 + $0x1224] ss:$16 sps:$4 sm:$0xff]   ;;  %v14311_v17 = vld [vmem:[%s17665_s14 + $0x1020] ss:$16 sps:$4 sm:$0xff]  }
 0x323   : > { %9843 = vmatmul.mubr.bf16.gmra.mxu1 %v18418_v10  ;;  %v9346_v53 = vpop.f32.mrf.mxu1  ;;  %9882 = vmatpush1.bf16.msra.mxu0 %v14299_v37  ;;  %v14314_v10 = vld [vmem:[%s17665_s14 + $0x1220] ss:$16 sps:$4 sm:$0xff]  }
 0x324   : > { %9965 = vmatpush1.bf16.msra.mxu1 %v14302_v20  ;;  %v18443_v32 = vadd.f32 %v9346_v53, %v9263_v42  ;;  %9883 = vmatprep.subr.bf16.mxu0 %v14307_v36  ;;  %v9265_v61 = vpop.f32.mrf.mxu0  ;;  %v2372_v37 = vld [vmem:[%s21382_s0 + $0x430] sm:$0xff]  ;;  %v18460_v42 = vcombine.low %v2341_v29, %v2357_v11  ;;  %v2373_v53 = vld [vmem:[%s21382_s0 + $0x438] sm:$0xff] }
 0x325   : > { %9966 = vmatprep.subr.bf16.mxu1 %v14310_v40  ;;  %v9348_v49 = vpop.f32.mrf.mxu1  ;;  %9769 = vmatprep.mubr.bf16.mxu0 %v18434_v1  ;;  %v2388_v20 = vld [vmem:[%s21382_s0 + $0x4b0] sm:$0xff]  ;;  %v18458_v40 = vcombine.low %v2340_v41, %v2356_v21 }
 0x326   : > { %9852 = vmatprep.mubr.bf16.mxu1 %v18436_v8  ;;  %v18456_v36 = vadd.f32 %v9348_v49, %v9265_v61  ;;  %21596 = vst [vmem:[#allocation59_spill] sm:$0xff] %v18460_v42  ;;  %v2389_v8 = vld [vmem:[%s21382_s0 + $0x4b8] sm:$0xff]  ;;  %v9267_v1 = vpop.f32.mrf.mxu0  ;;  %v14322_v11 = vld [vmem:[%s17665_s14 + $0x1204] ss:$16 sps:$4 sm:$0xff]   ;;  %v18476_v29 = vcombine.high %v2372_v37, %v2388_v20 }
 0x327   : > { %21595 = vst [vmem:[#allocation58_spill] sm:$0xff] %v18458_v40  ;;  %v9350_v35 = vpop.f32.mrf.mxu1  ;;  %9884 = vmatpush1.bf16.msra.mxu0 %v14305_v19  ;;  %v18478_v61 = vcombine.high %v2373_v53, %v2389_v8  ;;  %v14320_v19 = vld [vmem:[%s17665_s14 + $0x1200] ss:$16 sps:$4 sm:$0xff]  }
 0x328   : > { %9967 = vmatpush1.bf16.msra.mxu1 %v14308_v56  ;;  %v18469_v49 = vadd.f32 %v9350_v35, %v9267_v1  ;;  %9885 = vmatprep.subr.bf16.mxu0 %v14313_v26  ;;  %v18472_v41 = vpop.f32.mrf.mxu0  ;;  %21599 = vst [vmem:[#allocation62_spill] sm:$0xff] %v18476_v29  ;;  %v14317_v35 = vld [vmem:[%s17665_s14 + $0x1000] ss:$16 sps:$4 sm:$0xff]   ;;  %v14325_v26 = vld [vmem:[%s17665_s14 + $0x11e4] ss:$16 sps:$4 sm:$0xff]  }
 0x329   : > { %9968 = vmatprep.subr.bf16.mxu1 %v14316_v0  ;;  %21597 = vst [vmem:[#allocation60_spill] sm:$0xff] %v18472_v41  ;;  %v18474_v21 = vpop.f32.mrf.mxu1  ;;  %21600 = vst [vmem:[#allocation63_spill] sm:$0xff] %v18478_v61 }
 0x32a   : > { %21598 = vst [vmem:[#allocation61_spill] sm:$0xff] %v18474_v21  ;;  %9770 = vmatmul.mubr.bf16.gmra.mxu0 %v18458_v40  ;;  %v9273_v1 = vpop.f32.mrf.mxu0  ;;  %v14328_v21 = vld [vmem:[%s17665_s14 + $0x13e4] ss:$16 sps:$4 sm:$0xff]   ;;  %v14323_v40 = vld [vmem:[%s17665_s14 + $0x11e0] ss:$16 sps:$4 sm:$0xff]  }
 0x32b   : > { %9853 = vmatmul.mubr.bf16.gmra.mxu1 %v18460_v42  ;;  %v9356_v0 = vpop.f32.mrf.mxu1  ;;  %9886 = vmatpush1.bf16.msra.mxu0 %v14311_v17  ;;  %v14326_v42 = vld [vmem:[%s17665_s14 + $0x13e0] ss:$16 sps:$4 sm:$0xff]  }
 0x32c   : > { %9969 = vmatpush1.bf16.msra.mxu1 %v14314_v10  ;;  %v18484_v56 = vadd.f32 %v9356_v0, %v9273_v1  ;;  %9887 = vmatprep.subr.bf16.mxu0 %v14319_v52  ;;  %v9275_v41 = vpop.f32.mrf.mxu0  ;;  %v18497_v17 = vld [vmem:[%s21382_s0 + $0x40] sm:$0xff]  ;;  %v18504_v10 = vcombine.low %v2372_v37, %v2388_v20 }
 0x32d   : > { %9970 = vmatprep.subr.bf16.mxu1 %v14322_v11  ;;  %v9358_v25 = vpop.f32.mrf.mxu1  ;;  %9779 = vmatprep.mubr.bf16.mxu0 %v18476_v29  ;;  %v18502_v52 = vld [vmem:[%s21382_s0 + $0xc0] sm:$0xff]  ;;  %v18506_v11 = vcombine.low %v2373_v53, %v2389_v8 }
 0x32e   : > { %9862 = vmatprep.mubr.bf16.mxu1 %v18478_v61  ;;  %v18492_v16 = vadd.f32 %v9358_v25, %v9275_v41  ;;  %21601 = vst [vmem:[#allocation64_spill] sm:$0xff] %v18504_v10  ;;  %v9277_v1 = vpop.f32.mrf.mxu0  ;;  %v18511_v25 = vld [vmem:[%s21382_s0 + $0x48] sm:$0xff]  ;;  %v14331_v61 = vld [vmem:[%s17665_s14 + $0x11c4] ss:$16 sps:$4 sm:$0xff]   ;;  %v18528_v29 = vcombine.high %v18497_v17, %v18502_v52 }
 0x32f   : > { %21602 = vst [vmem:[#allocation65_spill] sm:$0xff] %v18506_v11  ;;  %v9360_v0 = vpop.f32.mrf.mxu1  ;;  %v18516_v41 = vld [vmem:[%s21382_s0 + $0xc8] sm:$0xff]  ;;  %9888 = vmatpush1.bf16.msra.mxu0 %v14317_v35  ;;  %v14334_v8 = vld [vmem:[%s17665_s14 + $0x13c4] ss:$16 sps:$4 sm:$0xff]  }
 0x330   : > { %9971 = vmatpush1.bf16.msra.mxu1 %v14320_v19  ;;  %v18519_v37 = vadd.f32 %v9360_v0, %v9277_v1  ;;  %9889 = vmatprep.subr.bf16.mxu0 %v14325_v26  ;;  %v18522_v20 = vpop.f32.mrf.mxu0  ;;  %21605 = vst [vmem:[#allocation68_spill] sm:$0xff] %v18528_v29  ;;  %v18532_v35 = vcombine.high %v18511_v25, %v18516_v41  ;;  %v14329_v26 = vld [vmem:[%s17665_s14 + $0x11c0] ss:$16 sps:$4 sm:$0xff]  }
 0x331   : > { %9972 = vmatprep.subr.bf16.mxu1 %v14328_v21  ;;  %21603 = vst [vmem:[#allocation66_spill] sm:$0xff] %v18522_v20  ;;  %v18524_v53 = vpop.f32.mrf.mxu1  ;;  %v14332_v1 = vld [vmem:[%s17665_s14 + $0x13c0] ss:$16 sps:$4 sm:$0xff]   ;;  %v14340_v20 = vld [vmem:[%s17665_s14 + $0x13a4] ss:$16 sps:$4 sm:$0xff]  }
 0x332   : > { %21604 = vst [vmem:[#allocation67_spill] sm:$0xff] %v18524_v53  ;;  %21606 = vst [vmem:[#allocation69_spill] sm:$0xff] %v18532_v35  ;;  %9780 = vmatmul.mubr.bf16.gmra.mxu0 %v18504_v10  ;;  %v9283_v21 = vpop.f32.mrf.mxu0  ;;  %v14337_v53 = vld [vmem:[%s17665_s14 + $0x11a4] ss:$16 sps:$4 sm:$0xff]  }
 0x333   : > { %9863 = vmatmul.mubr.bf16.gmra.mxu1 %v18506_v11  ;;  %v9366_v19 = vpop.f32.mrf.mxu1  ;;  %9890 = vmatpush2.bf16.msra.mxu0 %v14323_v40  ;;  %v14335_v40 = vld [vmem:[%s17665_s14 + $0x11a0] ss:$16 sps:$4 sm:$0xff]  }
 0x334   : > { %9973 = vmatpush2.bf16.msra.mxu1 %v14326_v42  ;;  %v18538_v0 = vadd.f32 %v9366_v19, %v9283_v21  ;;  %9891 = vmatprep.subr.bf16.mxu0 %v14331_v61  ;;  %v9285_v33 = vpop.f32.mrf.mxu0  ;;  %v14338_v42 = vld [vmem:[%s17665_s14 + $0x13a0] ss:$16 sps:$4 sm:$0xff]  }
 0x335   : > { %9974 = vmatprep.subr.bf16.mxu1 %v14334_v8  ;;  %v9368_v10 = vpop.f32.mrf.mxu1  ;;  %9905 = vmatprep.mubr.bf16.mxu0 %v18528_v29  ;;  %v14343_v8 = vld [vmem:[%s17665_s14 + $0x1184] ss:$16 sps:$4 sm:$0xff]   ;;  %v14347_v11 = vld [vmem:[%s17665_s14 + $0x1160] ss:$16 sps:$4 sm:$0xff]  }
 0x336   : > { %v18542_v58 = vadd.f32 %v9368_v10, %v9285_v33  ;;  %9988 = vmatprep.mubr.bf16.mxu1 %v18532_v35  ;;  %v9287_v21 = vpop.f32.mrf.mxu0  ;;  %v14346_v33 = vld [vmem:[%s17665_s14 + $0x1384] ss:$16 sps:$4 sm:$0xff]   ;;  %v14341_v10 = vld [vmem:[%s17665_s14 + $0x1180] ss:$16 sps:$4 sm:$0xff]  }
 0x337   : > { %v9370_v61 = vpop.f32.mrf.mxu1  ;;  %9892 = vmatpush2.bf16.msra.mxu0 %v14329_v26  ;;  %v14344_v35 = vld [vmem:[%s17665_s14 + $0x1380] ss:$16 sps:$4 sm:$0xff]   ;;  %v14349_v26 = vld [vmem:[%s17665_s14 + $0x1164] ss:$16 sps:$4 sm:$0xff]  }
 0x338   : > { %9975 = vmatpush2.bf16.msra.mxu1 %v14332_v1  ;;  %v18549_v19 = vadd.f32 %v9370_v61, %v9287_v21  ;;  %9893 = vmatprep.subr.bf16.mxu0 %v14337_v53  ;;  %v14352_v1 = vld [vmem:[%s17665_s14 + $0x1364] ss:$16 sps:$4 sm:$0xff]   ;;  %v14356_v21 = vld [vmem:[%s17665_s14 + $0x1340] ss:$16 sps:$4 sm:$0xff]   ;;  %v18595_v29 = vpop.f32.mrf.mxu0 }
 0x339   : > { %9976 = vmatprep.subr.bf16.mxu1 %v14340_v20  ;;  %v14350_v20 = vld [vmem:[%s17665_s14 + $0x1360] ss:$16 sps:$4 sm:$0xff]   ;;  %v14355_v53 = vld [vmem:[%s17665_s14 + $0x1144] ss:$16 sps:$4 sm:$0xff]   ;;  %21609 = vst [vmem:[#allocation72_spill] sm:$0xff] %v18595_v29 }
 0x33a   : > { %v14361_v61 = vld [vmem:[%s17665_s14 + $0x1124] ss:$16 sps:$4 sm:$0xff]  }
 0x33b   : > { %9894 = vmatpush2.bf16.msra.mxu0 %v14335_v40  ;;  %v14358_v40 = vld [vmem:[%s17665_s14 + $0x1344] ss:$16 sps:$4 sm:$0xff]  }
 0x33c   : > { %9977 = vmatpush2.bf16.msra.mxu1 %v14338_v42  ;;  %9895 = vmatprep.subr.bf16.mxu0 %v14343_v8  ;;  %v14353_v42 = vld [vmem:[%s17665_s14 + $0x1140] ss:$16 sps:$4 sm:$0xff]  }
 0x33d   : > { %9978 = vmatprep.subr.bf16.mxu1 %v14346_v33  ;;  %v14359_v8 = vld [vmem:[%s17665_s14 + $0x1120] ss:$16 sps:$4 sm:$0xff]  }
 0x33e   : > { %v14362_v33 = vld [vmem:[%s17665_s14 + $0x1320] ss:$16 sps:$4 sm:$0xff]  }
 0x33f   : > { %9896 = vmatpush2.bf16.msra.mxu0 %v14341_v10  ;;  %v14370_v10 = vld [vmem:[%s17665_s14 + $0x1304] ss:$16 sps:$4 sm:$0xff]  }
 0x340   : > { %9979 = vmatpush2.bf16.msra.mxu1 %v14344_v35  ;;  %9897 = vmatprep.subr.bf16.mxu0 %v14349_v26  ;;  %v14364_v35 = vld [vmem:[%s17665_s14 + $0x1324] ss:$16 sps:$4 sm:$0xff]   ;;  %v14365_v26 = vld [vmem:[%s17665_s14 + $0x1100] ss:$16 sps:$4 sm:$0xff]  }
 0x341   : > { %9980 = vmatprep.subr.bf16.mxu1 %v14352_v1  ;;  %v14368_v1 = vld [vmem:[%s17665_s14 + $0x1300] ss:$16 sps:$4 sm:$0xff]  }
 0x343   : > { %9898 = vmatpush2.bf16.msra.mxu0 %v14347_v11  ;;  %v14367_v11 = vld [vmem:[%s17665_s14 + $0x1104] ss:$16 sps:$4 sm:$0xff]  }
 0x344   : > { %9981 = vmatpush2.bf16.msra.mxu1 %v14350_v20  ;;  %9899 = vmatprep.subr.bf16.mxu0 %v14355_v53  ;;  %v14373_v20 = vld [vmem:[%s17665_s14 + $0x14e4] ss:$16 sps:$4 sm:$0xff]  }
 0x345   : > { %9982 = vmatprep.subr.bf16.mxu1 %v14358_v40  ;;  %v14376_v53 = vld [vmem:[%s17665_s14 + $0x16e4] ss:$16 sps:$4 sm:$0xff]   ;;  %v14371_v40 = vld [vmem:[%s17665_s14 + $0x14e0] ss:$16 sps:$4 sm:$0xff]  }
 0x347   : > { %9900 = vmatpush2.bf16.msra.mxu0 %v14353_v42  ;;  %v14374_v42 = vld [vmem:[%s17665_s14 + $0x16e0] ss:$16 sps:$4 sm:$0xff]  }
 0x348   : > { %9983 = vmatpush2.bf16.msra.mxu1 %v14356_v21  ;;  %9901 = vmatprep.subr.bf16.mxu0 %v14361_v61  ;;  %v2278_v21 = vld [vmem:[%s21382_s0 + $0x140] sm:$0xff] }
 0x349   : > { %9984 = vmatprep.subr.bf16.mxu1 %v14364_v35  ;;  %v2294_v61 = vld [vmem:[%s21382_s0 + $0x1c0] sm:$0xff]  ;;  %v18582_v35 = vcombine.low %v18497_v17, %v18502_v52  ;;  %v18597_v17 = vpop.f32.mrf.mxu1 }
 0x34a   : > { %21610 = vst [vmem:[#allocation73_spill] sm:$0xff] %v18597_v17  ;;  %v14382_v52 = vld [vmem:[%s17665_s14 + $0x16c4] ss:$16 sps:$4 sm:$0xff]  }
 0x34b   : > { %9902 = vmatpush2.bf16.msra.mxu0 %v14359_v8  ;;  %21607 = vst [vmem:[#allocation70_spill] sm:$0xff] %v18582_v35  ;;  %v18586_v8 = vcombine.low %v18511_v25, %v18516_v41  ;;  %v18600_v25 = vcombine.high %v2278_v21, %v2294_v61 }
 0x34c   : > { %9985 = vmatpush2.bf16.msra.mxu1 %v14362_v33  ;;  %9903 = vmatprep.subr.bf16.mxu0 %v14367_v11  ;;  %v2279_v33 = vld [vmem:[%s21382_s0 + $0x148] sm:$0xff] }
 0x34d   : > { %9986 = vmatprep.subr.bf16.mxu1 %v14370_v10  ;;  %21608 = vst [vmem:[#allocation71_spill] sm:$0xff] %v18586_v8  ;;  %v2295_v11 = vld [vmem:[%s21382_s0 + $0x1c8] sm:$0xff]  ;;  %v14379_v10 = vld [vmem:[%s17665_s14 + $0x14c4] ss:$16 sps:$4 sm:$0xff]   ;;  %21611 = vst [vmem:[#allocation74_spill] sm:$0xff] %v18600_v25 }
 0x34e   : > { %v18602_v41 = vcombine.high %v2279_v33, %v2295_v11 }
 0x34f   : > { %9904 = vmatpush2.bf16.msra.mxu0 %v14365_v26  ;;  %v14377_v26 = vld [vmem:[%s17665_s14 + $0x14c0] ss:$16 sps:$4 sm:$0xff]  }
 0x350   : > { %9987 = vmatpush2.bf16.msra.mxu1 %v14368_v1  ;;  %10039 = vmatprep.subr.bf16.mxu0 %v14373_v20  ;;  %21612 = vst [vmem:[#allocation75_spill] sm:$0xff] %v18602_v41  ;;  %v14380_v1 = vld [vmem:[%s17665_s14 + $0x16c0] ss:$16 sps:$4 sm:$0xff]   ;;  %v14385_v20 = vld [vmem:[%s17665_s14 + $0x14a4] ss:$16 sps:$4 sm:$0xff]  }
 0x351   : > { %10122 = vmatprep.subr.bf16.mxu1 %v14376_v53 }
 0x352   : > { %v9409_v18 = vpop.f32.mrf.mxu0  ;;  %9906 = vmatmul.mubr.bf16.vlgmr.msra.gmra.mxu0 %v18582_v35 }
 0x353   : > { %v9492_v55 = vpop.f32.mrf.mxu1  ;;  %9989 = vmatmul.mubr.bf16.vlgmr.msra.gmra.mxu1 %v18586_v8  ;;  %v9410_v17 = vadd.f32 %v9409_v18, %v18358_v45  ;;  %10040 = vmatpush1.bf16.msra.mxu0 %v14371_v40  ;;  %v14383_v8 = vld [vmem:[%s17665_s14 + $0x14a0] ss:$16 sps:$4 sm:$0xff]  }
 0x354   : > { %10123 = vmatpush1.bf16.msra.mxu1 %v14374_v42  ;;  %v9411_v53 = vpop.f32.mrf.mxu0  ;;  %10041 = vmatprep.subr.bf16.mxu0 %v14379_v10  ;;  %v2310_v18 = vld [vmem:[%s21382_s0 + $0x240] sm:$0xff]  ;;  %v18624_v42 = vcombine.low %v2278_v21, %v2294_v61  ;;  %v2311_v10 = vld [vmem:[%s21382_s0 + $0x248] sm:$0xff] }
 0x355   : > { %v9494_v29 = vpop.f32.mrf.mxu1  ;;  %10124 = vmatprep.subr.bf16.mxu1 %v14382_v52  ;;  %v18611_v48 = vadd.f32 %v9492_v55, %v9410_v17  ;;  %v9412_v35 = vadd.f32 %v9411_v53, %v18362_v27  ;;  %9915 = vmatprep.mubr.bf16.mxu0 %v18600_v25  ;;  %v2326_v45 = vld [vmem:[%s21382_s0 + $0x2c0] sm:$0xff]  ;;  %v18626_v27 = vcombine.low %v2279_v33, %v2295_v11  ;;  %v2327_v17 = vld [vmem:[%s21382_s0 + $0x2c8] sm:$0xff] }
 0x356   : > { %9998 = vmatprep.mubr.bf16.mxu1 %v18602_v41  ;;  %v9413_v55 = vpop.f32.mrf.mxu0  ;;  %21613 = vst [vmem:[#allocation76_spill] sm:$0xff] %v18624_v42  ;;  %v14391_v21 = vld [vmem:[%s17665_s14 + $0x1484] ss:$16 sps:$4 sm:$0xff]   ;;  %v18645_v25 = vcombine.high %v2310_v18, %v2326_v45 }
 0x357   : > { %v9496_v40 = vpop.f32.mrf.mxu1  ;;  %21614 = vst [vmem:[#allocation77_spill] sm:$0xff] %v18626_v27  ;;  %v18634_v52 = vadd.f32 %v9494_v29, %v9412_v35  ;;  %v9414_v53 = vadd.f32 %v9413_v55, %v18382_v2  ;;  %10042 = vmatpush1.bf16.msra.mxu0 %v14377_v26  ;;  %v14394_v11 = vld [vmem:[%s17665_s14 + $0x1684] ss:$16 sps:$4 sm:$0xff]   ;;  %v18647_v29 = vcombine.high %v2311_v10, %v2327_v17  ;;  %v14389_v26 = vld [vmem:[%s17665_s14 + $0x1480] ss:$16 sps:$4 sm:$0xff]  }
 0x358   : > { %10125 = vmatpush1.bf16.msra.mxu1 %v14380_v1  ;;  %v18638_v61 = vpop.f32.mrf.mxu0  ;;  %10043 = vmatprep.subr.bf16.mxu0 %v14385_v20  ;;  %21617 = vst [vmem:[#allocation80_spill] sm:$0xff] %v18645_v25  ;;  %v14392_v1 = vld [vmem:[%s17665_s14 + $0x1680] ss:$16 sps:$4 sm:$0xff]   ;;  %v14397_v20 = vld [vmem:[%s17665_s14 + $0x1464] ss:$16 sps:$4 sm:$0xff]  }
 0x359   : > { %21615 = vst [vmem:[#allocation78_spill] sm:$0xff] %v18638_v61  ;;  %v18640_v33 = vpop.f32.mrf.mxu1  ;;  %10126 = vmatprep.subr.bf16.mxu1 %v14388_v3  ;;  %v18643_v41 = vadd.f32 %v9496_v40, %v9414_v53  ;;  %21618 = vst [vmem:[#allocation81_spill] sm:$0xff] %v18647_v29  ;;  %v14400_v53 = vld [vmem:[%s17665_s14 + $0x1664] ss:$16 sps:$4 sm:$0xff]  }
 0x35a   : > { %21616 = vst [vmem:[#allocation79_spill] sm:$0xff] %v18640_v33  ;;  %v9419_v2 = vpop.f32.mrf.mxu0  ;;  %9916 = vmatmul.mubr.bf16.gmra.mxu0 %v18624_v42  ;;  %v14398_v42 = vld [vmem:[%s17665_s14 + $0x1660] ss:$16 sps:$4 sm:$0xff]  }
 0x35b   : > { %v9502_v35 = vpop.f32.mrf.mxu1  ;;  %9999 = vmatmul.mubr.bf16.gmra.mxu1 %v18626_v27  ;;  %v9420_v3 = vadd.f32 %v9419_v2, %v18401_v9  ;;  %10044 = vmatpush1.bf16.msra.mxu0 %v14383_v8  ;;  %v14395_v27 = vld [vmem:[%s17665_s14 + $0x1460] ss:$16 sps:$4 sm:$0xff]   ;;  %v2343_v2 = vld [vmem:[%s21382_s0 + $0x348] sm:$0xff] }
 0x35c   : > { %10127 = vmatpush1.bf16.msra.mxu1 %v14386_v34  ;;  %v9421_v55 = vpop.f32.mrf.mxu0  ;;  %10045 = vmatprep.subr.bf16.mxu0 %v14391_v21  ;;  %v2342_v34 = vld [vmem:[%s21382_s0 + $0x340] sm:$0xff]  ;;  %v18666_v21 = vcombine.low %v2310_v18, %v2326_v45 }
 0x35d   : > { %v9504_v40 = vpop.f32.mrf.mxu1  ;;  %10128 = vmatprep.subr.bf16.mxu1 %v14394_v11  ;;  %v9422_v33 = vadd.f32 %v9421_v55, %v18414_v12  ;;  %v18657_v61 = vadd.f32 %v9502_v35, %v9420_v3  ;;  %9925 = vmatprep.mubr.bf16.mxu0 %v18645_v25  ;;  %v18668_v11 = vcombine.low %v2311_v10, %v2327_v17  ;;  %v2358_v12 = vld [vmem:[%s21382_s0 + $0x3c0] sm:$0xff]  ;;  %v2359_v35 = vld [vmem:[%s21382_s0 + $0x3c8] sm:$0xff] }
 0x35e   : > { %10008 = vmatprep.mubr.bf16.mxu1 %v18647_v29  ;;  %v9423_v9 = vpop.f32.mrf.mxu0  ;;  %21619 = vst [vmem:[#allocation82_spill] sm:$0xff] %v18666_v21  ;;  %v14403_v18 = vld [vmem:[%s17665_s14 + $0x1444] ss:$16 sps:$4 sm:$0xff]   ;;  %v18690_v25 = vcombine.high %v2342_v34, %v2358_v12 }
 0x35f   : > { %v9506_v8 = vpop.f32.mrf.mxu1  ;;  %21620 = vst [vmem:[#allocation83_spill] sm:$0xff] %v18668_v11  ;;  %v9424_v3 = vadd.f32 %v9423_v9, %v18427_v28  ;;  %v18680_v55 = vadd.f32 %v9504_v40, %v9422_v33  ;;  %10046 = vmatpush1.bf16.msra.mxu0 %v14389_v26  ;;  %v14406_v17 = vld [vmem:[%s17665_s14 + $0x1644] ss:$16 sps:$4 sm:$0xff]   ;;  %v18692_v28 = vcombine.high %v2343_v2, %v2359_v35  ;;  %v14404_v40 = vld [vmem:[%s17665_s14 + $0x1640] ss:$16 sps:$4 sm:$0xff]  }
 0x360   : > { %10129 = vmatpush1.bf16.msra.mxu1 %v14392_v1  ;;  %v18683_v45 = vpop.f32.mrf.mxu0  ;;  %10047 = vmatprep.subr.bf16.mxu0 %v14397_v20  ;;  %21623 = vst [vmem:[#allocation86_spill] sm:$0xff] %v18690_v25  ;;  %v14401_v1 = vld [vmem:[%s17665_s14 + $0x1440] ss:$16 sps:$4 sm:$0xff]  }
 0x361   : > { %21621 = vst [vmem:[#allocation84_spill] sm:$0xff] %v18683_v45  ;;  %v18685_v10 = vpop.f32.mrf.mxu1  ;;  %10130 = vmatprep.subr.bf16.mxu1 %v14400_v53  ;;  %v18688_v29 = vadd.f32 %v9506_v8, %v9424_v3  ;;  %21624 = vst [vmem:[#allocation87_spill] sm:$0xff] %v18692_v28  ;;  %v14409_v8 = vld [vmem:[%s17665_s14 + $0x1424] ss:$16 sps:$4 sm:$0xff]  }
 0x362   : > { %21622 = vst [vmem:[#allocation85_spill] sm:$0xff] %v18685_v10  ;;  %v9429_v33 = vpop.f32.mrf.mxu0  ;;  %9926 = vmatmul.mubr.bf16.gmra.mxu0 %v18666_v21  ;;  %v14412_v3 = vld [vmem:[%s17665_s14 + $0x1624] ss:$16 sps:$4 sm:$0xff]   ;;  %v14410_v21 = vld [vmem:[%s17665_s14 + $0x1620] ss:$16 sps:$4 sm:$0xff]  }
 0x363   : > { %v9512_v26 = vpop.f32.mrf.mxu1  ;;  %10009 = vmatmul.mubr.bf16.gmra.mxu1 %v18668_v11  ;;  %v9430_v20 = vadd.f32 %v9429_v33, %v18443_v32  ;;  %10048 = vmatpush1.bf16.msra.mxu0 %v14395_v27  ;;  %v14407_v11 = vld [vmem:[%s17665_s14 + $0x1420] ss:$16 sps:$4 sm:$0xff]   ;;  %v2375_v33 = vld [vmem:[%s21382_s0 + $0x448] sm:$0xff] }
 0x364   : > { %10131 = vmatpush1.bf16.msra.mxu1 %v14398_v42  ;;  %v9431_v53 = vpop.f32.mrf.mxu0  ;;  %10049 = vmatprep.subr.bf16.mxu0 %v14403_v18  ;;  %v2374_v32 = vld [vmem:[%s21382_s0 + $0x440] sm:$0xff]  ;;  %v18714_v18 = vcombine.low %v2342_v34, %v2358_v12 }
 0x365   : > { %v9514_v9 = vpop.f32.mrf.mxu1  ;;  %10132 = vmatprep.subr.bf16.mxu1 %v14406_v17  ;;  %v9432_v10 = vadd.f32 %v9431_v53, %v18456_v36  ;;  %v18702_v45 = vadd.f32 %v9512_v26, %v9430_v20  ;;  %9935 = vmatprep.mubr.bf16.mxu0 %v18690_v25  ;;  %v2390_v42 = vld [vmem:[%s21382_s0 + $0x4c0] sm:$0xff]  ;;  %v18716_v17 = vcombine.low %v2343_v2, %v2359_v35  ;;  %v2391_v26 = vld [vmem:[%s21382_s0 + $0x4c8] sm:$0xff] }
 0x366   : > { %10018 = vmatprep.mubr.bf16.mxu1 %v18692_v28  ;;  %v9433_v27 = vpop.f32.mrf.mxu0  ;;  %21625 = vst [vmem:[#allocation88_spill] sm:$0xff] %v18714_v18  ;;  %v14415_v28 = vld [vmem:[%s17665_s14 + $0x1404] ss:$16 sps:$4 sm:$0xff]   ;;  %v18735_v25 = vcombine.high %v2374_v32, %v2390_v42 }
 0x367   : > { %v9516_v36 = vpop.f32.mrf.mxu1  ;;  %21626 = vst [vmem:[#allocation89_spill] sm:$0xff] %v18716_v17  ;;  %v9434_v20 = vadd.f32 %v9433_v27, %v18469_v49  ;;  %v18725_v53 = vadd.f32 %v9514_v9, %v9432_v10  ;;  %10050 = vmatpush1.bf16.msra.mxu0 %v14401_v1  ;;  %v14418_v2 = vld [vmem:[%s17665_s14 + $0x1604] ss:$16 sps:$4 sm:$0xff]   ;;  %v18737_v49 = vcombine.high %v2375_v33, %v2391_v26  ;;  %v14413_v9 = vld [vmem:[%s17665_s14 + $0x1400] ss:$16 sps:$4 sm:$0xff]  }
 0x368   : > { %10133 = vmatpush1.bf16.msra.mxu1 %v14404_v40  ;;  %v18728_v34 = vpop.f32.mrf.mxu0  ;;  %10051 = vmatprep.subr.bf16.mxu0 %v14409_v8  ;;  %21629 = vst [vmem:[#allocation92_spill] sm:$0xff] %v18735_v25  ;;  %v14416_v8 = vld [vmem:[%s17665_s14 + $0x1600] ss:$16 sps:$4 sm:$0xff]  }
 0x369   : > { %21627 = vst [vmem:[#allocation90_spill] sm:$0xff] %v18728_v34  ;;  %v18730_v12 = vpop.f32.mrf.mxu1  ;;  %10134 = vmatprep.subr.bf16.mxu1 %v14412_v3  ;;  %v18733_v35 = vadd.f32 %v9516_v36, %v9434_v20  ;;  %21630 = vst [vmem:[#allocation93_spill] sm:$0xff] %v18737_v49  ;;  %v14421_v3 = vld [vmem:[%s17665_s14 + $0x15e4] ss:$16 sps:$4 sm:$0xff]  }
 0x36a   : > { %21628 = vst [vmem:[#allocation91_spill] sm:$0xff] %v18730_v12  ;;  %v9439_v10 = vpop.f32.mrf.mxu0  ;;  %9936 = vmatmul.mubr.bf16.gmra.mxu0 %v18714_v18  ;;  %v14424_v20 = vld [vmem:[%s17665_s14 + $0x17e4] ss:$16 sps:$4 sm:$0xff]   ;;  %v14422_v18 = vld [vmem:[%s17665_s14 + $0x17e0] ss:$16 sps:$4 sm:$0xff]  }
 0x36b   : > { %v9522_v1 = vpop.f32.mrf.mxu1  ;;  %10019 = vmatmul.mubr.bf16.gmra.mxu1 %v18716_v17  ;;  %v9440_v40 = vadd.f32 %v9439_v10, %v18484_v56  ;;  %10052 = vmatpush1.bf16.msra.mxu0 %v14407_v11  ;;  %v14419_v17 = vld [vmem:[%s17665_s14 + $0x15e0] ss:$16 sps:$4 sm:$0xff]   ;;  %v18770_v10 = vld [vmem:[%s21382_s0 + $0x58] sm:$0xff] }
 0x36c   : > { %10135 = vmatpush1.bf16.msra.mxu1 %v14410_v21  ;;  %v9441_v27 = vpop.f32.mrf.mxu0  ;;  %10053 = vmatprep.subr.bf16.mxu0 %v14415_v28  ;;  %v18756_v56 = vld [vmem:[%s21382_s0 + $0x50] sm:$0xff]  ;;  %v18763_v28 = vcombine.low %v2374_v32, %v2390_v42 }
 0x36d   : > { %v9524_v36 = vpop.f32.mrf.mxu1  ;;  %10136 = vmatprep.subr.bf16.mxu1 %v14418_v2  ;;  %v9442_v12 = vadd.f32 %v9441_v27, %v18492_v16  ;;  %v18747_v34 = vadd.f32 %v9522_v1, %v9440_v40  ;;  %9945 = vmatprep.mubr.bf16.mxu0 %v18735_v25  ;;  %v18761_v21 = vld [vmem:[%s21382_s0 + $0xd0] sm:$0xff]  ;;  %v18765_v2 = vcombine.low %v2375_v33, %v2391_v26  ;;  %v18775_v1 = vld [vmem:[%s21382_s0 + $0xd8] sm:$0xff] }
 0x36e   : > { %10028 = vmatprep.mubr.bf16.mxu1 %v18737_v49  ;;  %v9443_v16 = vpop.f32.mrf.mxu0  ;;  %21631 = vst [vmem:[#allocation94_spill] sm:$0xff] %v18763_v28  ;;  %v14427_v32 = vld [vmem:[%s17665_s14 + $0x15c4] ss:$16 sps:$4 sm:$0xff]   ;;  %v14482_v25 = vld [vmem:[%s17665_s14 + $0x1aa0] ss:$16 sps:$4 sm:$0xff]  }
 0x36f   : > { %v9526_v11 = vpop.f32.mrf.mxu1  ;;  %21632 = vst [vmem:[#allocation95_spill] sm:$0xff] %v18765_v2  ;;  %v9444_v40 = vadd.f32 %v9443_v16, %v18519_v37  ;;  %v18778_v27 = vadd.f32 %v9524_v36, %v9442_v12  ;;  %10054 = vmatpush1.bf16.msra.mxu0 %v14413_v9  ;;  %v14430_v26 = vld [vmem:[%s17665_s14 + $0x17c4] ss:$16 sps:$4 sm:$0xff]   ;;  %v18790_v37 = vcombine.high %v18756_v56, %v18761_v21  ;;  %v14428_v36 = vld [vmem:[%s17665_s14 + $0x17c0] ss:$16 sps:$4 sm:$0xff]  }
 0x370   : > { %10137 = vmatpush1.bf16.msra.mxu1 %v14416_v8  ;;  %v18781_v42 = vpop.f32.mrf.mxu0  ;;  %10055 = vmatprep.subr.bf16.mxu0 %v14421_v3  ;;  %v18794_v12 = vcombine.high %v18770_v10, %v18775_v1  ;;  %v14425_v3 = vld [vmem:[%s17665_s14 + $0x15c0] ss:$16 sps:$4 sm:$0xff]   ;;  %v14433_v16 = vld [vmem:[%s17665_s14 + $0x15a4] ss:$16 sps:$4 sm:$0xff]  }
 0x371   : > { %21633 = vst [vmem:[#allocation96_spill] sm:$0xff] %v18781_v42  ;;  %v18783_v33 = vpop.f32.mrf.mxu1  ;;  %10138 = vmatprep.subr.bf16.mxu1 %v14424_v20  ;;  %v18786_v49 = vadd.f32 %v9526_v11, %v9444_v40  ;;  %21635 = vst [vmem:[#allocation98_spill] sm:$0xff] %v18790_v37 }
 0x372   : > { %21634 = vst [vmem:[#allocation97_spill] sm:$0xff] %v18783_v33  ;;  %21636 = vst [vmem:[#allocation99_spill] sm:$0xff] %v18794_v12  ;;  %v9449_v9 = vpop.f32.mrf.mxu0  ;;  %9946 = vmatmul.mubr.bf16.gmra.mxu0 %v18763_v28  ;;  %v14436_v33 = vld [vmem:[%s17665_s14 + $0x17a4] ss:$16 sps:$4 sm:$0xff]  }
 0x373   : > { %v9532_v8 = vpop.f32.mrf.mxu1  ;;  %10029 = vmatmul.mubr.bf16.gmra.mxu1 %v18765_v2  ;;  %v9450_v20 = vadd.f32 %v9449_v9, %v18538_v0  ;;  %10056 = vmatpush2.bf16.msra.mxu0 %v14419_v17  ;;  %v14431_v17 = vld [vmem:[%s17665_s14 + $0x15a0] ss:$16 sps:$4 sm:$0xff]   ;;  %v14439_v9 = vld [vmem:[%s17665_s14 + $0x1584] ss:$16 sps:$4 sm:$0xff]  }
 0x374   : > { %10139 = vmatpush2.bf16.msra.mxu1 %v14422_v18  ;;  %v9451_v11 = vpop.f32.mrf.mxu0  ;;  %10057 = vmatprep.subr.bf16.mxu0 %v14427_v32  ;;  %v14484_v2 = vld [vmem:[%s17665_s14 + $0x1aa4] ss:$16 sps:$4 sm:$0xff]  }
 0x375   : > { %v9534_v40 = vpop.f32.mrf.mxu1  ;;  %10140 = vmatprep.subr.bf16.mxu1 %v14430_v26  ;;  %v9452_v42 = vadd.f32 %v9451_v11, %v18542_v58  ;;  %v18804_v28 = vadd.f32 %v9532_v8, %v9450_v20  ;;  %10071 = vmatprep.mubr.bf16.mxu0 %v18790_v37  ;;  %v14434_v58 = vld [vmem:[%s17665_s14 + $0x17a0] ss:$16 sps:$4 sm:$0xff]   ;;  %v14442_v8 = vld [vmem:[%s17665_s14 + $0x1784] ss:$16 sps:$4 sm:$0xff]  }
 0x376   : > { %10154 = vmatprep.mubr.bf16.mxu1 %v18794_v12  ;;  %v9453_v0 = vpop.f32.mrf.mxu0  ;;  %v14437_v11 = vld [vmem:[%s17665_s14 + $0x1580] ss:$16 sps:$4 sm:$0xff]  }
 0x377   : > { %v9536_v18 = vpop.f32.mrf.mxu1  ;;  %v9454_v32 = vadd.f32 %v9453_v0, %v18549_v19  ;;  %v18810_v26 = vadd.f32 %v9534_v40, %v9452_v42  ;;  %10058 = vmatpush2.bf16.msra.mxu0 %v14425_v3  ;;  %v14440_v12 = vld [vmem:[%s17665_s14 + $0x1780] ss:$16 sps:$4 sm:$0xff]   ;;  %v14445_v19 = vld [vmem:[%s17665_s14 + $0x1564] ss:$16 sps:$4 sm:$0xff]  }
 0x378   : > { %10141 = vmatpush2.bf16.msra.mxu1 %v14428_v36  ;;  %10059 = vmatprep.subr.bf16.mxu0 %v14433_v16  ;;  %v14448_v42 = vld [vmem:[%s17665_s14 + $0x1764] ss:$16 sps:$4 sm:$0xff]   ;;  %v14446_v3 = vld [vmem:[%s17665_s14 + $0x1760] ss:$16 sps:$4 sm:$0xff]  }
 0x379   : > { %10142 = vmatprep.subr.bf16.mxu1 %v14436_v33  ;;  %v18815_v20 = vadd.f32 %v9536_v18, %v9454_v32  ;;  %v14443_v33 = vld [vmem:[%s17665_s14 + $0x1560] ss:$16 sps:$4 sm:$0xff]   ;;  %v14451_v36 = vld [vmem:[%s17665_s14 + $0x1544] ss:$16 sps:$4 sm:$0xff]  }
 0x37a   : > { %v14454_v16 = vld [vmem:[%s17665_s14 + $0x1744] ss:$16 sps:$4 sm:$0xff]   ;;  %v14449_v40 = vld [vmem:[%s17665_s14 + $0x1540] ss:$16 sps:$4 sm:$0xff]  }
 0x37b   : > { %10060 = vmatpush2.bf16.msra.mxu0 %v14431_v17  ;;  %v14452_v0 = vld [vmem:[%s17665_s14 + $0x1740] ss:$16 sps:$4 sm:$0xff]   ;;  %v14460_v18 = vld [vmem:[%s17665_s14 + $0x1724] ss:$16 sps:$4 sm:$0xff]  }
 0x37c   : > { %10143 = vmatpush2.bf16.msra.mxu1 %v14434_v58  ;;  %10061 = vmatprep.subr.bf16.mxu0 %v14439_v9  ;;  %v14455_v17 = vld [vmem:[%s17665_s14 + $0x1520] ss:$16 sps:$4 sm:$0xff]   ;;  %v14463_v58 = vld [vmem:[%s17665_s14 + $0x1504] ss:$16 sps:$4 sm:$0xff]  }
 0x37d   : > { %10144 = vmatprep.subr.bf16.mxu1 %v14442_v8  ;;  %v14458_v32 = vld [vmem:[%s17665_s14 + $0x1720] ss:$16 sps:$4 sm:$0xff]   ;;  %v14466_v9 = vld [vmem:[%s17665_s14 + $0x1704] ss:$16 sps:$4 sm:$0xff]  }
 0x37e   : > { %v14461_v8 = vld [vmem:[%s17665_s14 + $0x1500] ss:$16 sps:$4 sm:$0xff]  }
 0x37f   : > { %10062 = vmatpush2.bf16.msra.mxu0 %v14437_v11  ;;  %v14464_v11 = vld [vmem:[%s17665_s14 + $0x1700] ss:$16 sps:$4 sm:$0xff]  }
 0x380   : > { %10145 = vmatpush2.bf16.msra.mxu1 %v14440_v12  ;;  %10063 = vmatprep.subr.bf16.mxu0 %v14445_v19  ;;  %v14457_v12 = vld [vmem:[%s17665_s14 + $0x1524] ss:$16 sps:$4 sm:$0xff]  }
 0x381   : > { %10146 = vmatprep.subr.bf16.mxu1 %v14448_v42  ;;  %v14469_v19 = vld [vmem:[%s17665_s14 + $0x18e4] ss:$16 sps:$4 sm:$0xff]  }
 0x382   : > { %v14472_v42 = vld [vmem:[%s17665_s14 + $0x1ae4] ss:$16 sps:$4 sm:$0xff]  }
 0x383   : > { %10064 = vmatpush2.bf16.msra.mxu0 %v14443_v33  ;;  %v2280_v33 = vld [vmem:[%s21382_s0 + $0x150] sm:$0xff] }
 0x384   : > { %10147 = vmatpush2.bf16.msra.mxu1 %v14446_v3  ;;  %10065 = vmatprep.subr.bf16.mxu0 %v14451_v36  ;;  %v2296_v3 = vld [vmem:[%s21382_s0 + $0x1d0] sm:$0xff]  ;;  %v2281_v36 = vld [vmem:[%s21382_s0 + $0x158] sm:$0xff] }
 0x385   : > { %10148 = vmatprep.subr.bf16.mxu1 %v14454_v16  ;;  %v18848_v16 = vcombine.low %v18756_v56, %v18761_v21  ;;  %v18862_v56 = vpop.f32.mrf.mxu1  ;;  %v14478_v21 = vld [vmem:[%s17665_s14 + $0x1ac4] ss:$16 sps:$4 sm:$0xff]  }
 0x386   : > { %21640 = vst [vmem:[#allocation103_spill] sm:$0xff] %v18862_v56 }
 0x387   : > { %10066 = vmatpush2.bf16.msra.mxu0 %v14449_v40  ;;  %21637 = vst [vmem:[#allocation100_spill] sm:$0xff] %v18848_v16  ;;  %v18852_v40 = vcombine.low %v18770_v10, %v18775_v1  ;;  %v18865_v10 = vcombine.high %v2280_v33, %v2296_v3 }
 0x388   : > { %10149 = vmatpush2.bf16.msra.mxu1 %v14452_v0  ;;  %10067 = vmatprep.subr.bf16.mxu0 %v14457_v12  ;;  %v2297_v0 = vld [vmem:[%s21382_s0 + $0x1d8] sm:$0xff]  ;;  %v14467_v12 = vld [vmem:[%s17665_s14 + $0x18e0] ss:$16 sps:$4 sm:$0xff]  }
 0x389   : > { %10150 = vmatprep.subr.bf16.mxu1 %v14460_v18  ;;  %21638 = vst [vmem:[#allocation101_spill] sm:$0xff] %v18852_v40  ;;  %v14470_v18 = vld [vmem:[%s17665_s14 + $0x1ae0] ss:$16 sps:$4 sm:$0xff]   ;;  %21641 = vst [vmem:[#allocation104_spill] sm:$0xff] %v18865_v10  ;;  %v18867_v1 = vcombine.high %v2281_v36, %v2297_v0 }
 0x38b   : > { %10068 = vmatpush2.bf16.msra.mxu0 %v14455_v17  ;;  %v14475_v17 = vld [vmem:[%s17665_s14 + $0x18c4] ss:$16 sps:$4 sm:$0xff]   ;;  %21642 = vst [vmem:[#allocation105_spill] sm:$0xff] %v18867_v1 }
 0x38c   : > { %10151 = vmatpush2.bf16.msra.mxu1 %v14458_v32  ;;  %10069 = vmatprep.subr.bf16.mxu0 %v14463_v58  ;;  %v18860_v32 = vpop.f32.mrf.mxu0 }
 0x38d   : > { %10152 = vmatprep.subr.bf16.mxu1 %v14466_v9  ;;  %21639 = vst [vmem:[#allocation102_spill] sm:$0xff] %v18860_v32 }
 0x38f   : > { %10070 = vmatpush2.bf16.msra.mxu0 %v14461_v8  ;;  %v14473_v8 = vld [vmem:[%s17665_s14 + $0x18c0] ss:$16 sps:$4 sm:$0xff]  }
 0x390   : > { %10153 = vmatpush2.bf16.msra.mxu1 %v14464_v11  ;;  %10205 = vmatprep.subr.bf16.mxu0 %v14469_v19  ;;  %v14476_v19 = vld [vmem:[%s17665_s14 + $0x1ac0] ss:$16 sps:$4 sm:$0xff]  }
 0x391   : > { %10288 = vmatprep.subr.bf16.mxu1 %v14472_v42  ;;  %v14481_v42 = vld [vmem:[%s17665_s14 + $0x18a4] ss:$16 sps:$4 sm:$0xff]  }
 0x392   : > { %v9575_v58 = vpop.f32.mrf.mxu0  ;;  %10072 = vmatmul.mubr.bf16.vlgmr.msra.gmra.mxu0 %v18848_v16 }
 0x393   : > { %v9658_v9 = vpop.f32.mrf.mxu1  ;;  %10155 = vmatmul.mubr.bf16.vlgmr.msra.gmra.mxu1 %v18852_v40  ;;  %v9576_v11 = vadd.f32 %v9575_v58, %v18611_v48  ;;  %10206 = vmatpush1.bf16.msra.mxu0 %v14467_v12  ;;  %v14479_v40 = vld [vmem:[%s17665_s14 + $0x18a0] ss:$16 sps:$4 sm:$0xff]   ;;  %v2329_v58 = vld [vmem:[%s21382_s0 + $0x2d8] sm:$0xff] }
 0x394   : > { %10289 = vmatpush1.bf16.msra.mxu1 %v14470_v18  ;;  %v9577_v56 = vpop.f32.mrf.mxu0  ;;  %10207 = vmatprep.subr.bf16.mxu0 %v14475_v17  ;;  %v2312_v48 = vld [vmem:[%s21382_s0 + $0x250] sm:$0xff]  ;;  %v18886_v17 = vcombine.low %v2280_v33, %v2296_v3 }
 0x395   : > { %v9660_v32 = vpop.f32.mrf.mxu1  ;;  %10290 = vmatprep.subr.bf16.mxu1 %v14478_v21  ;;  %v18876_v37 = vadd.f32 %v9658_v9, %v9576_v11  ;;  %v9578_v16 = vadd.f32 %v9577_v56, %v18634_v52  ;;  %10081 = vmatprep.mubr.bf16.mxu0 %v18865_v10  ;;  %v18888_v21 = vcombine.low %v2281_v36, %v2297_v0  ;;  %v2328_v52 = vld [vmem:[%s21382_s0 + $0x2d0] sm:$0xff]  ;;  %v2313_v56 = vld [vmem:[%s21382_s0 + $0x258] sm:$0xff] }
 0x396   : > { %10164 = vmatprep.mubr.bf16.mxu1 %v18867_v1  ;;  %v9579_v12 = vpop.f32.mrf.mxu0  ;;  %21643 = vst [vmem:[#allocation106_spill] sm:$0xff] %v18886_v17  ;;  %v14487_v0 = vld [vmem:[%s17665_s14 + $0x1884] ss:$16 sps:$4 sm:$0xff]   ;;  %v14485_v10 = vld [vmem:[%s17665_s14 + $0x1880] ss:$16 sps:$4 sm:$0xff]  }
 0x397   : > { %v9662_v18 = vpop.f32.mrf.mxu1  ;;  %21644 = vst [vmem:[#allocation107_spill] sm:$0xff] %v18888_v21  ;;  %v18899_v9 = vadd.f32 %v9660_v32, %v9578_v16  ;;  %v9580_v33 = vadd.f32 %v9579_v12, %v18643_v41  ;;  %10208 = vmatpush1.bf16.msra.mxu0 %v14473_v8  ;;  %v14490_v11 = vld [vmem:[%s17665_s14 + $0x1a84] ss:$16 sps:$4 sm:$0xff]   ;;  %v18911_v16 = vcombine.high %v2312_v48, %v2328_v52 }
 0x398   : > { %10291 = vmatpush1.bf16.msra.mxu1 %v14476_v19  ;;  %v18902_v3 = vpop.f32.mrf.mxu0  ;;  %10209 = vmatprep.subr.bf16.mxu0 %v14481_v42  ;;  %v18913_v32 = vcombine.high %v2313_v56, %v2329_v58 }
 0x399   : > { %21645 = vst [vmem:[#allocation108_spill] sm:$0xff] %v18902_v3  ;;  %v18904_v36 = vpop.f32.mrf.mxu1  ;;  %10292 = vmatprep.subr.bf16.mxu1 %v14484_v2  ;;  %v18908_v1 = vadd.f32 %v9662_v18, %v9580_v33  ;;  %21647 = vst [vmem:[#allocation110_spill] sm:$0xff] %v18911_v16  ;;  %v14488_v2 = vld [vmem:[%s17665_s14 + $0x1a80] ss:$16 sps:$4 sm:$0xff]   ;;  %v14493_v18 = vld [vmem:[%s17665_s14 + $0x1864] ss:$16 sps:$4 sm:$0xff]  }
 0x39a   : > { %21646 = vst [vmem:[#allocation109_spill] sm:$0xff] %v18904_v36  ;;  %21648 = vst [vmem:[#allocation111_spill] sm:$0xff] %v18913_v32  ;;  %v9585_v41 = vpop.f32.mrf.mxu0  ;;  %10082 = vmatmul.mubr.bf16.gmra.mxu0 %v18886_v17  ;;  %v14496_v33 = vld [vmem:[%s17665_s14 + $0x1a64] ss:$16 sps:$4 sm:$0xff]   ;;  %v14491_v17 = vld [vmem:[%s17665_s14 + $0x1860] ss:$16 sps:$4 sm:$0xff]  }
 0x39b   : > { %v9668_v8 = vpop.f32.mrf.mxu1  ;;  %10165 = vmatmul.mubr.bf16.gmra.mxu1 %v18888_v21  ;;  %v9586_v19 = vadd.f32 %v9585_v41, %v18657_v61  ;;  %10210 = vmatpush1.bf16.msra.mxu0 %v14479_v40  ;;  %v2360_v61 = vld [vmem:[%s21382_s0 + $0x3d0] sm:$0xff]  ;;  %v2345_v41 = vld [vmem:[%s21382_s0 + $0x358] sm:$0xff] }
 0x39c   : > { %10293 = vmatpush1.bf16.msra.mxu1 %v14482_v25  ;;  %v9587_v42 = vpop.f32.mrf.mxu0  ;;  %10211 = vmatprep.subr.bf16.mxu0 %v14487_v0  ;;  %v2344_v25 = vld [vmem:[%s21382_s0 + $0x350] sm:$0xff]  ;;  %v18934_v0 = vcombine.low %v2312_v48, %v2328_v52 }
 0x39d   : > { %v9670_v12 = vpop.f32.mrf.mxu1  ;;  %10294 = vmatprep.subr.bf16.mxu1 %v14490_v11  ;;  %v9588_v36 = vadd.f32 %v9587_v42, %v18680_v55  ;;  %v18922_v3 = vadd.f32 %v9668_v8, %v9586_v19  ;;  %10091 = vmatprep.mubr.bf16.mxu0 %v18911_v16  ;;  %v18936_v11 = vcombine.low %v2313_v56, %v2329_v58  ;;  %v2361_v8 = vld [vmem:[%s21382_s0 + $0x3d8] sm:$0xff]  ;;  %v14499_v52 = vld [vmem:[%s17665_s14 + $0x1844] ss:$16 sps:$4 sm:$0xff]   ;;  %v14497_v21 = vld [vmem:[%s17665_s14 + $0x1840] ss:$16 sps:$4 sm:$0xff]  }
 0x39e   : > { %10174 = vmatprep.mubr.bf16.mxu1 %v18913_v32  ;;  %v9589_v40 = vpop.f32.mrf.mxu0  ;;  %21649 = vst [vmem:[#allocation112_spill] sm:$0xff] %v18934_v0  ;;  %v14502_v56 = vld [vmem:[%s17665_s14 + $0x1a44] ss:$16 sps:$4 sm:$0xff]   ;;  %v18956_v16 = vcombine.high %v2344_v25, %v2360_v61 }
 0x39f   : > { %v9672_v55 = vpop.f32.mrf.mxu1  ;;  %21650 = vst [vmem:[#allocation113_spill] sm:$0xff] %v18936_v11  ;;  %v9590_v19 = vadd.f32 %v9589_v40, %v18688_v29  ;;  %v18945_v42 = vadd.f32 %v9670_v12, %v9588_v36  ;;  %10212 = vmatpush1.bf16.msra.mxu0 %v14485_v10  ;;  %v18958_v29 = vcombine.high %v2345_v41, %v2361_v8  ;;  %v14505_v40 = vld [vmem:[%s17665_s14 + $0x1824] ss:$16 sps:$4 sm:$0xff]  }
 0x3a0   : > { %10295 = vmatpush1.bf16.msra.mxu1 %v14488_v2  ;;  %v18947_v32 = vpop.f32.mrf.mxu0  ;;  %10213 = vmatprep.subr.bf16.mxu0 %v14493_v18  ;;  %21653 = vst [vmem:[#allocation116_spill] sm:$0xff] %v18956_v16  ;;  %v14500_v2 = vld [vmem:[%s17665_s14 + $0x1a40] ss:$16 sps:$4 sm:$0xff]  }
 0x3a1   : > { %21651 = vst [vmem:[#allocation114_spill] sm:$0xff] %v18947_v32  ;;  %v18949_v48 = vpop.f32.mrf.mxu1  ;;  %10296 = vmatprep.subr.bf16.mxu1 %v14496_v33  ;;  %v18953_v58 = vadd.f32 %v9672_v55, %v9590_v19  ;;  %21654 = vst [vmem:[#allocation117_spill] sm:$0xff] %v18958_v29  ;;  %v14508_v55 = vld [vmem:[%s17665_s14 + $0x1a24] ss:$16 sps:$4 sm:$0xff]   ;;  %v14503_v32 = vld [vmem:[%s17665_s14 + $0x1820] ss:$16 sps:$4 sm:$0xff]  }
 0x3a2   : > { %21652 = vst [vmem:[#allocation115_spill] sm:$0xff] %v18949_v48  ;;  %v9595_v10 = vpop.f32.mrf.mxu0  ;;  %10092 = vmatmul.mubr.bf16.gmra.mxu0 %v18934_v0  ;;  %v14506_v0 = vld [vmem:[%s17665_s14 + $0x1a20] ss:$16 sps:$4 sm:$0xff]  }
 0x3a3   : > { %v9678_v36 = vpop.f32.mrf.mxu1  ;;  %10175 = vmatmul.mubr.bf16.gmra.mxu1 %v18936_v11  ;;  %v9596_v12 = vadd.f32 %v9595_v10, %v18702_v45  ;;  %10214 = vmatpush1.bf16.msra.mxu0 %v14491_v17  ;;  %v2392_v45 = vld [vmem:[%s21382_s0 + $0x4d0] sm:$0xff]  ;;  %v2377_v10 = vld [vmem:[%s21382_s0 + $0x458] sm:$0xff] }
 0x3a4   : > { %10297 = vmatpush1.bf16.msra.mxu1 %v14494_v22  ;;  %v9597_v18 = vpop.f32.mrf.mxu0  ;;  %10215 = vmatprep.subr.bf16.mxu0 %v14499_v52  ;;  %v2376_v22 = vld [vmem:[%s21382_s0 + $0x450] sm:$0xff]  ;;  %v18979_v52 = vcombine.low %v2344_v25, %v2360_v61 }
 0x3a5   : > { %v9680_v33 = vpop.f32.mrf.mxu1  ;;  %10298 = vmatprep.subr.bf16.mxu1 %v14502_v56  ;;  %v9598_v19 = vadd.f32 %v9597_v18, %v18725_v53  ;;  %v18967_v48 = vadd.f32 %v9678_v36, %v9596_v12  ;;  %10101 = vmatprep.mubr.bf16.mxu0 %v18956_v16  ;;  %v18981_v56 = vcombine.low %v2345_v41, %v2361_v8  ;;  %v2393_v36 = vld [vmem:[%s21382_s0 + $0x4d8] sm:$0xff]  ;;  %v14511_v61 = vld [vmem:[%s17665_s14 + $0x1804] ss:$16 sps:$4 sm:$0xff]   ;;  %v14509_v11 = vld [vmem:[%s17665_s14 + $0x1800] ss:$16 sps:$4 sm:$0xff]  }
 0x3a6   : > { %10184 = vmatprep.mubr.bf16.mxu1 %v18958_v29  ;;  %v9599_v17 = vpop.f32.mrf.mxu0  ;;  %21655 = vst [vmem:[#allocation118_spill] sm:$0xff] %v18979_v52  ;;  %v14514_v41 = vld [vmem:[%s17665_s14 + $0x1a04] ss:$16 sps:$4 sm:$0xff]   ;;  %v19001_v16 = vcombine.high %v2376_v22, %v2392_v45 }
 0x3a7   : > { %v9682_v53 = vpop.f32.mrf.mxu1  ;;  %21656 = vst [vmem:[#allocation119_spill] sm:$0xff] %v18981_v56  ;;  %v9600_v12 = vadd.f32 %v9599_v17, %v18733_v35  ;;  %v18990_v18 = vadd.f32 %v9680_v33, %v9598_v19  ;;  %10216 = vmatpush1.bf16.msra.mxu0 %v14497_v21  ;;  %v19003_v35 = vcombine.high %v2377_v10, %v2393_v36  ;;  %v14512_v33 = vld [vmem:[%s17665_s14 + $0x1a00] ss:$16 sps:$4 sm:$0xff]   ;;  %v14517_v17 = vld [vmem:[%s17665_s14 + $0x19e4] ss:$16 sps:$4 sm:$0xff]  }
 0x3a8   : > { %10299 = vmatpush1.bf16.msra.mxu1 %v14500_v2  ;;  %v18992_v29 = vpop.f32.mrf.mxu0  ;;  %10217 = vmatprep.subr.bf16.mxu0 %v14505_v40  ;;  %21659 = vst [vmem:[#allocation122_spill] sm:$0xff] %v19001_v16 }
 0x3a9   : > { %21657 = vst [vmem:[#allocation120_spill] sm:$0xff] %v18992_v29  ;;  %v18994_v25 = vpop.f32.mrf.mxu1  ;;  %10300 = vmatprep.subr.bf16.mxu1 %v14508_v55  ;;  %v18998_v8 = vadd.f32 %v9682_v53, %v9600_v12  ;;  %21660 = vst [vmem:[#allocation123_spill] sm:$0xff] %v19003_v35  ;;  %v14520_v53 = vld [vmem:[%s17665_s14 + $0x1be4] ss:$16 sps:$4 sm:$0xff]   ;;  %v14515_v29 = vld [vmem:[%s17665_s14 + $0x19e0] ss:$16 sps:$4 sm:$0xff]  }
 0x3aa   : > { %21658 = vst [vmem:[#allocation121_spill] sm:$0xff] %v18994_v25  ;;  %v9605_v21 = vpop.f32.mrf.mxu0  ;;  %10102 = vmatmul.mubr.bf16.gmra.mxu0 %v18979_v52  ;;  %v14518_v52 = vld [vmem:[%s17665_s14 + $0x1be0] ss:$16 sps:$4 sm:$0xff]  }
 0x3ab   : > { %v9688_v2 = vpop.f32.mrf.mxu1  ;;  %10185 = vmatmul.mubr.bf16.gmra.mxu1 %v18981_v56  ;;  %v9606_v40 = vadd.f32 %v9605_v21, %v18747_v34  ;;  %10218 = vmatpush1.bf16.msra.mxu0 %v14503_v32  ;;  %v19021_v34 = vld [vmem:[%s21382_s0 + $0x60] sm:$0xff]  ;;  %v19035_v21 = vld [vmem:[%s21382_s0 + $0x68] sm:$0xff] }
 0x3ac   : > { %10301 = vmatpush1.bf16.msra.mxu1 %v14506_v0  ;;  %v9607_v55 = vpop.f32.mrf.mxu0  ;;  %10219 = vmatprep.subr.bf16.mxu0 %v14511_v61  ;;  %v19026_v32 = vld [vmem:[%s21382_s0 + $0xe0] sm:$0xff]  ;;  %v19028_v61 = vcombine.low %v2376_v22, %v2392_v45 }
 0x3ad   : > { %v9690_v19 = vpop.f32.mrf.mxu1  ;;  %10302 = vmatprep.subr.bf16.mxu1 %v14514_v41  ;;  %v9608_v12 = vadd.f32 %v9607_v55, %v18778_v27  ;;  %v19012_v25 = vadd.f32 %v9688_v2, %v9606_v40  ;;  %10111 = vmatprep.mubr.bf16.mxu0 %v19001_v16  ;;  %v19030_v41 = vcombine.low %v2377_v10, %v2393_v36  ;;  %v19040_v2 = vld [vmem:[%s21382_s0 + $0xe8] sm:$0xff]  ;;  %v14523_v10 = vld [vmem:[%s17665_s14 + $0x19c4] ss:$16 sps:$4 sm:$0xff]   ;;  %v14521_v56 = vld [vmem:[%s17665_s14 + $0x19c0] ss:$16 sps:$4 sm:$0xff]  }
 0x3ae   : > { %10194 = vmatprep.mubr.bf16.mxu1 %v19003_v35  ;;  %v9609_v27 = vpop.f32.mrf.mxu0  ;;  %21661 = vst [vmem:[#allocation124_spill] sm:$0xff] %v19028_v61  ;;  %v14526_v36 = vld [vmem:[%s17665_s14 + $0x1bc4] ss:$16 sps:$4 sm:$0xff]   ;;  %v14524_v16 = vld [vmem:[%s17665_s14 + $0x1bc0] ss:$16 sps:$4 sm:$0xff]  }
 0x3af   : > { %v9692_v0 = vpop.f32.mrf.mxu1  ;;  %21662 = vst [vmem:[#allocation125_spill] sm:$0xff] %v19030_v41  ;;  %v9610_v40 = vadd.f32 %v9609_v27, %v18786_v49  ;;  %v19043_v55 = vadd.f32 %v9690_v19, %v9608_v12  ;;  %10220 = vmatpush1.bf16.msra.mxu0 %v14509_v11  ;;  %v19057_v49 = vcombine.high %v19021_v34, %v19026_v32  ;;  %v14529_v27 = vld [vmem:[%s17665_s14 + $0x19a4] ss:$16 sps:$4 sm:$0xff]  }
 0x3b0   : > { %10303 = vmatpush1.bf16.msra.mxu1 %v14512_v33  ;;  %v19045_v22 = vpop.f32.mrf.mxu0  ;;  %10221 = vmatprep.subr.bf16.mxu0 %v14517_v17  ;;  %v19061_v11 = vcombine.high %v19035_v21, %v19040_v2 }
 0x3b1   : > { %21663 = vst [vmem:[#allocation126_spill] sm:$0xff] %v19045_v22  ;;  %v19047_v45 = vpop.f32.mrf.mxu1  ;;  %10304 = vmatprep.subr.bf16.mxu1 %v14520_v53  ;;  %v19051_v35 = vadd.f32 %v9692_v0, %v9610_v40  ;;  %21665 = vst [vmem:[#allocation128_spill] sm:$0xff] %v19057_v49  ;;  %v14532_v0 = vld [vmem:[%s17665_s14 + $0x1ba4] ss:$16 sps:$4 sm:$0xff]   ;;  %v14527_v22 = vld [vmem:[%s17665_s14 + $0x19a0] ss:$16 sps:$4 sm:$0xff]  }
 0x3b2   : > { %21664 = vst [vmem:[#allocation127_spill] sm:$0xff] %v19047_v45  ;;  %21666 = vst [vmem:[#allocation129_spill] sm:$0xff] %v19061_v11  ;;  %v9615_v33 = vpop.f32.mrf.mxu0  ;;  %10112 = vmatmul.mubr.bf16.gmra.mxu0 %v19028_v61  ;;  %v14530_v61 = vld [vmem:[%s17665_s14 + $0x1ba0] ss:$16 sps:$4 sm:$0xff]  }
 0x3b3   : > { %v9698_v19 = vpop.f32.mrf.mxu1  ;;  %10195 = vmatmul.mubr.bf16.gmra.mxu1 %v19030_v41  ;;  %v9616_v17 = vadd.f32 %v9615_v33, %v18804_v28  ;;  %10222 = vmatpush2.bf16.msra.mxu0 %v14515_v29 }
 0x3b4   : > { %10305 = vmatpush2.bf16.msra.mxu1 %v14518_v52  ;;  %v9617_v53 = vpop.f32.mrf.mxu0  ;;  %10223 = vmatprep.subr.bf16.mxu0 %v14523_v10 }
 0x3b5   : > { %v9700_v12 = vpop.f32.mrf.mxu1  ;;  %10306 = vmatprep.subr.bf16.mxu1 %v14526_v36  ;;  %v9618_v40 = vadd.f32 %v9617_v53, %v18810_v26  ;;  %v19069_v45 = vadd.f32 %v9698_v19, %v9616_v17  ;;  %10237 = vmatprep.mubr.bf16.mxu0 %v19057_v49  ;;  %v14535_v26 = vld [vmem:[%s17665_s14 + $0x1984] ss:$16 sps:$4 sm:$0xff]   ;;  %v14533_v19 = vld [vmem:[%s17665_s14 + $0x1980] ss:$16 sps:$4 sm:$0xff]  }
 0x3b6   : > { %10320 = vmatprep.mubr.bf16.mxu1 %v19061_v11  ;;  %v9619_v28 = vpop.f32.mrf.mxu0  ;;  %v14538_v36 = vld [vmem:[%s17665_s14 + $0x1b84] ss:$16 sps:$4 sm:$0xff]   ;;  %v14539_v17 = vld [vmem:[%s17665_s14 + $0x1960] ss:$16 sps:$4 sm:$0xff]  }
 0x3b7   : > { %v9702_v29 = vpop.f32.mrf.mxu1  ;;  %v9620_v52 = vadd.f32 %v9619_v28, %v18815_v20  ;;  %v19076_v10 = vadd.f32 %v9700_v12, %v9618_v40  ;;  %10224 = vmatpush2.bf16.msra.mxu0 %v14521_v56  ;;  %v14536_v20 = vld [vmem:[%s17665_s14 + $0x1b80] ss:$16 sps:$4 sm:$0xff]   ;;  %v14541_v56 = vld [vmem:[%s17665_s14 + $0x1964] ss:$16 sps:$4 sm:$0xff]  }
 0x3b8   : > { %10307 = vmatpush2.bf16.msra.mxu1 %v14524_v16  ;;  %10225 = vmatprep.subr.bf16.mxu0 %v14529_v27  ;;  %v14544_v16 = vld [vmem:[%s17665_s14 + $0x1b64] ss:$16 sps:$4 sm:$0xff]   ;;  %v14542_v53 = vld [vmem:[%s17665_s14 + $0x1b60] ss:$16 sps:$4 sm:$0xff]  }
 0x3b9   : > { %10308 = vmatprep.subr.bf16.mxu1 %v14532_v0  ;;  %v19080_v33 = vadd.f32 %v9702_v29, %v9620_v52  ;;  %v14545_v12 = vld [vmem:[%s17665_s14 + $0x1940] ss:$16 sps:$4 sm:$0xff]   ;;  %v14553_v0 = vld [vmem:[%s17665_s14 + $0x1924] ss:$16 sps:$4 sm:$0xff]  }
 0x3ba   : > { %v14548_v27 = vld [vmem:[%s17665_s14 + $0x1b40] ss:$16 sps:$4 sm:$0xff]   ;;  %v14556_v40 = vld [vmem:[%s17665_s14 + $0x1b24] ss:$16 sps:$4 sm:$0xff]  }
 0x3bb   : > { %10226 = vmatpush2.bf16.msra.mxu0 %v14527_v22  ;;  %v14547_v22 = vld [vmem:[%s17665_s14 + $0x1944] ss:$16 sps:$4 sm:$0xff]   ;;  %v14551_v28 = vld [vmem:[%s17665_s14 + $0x1920] ss:$16 sps:$4 sm:$0xff]  }
 0x3bc   : > { %10309 = vmatpush2.bf16.msra.mxu1 %v14530_v61  ;;  %10227 = vmatprep.subr.bf16.mxu0 %v14535_v26  ;;  %v14550_v61 = vld [vmem:[%s17665_s14 + $0x1b44] ss:$16 sps:$4 sm:$0xff]   ;;  %v14554_v29 = vld [vmem:[%s17665_s14 + $0x1b20] ss:$16 sps:$4 sm:$0xff]  }
 0x3bd   : > { %10310 = vmatprep.subr.bf16.mxu1 %v14538_v36  ;;  %v14559_v52 = vld [vmem:[%s17665_s14 + $0x1904] ss:$16 sps:$4 sm:$0xff]   ;;  %v14557_v36 = vld [vmem:[%s17665_s14 + $0x1900] ss:$16 sps:$4 sm:$0xff]  }
 0x3be   : > { %v14562_v26 = vld [vmem:[%s17665_s14 + $0x1b04] ss:$16 sps:$4 sm:$0xff]   ;;  %v14572_v11 = vld [vmem:[%s17665_s14 + $0x1ec0] ss:$16 sps:$4 sm:$0xff]  }
 0x3bf   : > { %10228 = vmatpush2.bf16.msra.mxu0 %v14533_v19  ;;  %v14560_v19 = vld [vmem:[%s17665_s14 + $0x1b00] ss:$16 sps:$4 sm:$0xff]   ;;  %v14583_v49 = vld [vmem:[%s17665_s14 + $0x1c84] ss:$16 sps:$4 sm:$0xff]  }
 0x3c0   : > { %10311 = vmatpush2.bf16.msra.mxu1 %v14536_v20  ;;  %10229 = vmatprep.subr.bf16.mxu0 %v14541_v56  ;;  %v14565_v20 = vld [vmem:[%s17665_s14 + $0x1ce4] ss:$16 sps:$4 sm:$0xff]  }
 0x3c1   : > { %10312 = vmatprep.subr.bf16.mxu1 %v14544_v16  ;;  %v14568_v56 = vld [vmem:[%s17665_s14 + $0x1ee4] ss:$16 sps:$4 sm:$0xff]  }
 0x3c2   : > { %v2282_v16 = vld [vmem:[%s21382_s0 + $0x160] sm:$0xff] }
 0x3c3   : > { %10230 = vmatpush2.bf16.msra.mxu0 %v14539_v17  ;;  %v2298_v17 = vld [vmem:[%s21382_s0 + $0x1e0] sm:$0xff] }
 0x3c4   : > { %10313 = vmatpush2.bf16.msra.mxu1 %v14542_v53  ;;  %10231 = vmatprep.subr.bf16.mxu0 %v14547_v22  ;;  %v2283_v53 = vld [vmem:[%s21382_s0 + $0x168] sm:$0xff] }
 0x3c5   : > { %10314 = vmatprep.subr.bf16.mxu1 %v14550_v61  ;;  %v2299_v22 = vld [vmem:[%s21382_s0 + $0x1e8] sm:$0xff]  ;;  %v14563_v61 = vld [vmem:[%s17665_s14 + $0x1ce0] ss:$16 sps:$4 sm:$0xff]  }
 0x3c7   : > { %10232 = vmatpush2.bf16.msra.mxu0 %v14545_v12  ;;  %v14566_v12 = vld [vmem:[%s17665_s14 + $0x1ee0] ss:$16 sps:$4 sm:$0xff]  }
 0x3c8   : > { %10315 = vmatpush2.bf16.msra.mxu1 %v14548_v27  ;;  %10233 = vmatprep.subr.bf16.mxu0 %v14553_v0  ;;  %v19118_v27 = vcombine.low %v19021_v34, %v19026_v32  ;;  %v19122_v0 = vcombine.low %v19035_v21, %v19040_v2  ;;  %v19132_v34 = vcombine.high %v2282_v16, %v2298_v17 }
 0x3c9   : > { %10316 = vmatprep.subr.bf16.mxu1 %v14556_v40  ;;  %v19124_v40 = vpop.f32.mrf.mxu0  ;;  %v19134_v32 = vcombine.high %v2283_v53, %v2299_v22 }
 0x3ca   : > { %21667 = vst [vmem:[#allocation130_spill] sm:$0xff] %v19118_v27  ;;  %21668 = vst [vmem:[#allocation131_spill] sm:$0xff] %v19122_v0 }
 0x3cb   : > { %10234 = vmatpush2.bf16.msra.mxu0 %v14551_v28  ;;  %21669 = vst [vmem:[#allocation132_spill] sm:$0xff] %v19124_v40  ;;  %v19126_v28 = vpop.f32.mrf.mxu1  ;;  %21671 = vst [vmem:[#allocation134_spill] sm:$0xff] %v19132_v34 }
 0x3cc   : > { %10317 = vmatpush2.bf16.msra.mxu1 %v14554_v29  ;;  %10235 = vmatprep.subr.bf16.mxu0 %v14559_v52  ;;  %21670 = vst [vmem:[#allocation133_spill] sm:$0xff] %v19126_v28  ;;  %v14571_v29 = vld [vmem:[%s17665_s14 + $0x1cc4] ss:$16 sps:$4 sm:$0xff]   ;;  %21672 = vst [vmem:[#allocation135_spill] sm:$0xff] %v19134_v32 }
 0x3cd   : > { %10318 = vmatprep.subr.bf16.mxu1 %v14562_v26  ;;  %v14574_v52 = vld [vmem:[%s17665_s14 + $0x1ec4] ss:$16 sps:$4 sm:$0xff]   ;;  %v14569_v26 = vld [vmem:[%s17665_s14 + $0x1cc0] ss:$16 sps:$4 sm:$0xff]  }
 0x3ce   : > { %v2314_v28 = vld [vmem:[%s21382_s0 + $0x260] sm:$0xff] }
 0x3cf   : > { %10236 = vmatpush2.bf16.msra.mxu0 %v14557_v36  ;;  %v14577_v36 = vld [vmem:[%s17665_s14 + $0x1ca4] ss:$16 sps:$4 sm:$0xff]  }
 0x3d0   : > { %10319 = vmatpush2.bf16.msra.mxu1 %v14560_v19  ;;  %10371 = vmatprep.subr.bf16.mxu0 %v14565_v20  ;;  %v14580_v19 = vld [vmem:[%s17665_s14 + $0x1ea4] ss:$16 sps:$4 sm:$0xff]  }
 0x3d1   : > { %10454 = vmatprep.subr.bf16.mxu1 %v14568_v56 }
 0x3d2   : > { %v9741_v21 = vpop.f32.mrf.mxu0  ;;  %10238 = vmatmul.mubr.bf16.vlgmr.msra.gmra.mxu0 %v19118_v27 }
 0x3d3   : > { %v9824_v2 = vpop.f32.mrf.mxu1  ;;  %10321 = vmatmul.mubr.bf16.vlgmr.msra.gmra.mxu1 %v19122_v0  ;;  %v9742_v20 = vadd.f32 %v9741_v21, %v18876_v37  ;;  %10372 = vmatpush1.bf16.msra.mxu0 %v14563_v61  ;;  %v2330_v0 = vld [vmem:[%s21382_s0 + $0x2e0] sm:$0xff]  ;;  %v19160_v21 = vcombine.low %v2282_v16, %v2298_v17 }
 0x3d4   : > { %10455 = vmatpush1.bf16.msra.mxu1 %v14566_v12  ;;  %v9743_v56 = vpop.f32.mrf.mxu0  ;;  %10373 = vmatprep.subr.bf16.mxu0 %v14571_v29  ;;  %v14575_v37 = vld [vmem:[%s17665_s14 + $0x1ca0] ss:$16 sps:$4 sm:$0xff]   ;;  %v2315_v12 = vld [vmem:[%s21382_s0 + $0x268] sm:$0xff] }
 0x3d5   : > { %v9826_v41 = vpop.f32.mrf.mxu1  ;;  %10456 = vmatprep.subr.bf16.mxu1 %v14574_v52  ;;  %v19147_v27 = vadd.f32 %v9824_v2, %v9742_v20  ;;  %v9744_v40 = vadd.f32 %v9743_v56, %v18899_v9  ;;  %10247 = vmatprep.mubr.bf16.mxu0 %v19132_v34  ;;  %v14578_v61 = vld [vmem:[%s17665_s14 + $0x1ea0] ss:$16 sps:$4 sm:$0xff]   ;;  %v2331_v29 = vld [vmem:[%s21382_s0 + $0x2e8] sm:$0xff]  ;;  %21673 = vst [vmem:[#allocation136_spill] sm:$0xff] %v19160_v21 }
 0x3d6   : > { %10330 = vmatprep.mubr.bf16.mxu1 %v19134_v32  ;;  %v9745_v52 = vpop.f32.mrf.mxu0  ;;  %v19162_v2 = vcombine.low %v2283_v53, %v2299_v22  ;;  %v14581_v17 = vld [vmem:[%s17665_s14 + $0x1c80] ss:$16 sps:$4 sm:$0xff]   ;;  %v19179_v22 = vcombine.high %v2315_v12, %v2331_v29 }
 0x3d7   : > { %v9828_v9 = vpop.f32.mrf.mxu1  ;;  %v19164_v20 = vadd.f32 %v9826_v41, %v9744_v40  ;;  %v9746_v56 = vadd.f32 %v9745_v52, %v18908_v1  ;;  %10374 = vmatpush1.bf16.msra.mxu0 %v14569_v26  ;;  %v14584_v53 = vld [vmem:[%s17665_s14 + $0x1e80] ss:$16 sps:$4 sm:$0xff]   ;;  %v19177_v41 = vcombine.high %v2314_v28, %v2330_v0  ;;  %v14589_v40 = vld [vmem:[%s17665_s14 + $0x1c64] ss:$16 sps:$4 sm:$0xff]  }
 0x3d8   : > { %21674 = vst [vmem:[#allocation137_spill] sm:$0xff] %v19162_v2  ;;  %10457 = vmatpush1.bf16.msra.mxu1 %v14572_v11  ;;  %v19167_v32 = vpop.f32.mrf.mxu0  ;;  %10375 = vmatprep.subr.bf16.mxu0 %v14577_v36  ;;  %21678 = vst [vmem:[#allocation141_spill] sm:$0xff] %v19179_v22  ;;  %v14592_v26 = vld [vmem:[%s17665_s14 + $0x1e64] ss:$16 sps:$4 sm:$0xff]  }
 0x3d9   : > { %21675 = vst [vmem:[#allocation138_spill] sm:$0xff] %v19167_v32  ;;  %v19169_v34 = vpop.f32.mrf.mxu1  ;;  %10458 = vmatprep.subr.bf16.mxu1 %v14580_v19  ;;  %v19173_v16 = vadd.f32 %v9828_v9, %v9746_v56  ;;  %21677 = vst [vmem:[#allocation140_spill] sm:$0xff] %v19177_v41  ;;  %v2346_v9 = vld [vmem:[%s21382_s0 + $0x360] sm:$0xff] }
 0x3da   : > { %21676 = vst [vmem:[#allocation139_spill] sm:$0xff] %v19169_v34  ;;  %v9751_v1 = vpop.f32.mrf.mxu0  ;;  %10248 = vmatmul.mubr.bf16.gmra.mxu0 %v19160_v21  ;;  %v2362_v56 = vld [vmem:[%s21382_s0 + $0x3e0] sm:$0xff] }
 0x3db   : > { %10331 = vmatmul.mubr.bf16.gmra.mxu1 %v19162_v2  ;;  %v9834_v11 = vpop.f32.mrf.mxu1  ;;  %v9752_v36 = vadd.f32 %v9751_v1, %v18922_v3  ;;  %10376 = vmatpush1.bf16.msra.mxu0 %v14575_v37  ;;  %v14587_v3 = vld [vmem:[%s17665_s14 + $0x1c60] ss:$16 sps:$4 sm:$0xff]   ;;  %v2363_v37 = vld [vmem:[%s21382_s0 + $0x3e8] sm:$0xff]  ;;  %v19205_v1 = vcombine.low %v2314_v28, %v2330_v0  ;;  %v14595_v34 = vld [vmem:[%s17665_s14 + $0x1c44] ss:$16 sps:$4 sm:$0xff]  }
 0x3dc   : > { %10459 = vmatpush1.bf16.msra.mxu1 %v14578_v61  ;;  %v9753_v19 = vpop.f32.mrf.mxu0  ;;  %10377 = vmatprep.subr.bf16.mxu0 %v14583_v49  ;;  %v14590_v49 = vld [vmem:[%s17665_s14 + $0x1e60] ss:$16 sps:$4 sm:$0xff]   ;;  %v14598_v32 = vld [vmem:[%s17665_s14 + $0x1e44] ss:$16 sps:$4 sm:$0xff]  }
 0x3dd   : > { %v9836_v52 = vpop.f32.mrf.mxu1  ;;  %10460 = vmatprep.subr.bf16.mxu1 %v14586_v13  ;;  %v9754_v2 = vadd.f32 %v9753_v19, %v18945_v42  ;;  %v19193_v21 = vadd.f32 %v9834_v11, %v9752_v36  ;;  %10257 = vmatprep.mubr.bf16.mxu0 %v19177_v41  ;;  %v2347_v13 = vld [vmem:[%s21382_s0 + $0x368] sm:$0xff]  ;;  %21679 = vst [vmem:[#allocation142_spill] sm:$0xff] %v19205_v1  ;;  %v14593_v28 = vld [vmem:[%s17665_s14 + $0x1c40] ss:$16 sps:$4 sm:$0xff]  }
 0x3de   : > { %10340 = vmatprep.mubr.bf16.mxu1 %v19179_v22  ;;  %v9755_v42 = vpop.f32.mrf.mxu0  ;;  %v19207_v11 = vcombine.low %v2315_v12, %v2331_v29  ;;  %v14596_v12 = vld [vmem:[%s17665_s14 + $0x1e40] ss:$16 sps:$4 sm:$0xff]   ;;  %v19222_v29 = vcombine.high %v2346_v9, %v2362_v56 }
 0x3df   : > { %v9838_v61 = vpop.f32.mrf.mxu1  ;;  %v9756_v36 = vadd.f32 %v9755_v42, %v18953_v58  ;;  %v19210_v19 = vadd.f32 %v9836_v52, %v9754_v2  ;;  %10378 = vmatpush1.bf16.msra.mxu0 %v14581_v17  ;;  %v19224_v58 = vcombine.high %v2347_v13, %v2363_v37 }
 0x3e0   : > { %21680 = vst [vmem:[#allocation143_spill] sm:$0xff] %v19207_v11  ;;  %10461 = vmatpush1.bf16.msra.mxu1 %v14584_v53  ;;  %v19212_v22 = vpop.f32.mrf.mxu0  ;;  %10379 = vmatprep.subr.bf16.mxu0 %v14589_v40  ;;  %21683 = vst [vmem:[#allocation146_spill] sm:$0xff] %v19222_v29  ;;  %v14601_v53 = vld [vmem:[%s17665_s14 + $0x1c24] ss:$16 sps:$4 sm:$0xff]  }
 0x3e1   : > { %21681 = vst [vmem:[#allocation144_spill] sm:$0xff] %v19212_v22  ;;  %v19214_v41 = vpop.f32.mrf.mxu1  ;;  %10462 = vmatprep.subr.bf16.mxu1 %v14592_v26  ;;  %v19218_v0 = vadd.f32 %v9838_v61, %v9756_v36  ;;  %21684 = vst [vmem:[#allocation147_spill] sm:$0xff] %v19224_v58  ;;  %v14604_v40 = vld [vmem:[%s17665_s14 + $0x1e24] ss:$16 sps:$4 sm:$0xff]  }
 0x3e2   : > { %21682 = vst [vmem:[#allocation145_spill] sm:$0xff] %v19214_v41  ;;  %v9761_v2 = vpop.f32.mrf.mxu0  ;;  %10258 = vmatmul.mubr.bf16.gmra.mxu0 %v19205_v1  ;;  %v2378_v61 = vld [vmem:[%s21382_s0 + $0x460] sm:$0xff] }
 0x3e3   : > { %10341 = vmatmul.mubr.bf16.gmra.mxu1 %v19207_v11  ;;  %v9844_v17 = vpop.f32.mrf.mxu1  ;;  %v9762_v26 = vadd.f32 %v9761_v2, %v18967_v48  ;;  %10380 = vmatpush1.bf16.msra.mxu0 %v14587_v3  ;;  %v2394_v36 = vld [vmem:[%s21382_s0 + $0x4e0] sm:$0xff]  ;;  %v2395_v3 = vld [vmem:[%s21382_s0 + $0x4e8] sm:$0xff]  ;;  %v19250_v2 = vcombine.low %v2346_v9, %v2362_v56 }
 0x3e4   : > { %10463 = vmatpush1.bf16.msra.mxu1 %v14590_v49  ;;  %v9763_v52 = vpop.f32.mrf.mxu0  ;;  %10381 = vmatprep.subr.bf16.mxu0 %v14595_v34  ;;  %v14599_v48 = vld [vmem:[%s17665_s14 + $0x1c20] ss:$16 sps:$4 sm:$0xff]   ;;  %v14607_v41 = vld [vmem:[%s17665_s14 + $0x1c04] ss:$16 sps:$4 sm:$0xff]  }
 0x3e5   : > { %v9846_v42 = vpop.f32.mrf.mxu1  ;;  %10464 = vmatprep.subr.bf16.mxu1 %v14598_v32  ;;  %v9764_v11 = vadd.f32 %v9763_v52, %v18990_v18  ;;  %v19238_v1 = vadd.f32 %v9844_v17, %v9762_v26  ;;  %10267 = vmatprep.mubr.bf16.mxu0 %v19222_v29  ;;  %v14602_v34 = vld [vmem:[%s17665_s14 + $0x1e20] ss:$16 sps:$4 sm:$0xff]   ;;  %v2379_v32 = vld [vmem:[%s21382_s0 + $0x468] sm:$0xff]  ;;  %21685 = vst [vmem:[#allocation148_spill] sm:$0xff] %v19250_v2  ;;  %v14610_v22 = vld [vmem:[%s17665_s14 + $0x1e04] ss:$16 sps:$4 sm:$0xff]  }
 0x3e6   : > { %10350 = vmatprep.mubr.bf16.mxu1 %v19224_v58  ;;  %v9765_v18 = vpop.f32.mrf.mxu0  ;;  %v19252_v17 = vcombine.low %v2347_v13, %v2363_v37  ;;  %v14605_v56 = vld [vmem:[%s17665_s14 + $0x1c00] ss:$16 sps:$4 sm:$0xff]   ;;  %v19267_v37 = vcombine.high %v2378_v61, %v2394_v36 }
 0x3e7   : > { %v9848_v49 = vpop.f32.mrf.mxu1  ;;  %v9766_v26 = vadd.f32 %v9765_v18, %v18998_v8  ;;  %v19255_v52 = vadd.f32 %v9846_v42, %v9764_v11  ;;  %10382 = vmatpush1.bf16.msra.mxu0 %v14593_v28  ;;  %v14608_v13 = vld [vmem:[%s17665_s14 + $0x1e00] ss:$16 sps:$4 sm:$0xff]   ;;  %v19269_v8 = vcombine.high %v2379_v32, %v2395_v3 }
 0x3e8   : > { %21686 = vst [vmem:[#allocation149_spill] sm:$0xff] %v19252_v17  ;;  %10465 = vmatpush1.bf16.msra.mxu1 %v14596_v12  ;;  %v19257_v58 = vpop.f32.mrf.mxu0  ;;  %10383 = vmatprep.subr.bf16.mxu0 %v14601_v53  ;;  %21689 = vst [vmem:[#allocation152_spill] sm:$0xff] %v19267_v37  ;;  %v14613_v12 = vld [vmem:[%s17665_s14 + $0x1de4] ss:$16 sps:$4 sm:$0xff]  }
 0x3e9   : > { %21687 = vst [vmem:[#allocation150_spill] sm:$0xff] %v19257_v58  ;;  %v19259_v29 = vpop.f32.mrf.mxu1  ;;  %10466 = vmatprep.subr.bf16.mxu1 %v14604_v40  ;;  %v19263_v9 = vadd.f32 %v9848_v49, %v9766_v26  ;;  %21690 = vst [vmem:[#allocation153_spill] sm:$0xff] %v19269_v8  ;;  %v14616_v53 = vld [vmem:[%s17665_s14 + $0x1f24] ss:$16 sps:$4 sm:$0xff]   ;;  %v2253_v49 = vld [vmem:[%s21382_s0 + $0x78] sm:$0xff] }
 0x3ea   : > { %21688 = vst [vmem:[#allocation151_spill] sm:$0xff] %v19259_v29  ;;  %v9771_v11 = vpop.f32.mrf.mxu0  ;;  %10268 = vmatmul.mubr.bf16.gmra.mxu0 %v19250_v2  ;;  %v2269_v26 = vld [vmem:[%s21382_s0 + $0xf8] sm:$0xff]  ;;  %v14619_v29 = vld [vmem:[%s17665_s14 + $0x1dc4] ss:$16 sps:$4 sm:$0xff]  }
 0x3eb   : > { %10351 = vmatmul.mubr.bf16.gmra.mxu1 %v19252_v17  ;;  %v9854_v28 = vpop.f32.mrf.mxu1  ;;  %v9772_v40 = vadd.f32 %v9771_v11, %v19012_v25  ;;  %10384 = vmatpush1.bf16.msra.mxu0 %v14599_v48  ;;  %v14611_v25 = vld [vmem:[%s17665_s14 + $0x1de0] ss:$16 sps:$4 sm:$0xff]   ;;  %v19299_v11 = vcombine.low %v2378_v61, %v2394_v36  ;;  %v14622_v58 = vld [vmem:[%s17665_s14 + $0x1f04] ss:$16 sps:$4 sm:$0xff]  }
 0x3ec   : > { %10467 = vmatpush1.bf16.msra.mxu1 %v14602_v34  ;;  %v9773_v42 = vpop.f32.mrf.mxu0  ;;  %10385 = vmatprep.subr.bf16.mxu0 %v14607_v41  ;;  %v14614_v41 = vld [vmem:[%s17665_s14 + $0x1f20] ss:$16 sps:$4 sm:$0xff]  }
 0x3ed   : > { %v9856_v18 = vpop.f32.mrf.mxu1  ;;  %10468 = vmatprep.subr.bf16.mxu1 %v14610_v22  ;;  %v9774_v17 = vadd.f32 %v9773_v42, %v19043_v55  ;;  %v19283_v2 = vadd.f32 %v9854_v28, %v9772_v40  ;;  %10277 = vmatprep.mubr.bf16.mxu0 %v19267_v37  ;;  %v19292_v22 = vld [vmem:[%s21382_s0 + $0x70] sm:$0xff]  ;;  %21691 = vst [vmem:[#allocation154_spill] sm:$0xff] %v19299_v11 }
 0x3ee   : > { %10360 = vmatprep.mubr.bf16.mxu1 %v19269_v8  ;;  %v19297_v48 = vld [vmem:[%s21382_s0 + $0xf0] sm:$0xff]  ;;  %v9775_v55 = vpop.f32.mrf.mxu0  ;;  %v19301_v28 = vcombine.low %v2379_v32, %v2395_v3  ;;  %v19316_v32 = vcombine.high %v2253_v49, %v2269_v26 }
 0x3ef   : > { %v9858_v34 = vpop.f32.mrf.mxu1  ;;  %v9776_v40 = vadd.f32 %v9775_v55, %v19051_v35  ;;  %v19304_v42 = vadd.f32 %v9856_v18, %v9774_v17  ;;  %10386 = vmatpush1.bf16.msra.mxu0 %v14605_v56  ;;  %v14617_v61 = vld [vmem:[%s17665_s14 + $0x1dc0] ss:$16 sps:$4 sm:$0xff]   ;;  %v19320_v35 = vcombine.high %v19292_v22, %v19297_v48  ;;  %v14628_v18 = vld [vmem:[%s17665_s14 + $0xec] ss:$16 sps:$4 sm:$0xff]  }
 0x3f0   : > { %21692 = vst [vmem:[#allocation155_spill] sm:$0xff] %v19301_v28  ;;  %10469 = vmatpush1.bf16.msra.mxu1 %v14608_v13  ;;  %v19306_v8 = vpop.f32.mrf.mxu0  ;;  %10387 = vmatprep.subr.bf16.mxu0 %v14613_v12  ;;  %v14620_v36 = vld [vmem:[%s17665_s14 + $0x1f00] ss:$16 sps:$4 sm:$0xff]   ;;  %21695 = vst [vmem:[#allocation158_spill] sm:$0xff] %v19316_v32 }
 0x3f1   : > { %21693 = vst [vmem:[#allocation156_spill] sm:$0xff] %v19306_v8  ;;  %v19308_v37 = vpop.f32.mrf.mxu1  ;;  %10482 = vmatprep.subr.bf16.mxu1 %v14616_v53  ;;  %v19312_v57 = vadd.f32 %v9858_v34, %v9776_v40  ;;  %21696 = vst [vmem:[#allocation159_spill] sm:$0xff] %v19320_v35  ;;  %v14625_v53 = vld [vmem:[%s17665_s14 + $0x1da4] ss:$16 sps:$4 sm:$0xff]   ;;  %v14623_v40 = vld [vmem:[%s17665_s14 + $0x1da0] ss:$16 sps:$4 sm:$0xff]  }
 0x3f2   : > { %21694 = vst [vmem:[#allocation157_spill] sm:$0xff] %v19308_v37  ;;  %v9781_v3 = vpop.f32.mrf.mxu0  ;;  %10278 = vmatmul.mubr.bf16.gmra.mxu0 %v19299_v11  ;;  %v14671_v8 = vld [vmem:[%s17665_s14 + $0x1e8] ss:$16 sps:$4 sm:$0xff]  }
 0x3f3   : > { %10361 = vmatmul.mubr.bf16.gmra.mxu1 %v19301_v28  ;;  %v9864_v17 = vpop.f32.mrf.mxu1  ;;  %v9782_v56 = vadd.f32 %v9781_v3, %v19069_v45  ;;  %10388 = vmatpush2.bf16.msra.mxu0 %v14611_v25  ;;  %v14626_v28 = vld [vmem:[%s17665_s14 + $0xe8] ss:$16 sps:$4 sm:$0xff]   ;;  %v19341_v25 = vcombine.low %v2253_v49, %v2269_v26  ;;  %v14640_v26 = vld [vmem:[%s17665_s14 + $0xac] ss:$16 sps:$4 sm:$0xff]  }
 0x3f4   : > { %10483 = vmatpush2.bf16.msra.mxu1 %v14614_v41  ;;  %v9783_v13 = vpop.f32.mrf.mxu0  ;;  %10389 = vmatprep.subr.bf16.mxu0 %v14619_v29  ;;  %v2285_v45 = vld [vmem:[%s21382_s0 + $0x178] sm:$0xff] }
 0x3f5   : > { %v9866_v12 = vpop.f32.mrf.mxu1  ;;  %10484 = vmatprep.subr.bf16.mxu1 %v14622_v58  ;;  %v9784_v55 = vadd.f32 %v9783_v13, %v19076_v10  ;;  %v19328_v34 = vadd.f32 %v9864_v17, %v9782_v56  ;;  %13739 = vmatprep.mubr.msk.bf16.mxu1 %vm9193_vm0, %v19316_v32  ;;  %v2301_v10 = vld [vmem:[%s21382_s0 + $0x1f8] sm:$0xff]  ;;  %21697 = vst [vmem:[#allocation160_spill] sm:$0xff] %v19341_v25  ;;  %v14631_v17 = vld [vmem:[%s17665_s14 + $0x1d84] ss:$16 sps:$4 sm:$0xff]   ;;  %v14629_v32 = vld [vmem:[%s17665_s14 + $0x1d80] ss:$16 sps:$4 sm:$0xff]  }
 0x3f6   : > { %10403 = vmatprep.mubr.bf16.mxu0 %v19320_v35  ;;  %v9785_v29 = vpop.f32.mrf.mxu0  ;;  %v14634_v56 = vld [vmem:[%s17665_s14 + $0xcc] ss:$16 sps:$4 sm:$0xff]   ;;  %v14632_v35 = vld [vmem:[%s17665_s14 + $0xc8] ss:$16 sps:$4 sm:$0xff]   ;;  %v19352_v49 = vcombine.high %v2285_v45, %v2301_v10 }
 0x3f7   : > { %v9868_v58 = vpop.f32.mrf.mxu1  ;;  %v9786_v41 = vadd.f32 %v9785_v29, %v19080_v33  ;;  %v19344_v3 = vadd.f32 %v9866_v12, %v9784_v55  ;;  %10390 = vmatpush2.bf16.msra.mxu0 %v14617_v61  ;;  %v14637_v33 = vld [vmem:[%s17665_s14 + $0x1d64] ss:$16 sps:$4 sm:$0xff]   ;;  %v2317_v61 = vld [vmem:[%s21382_s0 + $0x278] sm:$0xff]  ;;  %v14635_v12 = vld [vmem:[%s17665_s14 + $0x1d60] ss:$16 sps:$4 sm:$0xff]  }
 0x3f8   : > { %10485 = vmatpush2.bf16.msra.mxu1 %v14620_v36  ;;  %10391 = vmatprep.subr.bf16.mxu0 %v14625_v53  ;;  %21698 = vst [vmem:[#allocation161_spill] sm:$0xff] %v19352_v49  ;;  %v2333_v36 = vld [vmem:[%s21382_s0 + $0x2f8] sm:$0xff] }
 0x3f9   : > { %10537 = vmatprep.subr.bf16.mxu1 %v14628_v18  ;;  %v19348_v13 = vadd.f32 %v9868_v58, %v9786_v41  ;;  %v14638_v53 = vld [vmem:[%s17665_s14 + $0xa8] ss:$16 sps:$4 sm:$0xff]   ;;  %v14643_v18 = vld [vmem:[%s17665_s14 + $0x1d44] ss:$16 sps:$4 sm:$0xff]   ;;  %v14646_v55 = vld [vmem:[%s17665_s14 + $0x8c] ss:$16 sps:$4 sm:$0xff]   ;;  %v19373_v58 = vcombine.high %v2317_v61, %v2333_v36 }
 0x3fa   : > { %v14644_v29 = vld [vmem:[%s17665_s14 + $0x88] ss:$16 sps:$4 sm:$0xff]   ;;  %v14647_v41 = vld [vmem:[%s17665_s14 + $0x1d20] ss:$16 sps:$4 sm:$0xff]  }
 0x3fb   : > { %10487 = vmatmul.mubr.bf16.vlgmr.msra.gmra.mxu1 %v19341_v25  ;;  %10392 = vmatpush2.bf16.msra.mxu0 %v14623_v40  ;;  %v14641_v40 = vld [vmem:[%s17665_s14 + $0x1d40] ss:$16 sps:$4 sm:$0xff]   ;;  %21700 = vst [vmem:[#allocation163_spill] sm:$0xff] %v19373_v58 }
 0x3fc   : > { %10538 = vmatpush1.bf16.msra.mxu1 %v14626_v28  ;;  %10393 = vmatprep.subr.bf16.mxu0 %v14631_v17  ;;  %v19367_v28 = vcombine.low %v2285_v45, %v2301_v10  ;;  %v14649_v45 = vld [vmem:[%s17665_s14 + $0x1d24] ss:$16 sps:$4 sm:$0xff]   ;;  %v2365_v10 = vld [vmem:[%s21382_s0 + $0x3f8] sm:$0xff] }
 0x3fd   : > { %10539 = vmatprep.subr.bf16.mxu1 %v14634_v56  ;;  %13740 = vmatprep.mubr.msk.bf16.mxu1 %vm9193_vm0, %v19352_v49  ;;  %v14650_v17 = vld [vmem:[%s17665_s14 + $0x68] ss:$16 sps:$4 sm:$0xff]   ;;  %v19388_v56 = vcombine.low %v2317_v61, %v2333_v36  ;;  %v2284_v61 = vld [vmem:[%s21382_s0 + $0x170] sm:$0xff] }
 0x3fe   : > { %21699 = vst [vmem:[#allocation162_spill] sm:$0xff] %v19367_v28  ;;  %v2300_v36 = vld [vmem:[%s21382_s0 + $0x1f0] sm:$0xff]  ;;  %v14665_v49 = vld [vmem:[%s17665_s14 + $0x8] ss:$16 sps:$4 sm:$0xff]  }
 0x3ff   : > { %10394 = vmatpush2.bf16.msra.mxu0 %v14629_v32  ;;  %v14652_v32 = vld [vmem:[%s17665_s14 + $0x6c] ss:$16 sps:$4 sm:$0xff]   ;;  %21701 = vst [vmem:[#allocation164_spill] sm:$0xff] %v19388_v56  ;;  %v19429_v25 = vcombine.high %v2284_v61, %v2300_v36 }
 0x400   : > { %10540 = vmatpush1.bf16.msra.mxu1 %v14632_v35  ;;  %10395 = vmatprep.subr.bf16.mxu0 %v14637_v33  ;;  %v2349_v35 = vld [vmem:[%s21382_s0 + $0x378] sm:$0xff]  ;;  %v14655_v33 = vld [vmem:[%s17665_s14 + $0x1d04] ss:$16 sps:$4 sm:$0xff]  }
 0x401   : > { %10541 = vmatprep.subr.bf16.mxu1 %v14640_v26  ;;  %v14658_v26 = vld [vmem:[%s17665_s14 + $0x4c] ss:$16 sps:$4 sm:$0xff]   ;;  %21705 = vst [vmem:[#allocation168_spill] sm:$0xff] %v19429_v25 }
 0x403   : > { %10497 = vmatmul.mubr.bf16.gmra.mxu1 %v19367_v28  ;;  %10396 = vmatpush2.bf16.msra.mxu0 %v14635_v12  ;;  %v14653_v12 = vld [vmem:[%s17665_s14 + $0x1d00] ss:$16 sps:$4 sm:$0xff]   ;;  %v14670_v28 = vld [vmem:[%s17665_s14 + $0x2cc] ss:$16 sps:$4 sm:$0xff]  }
 0x404   : > { %10542 = vmatpush1.bf16.msra.mxu1 %v14638_v53  ;;  %10397 = vmatprep.subr.bf16.mxu0 %v14643_v18  ;;  %v14656_v53 = vld [vmem:[%s17665_s14 + $0x48] ss:$16 sps:$4 sm:$0xff]   ;;  %v19394_v18 = vcombine.high %v2349_v35, %v2365_v10 }
 0x405   : > { %10543 = vmatprep.subr.bf16.mxu1 %v14646_v55  ;;  %13741 = vmatprep.mubr.msk.bf16.mxu1 %vm9193_vm0, %v19373_v58  ;;  %v14661_v55 = vld [vmem:[%s17665_s14 + $0x2c] ss:$16 sps:$4 sm:$0xff]  }
 0x406   : > { %21702 = vst [vmem:[#allocation165_spill] sm:$0xff] %v19394_v18  ;;  %v14664_v58 = vld [vmem:[%s17665_s14 + $0x2ec] ss:$16 sps:$4 sm:$0xff]  }
 0x407   : > { %10398 = vmatpush2.bf16.msra.mxu0 %v14641_v40  ;;  %v2381_v40 = vld [vmem:[%s21382_s0 + $0x478] sm:$0xff] }
 0x408   : > { %10544 = vmatpush1.bf16.msra.mxu1 %v14644_v29  ;;  %10399 = vmatprep.subr.bf16.mxu0 %v14649_v45  ;;  %v2397_v29 = vld [vmem:[%s21382_s0 + $0x4f8] sm:$0xff] }
 0x409   : > { %10545 = vmatprep.subr.bf16.mxu1 %v14652_v32  ;;  %v14659_v45 = vld [vmem:[%s17665_s14 + $0x28] ss:$16 sps:$4 sm:$0xff]  }
 0x40a   : > { %v14662_v32 = vld [vmem:[%s17665_s14 + $0x2e8] ss:$16 sps:$4 sm:$0xff]  }
 0x40b   : > { %10507 = vmatmul.mubr.bf16.gmra.mxu1 %v19388_v56  ;;  %10400 = vmatpush2.bf16.msra.mxu0 %v14647_v41  ;;  %v19417_v41 = vcombine.low %v19292_v22, %v19297_v48  ;;  %v14667_v56 = vld [vmem:[%s17665_s14 + $0xc] ss:$16 sps:$4 sm:$0xff]   ;;  %v19431_v22 = vcombine.high %v2381_v40, %v2397_v29 }
 0x40c   : > { %10546 = vmatpush1.bf16.msra.mxu1 %v14650_v17  ;;  %10401 = vmatprep.subr.bf16.mxu0 %v14655_v33  ;;  %v19419_v17 = vcombine.low %v2349_v35, %v2365_v10  ;;  %v19421_v33 = vpop.f32.mrf.mxu0 }
 0x40d   : > { %10547 = vmatprep.subr.bf16.mxu1 %v14658_v26  ;;  %13742 = vmatprep.mubr.msk.bf16.mxu1 %vm9193_vm0, %v19394_v18  ;;  %21703 = vst [vmem:[#allocation166_spill] sm:$0xff] %v19417_v41  ;;  %v19423_v26 = vpop.f32.mrf.mxu1  ;;  %v14668_v18 = vld [vmem:[%s17665_s14 + $0x2c8] ss:$16 sps:$4 sm:$0xff]   ;;  %21706 = vst [vmem:[#allocation169_spill] sm:$0xff] %v19431_v22 }
 0x40e   : > { %21704 = vst [vmem:[#allocation167_spill] sm:$0xff] %v19419_v17 }
 0x40f   : > { %10402 = vmatpush2.bf16.msra.mxu0 %v14653_v12 }
 0x410   : > { %10548 = vmatpush1.bf16.msra.mxu1 %v14656_v53  ;;  %10620 = vmatprep.subr.bf16.mxu0 %v14664_v58  ;;  %v14673_v53 = vld [vmem:[%s17665_s14 + $0x1ec] ss:$16 sps:$4 sm:$0xff]  }
 0x411   : > { %10549 = vmatprep.subr.bf16.mxu1 %v14661_v55  ;;  %v14676_v55 = vld [vmem:[%s17665_s14 + $0x2ac] ss:$16 sps:$4 sm:$0xff]  }
 0x412   : > { %v9907_v48 = vpop.f32.mrf.mxu0  ;;  %10404 = vmatmul.mubr.bf16.vlgmr.msra.gmra.mxu0 %v19417_v41  ;;  %v14674_v41 = vld [vmem:[%s17665_s14 + $0x2a8] ss:$16 sps:$4 sm:$0xff]  }
 0x413   : > { %v9990_v35 = vpop.f32.mrf.mxu1  ;;  %10517 = vmatmul.mubr.bf16.gmra.mxu1 %v19419_v17  ;;  %v9908_v58 = vadd.f32 %v9907_v48, %v19147_v27  ;;  %10621 = vmatpush1.bf16.msra.mxu0 %v14662_v32  ;;  %v2316_v27 = vld [vmem:[%s21382_s0 + $0x270] sm:$0xff]  ;;  %v19454_v32 = vcombine.low %v2381_v40, %v2397_v29  ;;  %v14682_v17 = vld [vmem:[%s17665_s14 + $0x28c] ss:$16 sps:$4 sm:$0xff]  }
 0x414   : > { %10550 = vmatpush1.bf16.msra.mxu1 %v14659_v45  ;;  %v9909_v10 = vpop.f32.mrf.mxu0  ;;  %10622 = vmatprep.subr.bf16.mxu0 %v14670_v28  ;;  %v2332_v28 = vld [vmem:[%s21382_s0 + $0x2f0] sm:$0xff]  ;;  %v19452_v45 = vcombine.low %v2284_v61, %v2300_v36  ;;  %v14677_v61 = vld [vmem:[%s17665_s14 + $0x1c8] ss:$16 sps:$4 sm:$0xff]  }
 0x415   : > { %v9992_v12 = vpop.f32.mrf.mxu1  ;;  %10551 = vmatprep.subr.bf16.mxu1 %v14667_v56  ;;  %v19438_v11 = vadd.f32 %v9990_v35, %v9908_v58  ;;  %v9910_v37 = vadd.f32 %v9909_v10, %v19164_v20  ;;  %10413 = vmatprep.mubr.bf16.mxu0 %v19429_v25  ;;  %21708 = vst [vmem:[#allocation171_spill] sm:$0xff] %v19454_v32  ;;  %v14680_v36 = vld [vmem:[%s17665_s14 + $0x288] ss:$16 sps:$4 sm:$0xff]  }
 0x416   : > { %13743 = vmatprep.mubr.msk.bf16.mxu1 %vm9193_vm0, %v19431_v22  ;;  %v9911_v56 = vpop.f32.mrf.mxu0  ;;  %21707 = vst [vmem:[#allocation170_spill] sm:$0xff] %v19452_v45  ;;  %v14679_v22 = vld [vmem:[%s17665_s14 + $0x1cc] ss:$16 sps:$4 sm:$0xff]  }
 0x417   : > { %v9994_v20 = vpop.f32.mrf.mxu1  ;;  %v19456_v48 = vadd.f32 %v9992_v12, %v9910_v37  ;;  %v9912_v35 = vadd.f32 %v9911_v56, %v19173_v16  ;;  %10623 = vmatpush1.bf16.msra.mxu0 %v14668_v18  ;;  %v19469_v37 = vcombine.high %v2316_v27, %v2332_v28  ;;  %v14685_v12 = vld [vmem:[%s17665_s14 + $0x1ac] ss:$16 sps:$4 sm:$0xff]  }
 0x418   : > { %10552 = vmatpush1.bf16.msra.mxu1 %v14665_v49  ;;  %v19459_v58 = vpop.f32.mrf.mxu0  ;;  %10624 = vmatprep.subr.bf16.mxu0 %v14676_v55 }
 0x419   : > { %v19461_v10 = vpop.f32.mrf.mxu1  ;;  %10553 = vmatprep.subr.bf16.mxu1 %v14673_v53  ;;  %v19465_v25 = vadd.f32 %v9994_v20, %v9912_v35  ;;  %21709 = vst [vmem:[#allocation172_spill] sm:$0xff] %v19469_v37  ;;  %v14688_v53 = vld [vmem:[%s17665_s14 + $0x26c] ss:$16 sps:$4 sm:$0xff]   ;;  %v14683_v20 = vld [vmem:[%s17665_s14 + $0x1a8] ss:$16 sps:$4 sm:$0xff]  }
 0x41a   : > { %v9917_v40 = vpop.f32.mrf.mxu0  ;;  %10414 = vmatmul.mubr.bf16.gmra.mxu0 %v19452_v45  ;;  %v14686_v35 = vld [vmem:[%s17665_s14 + $0x268] ss:$16 sps:$4 sm:$0xff]  }
 0x41b   : > { %v10000_v16 = vpop.f32.mrf.mxu1  ;;  %10527 = vmatmul.mubr.bf16.gmra.mxu1 %v19454_v32  ;;  %v9918_v49 = vadd.f32 %v9917_v40, %v19193_v21  ;;  %10625 = vmatpush1.bf16.msra.mxu0 %v14674_v41  ;;  %v2348_v21 = vld [vmem:[%s21382_s0 + $0x370] sm:$0xff] }
 0x41c   : > { %10554 = vmatpush2.bf16.msra.mxu1 %v14671_v8  ;;  %v9919_v18 = vpop.f32.mrf.mxu0  ;;  %10626 = vmatprep.subr.bf16.mxu0 %v14682_v17  ;;  %v2364_v8 = vld [vmem:[%s21382_s0 + $0x3f0] sm:$0xff]  ;;  %v19489_v17 = vcombine.low %v2316_v27, %v2332_v28  ;;  %v14689_v27 = vld [vmem:[%s17665_s14 + $0x188] ss:$16 sps:$4 sm:$0xff]  }
 0x41d   : > { %v10002_v29 = vpop.f32.mrf.mxu1  ;;  %10555 = vmatprep.subr.bf16.mxu1 %v14679_v22  ;;  %v9920_v55 = vadd.f32 %v9919_v18, %v19210_v19  ;;  %v19477_v56 = vadd.f32 %v10000_v16, %v9918_v49  ;;  %10423 = vmatprep.mubr.bf16.mxu0 %v19469_v37  ;;  %v14691_v18 = vld [vmem:[%s17665_s14 + $0x18c] ss:$16 sps:$4 sm:$0xff]   ;;  %v14692_v28 = vld [vmem:[%s17665_s14 + $0x248] ss:$16 sps:$4 sm:$0xff]   ;;  %v19504_v37 = vcombine.high %v2348_v21, %v2364_v8 }
 0x41e   : > { %10569 = vmatprep.mubr.bf16.mxu1 %v17655_v44  ;;  %v9921_v19 = vpop.f32.mrf.mxu0  ;;  %21710 = vst [vmem:[#allocation173_spill] sm:$0xff] %v19489_v17  ;;  %v14694_v44 = vld [vmem:[%s17665_s14 + $0x24c] ss:$16 sps:$4 sm:$0xff]  }
 0x41f   : > { %v10004_v41 = vpop.f32.mrf.mxu1  ;;  %v9922_v22 = vadd.f32 %v9921_v19, %v19218_v0  ;;  %v19492_v40 = vadd.f32 %v10002_v29, %v9920_v55  ;;  %10627 = vmatpush1.bf16.msra.mxu0 %v14680_v36  ;;  %21712 = vst [vmem:[#allocation175_spill] sm:$0xff] %v19504_v37  ;;  %v14700_v55 = vld [vmem:[%s17665_s14 + $0x22c] ss:$16 sps:$4 sm:$0xff]  }
 0x420   : > { %10556 = vmatpush2.bf16.msra.mxu1 %v14677_v61  ;;  %v19494_v16 = vpop.f32.mrf.mxu0  ;;  %10628 = vmatprep.subr.bf16.mxu0 %v14688_v53  ;;  %v14697_v53 = vld [vmem:[%s17665_s14 + $0x16c] ss:$16 sps:$4 sm:$0xff]  }
 0x421   : > { %v19496_v49 = vpop.f32.mrf.mxu1  ;;  %10557 = vmatprep.subr.bf16.mxu1 %v14685_v12  ;;  %v19500_v32 = vadd.f32 %v10004_v41, %v9922_v22  ;;  %v14695_v22 = vld [vmem:[%s17665_s14 + $0x168] ss:$16 sps:$4 sm:$0xff]  }
 0x422   : > { %21711 = vst [vmem:[#allocation174_spill] sm:$0xff] %v19496_v49  ;;  %v9927_v0 = vpop.f32.mrf.mxu0  ;;  %10424 = vmatmul.mubr.bf16.gmra.mxu0 %v19489_v17  ;;  %v14698_v17 = vld [vmem:[%s17665_s14 + $0x228] ss:$16 sps:$4 sm:$0xff]  }
 0x423   : > { %v10010_v61 = vpop.f32.mrf.mxu1  ;;  %v9928_v36 = vadd.f32 %v9927_v0, %v19238_v1  ;;  %10629 = vmatpush1.bf16.msra.mxu0 %v14686_v35  ;;  %10433 = vmatprep.mubr.bf16.mxu0 %v19504_v37  ;;  %v2380_v1 = vld [vmem:[%s21382_s0 + $0x470] sm:$0xff]  ;;  %v14706_v37 = vld [vmem:[%s17665_s14 + $0x20c] ss:$16 sps:$4 sm:$0xff]  }
 0x424   : > { %10558 = vmatpush2.bf16.msra.mxu1 %v14683_v20  ;;  %v9929_v29 = vpop.f32.mrf.mxu0  ;;  %10630 = vmatprep.subr.bf16.mxu0 %v14694_v44  ;;  %v2396_v20 = vld [vmem:[%s21382_s0 + $0x4f0] sm:$0xff] }
 0x425   : > { %v10012_v12 = vpop.f32.mrf.mxu1  ;;  %10559 = vmatprep.subr.bf16.mxu1 %v14691_v18  ;;  %v9930_v19 = vadd.f32 %v9929_v29, %v19255_v52  ;;  %v19511_v41 = vadd.f32 %v10010_v61, %v9928_v36  ;;  %v19522_v18 = vcombine.low %v2348_v21, %v2364_v8  ;;  %v14703_v29 = vld [vmem:[%s17665_s14 + $0x14c] ss:$16 sps:$4 sm:$0xff]   ;;  %v14701_v21 = vld [vmem:[%s17665_s14 + $0x148] ss:$16 sps:$4 sm:$0xff]   ;;  %v19537_v49 = vcombine.high %v2380_v1, %v2396_v20 }
 0x426   : > { %v9931_v35 = vpop.f32.mrf.mxu0  ;;  %v14704_v8 = vld [vmem:[%s17665_s14 + $0x208] ss:$16 sps:$4 sm:$0xff]  }
 0x427   : > { %v10014_v52 = vpop.f32.mrf.mxu1  ;;  %21713 = vst [vmem:[#allocation176_spill] sm:$0xff] %v19522_v18  ;;  %v9932_v44 = vadd.f32 %v9931_v35, %v19263_v9  ;;  %v19525_v0 = vadd.f32 %v10012_v12, %v9930_v19  ;;  %10631 = vmatpush1.bf16.msra.mxu0 %v14692_v28  ;;  %21714 = vst [vmem:[#allocation177_spill] sm:$0xff] %v19537_v49  ;;  %v14712_v19 = vld [vmem:[%s17665_s14 + $0x3ec] ss:$16 sps:$4 sm:$0xff]  }
 0x428   : > { %10560 = vmatpush2.bf16.msra.mxu1 %v14689_v27  ;;  %v19527_v61 = vpop.f32.mrf.mxu0  ;;  %10632 = vmatprep.subr.bf16.mxu0 %v14700_v55  ;;  %v14709_v55 = vld [vmem:[%s17665_s14 + $0x12c] ss:$16 sps:$4 sm:$0xff]  }
 0x429   : > { %v19529_v36 = vpop.f32.mrf.mxu1  ;;  %10561 = vmatprep.subr.bf16.mxu1 %v14697_v53  ;;  %v19533_v45 = vadd.f32 %v10014_v52, %v9932_v44  ;;  %v14707_v44 = vld [vmem:[%s17665_s14 + $0x128] ss:$16 sps:$4 sm:$0xff]  }
 0x42a   : > { %v9937_v9 = vpop.f32.mrf.mxu0  ;;  %10434 = vmatmul.mubr.bf16.gmra.mxu0 %v19522_v18  ;;  %v14710_v18 = vld [vmem:[%s17665_s14 + $0x3e8] ss:$16 sps:$4 sm:$0xff]  }
 0x42b   : > { %v10020_v27 = vpop.f32.mrf.mxu1  ;;  %v9938_v28 = vadd.f32 %v9937_v9, %v19283_v2  ;;  %10633 = vmatpush1.bf16.msra.mxu0 %v14698_v17  ;;  %10443 = vmatprep.mubr.bf16.mxu0 %v19537_v49  ;;  %v14952_v49 = vld [vmem:[%s17665_s14 + $0xeec] ss:$16 sps:$4 sm:$0xff]  }
 0x42c   : > { %10562 = vmatpush2.bf16.msra.mxu1 %v14695_v22  ;;  %v9939_v12 = vpop.f32.mrf.mxu0  ;;  %10634 = vmatprep.subr.bf16.mxu0 %v14706_v37  ;;  %v19549_v22 = vcombine.low %v2380_v1, %v2396_v20  ;;  %v14713_v1 = vld [vmem:[%s17665_s14 + $0x108] ss:$16 sps:$4 sm:$0xff]  }
 0x42d   : > { %v10022_v53 = vpop.f32.mrf.mxu1  ;;  %10563 = vmatprep.subr.bf16.mxu1 %v14703_v29  ;;  %v9940_v35 = vadd.f32 %v9939_v12, %v19304_v42  ;;  %v19544_v52 = vadd.f32 %v10020_v27, %v9938_v28  ;;  %v14715_v27 = vld [vmem:[%s17665_s14 + $0x10c] ss:$16 sps:$4 sm:$0xff]   ;;  %v14716_v20 = vld [vmem:[%s17665_s14 + $0x3c8] ss:$16 sps:$4 sm:$0xff]  }
 0x42e   : > { %v9941_v2 = vpop.f32.mrf.mxu0  ;;  %21715 = vst [vmem:[#allocation178_spill] sm:$0xff] %v19549_v22  ;;  %v14718_v28 = vld [vmem:[%s17665_s14 + $0x3cc] ss:$16 sps:$4 sm:$0xff]  }
 0x42f   : > { %v10024_v17 = vpop.f32.mrf.mxu1  ;;  %v9942_v37 = vadd.f32 %v9941_v2, %v19312_v57  ;;  %v19552_v29 = vadd.f32 %v10022_v53, %v9940_v35  ;;  %10635 = vmatpush1.bf16.msra.mxu0 %v14704_v8  ;;  %v14724_v35 = vld [vmem:[%s17665_s14 + $0x4ec] ss:$16 sps:$4 sm:$0xff]  }
 0x430   : > { %10564 = vmatpush2.bf16.msra.mxu1 %v14701_v21  ;;  %v19554_v42 = vpop.f32.mrf.mxu0  ;;  %10636 = vmatprep.subr.bf16.mxu0 %v14712_v19  ;;  %v14721_v19 = vld [vmem:[%s17665_s14 + $0x3ac] ss:$16 sps:$4 sm:$0xff]  }
 0x431   : > { %v19556_v9 = vpop.f32.mrf.mxu1  ;;  %10565 = vmatprep.subr.bf16.mxu1 %v14709_v55  ;;  %v19560_v12 = vadd.f32 %v10024_v17, %v9942_v37  ;;  %v14719_v37 = vld [vmem:[%s17665_s14 + $0x3a8] ss:$16 sps:$4 sm:$0xff]  }
 0x432   : > { %v9947_v57 = vpop.f32.mrf.mxu0  ;;  %10444 = vmatmul.mubr.bf16.gmra.mxu0 %v19549_v22  ;;  %v14722_v22 = vld [vmem:[%s17665_s14 + $0x4e8] ss:$16 sps:$4 sm:$0xff]  }
 0x433   : > { %v10030_v21 = vpop.f32.mrf.mxu1  ;;  %v9948_v8 = vadd.f32 %v9947_v57, %v19328_v34  ;;  %10637 = vmatpush2.bf16.msra.mxu0 %v14710_v18  ;;  %10652 = vmatprep.mubr.bf16.mxu0 %v17662_v47  ;;  %v14728_v47 = vld [vmem:[%s17665_s14 + $0x4c8] ss:$16 sps:$4 sm:$0xff]  }
 0x434   : > { %10566 = vmatpush2.bf16.msra.mxu1 %v14707_v44  ;;  %v9949_v53 = vpop.f32.mrf.mxu0  ;;  %10638 = vmatprep.subr.bf16.mxu0 %v14718_v28  ;;  %v14730_v28 = vld [vmem:[%s17665_s14 + $0x4cc] ss:$16 sps:$4 sm:$0xff]  }
 0x435   : > { %v10032_v55 = vpop.f32.mrf.mxu1  ;;  %10567 = vmatprep.subr.bf16.mxu1 %v14715_v27  ;;  %v9950_v2 = vadd.f32 %v9949_v53, %v19344_v3  ;;  %v19569_v17 = vadd.f32 %v10030_v21, %v9948_v8  ;;  %v14727_v3 = vld [vmem:[%s17665_s14 + $0x38c] ss:$16 sps:$4 sm:$0xff]   ;;  %v14725_v21 = vld [vmem:[%s17665_s14 + $0x388] ss:$16 sps:$4 sm:$0xff]  }
 0x436   : > { %v9951_v34 = vpop.f32.mrf.mxu0  ;;  %v14734_v8 = vld [vmem:[%s17665_s14 + $0x4a8] ss:$16 sps:$4 sm:$0xff]  }
 0x437   : > { %v10034_v18 = vpop.f32.mrf.mxu1  ;;  %v9952_v44 = vadd.f32 %v9951_v34, %v19348_v13  ;;  %v19575_v27 = vadd.f32 %v10032_v55, %v9950_v2  ;;  %10639 = vmatpush2.bf16.msra.mxu0 %v14716_v20  ;;  %v14733_v13 = vld [vmem:[%s17665_s14 + $0x36c] ss:$16 sps:$4 sm:$0xff]   ;;  %v14731_v20 = vld [vmem:[%s17665_s14 + $0x368] ss:$16 sps:$4 sm:$0xff]  }
 0x438   : > { %10568 = vmatpush2.bf16.msra.mxu1 %v14713_v1  ;;  %10640 = vmatprep.subr.bf16.mxu0 %v14721_v19  ;;  %v14736_v1 = vld [vmem:[%s17665_s14 + $0x4ac] ss:$16 sps:$4 sm:$0xff]   ;;  %v14737_v53 = vld [vmem:[%s17665_s14 + $0x348] ss:$16 sps:$4 sm:$0xff]  }
 0x439   : > { %10703 = vmatprep.subr.bf16.mxu1 %v14724_v35  ;;  %v19579_v57 = vadd.f32 %v10034_v18, %v9952_v44  ;;  %v14740_v55 = vld [vmem:[%s17665_s14 + $0x488] ss:$16 sps:$4 sm:$0xff]   ;;  %v14748_v19 = vld [vmem:[%s17665_s14 + $0x46c] ss:$16 sps:$4 sm:$0xff]  }
 0x43a   : > { %v14743_v35 = vld [vmem:[%s17665_s14 + $0x328] ss:$16 sps:$4 sm:$0xff]   ;;  %v14760_v44 = vld [vmem:[%s17665_s14 + $0x6ec] ss:$16 sps:$4 sm:$0xff]  }
 0x43b   : > { %10570 = vmatmul.mubr.bf16.vlgmr.msra.gmra.mxu1 %v17653_v43  ;;  %10641 = vmatpush2.bf16.msra.mxu0 %v14719_v37  ;;  %v14739_v43 = vld [vmem:[%s17665_s14 + $0x34c] ss:$16 sps:$4 sm:$0xff]   ;;  %v14746_v2 = vld [vmem:[%s17665_s14 + $0x468] ss:$16 sps:$4 sm:$0xff]  }
 0x43c   : > { %10704 = vmatpush1.bf16.msra.mxu1 %v14722_v22  ;;  %10642 = vmatprep.subr.bf16.mxu0 %v14727_v3  ;;  %v14742_v22 = vld [vmem:[%s17665_s14 + $0x48c] ss:$16 sps:$4 sm:$0xff]   ;;  %v14749_v34 = vld [vmem:[%s17665_s14 + $0x308] ss:$16 sps:$4 sm:$0xff]  }
 0x43d   : > { %10705 = vmatprep.subr.bf16.mxu1 %v14730_v28  ;;  %10579 = vmatprep.mubr.bf16.mxu1 %v17750_v62  ;;  %v14745_v62 = vld [vmem:[%s17665_s14 + $0x32c] ss:$16 sps:$4 sm:$0xff]   ;;  %v14752_v18 = vld [vmem:[%s17665_s14 + $0x448] ss:$16 sps:$4 sm:$0xff]  }
 0x43e   : > { %v14754_v37 = vld [vmem:[%s17665_s14 + $0x44c] ss:$16 sps:$4 sm:$0xff]   ;;  %v14755_v3 = vld [vmem:[%s17665_s14 + $0x428] ss:$16 sps:$4 sm:$0xff]  }
 0x43f   : > { %10643 = vmatpush2.bf16.msra.mxu0 %v14725_v21  ;;  %v14758_v28 = vld [vmem:[%s17665_s14 + $0x6e8] ss:$16 sps:$4 sm:$0xff]   ;;  %v19609_v21 = vpop.f32.mrf.mxu0 }
 0x440   : > { %10706 = vmatpush1.bf16.msra.mxu1 %v14728_v47  ;;  %10644 = vmatprep.subr.bf16.mxu0 %v14733_v13  ;;  %v14763_v47 = vld [vmem:[%s17665_s14 + $0x40c] ss:$16 sps:$4 sm:$0xff]  }
 0x441   : > { %10707 = vmatprep.subr.bf16.mxu1 %v14736_v1  ;;  %v14766_v13 = vld [vmem:[%s17665_s14 + $0x6cc] ss:$16 sps:$4 sm:$0xff]   ;;  %v14761_v1 = vld [vmem:[%s17665_s14 + $0x408] ss:$16 sps:$4 sm:$0xff]  }
 0x443   : > { %10580 = vmatmul.mubr.bf16.gmra.mxu1 %v17768_v6  ;;  %10645 = vmatpush2.bf16.msra.mxu0 %v14731_v20  ;;  %v14751_v6 = vld [vmem:[%s17665_s14 + $0x30c] ss:$16 sps:$4 sm:$0xff]   ;;  %v14764_v20 = vld [vmem:[%s17665_s14 + $0x6c8] ss:$16 sps:$4 sm:$0xff]  }
 0x444   : > { %10708 = vmatpush1.bf16.msra.mxu1 %v14734_v8  ;;  %10646 = vmatprep.subr.bf16.mxu0 %v14739_v43 }
 0x445   : > { %10709 = vmatprep.subr.bf16.mxu1 %v14742_v22  ;;  %10589 = vmatprep.mubr.bf16.mxu1 %v17782_v14  ;;  %v14757_v14 = vld [vmem:[%s17665_s14 + $0x42c] ss:$16 sps:$4 sm:$0xff]  }
 0x447   : > { %10647 = vmatpush2.bf16.msra.mxu0 %v14737_v53 }
 0x448   : > { %10710 = vmatpush1.bf16.msra.mxu1 %v14740_v55  ;;  %10648 = vmatprep.subr.bf16.mxu0 %v14745_v62  ;;  %v14769_v55 = vld [vmem:[%s17665_s14 + $0x5ec] ss:$16 sps:$4 sm:$0xff]  }
 0x449   : > { %10711 = vmatprep.subr.bf16.mxu1 %v14748_v19  ;;  %v14772_v62 = vld [vmem:[%s17665_s14 + $0x6ac] ss:$16 sps:$4 sm:$0xff]  }
 0x44b   : > { %10590 = vmatmul.mubr.bf16.gmra.mxu1 %v17799_v23  ;;  %10649 = vmatpush2.bf16.msra.mxu0 %v14743_v35  ;;  %v19611_v23 = vpop.f32.mrf.mxu1 }
 0x44c   : > { %10712 = vmatpush1.bf16.msra.mxu1 %v14746_v2  ;;  %10650 = vmatprep.subr.bf16.mxu0 %v14751_v6 }
 0x44d   : > { %10713 = vmatprep.subr.bf16.mxu1 %v14754_v37  ;;  %10599 = vmatprep.mubr.bf16.mxu1 %v17814_v30 }
 0x44f   : > { %10651 = vmatpush2.bf16.msra.mxu0 %v14749_v34 }
 0x450   : > { %10714 = vmatpush1.bf16.msra.mxu1 %v14752_v18  ;;  %10786 = vmatprep.subr.bf16.mxu0 %v14760_v44  ;;  %v14778_v18 = vld [vmem:[%s17665_s14 + $0x68c] ss:$16 sps:$4 sm:$0xff]   ;;  %v14776_v44 = vld [vmem:[%s17665_s14 + $0x688] ss:$16 sps:$4 sm:$0xff]  }
 0x451   : > { %10715 = vmatprep.subr.bf16.mxu1 %v14757_v14 }
 0x452   : > { %v10073_v8 = vpop.f32.mrf.mxu0  ;;  %10653 = vmatmul.mubr.bf16.vlgmr.msra.gmra.mxu0 %v17660_v46  ;;  %v14767_v46 = vld [vmem:[%s17665_s14 + $0x5e8] ss:$16 sps:$4 sm:$0xff]  }
 0x453   : > { %v10156_v43 = vpop.f32.mrf.mxu1  ;;  %10600 = vmatmul.mubr.bf16.gmra.mxu1 %v17832_v38  ;;  %v10074_v30 = vadd.f32 %v10073_v8, %v19438_v11  ;;  %10787 = vmatpush1.bf16.msra.mxu0 %v14758_v28  ;;  %v14770_v38 = vld [vmem:[%s17665_s14 + $0x6a8] ss:$16 sps:$4 sm:$0xff]  }
 0x454   : > { %10716 = vmatpush1.bf16.msra.mxu1 %v14755_v3  ;;  %v10075_v22 = vpop.f32.mrf.mxu0  ;;  %10788 = vmatprep.subr.bf16.mxu0 %v14766_v13 }
 0x455   : > { %v10158_v53 = vpop.f32.mrf.mxu1  ;;  %10717 = vmatprep.subr.bf16.mxu1 %v14763_v47  ;;  %v19622_v19 = vadd.f32 %v10156_v43, %v10074_v30  ;;  %v10076_v35 = vadd.f32 %v10075_v22, %v19456_v48  ;;  %10662 = vmatprep.mubr.bf16.mxu0 %v17752_v63  ;;  %v14775_v63 = vld [vmem:[%s17665_s14 + $0x5cc] ss:$16 sps:$4 sm:$0xff]  }
 0x456   : > { %10609 = vmatprep.mubr.bf16.mxu1 %v17846_v50  ;;  %v10077_v11 = vpop.f32.mrf.mxu0  ;;  %v14773_v50 = vld [vmem:[%s17665_s14 + $0x5c8] ss:$16 sps:$4 sm:$0xff]   ;;  %v14787_v22 = vld [vmem:[%s17665_s14 + $0x58c] ss:$16 sps:$4 sm:$0xff]  }
 0x457   : > { %v10160_v2 = vpop.f32.mrf.mxu1  ;;  %v19629_v6 = vadd.f32 %v10158_v53, %v10076_v35  ;;  %v10078_v37 = vadd.f32 %v10077_v11, %v19465_v25  ;;  %10789 = vmatpush1.bf16.msra.mxu0 %v14764_v20  ;;  %v14784_v20 = vld [vmem:[%s17665_s14 + $0x66c] ss:$16 sps:$4 sm:$0xff]  }
 0x458   : > { %10718 = vmatpush1.bf16.msra.mxu1 %v14761_v1  ;;  %v19632_v34 = vpop.f32.mrf.mxu0  ;;  %10790 = vmatprep.subr.bf16.mxu0 %v14772_v62  ;;  %v14781_v1 = vld [vmem:[%s17665_s14 + $0x5ac] ss:$16 sps:$4 sm:$0xff]  }
 0x459   : > { %v19634_v48 = vpop.f32.mrf.mxu1  ;;  %10719 = vmatprep.subr.bf16.mxu1 %v14769_v55  ;;  %v19638_v14 = vadd.f32 %v10160_v2, %v10078_v37  ;;  %v14790_v53 = vld [vmem:[%s17665_s14 + $0x64c] ss:$16 sps:$4 sm:$0xff]  }
 0x45a   : > { %v10083_v3 = vpop.f32.mrf.mxu0  ;;  %10663 = vmatmul.mubr.bf16.gmra.mxu0 %v17770_v7  ;;  %v14779_v7 = vld [vmem:[%s17665_s14 + $0x5a8] ss:$16 sps:$4 sm:$0xff]   ;;  %v14793_v11 = vld [vmem:[%s17665_s14 + $0x56c] ss:$16 sps:$4 sm:$0xff]  }
 0x45b   : > { %v10166_v25 = vpop.f32.mrf.mxu1  ;;  %10610 = vmatmul.mubr.bf16.gmra.mxu1 %v17873_v59  ;;  %v10084_v28 = vadd.f32 %v10083_v3, %v19477_v56  ;;  %10791 = vmatpush1.bf16.msra.mxu0 %v14770_v38  ;;  %v14782_v59 = vld [vmem:[%s17665_s14 + $0x668] ss:$16 sps:$4 sm:$0xff]   ;;  %v14796_v2 = vld [vmem:[%s17665_s14 + $0x62c] ss:$16 sps:$4 sm:$0xff]  }
 0x45c   : > { %10720 = vmatpush2.bf16.msra.mxu1 %v14767_v46  ;;  %v10085_v47 = vpop.f32.mrf.mxu0  ;;  %10792 = vmatprep.subr.bf16.mxu0 %v14778_v18  ;;  %v14788_v46 = vld [vmem:[%s17665_s14 + $0x648] ss:$16 sps:$4 sm:$0xff]  }
 0x45d   : > { %v10168_v13 = vpop.f32.mrf.mxu1  ;;  %10721 = vmatprep.subr.bf16.mxu1 %v14775_v63  ;;  %v10086_v8 = vadd.f32 %v10085_v47, %v19492_v40  ;;  %v19648_v43 = vadd.f32 %v10166_v25, %v10084_v28  ;;  %10672 = vmatprep.mubr.bf16.mxu0 %v17784_v15  ;;  %v14794_v3 = vld [vmem:[%s17665_s14 + $0x628] ss:$16 sps:$4 sm:$0xff]   ;;  %v14799_v47 = vld [vmem:[%s17665_s14 + $0x54c] ss:$16 sps:$4 sm:$0xff]  }
 0x45e   : > { %10735 = vmatprep.mubr.bf16.mxu1 %v17888_v4  ;;  %v10087_v56 = vpop.f32.mrf.mxu0  ;;  %v14785_v4 = vld [vmem:[%s17665_s14 + $0x588] ss:$16 sps:$4 sm:$0xff]  }
 0x45f   : > { %v10170_v30 = vpop.f32.mrf.mxu1  ;;  %v10088_v55 = vadd.f32 %v10087_v56, %v19500_v32  ;;  %v19657_v62 = vadd.f32 %v10168_v13, %v10086_v8  ;;  %10793 = vmatpush1.bf16.msra.mxu0 %v14776_v44  ;;  %v14797_v8 = vld [vmem:[%s17665_s14 + $0x548] ss:$16 sps:$4 sm:$0xff]   ;;  %v14805_v56 = vld [vmem:[%s17665_s14 + $0x52c] ss:$16 sps:$4 sm:$0xff]  }
 0x460   : > { %10722 = vmatpush2.bf16.msra.mxu1 %v14773_v50  ;;  %v19659_v40 = vpop.f32.mrf.mxu0  ;;  %10794 = vmatprep.subr.bf16.mxu0 %v14784_v20 }
 0x461   : > { %v19661_v15 = vpop.f32.mrf.mxu1  ;;  %10723 = vmatprep.subr.bf16.mxu1 %v14781_v1  ;;  %v19663_v35 = vadd.f32 %v10170_v30, %v10088_v55  ;;  %v14808_v30 = vld [vmem:[%s17665_s14 + $0x7ec] ss:$16 sps:$4 sm:$0xff]  }
 0x462   : > { %21716 = vst [vmem:[#allocation179_spill] sm:$0xff] %v19661_v15  ;;  %v10093_v38 = vpop.f32.mrf.mxu0  ;;  %10673 = vmatmul.mubr.bf16.gmra.mxu0 %v17801_v24  ;;  %v14791_v24 = vld [vmem:[%s17665_s14 + $0x568] ss:$16 sps:$4 sm:$0xff]  }
 0x463   : > { %v10176_v32 = vpop.f32.mrf.mxu1  ;;  %v10094_v37 = vadd.f32 %v10093_v38, %v19511_v41  ;;  %10795 = vmatpush1.bf16.msra.mxu0 %v14782_v59  ;;  %10682 = vmatprep.mubr.bf16.mxu0 %v17816_v31  ;;  %v14802_v41 = vld [vmem:[%s17665_s14 + $0x60c] ss:$16 sps:$4 sm:$0xff]   ;;  %v14806_v38 = vld [vmem:[%s17665_s14 + $0x7e8] ss:$16 sps:$4 sm:$0xff]  }
 0x464   : > { %10724 = vmatpush2.bf16.msra.mxu1 %v14779_v7  ;;  %v10095_v63 = vpop.f32.mrf.mxu0  ;;  %10796 = vmatprep.subr.bf16.mxu0 %v14790_v53  ;;  %v14800_v7 = vld [vmem:[%s17665_s14 + $0x608] ss:$16 sps:$4 sm:$0xff]  }
 0x465   : > { %v10178_v18 = vpop.f32.mrf.mxu1  ;;  %10725 = vmatprep.subr.bf16.mxu1 %v14787_v22  ;;  %v10096_v50 = vadd.f32 %v10095_v63, %v19525_v0  ;;  %v19672_v44 = vadd.f32 %v10176_v32, %v10094_v37 }
 0x466   : > { %v10097_v25 = vpop.f32.mrf.mxu0 }
 0x467   : > { %v10180_v28 = vpop.f32.mrf.mxu1  ;;  %v10098_v13 = vadd.f32 %v10097_v25, %v19533_v45  ;;  %v19680_v1 = vadd.f32 %v10178_v18, %v10096_v50  ;;  %10797 = vmatpush1.bf16.msra.mxu0 %v14788_v46 }
 0x468   : > { %10726 = vmatpush2.bf16.msra.mxu1 %v14785_v4  ;;  %v19682_v0 = vpop.f32.mrf.mxu0  ;;  %10798 = vmatprep.subr.bf16.mxu0 %v14796_v2  ;;  %v14811_v2 = vld [vmem:[%s17665_s14 + $0x50c] ss:$16 sps:$4 sm:$0xff]  }
 0x469   : > { %v19684_v20 = vpop.f32.mrf.mxu1  ;;  %10727 = vmatprep.subr.bf16.mxu1 %v14793_v11  ;;  %v19686_v31 = vadd.f32 %v10180_v28, %v10098_v13  ;;  %v14817_v28 = vld [vmem:[%s17665_s14 + $0x7ac] ss:$16 sps:$4 sm:$0xff]  }
 0x46a   : > { %21717 = vst [vmem:[#allocation180_spill] sm:$0xff] %v19684_v20  ;;  %v10103_v59 = vpop.f32.mrf.mxu0  ;;  %10683 = vmatmul.mubr.bf16.gmra.mxu0 %v17834_v39  ;;  %v14803_v39 = vld [vmem:[%s17665_s14 + $0x528] ss:$16 sps:$4 sm:$0xff]  }
 0x46b   : > { %v10186_v45 = vpop.f32.mrf.mxu1  ;;  %v10104_v22 = vadd.f32 %v10103_v59, %v19544_v52  ;;  %10799 = vmatpush1.bf16.msra.mxu0 %v14794_v3  ;;  %10692 = vmatprep.mubr.bf16.mxu0 %v17848_v51  ;;  %v14814_v52 = vld [vmem:[%s17665_s14 + $0x7cc] ss:$16 sps:$4 sm:$0xff]   ;;  %v14809_v3 = vld [vmem:[%s17665_s14 + $0x508] ss:$16 sps:$4 sm:$0xff]  }
 0x46c   : > { %10728 = vmatpush2.bf16.msra.mxu1 %v14791_v24  ;;  %v10105_v53 = vpop.f32.mrf.mxu0  ;;  %10800 = vmatprep.subr.bf16.mxu0 %v14802_v41  ;;  %v14815_v59 = vld [vmem:[%s17665_s14 + $0x7a8] ss:$16 sps:$4 sm:$0xff]  }
 0x46d   : > { %v10188_v55 = vpop.f32.mrf.mxu1  ;;  %10729 = vmatprep.subr.bf16.mxu1 %v14799_v47  ;;  %v10106_v4 = vadd.f32 %v10105_v53, %v19552_v29  ;;  %v19695_v46 = vadd.f32 %v10186_v45, %v10104_v22  ;;  %v14820_v47 = vld [vmem:[%s17665_s14 + $0x8ec] ss:$16 sps:$4 sm:$0xff]   ;;  %v14818_v45 = vld [vmem:[%s17665_s14 + $0x8e8] ss:$16 sps:$4 sm:$0xff]  }
 0x46e   : > { %v10107_v32 = vpop.f32.mrf.mxu0  ;;  %v14826_v22 = vld [vmem:[%s17665_s14 + $0x8cc] ss:$16 sps:$4 sm:$0xff]   ;;  %v14821_v53 = vld [vmem:[%s17665_s14 + $0x788] ss:$16 sps:$4 sm:$0xff]  }
 0x46f   : > { %v10190_v11 = vpop.f32.mrf.mxu1  ;;  %v10108_v37 = vadd.f32 %v10107_v32, %v19560_v12  ;;  %v19703_v63 = vadd.f32 %v10188_v55, %v10106_v4  ;;  %10801 = vmatpush1.bf16.msra.mxu0 %v14800_v7  ;;  %v14812_v12 = vld [vmem:[%s17665_s14 + $0x7c8] ss:$16 sps:$4 sm:$0xff]   ;;  %v14832_v4 = vld [vmem:[%s17665_s14 + $0x8ac] ss:$16 sps:$4 sm:$0xff]  }
 0x470   : > { %10730 = vmatpush2.bf16.msra.mxu1 %v14797_v8  ;;  %v19705_v29 = vpop.f32.mrf.mxu0  ;;  %10802 = vmatprep.subr.bf16.mxu0 %v14808_v30  ;;  %v14824_v55 = vld [vmem:[%s17665_s14 + $0x8c8] ss:$16 sps:$4 sm:$0xff]  }
 0x471   : > { %v19707_v18 = vpop.f32.mrf.mxu1  ;;  %10731 = vmatprep.subr.bf16.mxu1 %v14805_v56  ;;  %v19709_v51 = vadd.f32 %v10190_v11, %v10108_v37  ;;  %v14830_v32 = vld [vmem:[%s17665_s14 + $0x8a8] ss:$16 sps:$4 sm:$0xff]   ;;  %v14838_v11 = vld [vmem:[%s17665_s14 + $0x88c] ss:$16 sps:$4 sm:$0xff]  }
 0x472   : > { %v10113_v50 = vpop.f32.mrf.mxu0  ;;  %10693 = vmatmul.mubr.bf16.gmra.mxu0 %v17875_v60  ;;  %v14836_v37 = vld [vmem:[%s17665_s14 + $0x888] ss:$16 sps:$4 sm:$0xff]  }
 0x473   : > { %v10196_v24 = vpop.f32.mrf.mxu1  ;;  %v10114_v25 = vadd.f32 %v10113_v50, %v19569_v17  ;;  %10803 = vmatpush2.bf16.msra.mxu0 %v14806_v38  ;;  %10818 = vmatprep.mubr.bf16.mxu0 %v17892_v5  ;;  %v14827_v38 = vld [vmem:[%s17665_s14 + $0x768] ss:$16 sps:$4 sm:$0xff]   ;;  %v14841_v50 = vld [vmem:[%s17665_s14 + $0x72c] ss:$16 sps:$4 sm:$0xff]  }
 0x474   : > { %10732 = vmatpush2.bf16.msra.mxu1 %v14803_v39  ;;  %v10115_v41 = vpop.f32.mrf.mxu0  ;;  %10804 = vmatprep.subr.bf16.mxu0 %v14814_v52  ;;  %v21718_v39 = vld [vmem:[#allocation4_spill] sm:$0xff] }
 0x475   : > { %v10198_v13 = vpop.f32.mrf.mxu1  ;;  %10733 = vmatprep.subr.bf16.mxu1 %v14811_v2  ;;  %v10116_v8 = vadd.f32 %v10115_v41, %v19575_v27  ;;  %v19718_v60 = vadd.f32 %v10196_v24, %v10114_v25  ;;  %v14823_v27 = vld [vmem:[%s17665_s14 + $0x78c] ss:$16 sps:$4 sm:$0xff]   ;;  %v14833_v52 = vld [vmem:[%s17665_s14 + $0x748] ss:$16 sps:$4 sm:$0xff]  }
 0x476   : > { %v10117_v7 = vpop.f32.mrf.mxu0  ;;  %v21719_v2 = vld [vmem:[#allocation6_spill] sm:$0xff] }
 0x477   : > { %v10200_v17 = vpop.f32.mrf.mxu1  ;;  %v10118_v56 = vadd.f32 %v10117_v7, %v19579_v57  ;;  %v19724_v30 = vadd.f32 %v10198_v13, %v10116_v8  ;;  %10805 = vmatpush2.bf16.msra.mxu0 %v14812_v12  ;;  %v14829_v57 = vld [vmem:[%s17665_s14 + $0x76c] ss:$16 sps:$4 sm:$0xff]   ;;  %v14839_v12 = vld [vmem:[%s17665_s14 + $0x728] ss:$16 sps:$4 sm:$0xff]  }
 0x478   : > { %10734 = vmatpush2.bf16.msra.mxu1 %v14809_v3  ;;  %10806 = vmatprep.subr.bf16.mxu0 %v14817_v28  ;;  %v14844_v24 = vld [vmem:[%s17665_s14 + $0x86c] ss:$16 sps:$4 sm:$0xff]   ;;  %v14842_v25 = vld [vmem:[%s17665_s14 + $0x868] ss:$16 sps:$4 sm:$0xff]  }
 0x479   : > { %10869 = vmatprep.subr.bf16.mxu1 %v14820_v47  ;;  %v19728_v5 = vadd.f32 %v10200_v17, %v10118_v56  ;;  %v21720_v3 = vld [vmem:[#allocation8_spill] sm:$0xff]  ;;  %v21721_v41 = vld [vmem:[#allocation10_spill] sm:$0xff] }
 0x47a   : > { %v14847_v28 = vld [vmem:[%s17665_s14 + $0x70c] ss:$16 sps:$4 sm:$0xff]   ;;  %v14845_v13 = vld [vmem:[%s17665_s14 + $0x708] ss:$16 sps:$4 sm:$0xff]  }
 0x47b   : > { %10736 = vmatmul.mubr.bf16.vlgmr.msra.gmra.mxu1 %v17936_v54  ;;  %10807 = vmatpush2.bf16.msra.mxu0 %v14815_v59  ;;  %v14835_v54 = vld [vmem:[%s17665_s14 + $0x74c] ss:$16 sps:$4 sm:$0xff]   ;;  %v14848_v8 = vld [vmem:[%s17665_s14 + $0x848] ss:$16 sps:$4 sm:$0xff]  }
 0x47c   : > { %10870 = vmatpush1.bf16.msra.mxu1 %v14818_v45  ;;  %10808 = vmatprep.subr.bf16.mxu0 %v14823_v27  ;;  %v14850_v47 = vld [vmem:[%s17665_s14 + $0x84c] ss:$16 sps:$4 sm:$0xff]   ;;  %v14851_v45 = vld [vmem:[%s17665_s14 + $0x828] ss:$16 sps:$4 sm:$0xff]   ;;  %v19758_v27 = vpop.f32.mrf.mxu0 }
 0x47d   : > { %10871 = vmatprep.subr.bf16.mxu1 %v14826_v22  ;;  %10745 = vmatprep.mubr.bf16.mxu1 %v21718_v39  ;;  %v14853_v7 = vld [vmem:[%s17665_s14 + $0x82c] ss:$16 sps:$4 sm:$0xff]   ;;  %v14854_v56 = vld [vmem:[%s17665_s14 + $0xae8] ss:$16 sps:$4 sm:$0xff]   ;;  %v19760_v22 = vpop.f32.mrf.mxu1 }
 0x47e   : > { %v14856_v17 = vld [vmem:[%s17665_s14 + $0xaec] ss:$16 sps:$4 sm:$0xff]   ;;  %v15265_v20 = vld [vmem:[%s17665_s14 + $0x1988] ss:$16 sps:$4 sm:$0xff]  }
 0x47f   : > { %10809 = vmatpush2.bf16.msra.mxu0 %v14821_v53  ;;  %v21722_v59 = vld [vmem:[#allocation12_spill] sm:$0xff]  ;;  %v21723_v39 = vld [vmem:[#allocation14_spill] sm:$0xff] }
 0x480   : > { %10872 = vmatpush1.bf16.msra.mxu1 %v14824_v55  ;;  %10810 = vmatprep.subr.bf16.mxu0 %v14829_v57  ;;  %v14859_v53 = vld [vmem:[%s17665_s14 + $0x80c] ss:$16 sps:$4 sm:$0xff]  }
 0x481   : > { %10873 = vmatprep.subr.bf16.mxu1 %v14832_v4  ;;  %v14862_v55 = vld [vmem:[%s17665_s14 + $0xacc] ss:$16 sps:$4 sm:$0xff]  }
 0x483   : > { %10746 = vmatmul.mubr.bf16.gmra.mxu1 %v21719_v2  ;;  %10811 = vmatpush2.bf16.msra.mxu0 %v14827_v38  ;;  %v21724_v38 = vld [vmem:[#allocation3_spill] sm:$0xff] }
 0x484   : > { %10874 = vmatpush1.bf16.msra.mxu1 %v14830_v32  ;;  %10812 = vmatprep.subr.bf16.mxu0 %v14835_v54  ;;  %v14857_v54 = vld [vmem:[%s17665_s14 + $0x808] ss:$16 sps:$4 sm:$0xff]  }
 0x485   : > { %10875 = vmatprep.subr.bf16.mxu1 %v14838_v11  ;;  %10755 = vmatprep.mubr.bf16.mxu1 %v21720_v3  ;;  %v14860_v11 = vld [vmem:[%s17665_s14 + $0xac8] ss:$16 sps:$4 sm:$0xff]  }
 0x487   : > { %10813 = vmatpush2.bf16.msra.mxu0 %v14833_v52 }
 0x488   : > { %10876 = vmatpush1.bf16.msra.mxu1 %v14836_v37  ;;  %10814 = vmatprep.subr.bf16.mxu0 %v14841_v50  ;;  %v14865_v37 = vld [vmem:[%s17665_s14 + $0x9ec] ss:$16 sps:$4 sm:$0xff]  }
 0x489   : > { %10877 = vmatprep.subr.bf16.mxu1 %v14844_v24  ;;  %v14868_v50 = vld [vmem:[%s17665_s14 + $0xaac] ss:$16 sps:$4 sm:$0xff]  }
 0x48b   : > { %10756 = vmatmul.mubr.bf16.gmra.mxu1 %v21721_v41  ;;  %10815 = vmatpush2.bf16.msra.mxu0 %v14839_v12  ;;  %v21725_v12 = vld [vmem:[#allocation16_spill] sm:$0xff] }
 0x48c   : > { %10878 = vmatpush1.bf16.msra.mxu1 %v14842_v25  ;;  %10816 = vmatprep.subr.bf16.mxu0 %v14847_v28 }
 0x48d   : > { %10879 = vmatprep.subr.bf16.mxu1 %v14850_v47  ;;  %10765 = vmatprep.mubr.bf16.mxu1 %v21722_v59  ;;  %v14874_v59 = vld [vmem:[%s17665_s14 + $0xa8c] ss:$16 sps:$4 sm:$0xff]  }
 0x48f   : > { %10817 = vmatpush2.bf16.msra.mxu0 %v14845_v13  ;;  %v14863_v13 = vld [vmem:[%s17665_s14 + $0x9e8] ss:$16 sps:$4 sm:$0xff]  }
 0x490   : > { %10880 = vmatpush1.bf16.msra.mxu1 %v14848_v8  ;;  %10952 = vmatprep.subr.bf16.mxu0 %v14856_v17  ;;  %v14866_v8 = vld [vmem:[%s17665_s14 + $0xaa8] ss:$16 sps:$4 sm:$0xff]   ;;  %v14871_v17 = vld [vmem:[%s17665_s14 + $0x9cc] ss:$16 sps:$4 sm:$0xff]  }
 0x491   : > { %10881 = vmatprep.subr.bf16.mxu1 %v14853_v7 }
 0x492   : > { %v10239_v57 = vpop.f32.mrf.mxu0  ;;  %10819 = vmatmul.mubr.bf16.vlgmr.msra.gmra.mxu0 %v21724_v38 }
 0x493   : > { %v10322_v4 = vpop.f32.mrf.mxu1  ;;  %10766 = vmatmul.mubr.bf16.gmra.mxu1 %v21723_v39  ;;  %v10240_v32 = vadd.f32 %v10239_v57, %v19622_v19  ;;  %10953 = vmatpush1.bf16.msra.mxu0 %v14854_v56  ;;  %v21726_v19 = vld [vmem:[#allocation5_spill] sm:$0xff]  ;;  %v14872_v39 = vld [vmem:[%s17665_s14 + $0xa88] ss:$16 sps:$4 sm:$0xff]  }
 0x494   : > { %10882 = vmatpush1.bf16.msra.mxu1 %v14851_v45  ;;  %v10241_v2 = vpop.f32.mrf.mxu0  ;;  %10954 = vmatprep.subr.bf16.mxu0 %v14862_v55  ;;  %v21729_v55 = vld [vmem:[#allocation7_spill] sm:$0xff] }
 0x495   : > { %v10324_v52 = vpop.f32.mrf.mxu1  ;;  %10883 = vmatprep.subr.bf16.mxu1 %v14859_v53  ;;  %v19771_v24 = vadd.f32 %v10322_v4, %v10240_v32  ;;  %v10242_v3 = vadd.f32 %v10241_v2, %v19629_v6  ;;  %10775 = vmatprep.mubr.bf16.mxu1 %v21725_v12  ;;  %v21728_v53 = vld [vmem:[#allocation18_spill] sm:$0xff] }
 0x496   : > { %10828 = vmatprep.mubr.bf16.mxu0 %v21726_v19  ;;  %v10243_v25 = vpop.f32.mrf.mxu0  ;;  %v14869_v4 = vld [vmem:[%s17665_s14 + $0x9c8] ss:$16 sps:$4 sm:$0xff]  }
 0x497   : > { %v10326_v28 = vpop.f32.mrf.mxu1  ;;  %v19776_v47 = vadd.f32 %v10324_v52, %v10242_v3  ;;  %v10244_v41 = vadd.f32 %v10243_v25, %v19638_v14  ;;  %10955 = vmatpush1.bf16.msra.mxu0 %v14860_v11  ;;  %v14880_v11 = vld [vmem:[%s17665_s14 + $0xa6c] ss:$16 sps:$4 sm:$0xff]   ;;  %v14875_v25 = vld [vmem:[%s17665_s14 + $0x9a8] ss:$16 sps:$4 sm:$0xff]  }
 0x498   : > { %10884 = vmatpush1.bf16.msra.mxu1 %v14857_v54  ;;  %v19781_v7 = vpop.f32.mrf.mxu0  ;;  %10956 = vmatprep.subr.bf16.mxu0 %v14868_v50  ;;  %v14877_v54 = vld [vmem:[%s17665_s14 + $0x9ac] ss:$16 sps:$4 sm:$0xff]  }
 0x499   : > { %v19783_v6 = vpop.f32.mrf.mxu1  ;;  %10885 = vmatprep.subr.bf16.mxu1 %v14865_v37  ;;  %v19787_v45 = vadd.f32 %v10326_v28, %v10244_v41  ;;  %v21730_v37 = vld [vmem:[#allocation9_spill] sm:$0xff]  ;;  %v14878_v28 = vld [vmem:[%s17665_s14 + $0xa68] ss:$16 sps:$4 sm:$0xff]  }
 0x49a   : > { %21727 = vst [vmem:[#allocation4_spill] sm:$0xff] %v19783_v6  ;;  %v10249_v56 = vpop.f32.mrf.mxu0  ;;  %10829 = vmatmul.mubr.bf16.gmra.mxu0 %v21729_v55  ;;  %v14884_v55 = vld [vmem:[%s17665_s14 + $0xa48] ss:$16 sps:$4 sm:$0xff]   ;;  %v15261_v6 = vld [vmem:[%s17665_s14 + $0x19ac] ss:$16 sps:$4 sm:$0xff]  }
 0x49b   : > { %v10332_v14 = vpop.f32.mrf.mxu1  ;;  %10776 = vmatmul.mubr.bf16.gmra.mxu1 %v21728_v53  ;;  %v10250_v57 = vadd.f32 %v10249_v56, %v19648_v43  ;;  %10957 = vmatpush1.bf16.msra.mxu0 %v14866_v8  ;;  %v21731_v43 = vld [vmem:[#allocation20_spill] sm:$0xff]  ;;  %v21734_v56 = vld [vmem:[#allocation11_spill] sm:$0xff] }
 0x49c   : > { %10886 = vmatpush2.bf16.msra.mxu1 %v14863_v13  ;;  %v10251_v38 = vpop.f32.mrf.mxu0  ;;  %10958 = vmatprep.subr.bf16.mxu0 %v14874_v59  ;;  %v14883_v13 = vld [vmem:[%s17665_s14 + $0x98c] ss:$16 sps:$4 sm:$0xff]   ;;  %v14881_v53 = vld [vmem:[%s17665_s14 + $0x988] ss:$16 sps:$4 sm:$0xff]  }
 0x49d   : > { %v10334_v32 = vpop.f32.mrf.mxu1  ;;  %10887 = vmatprep.subr.bf16.mxu1 %v14871_v17  ;;  %v19796_v2 = vadd.f32 %v10332_v14, %v10250_v57  ;;  %v10252_v52 = vadd.f32 %v10251_v38, %v19657_v62  ;;  %10838 = vmatprep.mubr.bf16.mxu0 %v21730_v37  ;;  %v14886_v8 = vld [vmem:[%s17665_s14 + $0xa4c] ss:$16 sps:$4 sm:$0xff]  }
 0x49e   : > { %10901 = vmatprep.mubr.bf16.mxu1 %v21731_v43  ;;  %v10253_v50 = vpop.f32.mrf.mxu0  ;;  %v14892_v38 = vld [vmem:[%s17665_s14 + $0xa2c] ss:$16 sps:$4 sm:$0xff]  }
 0x49f   : > { %v10336_v3 = vpop.f32.mrf.mxu1  ;;  %v19801_v12 = vadd.f32 %v10334_v32, %v10252_v52  ;;  %v10254_v19 = vadd.f32 %v10253_v50, %v19663_v35  ;;  %10959 = vmatpush1.bf16.msra.mxu0 %v14872_v39  ;;  %v14889_v39 = vld [vmem:[%s17665_s14 + $0x96c] ss:$16 sps:$4 sm:$0xff]   ;;  %v14887_v50 = vld [vmem:[%s17665_s14 + $0x968] ss:$16 sps:$4 sm:$0xff]  }
 0x4a0   : > { %10888 = vmatpush2.bf16.msra.mxu1 %v14869_v4  ;;  %v19806_v41 = vpop.f32.mrf.mxu0  ;;  %10960 = vmatprep.subr.bf16.mxu0 %v14880_v11  ;;  %v21735_v11 = vld [vmem:[#allocation13_spill] sm:$0xff] }
 0x4a1   : > { %21732 = vst [vmem:[#allocation6_spill] sm:$0xff] %v19806_v41  ;;  %v19808_v62 = vpop.f32.mrf.mxu1  ;;  %10889 = vmatprep.subr.bf16.mxu1 %v14877_v54  ;;  %v19812_v17 = vadd.f32 %v10336_v3, %v10254_v19  ;;  %v14890_v3 = vld [vmem:[%s17665_s14 + $0xa28] ss:$16 sps:$4 sm:$0xff]  }
 0x4a2   : > { %21733 = vst [vmem:[#allocation8_spill] sm:$0xff] %v19808_v62  ;;  %v10259_v59 = vpop.f32.mrf.mxu0  ;;  %10839 = vmatmul.mubr.bf16.gmra.mxu0 %v21734_v56  ;;  %v14893_v56 = vld [vmem:[%s17665_s14 + $0x948] ss:$16 sps:$4 sm:$0xff]  }
 0x4a3   : > { %v10342_v35 = vpop.f32.mrf.mxu1  ;;  %v10260_v14 = vadd.f32 %v10259_v59, %v19672_v44  ;;  %10961 = vmatpush1.bf16.msra.mxu0 %v14878_v28  ;;  %10848 = vmatprep.mubr.bf16.mxu0 %v21735_v11  ;;  %v14898_v28 = vld [vmem:[%s17665_s14 + $0xa0c] ss:$16 sps:$4 sm:$0xff]   ;;  %v21738_v59 = vld [vmem:[#allocation15_spill] sm:$0xff]  ;;  %v14956_v62 = vld [vmem:[%s17665_s14 + $0xec8] ss:$16 sps:$4 sm:$0xff]  }
 0x4a4   : > { %10890 = vmatpush2.bf16.msra.mxu1 %v14875_v25  ;;  %v10261_v57 = vpop.f32.mrf.mxu0  ;;  %10962 = vmatprep.subr.bf16.mxu0 %v14886_v8  ;;  %v14962_v41 = vld [vmem:[%s17665_s14 + $0xea8] ss:$16 sps:$4 sm:$0xff]  }
 0x4a5   : > { %v10344_v4 = vpop.f32.mrf.mxu1  ;;  %10891 = vmatprep.subr.bf16.mxu1 %v14883_v13  ;;  %v19820_v32 = vadd.f32 %v10342_v35, %v10260_v14  ;;  %v10262_v54 = vadd.f32 %v10261_v57, %v19680_v1  ;;  %v14895_v1 = vld [vmem:[%s17665_s14 + $0x94c] ss:$16 sps:$4 sm:$0xff]   ;;  %v14896_v14 = vld [vmem:[%s17665_s14 + $0xa08] ss:$16 sps:$4 sm:$0xff]  }
 0x4a6   : > { %v10263_v44 = vpop.f32.mrf.mxu0  ;;  %v14901_v57 = vld [vmem:[%s17665_s14 + $0x92c] ss:$16 sps:$4 sm:$0xff]  }
 0x4a7   : > { %v10346_v52 = vpop.f32.mrf.mxu1  ;;  %v19824_v37 = vadd.f32 %v10344_v4, %v10262_v54  ;;  %v10264_v43 = vadd.f32 %v10263_v44, %v19686_v31  ;;  %10963 = vmatpush1.bf16.msra.mxu0 %v14884_v55  ;;  %v14904_v4 = vld [vmem:[%s17665_s14 + $0xbec] ss:$16 sps:$4 sm:$0xff]   ;;  %v21739_v54 = vld [vmem:[#allocation17_spill] sm:$0xff] }
 0x4a8   : > { %10892 = vmatpush2.bf16.msra.mxu1 %v14881_v53  ;;  %v19829_v19 = vpop.f32.mrf.mxu0  ;;  %10964 = vmatprep.subr.bf16.mxu0 %v14892_v38 }
 0x4a9   : > { %21736 = vst [vmem:[#allocation10_spill] sm:$0xff] %v19829_v19  ;;  %v19831_v25 = vpop.f32.mrf.mxu1  ;;  %10893 = vmatprep.subr.bf16.mxu1 %v14889_v39  ;;  %v19835_v13 = vadd.f32 %v10346_v52, %v10264_v43  ;;  %v14899_v43 = vld [vmem:[%s17665_s14 + $0x928] ss:$16 sps:$4 sm:$0xff]  }
 0x4aa   : > { %21737 = vst [vmem:[#allocation12_spill] sm:$0xff] %v19831_v25  ;;  %v10269_v8 = vpop.f32.mrf.mxu0  ;;  %10849 = vmatmul.mubr.bf16.gmra.mxu0 %v21738_v59  ;;  %v21742_v59 = vld [vmem:[#allocation19_spill] sm:$0xff]  ;;  %v21753_v25 = vld [vmem:[#allocation34_spill] sm:$0xff] }
 0x4ab   : > { %v10352_v31 = vpop.f32.mrf.mxu1  ;;  %v10270_v35 = vadd.f32 %v10269_v8, %v19695_v46  ;;  %10965 = vmatpush1.bf16.msra.mxu0 %v14890_v3  ;;  %10858 = vmatprep.mubr.bf16.mxu0 %v21739_v54 }
 0x4ac   : > { %10894 = vmatpush2.bf16.msra.mxu1 %v14887_v50  ;;  %v10271_v53 = vpop.f32.mrf.mxu0  ;;  %10966 = vmatprep.subr.bf16.mxu0 %v14898_v28  ;;  %v14902_v50 = vld [vmem:[%s17665_s14 + $0xbe8] ss:$16 sps:$4 sm:$0xff]   ;;  %v14910_v28 = vld [vmem:[%s17665_s14 + $0xbcc] ss:$16 sps:$4 sm:$0xff]  }
 0x4ad   : > { %v10354_v55 = vpop.f32.mrf.mxu1  ;;  %10895 = vmatprep.subr.bf16.mxu1 %v14895_v1  ;;  %v19843_v39 = vadd.f32 %v10352_v31, %v10270_v35  ;;  %v10272_v38 = vadd.f32 %v10271_v53, %v19703_v63  ;;  %v14907_v63 = vld [vmem:[%s17665_s14 + $0x90c] ss:$16 sps:$4 sm:$0xff]  }
 0x4ae   : > { %v10273_v46 = vpop.f32.mrf.mxu0 }
 0x4af   : > { %v10356_v11 = vpop.f32.mrf.mxu1  ;;  %v19847_v44 = vadd.f32 %v10354_v55, %v10272_v38  ;;  %v10274_v52 = vadd.f32 %v10273_v46, %v19709_v51  ;;  %10967 = vmatpush1.bf16.msra.mxu0 %v14896_v14  ;;  %v14908_v14 = vld [vmem:[%s17665_s14 + $0xbc8] ss:$16 sps:$4 sm:$0xff]   ;;  %v21743_v46 = vld [vmem:[#allocation21_spill] sm:$0xff] }
 0x4b0   : > { %10896 = vmatpush2.bf16.msra.mxu1 %v14893_v56  ;;  %v19852_v3 = vpop.f32.mrf.mxu0  ;;  %10968 = vmatprep.subr.bf16.mxu0 %v14904_v4  ;;  %v14905_v56 = vld [vmem:[%s17665_s14 + $0x908] ss:$16 sps:$4 sm:$0xff]   ;;  %v14916_v4 = vld [vmem:[%s17665_s14 + $0xcec] ss:$16 sps:$4 sm:$0xff]  }
 0x4b1   : > { %21740 = vst [vmem:[#allocation14_spill] sm:$0xff] %v19852_v3  ;;  %v19854_v1 = vpop.f32.mrf.mxu1  ;;  %10897 = vmatprep.subr.bf16.mxu1 %v14901_v57  ;;  %v19858_v8 = vadd.f32 %v10356_v11, %v10274_v52  ;;  %v14913_v57 = vld [vmem:[%s17665_s14 + $0xbac] ss:$16 sps:$4 sm:$0xff]  }
 0x4b2   : > { %21741 = vst [vmem:[#allocation3_spill] sm:$0xff] %v19854_v1  ;;  %v10279_v31 = vpop.f32.mrf.mxu0  ;;  %10859 = vmatmul.mubr.bf16.gmra.mxu0 %v21742_v59  ;;  %v14964_v1 = vld [vmem:[%s17665_s14 + $0xeac] ss:$16 sps:$4 sm:$0xff]  }
 0x4b3   : > { %v10362_v51 = vpop.f32.mrf.mxu1  ;;  %v10280_v35 = vadd.f32 %v10279_v31, %v19718_v60  ;;  %10969 = vmatpush2.bf16.msra.mxu0 %v14902_v50  ;;  %10984 = vmatprep.mubr.bf16.mxu0 %v21743_v46  ;;  %v14911_v50 = vld [vmem:[%s17665_s14 + $0xba8] ss:$16 sps:$4 sm:$0xff]   ;;  %v14922_v31 = vld [vmem:[%s17665_s14 + $0xccc] ss:$16 sps:$4 sm:$0xff]  }
 0x4b4   : > { %10898 = vmatpush2.bf16.msra.mxu1 %v14899_v43  ;;  %v10281_v53 = vpop.f32.mrf.mxu0  ;;  %10970 = vmatprep.subr.bf16.mxu0 %v14910_v28  ;;  %v14926_v46 = vld [vmem:[%s17665_s14 + $0xca8] ss:$16 sps:$4 sm:$0xff]  }
 0x4b5   : > { %v10364_v55 = vpop.f32.mrf.mxu1  ;;  %10899 = vmatprep.subr.bf16.mxu1 %v14907_v63  ;;  %v19866_v38 = vadd.f32 %v10362_v51, %v10280_v35  ;;  %v10282_v54 = vadd.f32 %v10281_v53, %v19724_v30  ;;  %v14914_v63 = vld [vmem:[%s17665_s14 + $0xce8] ss:$16 sps:$4 sm:$0xff]   ;;  %v14919_v30 = vld [vmem:[%s17665_s14 + $0xb8c] ss:$16 sps:$4 sm:$0xff]  }
 0x4b6   : > { %v10283_v60 = vpop.f32.mrf.mxu0  ;;  %v21745_v35 = vld [vmem:[#allocation22_spill] sm:$0xff]  ;;  %v21880_v3 = vld [vmem:[#allocation96_spill] sm:$0xff] }
 0x4b7   : > { %v10366_v11 = vpop.f32.mrf.mxu1  ;;  %v19870_v52 = vadd.f32 %v10364_v55, %v10282_v54  ;;  %v10284_v43 = vadd.f32 %v10283_v60, %v19728_v5  ;;  %10971 = vmatpush2.bf16.msra.mxu0 %v14908_v14  ;;  %v14917_v5 = vld [vmem:[%s17665_s14 + $0xb88] ss:$16 sps:$4 sm:$0xff]   ;;  %v14925_v53 = vld [vmem:[%s17665_s14 + $0xb6c] ss:$16 sps:$4 sm:$0xff]  }
 0x4b8   : > { %10900 = vmatpush2.bf16.msra.mxu1 %v14905_v56  ;;  %10972 = vmatprep.subr.bf16.mxu0 %v14913_v57  ;;  %v14920_v56 = vld [vmem:[%s17665_s14 + $0xcc8] ss:$16 sps:$4 sm:$0xff]   ;;  %v14928_v55 = vld [vmem:[%s17665_s14 + $0xcac] ss:$16 sps:$4 sm:$0xff]  }
 0x4b9   : > { %v19875_v28 = vpop.f32.mrf.mxu1  ;;  %11035 = vmatprep.subr.bf16.mxu1 %v14916_v4  ;;  %v19879_v51 = vadd.f32 %v10366_v11, %v10284_v43  ;;  %v21746_v57 = vld [vmem:[#allocation24_spill] sm:$0xff] }
 0x4ba   : > { %21744 = vst [vmem:[#allocation16_spill] sm:$0xff] %v19875_v28  ;;  %v14923_v54 = vld [vmem:[%s17665_s14 + $0xb68] ss:$16 sps:$4 sm:$0xff]   ;;  %v14931_v11 = vld [vmem:[%s17665_s14 + $0xb4c] ss:$16 sps:$4 sm:$0xff]  }
 0x4bb   : > { %v19881_v59 = vpop.f32.mrf.mxu1  ;;  %10902 = vmatmul.mubr.bf16.vlgmr.msra.gmra.mxu1 %v21745_v35  ;;  %10973 = vmatpush2.bf16.msra.mxu0 %v14911_v50  ;;  %v14934_v43 = vld [vmem:[%s17665_s14 + $0xc8c] ss:$16 sps:$4 sm:$0xff]  }
 0x4bc   : > { %11036 = vmatpush1.bf16.msra.mxu1 %v14914_v63  ;;  %10974 = vmatprep.subr.bf16.mxu0 %v14919_v30  ;;  %v21748_v50 = vld [vmem:[#allocation26_spill] sm:$0xff]  ;;  %v21881_v28 = vld [vmem:[#allocation132_spill] sm:$0xff] }
 0x4bd   : > { %v19886_v14 = vpop.f32.mrf.mxu1  ;;  %11037 = vmatprep.subr.bf16.mxu1 %v14922_v31  ;;  %10911 = vmatprep.mubr.bf16.mxu1 %v21746_v57  ;;  %v14929_v30 = vld [vmem:[%s17665_s14 + $0xb48] ss:$16 sps:$4 sm:$0xff]   ;;  %v14937_v35 = vld [vmem:[%s17665_s14 + $0xb2c] ss:$16 sps:$4 sm:$0xff]  }
 0x4be   : > { %v14932_v31 = vld [vmem:[%s17665_s14 + $0xc88] ss:$16 sps:$4 sm:$0xff]  }
 0x4bf   : > { %v19891_v4 = vpop.f32.mrf.mxu1  ;;  %10975 = vmatpush2.bf16.msra.mxu0 %v14917_v5  ;;  %v14940_v5 = vld [vmem:[%s17665_s14 + $0xc6c] ss:$16 sps:$4 sm:$0xff]   ;;  %v14935_v57 = vld [vmem:[%s17665_s14 + $0xb28] ss:$16 sps:$4 sm:$0xff]  }
 0x4c0   : > { %11038 = vmatpush1.bf16.msra.mxu1 %v14920_v56  ;;  %10976 = vmatprep.subr.bf16.mxu0 %v14925_v53  ;;  %v21749_v53 = vld [vmem:[#allocation28_spill] sm:$0xff] }
 0x4c1   : > { %v19895_v60 = vpop.f32.mrf.mxu1  ;;  %11039 = vmatprep.subr.bf16.mxu1 %v14928_v55 }
 0x4c2   : > { %21747 = vst [vmem:[#allocation5_spill] sm:$0xff] %v19895_v60 }
 0x4c3   : > { %10912 = vmatmul.mubr.bf16.gmra.mxu1 %v21748_v50  ;;  %v19900_v63 = vpop.f32.mrf.mxu1  ;;  %10977 = vmatpush2.bf16.msra.mxu0 %v14923_v54  ;;  %v14938_v54 = vld [vmem:[%s17665_s14 + $0xc68] ss:$16 sps:$4 sm:$0xff]  }
 0x4c4   : > { %11040 = vmatpush1.bf16.msra.mxu1 %v14926_v46  ;;  %10978 = vmatprep.subr.bf16.mxu0 %v14931_v11  ;;  %v14943_v46 = vld [vmem:[%s17665_s14 + $0xb0c] ss:$16 sps:$4 sm:$0xff]  }
 0x4c5   : > { %11041 = vmatprep.subr.bf16.mxu1 %v14934_v43  ;;  %v19906_v56 = vpop.f32.mrf.mxu1  ;;  %10921 = vmatprep.mubr.bf16.mxu1 %v21749_v53  ;;  %v14946_v11 = vld [vmem:[%s17665_s14 + $0xc4c] ss:$16 sps:$4 sm:$0xff]   ;;  %v14941_v53 = vld [vmem:[%s17665_s14 + $0xb08] ss:$16 sps:$4 sm:$0xff]  }
 0x4c6   : > { %v21751_v50 = vld [vmem:[#allocation30_spill] sm:$0xff] }
 0x4c7   : > { %v19909_v55 = vpop.f32.mrf.mxu1  ;;  %10979 = vmatpush2.bf16.msra.mxu0 %v14929_v30  ;;  %v14944_v30 = vld [vmem:[%s17665_s14 + $0xc48] ss:$16 sps:$4 sm:$0xff]  }
 0x4c8   : > { %11042 = vmatpush1.bf16.msra.mxu1 %v14932_v31  ;;  %10980 = vmatprep.subr.bf16.mxu0 %v14937_v35  ;;  %v14949_v31 = vld [vmem:[%s17665_s14 + $0xc2c] ss:$16 sps:$4 sm:$0xff]  }
 0x4c9   : > { %11043 = vmatprep.subr.bf16.mxu1 %v14940_v5  ;;  %v19915_v43 = vpop.f32.mrf.mxu1  ;;  %v21752_v5 = vld [vmem:[#allocation32_spill] sm:$0xff] }
 0x4ca   : > { %21750 = vst [vmem:[#allocation18_spill] sm:$0xff] %v19915_v43  ;;  %v14947_v43 = vld [vmem:[%s17665_s14 + $0xc28] ss:$16 sps:$4 sm:$0xff]  }
 0x4cb   : > { %10922 = vmatmul.mubr.bf16.gmra.mxu1 %v21751_v50  ;;  %10981 = vmatpush2.bf16.msra.mxu0 %v14935_v57  ;;  %v19922_v35 = vpop.f32.mrf.mxu1  ;;  %v14950_v50 = vld [vmem:[%s17665_s14 + $0xee8] ss:$16 sps:$4 sm:$0xff]   ;;  %v19927_v57 = vpop.f32.mrf.mxu0 }
 0x4cc   : > { %11044 = vmatpush1.bf16.msra.mxu1 %v14938_v54  ;;  %10982 = vmatprep.subr.bf16.mxu0 %v14943_v46  ;;  %v14955_v54 = vld [vmem:[%s17665_s14 + $0xc0c] ss:$16 sps:$4 sm:$0xff]  }
 0x4cd   : > { %11045 = vmatprep.subr.bf16.mxu1 %v14946_v11  ;;  %10931 = vmatprep.mubr.bf16.mxu1 %v21752_v5  ;;  %v14958_v46 = vld [vmem:[%s17665_s14 + $0xecc] ss:$16 sps:$4 sm:$0xff]   ;;  %v19931_v11 = vpop.f32.mrf.mxu1  ;;  %v21754_v5 = vld [vmem:[#allocation23_spill] sm:$0xff] }
 0x4cf   : > { %10983 = vmatpush2.bf16.msra.mxu0 %v14941_v53  ;;  %v19940_v19 = vpop.f32.mrf.mxu1 }
 0x4d0   : > { %11046 = vmatpush1.bf16.msra.mxu1 %v14944_v30  ;;  %11118 = vmatprep.subr.bf16.mxu0 %v14952_v49  ;;  %v14953_v30 = vld [vmem:[%s17665_s14 + $0xc08] ss:$16 sps:$4 sm:$0xff]   ;;  %v14961_v49 = vld [vmem:[%s17665_s14 + $0xdec] ss:$16 sps:$4 sm:$0xff]  }
 0x4d1   : > { %11047 = vmatprep.subr.bf16.mxu1 %v14949_v31 }
 0x4d2   : > { %v10405_v60 = vpop.f32.mrf.mxu0  ;;  %10985 = vmatmul.mubr.bf16.vlgmr.msra.gmra.mxu0 %v21754_v5 }
 0x4d3   : > { %10932 = vmatmul.mubr.bf16.gmra.mxu1 %v21753_v25  ;;  %v10406_v53 = vadd.f32 %v10405_v60, %v19771_v24  ;;  %11119 = vmatpush1.bf16.msra.mxu0 %v14950_v50  ;;  %v21756_v60 = vld [vmem:[#allocation36_spill] sm:$0xff] }
 0x4d4   : > { %11048 = vmatpush1.bf16.msra.mxu1 %v14947_v43  ;;  %v10407_v31 = vpop.f32.mrf.mxu0  ;;  %11120 = vmatprep.subr.bf16.mxu0 %v14958_v46  ;;  %v21757_v43 = vld [vmem:[#allocation25_spill] sm:$0xff]  ;;  %v14959_v46 = vld [vmem:[%s17665_s14 + $0xde8] ss:$16 sps:$4 sm:$0xff]  }
 0x4d5   : > { %11049 = vmatprep.subr.bf16.mxu1 %v14955_v54  ;;  %v19943_v25 = vadd.f32 %v19881_v59, %v10406_v53  ;;  %v10408_v24 = vadd.f32 %v10407_v31, %v19776_v47  ;;  %10941 = vmatprep.mubr.bf16.mxu1 %v21756_v60  ;;  %v14967_v47 = vld [vmem:[%s17665_s14 + $0xdcc] ss:$16 sps:$4 sm:$0xff]   ;;  %v19958_v31 = vpop.f32.mrf.mxu1 }
 0x4d6   : > { %10994 = vmatprep.mubr.bf16.mxu0 %v21757_v43  ;;  %v10409_v50 = vpop.f32.mrf.mxu0  ;;  %v14970_v53 = vld [vmem:[%s17665_s14 + $0xe8c] ss:$16 sps:$4 sm:$0xff]   ;;  %21760 = vst [vmem:[#allocation11_spill] sm:$0xff] %v19958_v31  ;;  %v21809_v31 = vld [vmem:[#allocation53_spill] sm:$0xff] }
 0x4d7   : > { %21755 = vst [vmem:[#allocation7_spill] sm:$0xff] %v19943_v25  ;;  %v19949_v5 = vadd.f32 %v19886_v14, %v10408_v24  ;;  %v10410_v54 = vadd.f32 %v10409_v50, %v19787_v45  ;;  %11121 = vmatpush1.bf16.msra.mxu0 %v14956_v62  ;;  %v21763_v62 = vld [vmem:[#allocation27_spill] sm:$0xff]  ;;  %v14973_v43 = vld [vmem:[%s17665_s14 + $0xdac] ss:$16 sps:$4 sm:$0xff]  }
 0x4d8   : > { %11050 = vmatpush1.bf16.msra.mxu1 %v14953_v30  ;;  %v19954_v59 = vpop.f32.mrf.mxu0  ;;  %11122 = vmatprep.subr.bf16.mxu0 %v14964_v1  ;;  %v21762_v30 = vld [vmem:[#allocation38_spill] sm:$0xff] }
 0x4d9   : > { %21758 = vst [vmem:[#allocation9_spill] sm:$0xff] %v19949_v5  ;;  %21759 = vst [vmem:[#allocation20_spill] sm:$0xff] %v19954_v59  ;;  %11051 = vmatprep.subr.bf16.mxu1 %v14961_v49  ;;  %v19961_v14 = vadd.f32 %v19891_v4, %v10410_v54  ;;  %v14965_v49 = vld [vmem:[%s17665_s14 + $0xdc8] ss:$16 sps:$4 sm:$0xff]   ;;  %v14976_v50 = vld [vmem:[%s17665_s14 + $0xe6c] ss:$16 sps:$4 sm:$0xff]   ;;  %v10518_v4 = vpop.f32.mrf.mxu1 }
 0x4da   : > { %v10415_v45 = vpop.f32.mrf.mxu0  ;;  %10995 = vmatmul.mubr.bf16.gmra.mxu0 %v21763_v62  ;;  %v14968_v1 = vld [vmem:[%s17665_s14 + $0xe88] ss:$16 sps:$4 sm:$0xff]  }
 0x4db   : > { %21761 = vst [vmem:[#allocation13_spill] sm:$0xff] %v19961_v14  ;;  %10942 = vmatmul.mubr.bf16.gmra.mxu1 %v21762_v30  ;;  %v10416_v24 = vadd.f32 %v10415_v45, %v19796_v2  ;;  %11123 = vmatpush1.bf16.msra.mxu0 %v14962_v41  ;;  %v21765_v2 = vld [vmem:[#allocation29_spill] sm:$0xff]  ;;  %v21766_v41 = vld [vmem:[#allocation40_spill] sm:$0xff] }
 0x4dc   : > { %11052 = vmatpush2.bf16.msra.mxu1 %v14959_v46  ;;  %v10417_v60 = vpop.f32.mrf.mxu0  ;;  %11124 = vmatprep.subr.bf16.mxu0 %v14970_v53  ;;  %v14971_v53 = vld [vmem:[%s17665_s14 + $0xda8] ss:$16 sps:$4 sm:$0xff]  }
 0x4dd   : > { %11053 = vmatprep.subr.bf16.mxu1 %v14967_v47  ;;  %v19971_v54 = vadd.f32 %v19900_v63, %v10416_v24  ;;  %v10418_v30 = vadd.f32 %v10417_v60, %v19801_v12  ;;  %11004 = vmatprep.mubr.bf16.mxu0 %v21765_v2  ;;  %v14974_v62 = vld [vmem:[%s17665_s14 + $0xe68] ss:$16 sps:$4 sm:$0xff]   ;;  %v14979_v12 = vld [vmem:[%s17665_s14 + $0xd8c] ss:$16 sps:$4 sm:$0xff]   ;;  %v10520_v60 = vpop.f32.mrf.mxu1 }
 0x4de   : > { %11067 = vmatprep.mubr.bf16.mxu1 %v21766_v41  ;;  %v10419_v46 = vpop.f32.mrf.mxu0  ;;  %v14982_v24 = vld [vmem:[%s17665_s14 + $0xe4c] ss:$16 sps:$4 sm:$0xff]  }
 0x4df   : > { %21764 = vst [vmem:[#allocation15_spill] sm:$0xff] %v19971_v54  ;;  %v19977_v45 = vadd.f32 %v19906_v56, %v10418_v30  ;;  %v10420_v47 = vadd.f32 %v10419_v46, %v19812_v17  ;;  %11125 = vmatpush1.bf16.msra.mxu0 %v14968_v1  ;;  %v21770_v17 = vld [vmem:[#allocation31_spill] sm:$0xff]  ;;  %v14977_v1 = vld [vmem:[%s17665_s14 + $0xd88] ss:$16 sps:$4 sm:$0xff]   ;;  %v10522_v2 = vpop.f32.mrf.mxu1  ;;  %v14985_v41 = vld [vmem:[%s17665_s14 + $0xd6c] ss:$16 sps:$4 sm:$0xff]  }
 0x4e0   : > { %11054 = vmatpush2.bf16.msra.mxu1 %v14965_v49  ;;  %v19982_v63 = vpop.f32.mrf.mxu0  ;;  %11126 = vmatprep.subr.bf16.mxu0 %v14976_v50  ;;  %v14988_v46 = vld [vmem:[%s17665_s14 + $0xe2c] ss:$16 sps:$4 sm:$0xff]  }
 0x4e1   : > { %21767 = vst [vmem:[#allocation17_spill] sm:$0xff] %v19977_v45  ;;  %21768 = vst [vmem:[#allocation19_spill] sm:$0xff] %v19982_v63  ;;  %11055 = vmatprep.subr.bf16.mxu1 %v14973_v43  ;;  %v19987_v56 = vadd.f32 %v19909_v55, %v10420_v47  ;;  %v14980_v43 = vld [vmem:[%s17665_s14 + $0xe48] ss:$16 sps:$4 sm:$0xff]   ;;  %v15048_v54 = vld [vmem:[%s17665_s14 + $0x12ec] ss:$16 sps:$4 sm:$0xff]  }
 0x4e2   : > { %v10425_v30 = vpop.f32.mrf.mxu0  ;;  %11005 = vmatmul.mubr.bf16.gmra.mxu0 %v21770_v17  ;;  %v21795_v5 = vld [vmem:[#allocation52_spill] sm:$0xff] }
 0x4e3   : > { %21769 = vst [vmem:[#allocation21_spill] sm:$0xff] %v19987_v56  ;;  %v10426_v49 = vadd.f32 %v10425_v30, %v19820_v32  ;;  %11127 = vmatpush1.bf16.msra.mxu0 %v14974_v62  ;;  %v21772_v32 = vld [vmem:[#allocation33_spill] sm:$0xff]  ;;  %v15043_v56 = vld [vmem:[%s17665_s14 + $0x1028] ss:$16 sps:$4 sm:$0xff]  }
 0x4e4   : > { %11056 = vmatpush2.bf16.msra.mxu1 %v14971_v53  ;;  %v10427_v50 = vpop.f32.mrf.mxu0  ;;  %11128 = vmatprep.subr.bf16.mxu0 %v14982_v24  ;;  %v14986_v24 = vld [vmem:[%s17665_s14 + $0xe28] ss:$16 sps:$4 sm:$0xff]  }
 0x4e5   : > { %11057 = vmatprep.subr.bf16.mxu1 %v14979_v12  ;;  %v19996_v55 = vadd.f32 %v19922_v35, %v10426_v49  ;;  %v10428_v47 = vadd.f32 %v10427_v50, %v19824_v37  ;;  %11014 = vmatprep.mubr.bf16.mxu0 %v21772_v32  ;;  %v14983_v12 = vld [vmem:[%s17665_s14 + $0xd68] ss:$16 sps:$4 sm:$0xff]   ;;  %v20008_v37 = vpop.f32.mrf.mxu1  ;;  %v14991_v35 = vld [vmem:[%s17665_s14 + $0xd4c] ss:$16 sps:$4 sm:$0xff]  }
 0x4e6   : > { %v10429_v53 = vpop.f32.mrf.mxu0  ;;  %21775 = vst [vmem:[#allocation28_spill] sm:$0xff] %v20008_v37  ;;  %v14994_v49 = vld [vmem:[%s17665_s14 + $0xe0c] ss:$16 sps:$4 sm:$0xff]  }
 0x4e7   : > { %21771 = vst [vmem:[#allocation22_spill] sm:$0xff] %v19996_v55  ;;  %v20001_v62 = vadd.f32 %v19931_v11, %v10428_v47  ;;  %11129 = vmatpush1.bf16.msra.mxu0 %v14980_v43  ;;  %v10430_v30 = vadd.f32 %v10429_v53, %v19835_v13  ;;  %v21777_v43 = vld [vmem:[#allocation35_spill] sm:$0xff]  ;;  %v14989_v13 = vld [vmem:[%s17665_s14 + $0xd48] ss:$16 sps:$4 sm:$0xff]   ;;  %v10528_v47 = vpop.f32.mrf.mxu1  ;;  %v14997_v32 = vld [vmem:[%s17665_s14 + $0xd2c] ss:$16 sps:$4 sm:$0xff]  }
 0x4e8   : > { %11058 = vmatpush2.bf16.msra.mxu1 %v14977_v1  ;;  %v20006_v17 = vpop.f32.mrf.mxu0  ;;  %11130 = vmatprep.subr.bf16.mxu0 %v14988_v46  ;;  %v15000_v53 = vld [vmem:[%s17665_s14 + $0xfec] ss:$16 sps:$4 sm:$0xff]  }
 0x4e9   : > { %21773 = vst [vmem:[#allocation24_spill] sm:$0xff] %v20001_v62  ;;  %21774 = vst [vmem:[#allocation26_spill] sm:$0xff] %v20006_v17  ;;  %11059 = vmatprep.subr.bf16.mxu1 %v14985_v41  ;;  %v20013_v11 = vadd.f32 %v19940_v19, %v10430_v30  ;;  %v14992_v41 = vld [vmem:[%s17665_s14 + $0xe08] ss:$16 sps:$4 sm:$0xff]   ;;  %v21779_v30 = vld [vmem:[#allocation37_spill] sm:$0xff] }
 0x4ea   : > { %v10435_v1 = vpop.f32.mrf.mxu0  ;;  %11015 = vmatmul.mubr.bf16.gmra.mxu0 %v21777_v43  ;;  %v10530_v43 = vpop.f32.mrf.mxu1  ;;  %v21798_v55 = vld [vmem:[#allocation58_spill] sm:$0xff]  ;;  %v21815_v17 = vld [vmem:[#allocation69_spill] sm:$0xff] }
 0x4eb   : > { %21776 = vst [vmem:[#allocation30_spill] sm:$0xff] %v20013_v11  ;;  %v10436_v50 = vadd.f32 %v10435_v1, %v19843_v39  ;;  %11131 = vmatpush1.bf16.msra.mxu0 %v14986_v24  ;;  %11024 = vmatprep.mubr.bf16.mxu0 %v21779_v30  ;;  %v14995_v1 = vld [vmem:[%s17665_s14 + $0xd28] ss:$16 sps:$4 sm:$0xff]   ;;  %v15057_v11 = vld [vmem:[%s17665_s14 + $0x11ec] ss:$16 sps:$4 sm:$0xff]  }
 0x4ec   : > { %11060 = vmatpush2.bf16.msra.mxu1 %v14983_v12  ;;  %v10437_v46 = vpop.f32.mrf.mxu0  ;;  %11132 = vmatprep.subr.bf16.mxu0 %v14994_v49  ;;  %v15060_v62 = vld [vmem:[%s17665_s14 + $0x12ac] ss:$16 sps:$4 sm:$0xff]  }
 0x4ed   : > { %11061 = vmatprep.subr.bf16.mxu1 %v14991_v35  ;;  %v20021_v19 = vadd.f32 %v10518_v4, %v10436_v50  ;;  %v10438_v39 = vadd.f32 %v10437_v46, %v19847_v44  ;;  %v14998_v35 = vld [vmem:[%s17665_s14 + $0xfe8] ss:$16 sps:$4 sm:$0xff]   ;;  %v15003_v4 = vld [vmem:[%s17665_s14 + $0xd0c] ss:$16 sps:$4 sm:$0xff]  }
 0x4ee   : > { %v10439_v12 = vpop.f32.mrf.mxu0  ;;  %v15006_v44 = vld [vmem:[%s17665_s14 + $0xfcc] ss:$16 sps:$4 sm:$0xff]   ;;  %v15004_v46 = vld [vmem:[%s17665_s14 + $0xfc8] ss:$16 sps:$4 sm:$0xff]  }
 0x4ef   : > { %21778 = vst [vmem:[#allocation32_spill] sm:$0xff] %v20021_v19  ;;  %v10440_v24 = vadd.f32 %v10439_v12, %v19858_v8  ;;  %11133 = vmatpush1.bf16.msra.mxu0 %v14992_v41  ;;  %v20028_v49 = vadd.f32 %v10520_v60, %v10438_v39  ;;  %v15001_v41 = vld [vmem:[%s17665_s14 + $0xd08] ss:$16 sps:$4 sm:$0xff]   ;;  %v10532_v60 = vpop.f32.mrf.mxu1  ;;  %v21784_v12 = vld [vmem:[#allocation41_spill] sm:$0xff] }
 0x4f0   : > { %11062 = vmatpush2.bf16.msra.mxu1 %v14989_v13  ;;  %v20030_v25 = vpop.f32.mrf.mxu0  ;;  %11134 = vmatprep.subr.bf16.mxu0 %v15000_v53  ;;  %v21783_v13 = vld [vmem:[#allocation39_spill] sm:$0xff]  ;;  %v15009_v53 = vld [vmem:[%s17665_s14 + $0xfac] ss:$16 sps:$4 sm:$0xff]  }
 0x4f1   : > { %21780 = vst [vmem:[#allocation34_spill] sm:$0xff] %v20028_v49  ;;  %21781 = vst [vmem:[#allocation23_spill] sm:$0xff] %v20030_v25  ;;  %11063 = vmatprep.subr.bf16.mxu1 %v14997_v32  ;;  %v20034_v50 = vadd.f32 %v10522_v2, %v10440_v24  ;;  %v15012_v2 = vld [vmem:[%s17665_s14 + $0x10ec] ss:$16 sps:$4 sm:$0xff]  }
 0x4f2   : > { %v10445_v8 = vpop.f32.mrf.mxu0  ;;  %11025 = vmatmul.mubr.bf16.gmra.mxu0 %v21783_v13  ;;  %v21804_v19 = vld [vmem:[#allocation64_spill] sm:$0xff] }
 0x4f3   : > { %21782 = vst [vmem:[#allocation36_spill] sm:$0xff] %v20034_v50  ;;  %11135 = vmatpush2.bf16.msra.mxu0 %v14998_v35  ;;  %v10446_v30 = vadd.f32 %v10445_v8, %v19866_v38  ;;  %11150 = vmatprep.mubr.bf16.mxu0 %v21784_v12  ;;  %v15007_v38 = vld [vmem:[%s17665_s14 + $0xfa8] ss:$16 sps:$4 sm:$0xff]   ;;  %v15165_v25 = vld [vmem:[%s17665_s14 + $0x15ac] ss:$16 sps:$4 sm:$0xff]  }
 0x4f4   : > { %11064 = vmatpush2.bf16.msra.mxu1 %v14995_v1  ;;  %v10447_v32 = vpop.f32.mrf.mxu0  ;;  %11136 = vmatprep.subr.bf16.mxu0 %v15006_v44  ;;  %v20051_v44 = vpop.f32.mrf.mxu1  ;;  %v15022_v12 = vld [vmem:[%s17665_s14 + $0x10a8] ss:$16 sps:$4 sm:$0xff]  }
 0x4f5   : > { %11065 = vmatprep.subr.bf16.mxu1 %v15003_v4  ;;  %v10448_v39 = vadd.f32 %v10447_v32, %v19870_v52  ;;  %v20044_v24 = vadd.f32 %v10528_v47, %v10446_v30  ;;  %v15010_v4 = vld [vmem:[%s17665_s14 + $0x10e8] ss:$16 sps:$4 sm:$0xff]   ;;  %21787 = vst [vmem:[#allocation27_spill] sm:$0xff] %v20051_v44  ;;  %v15015_v52 = vld [vmem:[%s17665_s14 + $0xf8c] ss:$16 sps:$4 sm:$0xff]  }
 0x4f6   : > { %v10449_v1 = vpop.f32.mrf.mxu0  ;;  %v15018_v47 = vld [vmem:[%s17665_s14 + $0x10cc] ss:$16 sps:$4 sm:$0xff]  }
 0x4f7   : > { %21785 = vst [vmem:[#allocation25_spill] sm:$0xff] %v20044_v24  ;;  %v20046_v35 = vadd.f32 %v10530_v43, %v10448_v39  ;;  %v10450_v13 = vadd.f32 %v10449_v1, %v19879_v51  ;;  %11137 = vmatpush2.bf16.msra.mxu0 %v15004_v46  ;;  %v21789_v30 = vld [vmem:[#allocation42_spill] sm:$0xff] }
 0x4f8   : > { %11066 = vmatpush2.bf16.msra.mxu1 %v15001_v41  ;;  %11138 = vmatprep.subr.bf16.mxu0 %v15009_v53  ;;  %v15013_v51 = vld [vmem:[%s17665_s14 + $0xf88] ss:$16 sps:$4 sm:$0xff]   ;;  %v15021_v32 = vld [vmem:[%s17665_s14 + $0xf6c] ss:$16 sps:$4 sm:$0xff]  }
 0x4f9   : > { %21786 = vst [vmem:[#allocation38_spill] sm:$0xff] %v20046_v35  ;;  %11201 = vmatprep.subr.bf16.mxu1 %v15012_v2  ;;  %v20055_v8 = vadd.f32 %v10532_v60, %v10450_v13  ;;  %v15016_v41 = vld [vmem:[%s17665_s14 + $0x10c8] ss:$16 sps:$4 sm:$0xff]   ;;  %v15024_v53 = vld [vmem:[%s17665_s14 + $0x10ac] ss:$16 sps:$4 sm:$0xff]   ;;  %v21812_v35 = vld [vmem:[#allocation59_spill] sm:$0xff] }
 0x4fa   : > { %v21790_v60 = vld [vmem:[#allocation44_spill] sm:$0xff] }
 0x4fb   : > { %21788 = vst [vmem:[#allocation29_spill] sm:$0xff] %v20055_v8  ;;  %v20057_v43 = vpop.f32.mrf.mxu1  ;;  %11068 = vmatmul.mubr.bf16.vlgmr.msra.gmra.mxu1 %v21789_v30  ;;  %11139 = vmatpush2.bf16.msra.mxu0 %v15007_v38  ;;  %v15019_v39 = vld [vmem:[%s17665_s14 + $0xf68] ss:$16 sps:$4 sm:$0xff]   ;;  %v15027_v13 = vld [vmem:[%s17665_s14 + $0xf4c] ss:$16 sps:$4 sm:$0xff]   ;;  %v21813_v8 = vld [vmem:[#allocation63_spill] sm:$0xff] }
 0x4fc   : > { %11202 = vmatpush1.bf16.msra.mxu1 %v15010_v4  ;;  %11140 = vmatprep.subr.bf16.mxu0 %v15015_v52  ;;  %v15030_v38 = vld [vmem:[%s17665_s14 + $0x108c] ss:$16 sps:$4 sm:$0xff]   ;;  %v15028_v30 = vld [vmem:[%s17665_s14 + $0x1088] ss:$16 sps:$4 sm:$0xff]  }
 0x4fd   : > { %v20062_v46 = vpop.f32.mrf.mxu1  ;;  %11203 = vmatprep.subr.bf16.mxu1 %v15018_v47  ;;  %11077 = vmatprep.mubr.bf16.mxu1 %v21790_v60  ;;  %v21792_v4 = vld [vmem:[#allocation46_spill] sm:$0xff] }
 0x4fe   : > { %v15025_v47 = vld [vmem:[%s17665_s14 + $0xf48] ss:$16 sps:$4 sm:$0xff]  }
 0x4ff   : > { %v20067_v2 = vpop.f32.mrf.mxu1  ;;  %11141 = vmatpush2.bf16.msra.mxu0 %v15013_v51  ;;  %v15033_v51 = vld [vmem:[%s17665_s14 + $0xf2c] ss:$16 sps:$4 sm:$0xff]  }
 0x500   : > { %11204 = vmatpush1.bf16.msra.mxu1 %v15016_v41  ;;  %11142 = vmatprep.subr.bf16.mxu0 %v15021_v32  ;;  %v15036_v41 = vld [vmem:[%s17665_s14 + $0x106c] ss:$16 sps:$4 sm:$0xff]  }
 0x501   : > { %v20071_v1 = vpop.f32.mrf.mxu1  ;;  %11205 = vmatprep.subr.bf16.mxu1 %v15024_v53  ;;  %v21793_v53 = vld [vmem:[#allocation50_spill] sm:$0xff] }
 0x502   : > { %21791 = vst [vmem:[#allocation40_spill] sm:$0xff] %v20071_v1  ;;  %v15153_v1 = vld [vmem:[%s17665_s14 + $0x15ec] ss:$16 sps:$4 sm:$0xff]  }
 0x503   : > { %11078 = vmatmul.mubr.bf16.gmra.mxu1 %v21792_v4  ;;  %v20076_v52 = vpop.f32.mrf.mxu1  ;;  %11143 = vmatpush2.bf16.msra.mxu0 %v15019_v39  ;;  %v15031_v39 = vld [vmem:[%s17665_s14 + $0xf28] ss:$16 sps:$4 sm:$0xff]  }
 0x504   : > { %11206 = vmatpush1.bf16.msra.mxu1 %v15022_v12  ;;  %11144 = vmatprep.subr.bf16.mxu0 %v15027_v13  ;;  %v15034_v12 = vld [vmem:[%s17665_s14 + $0x1068] ss:$16 sps:$4 sm:$0xff]   ;;  %v15039_v13 = vld [vmem:[%s17665_s14 + $0xf0c] ss:$16 sps:$4 sm:$0xff]  }
 0x505   : > { %11207 = vmatprep.subr.bf16.mxu1 %v15030_v38  ;;  %v20082_v32 = vpop.f32.mrf.mxu1  ;;  %11087 = vmatprep.mubr.bf16.mxu1 %v21793_v53  ;;  %v15042_v38 = vld [vmem:[%s17665_s14 + $0x104c] ss:$16 sps:$4 sm:$0xff]   ;;  %v15037_v53 = vld [vmem:[%s17665_s14 + $0xf08] ss:$16 sps:$4 sm:$0xff]  }
 0x507   : > { %v20085_v60 = vpop.f32.mrf.mxu1  ;;  %11145 = vmatpush2.bf16.msra.mxu0 %v15025_v47  ;;  %v15040_v47 = vld [vmem:[%s17665_s14 + $0x1048] ss:$16 sps:$4 sm:$0xff]  }
 0x508   : > { %11208 = vmatpush1.bf16.msra.mxu1 %v15028_v30  ;;  %11146 = vmatprep.subr.bf16.mxu0 %v15033_v51  ;;  %v15045_v30 = vld [vmem:[%s17665_s14 + $0x102c] ss:$16 sps:$4 sm:$0xff]  }
 0x509   : > { %11209 = vmatprep.subr.bf16.mxu1 %v15036_v41  ;;  %v20091_v4 = vpop.f32.mrf.mxu1  ;;  %v21796_v41 = vld [vmem:[#allocation56_spill] sm:$0xff] }
 0x50a   : > { %21794 = vst [vmem:[#allocation31_spill] sm:$0xff] %v20091_v4 }
 0x50b   : > { %11088 = vmatmul.mubr.bf16.gmra.mxu1 %v21795_v5  ;;  %11147 = vmatpush2.bf16.msra.mxu0 %v15031_v39  ;;  %v20098_v51 = vpop.f32.mrf.mxu1  ;;  %v15046_v5 = vld [vmem:[%s17665_s14 + $0x12e8] ss:$16 sps:$4 sm:$0xff]   ;;  %v20103_v39 = vpop.f32.mrf.mxu0 }
 0x50c   : > { %11210 = vmatpush1.bf16.msra.mxu1 %v15034_v12  ;;  %11148 = vmatprep.subr.bf16.mxu0 %v15039_v13  ;;  %21797 = vst [vmem:[#allocation33_spill] sm:$0xff] %v20103_v39  ;;  %v15051_v12 = vld [vmem:[%s17665_s14 + $0x100c] ss:$16 sps:$4 sm:$0xff]  }
 0x50d   : > { %11211 = vmatprep.subr.bf16.mxu1 %v15042_v38  ;;  %11097 = vmatprep.mubr.bf16.mxu1 %v21796_v41  ;;  %v15054_v13 = vld [vmem:[%s17665_s14 + $0x12cc] ss:$16 sps:$4 sm:$0xff]   ;;  %v20107_v38 = vpop.f32.mrf.mxu1  ;;  %v21799_v41 = vld [vmem:[#allocation43_spill] sm:$0xff] }
 0x50f   : > { %11149 = vmatpush2.bf16.msra.mxu0 %v15037_v53  ;;  %v10595_v49 = vpop.f32.mrf.mxu1 }
 0x510   : > { %11212 = vmatpush1.bf16.msra.mxu1 %v15040_v47  ;;  %11284 = vmatprep.subr.bf16.mxu0 %v15048_v54  ;;  %v15049_v47 = vld [vmem:[%s17665_s14 + $0x1008] ss:$16 sps:$4 sm:$0xff]  }
 0x511   : > { %11213 = vmatprep.subr.bf16.mxu1 %v15045_v30  ;;  %v15052_v30 = vld [vmem:[%s17665_s14 + $0x12c8] ss:$16 sps:$4 sm:$0xff]  }
 0x512   : > { %v10654_v45 = vpop.f32.mrf.mxu0  ;;  %11151 = vmatmul.mubr.bf16.vlgmr.msra.gmra.mxu0 %v21799_v41  ;;  %v21800_v41 = vld [vmem:[#allocation62_spill] sm:$0xff] }
 0x513   : > { %11098 = vmatmul.mubr.bf16.gmra.mxu1 %v21798_v55  ;;  %v20112_v53 = vadd.f32 %v10654_v45, %v20057_v43  ;;  %11285 = vmatpush1.bf16.msra.mxu0 %v15046_v5  ;;  %v21801_v45 = vld [vmem:[#allocation45_spill] sm:$0xff]  ;;  %v15055_v5 = vld [vmem:[%s17665_s14 + $0x11e8] ss:$16 sps:$4 sm:$0xff]  }
 0x514   : > { %11214 = vmatpush1.bf16.msra.mxu1 %v15043_v56  ;;  %v10656_v54 = vpop.f32.mrf.mxu0  ;;  %11286 = vmatprep.subr.bf16.mxu0 %v15054_v13 }
 0x515   : > { %11215 = vmatprep.subr.bf16.mxu1 %v15051_v12  ;;  %v20119_v55 = vadd.f32 %v10656_v54, %v20062_v46  ;;  %11107 = vmatprep.mubr.bf16.mxu1 %v21800_v41  ;;  %v15058_v12 = vld [vmem:[%s17665_s14 + $0x12a8] ss:$16 sps:$4 sm:$0xff]   ;;  %v15063_v46 = vld [vmem:[%s17665_s14 + $0x11cc] ss:$16 sps:$4 sm:$0xff]   ;;  %v20132_v41 = vpop.f32.mrf.mxu1 }
 0x516   : > { %11160 = vmatprep.mubr.bf16.mxu0 %v21801_v45  ;;  %v10658_v56 = vpop.f32.mrf.mxu0  ;;  %v15066_v54 = vld [vmem:[%s17665_s14 + $0x128c] ss:$16 sps:$4 sm:$0xff]   ;;  %21803 = vst [vmem:[#allocation37_spill] sm:$0xff] %v20132_v41 }
 0x517   : > { %v20124_v43 = vadd.f32 %v10658_v56, %v20067_v2  ;;  %11287 = vmatpush1.bf16.msra.mxu0 %v15052_v30  ;;  %v21805_v2 = vld [vmem:[#allocation47_spill] sm:$0xff]  ;;  %v15061_v30 = vld [vmem:[%s17665_s14 + $0x11c8] ss:$16 sps:$4 sm:$0xff]   ;;  %v15069_v56 = vld [vmem:[%s17665_s14 + $0x11ac] ss:$16 sps:$4 sm:$0xff]   ;;  %v10601_v4 = vpop.f32.mrf.mxu1 }
 0x518   : > { %11216 = vmatpush1.bf16.msra.mxu1 %v15049_v47  ;;  %v20128_v13 = vpop.f32.mrf.mxu0  ;;  %11288 = vmatprep.subr.bf16.mxu0 %v15060_v62  ;;  %v15072_v41 = vld [vmem:[%s17665_s14 + $0x126c] ss:$16 sps:$4 sm:$0xff]  }
 0x519   : > { %21802 = vst [vmem:[#allocation35_spill] sm:$0xff] %v20128_v13  ;;  %11217 = vmatprep.subr.bf16.mxu1 %v15057_v11  ;;  %v15064_v11 = vld [vmem:[%s17665_s14 + $0x1288] ss:$16 sps:$4 sm:$0xff]  }
 0x51a   : > { %v10664_v45 = vpop.f32.mrf.mxu0  ;;  %11161 = vmatmul.mubr.bf16.gmra.mxu0 %v21805_v2  ;;  %v21806_v2 = vld [vmem:[#allocation51_spill] sm:$0xff] }
 0x51b   : > { %11108 = vmatmul.mubr.bf16.gmra.mxu1 %v21804_v19  ;;  %v20137_v47 = vadd.f32 %v10664_v45, %v20076_v52  ;;  %11289 = vmatpush1.bf16.msra.mxu0 %v15058_v12  ;;  %v21807_v52 = vld [vmem:[#allocation68_spill] sm:$0xff] }
 0x51c   : > { %11218 = vmatpush2.bf16.msra.mxu1 %v15055_v5  ;;  %v10666_v62 = vpop.f32.mrf.mxu0  ;;  %11290 = vmatprep.subr.bf16.mxu0 %v15066_v54  ;;  %v15070_v54 = vld [vmem:[%s17665_s14 + $0x1268] ss:$16 sps:$4 sm:$0xff]  }
 0x51d   : > { %11219 = vmatprep.subr.bf16.mxu1 %v15063_v46  ;;  %v20144_v19 = vadd.f32 %v10666_v62, %v20082_v32  ;;  %11170 = vmatprep.mubr.bf16.mxu0 %v21806_v2  ;;  %v15067_v46 = vld [vmem:[%s17665_s14 + $0x11a8] ss:$16 sps:$4 sm:$0xff]   ;;  %v15075_v32 = vld [vmem:[%s17665_s14 + $0x118c] ss:$16 sps:$4 sm:$0xff]   ;;  %v10603_v2 = vpop.f32.mrf.mxu1 }
 0x51e   : > { %11233 = vmatprep.mubr.bf16.mxu1 %v21807_v52  ;;  %v10668_v5 = vpop.f32.mrf.mxu0  ;;  %v15078_v62 = vld [vmem:[%s17665_s14 + $0x124c] ss:$16 sps:$4 sm:$0xff]  }
 0x51f   : > { %v20149_v12 = vadd.f32 %v10668_v5, %v20085_v60  ;;  %11291 = vmatpush1.bf16.msra.mxu0 %v15064_v11  ;;  %v15076_v11 = vld [vmem:[%s17665_s14 + $0x1248] ss:$16 sps:$4 sm:$0xff]  }
 0x520   : > { %11220 = vmatpush2.bf16.msra.mxu1 %v15061_v30  ;;  %v20153_v45 = vpop.f32.mrf.mxu0  ;;  %11292 = vmatprep.subr.bf16.mxu0 %v15072_v41  ;;  %v15073_v30 = vld [vmem:[%s17665_s14 + $0x1188] ss:$16 sps:$4 sm:$0xff]   ;;  %v10605_v41 = vpop.f32.mrf.mxu1 }
 0x521   : > { %21808 = vst [vmem:[#allocation39_spill] sm:$0xff] %v20153_v45  ;;  %11221 = vmatprep.subr.bf16.mxu1 %v15069_v56  ;;  %v15081_v56 = vld [vmem:[%s17665_s14 + $0x116c] ss:$16 sps:$4 sm:$0xff]  }
 0x522   : > { %v10674_v52 = vpop.f32.mrf.mxu0  ;;  %11171 = vmatmul.mubr.bf16.gmra.mxu0 %v21809_v31  ;;  %v15084_v45 = vld [vmem:[%s17665_s14 + $0x122c] ss:$16 sps:$4 sm:$0xff]   ;;  %v21810_v31 = vld [vmem:[#allocation57_spill] sm:$0xff] }
 0x523   : > { %v20159_v60 = vadd.f32 %v10674_v52, %v20098_v51  ;;  %11293 = vmatpush1.bf16.msra.mxu0 %v15070_v54  ;;  %11180 = vmatprep.mubr.bf16.mxu0 %v21810_v31  ;;  %v15079_v54 = vld [vmem:[%s17665_s14 + $0x1168] ss:$16 sps:$4 sm:$0xff]   ;;  %v20175_v52 = vpop.f32.mrf.mxu1 }
 0x524   : > { %11222 = vmatpush2.bf16.msra.mxu1 %v15067_v46  ;;  %v10676_v5 = vpop.f32.mrf.mxu0  ;;  %11294 = vmatprep.subr.bf16.mxu0 %v15078_v62 }
 0x525   : > { %11223 = vmatprep.subr.bf16.mxu1 %v15075_v32  ;;  %v20166_v24 = vadd.f32 %v10676_v5, %v20107_v38  ;;  %v15082_v32 = vld [vmem:[%s17665_s14 + $0x1228] ss:$16 sps:$4 sm:$0xff]   ;;  %v15087_v38 = vld [vmem:[%s17665_s14 + $0x114c] ss:$16 sps:$4 sm:$0xff]  }
 0x526   : > { %v10678_v51 = vpop.f32.mrf.mxu0  ;;  %v15090_v5 = vld [vmem:[%s17665_s14 + $0x120c] ss:$16 sps:$4 sm:$0xff]  }
 0x527   : > { %v20169_v46 = vadd.f32 %v10678_v51, %v10595_v49  ;;  %11295 = vmatpush1.bf16.msra.mxu0 %v15076_v11  ;;  %v15088_v11 = vld [vmem:[%s17665_s14 + $0x1208] ss:$16 sps:$4 sm:$0xff]  }
 0x528   : > { %11224 = vmatpush2.bf16.msra.mxu1 %v15073_v30  ;;  %v20173_v62 = vpop.f32.mrf.mxu0  ;;  %11296 = vmatprep.subr.bf16.mxu0 %v15084_v45  ;;  %v15085_v30 = vld [vmem:[%s17665_s14 + $0x1148] ss:$16 sps:$4 sm:$0xff]   ;;  %v15093_v45 = vld [vmem:[%s17665_s14 + $0x112c] ss:$16 sps:$4 sm:$0xff]  }
 0x529   : > { %21811 = vst [vmem:[#allocation41_spill] sm:$0xff] %v20173_v62  ;;  %11225 = vmatprep.subr.bf16.mxu1 %v15081_v56  ;;  %v10611_v56 = vpop.f32.mrf.mxu1  ;;  %v15096_v62 = vld [vmem:[%s17665_s14 + $0x13ec] ss:$16 sps:$4 sm:$0xff]  }
 0x52a   : > { %v10684_v31 = vpop.f32.mrf.mxu0  ;;  %11181 = vmatmul.mubr.bf16.gmra.mxu0 %v21812_v35 }
 0x52b   : > { %v20180_v49 = vadd.f32 %v10684_v31, %v10601_v4  ;;  %11297 = vmatpush1.bf16.msra.mxu0 %v15082_v32  ;;  %11190 = vmatprep.mubr.bf16.mxu0 %v21813_v8  ;;  %v15094_v32 = vld [vmem:[%s17665_s14 + $0x13e8] ss:$16 sps:$4 sm:$0xff]   ;;  %v10613_v31 = vpop.f32.mrf.mxu1  ;;  %v21814_v8 = vld [vmem:[#allocation65_spill] sm:$0xff] }
 0x52c   : > { %11226 = vmatpush2.bf16.msra.mxu1 %v15079_v54  ;;  %v10686_v51 = vpop.f32.mrf.mxu0  ;;  %11298 = vmatprep.subr.bf16.mxu0 %v15090_v5  ;;  %v15091_v54 = vld [vmem:[%s17665_s14 + $0x1128] ss:$16 sps:$4 sm:$0xff]   ;;  %v15102_v5 = vld [vmem:[%s17665_s14 + $0x13cc] ss:$16 sps:$4 sm:$0xff]  }
 0x52d   : > { %11227 = vmatprep.subr.bf16.mxu1 %v15087_v38  ;;  %v20186_v50 = vadd.f32 %v10686_v51, %v10603_v2  ;;  %v15099_v2 = vld [vmem:[%s17665_s14 + $0x110c] ss:$16 sps:$4 sm:$0xff]  }
 0x52e   : > { %v10688_v35 = vpop.f32.mrf.mxu0 }
 0x52f   : > { %v20189_v4 = vadd.f32 %v10688_v35, %v10605_v41  ;;  %11299 = vmatpush1.bf16.msra.mxu0 %v15088_v11  ;;  %v15100_v11 = vld [vmem:[%s17665_s14 + $0x13c8] ss:$16 sps:$4 sm:$0xff]   ;;  %v10615_v35 = vpop.f32.mrf.mxu1 }
 0x530   : > { %11228 = vmatpush2.bf16.msra.mxu1 %v15085_v30  ;;  %v20193_v38 = vpop.f32.mrf.mxu0  ;;  %11300 = vmatprep.subr.bf16.mxu0 %v15096_v62  ;;  %v15097_v30 = vld [vmem:[%s17665_s14 + $0x1108] ss:$16 sps:$4 sm:$0xff]   ;;  %v15105_v62 = vld [vmem:[%s17665_s14 + $0x13ac] ss:$16 sps:$4 sm:$0xff]  }
 0x531   : > { %11229 = vmatprep.subr.bf16.mxu1 %v15093_v45  ;;  %v15108_v45 = vld [vmem:[%s17665_s14 + $0x14ec] ss:$16 sps:$4 sm:$0xff]  }
 0x532   : > { %v10694_v51 = vpop.f32.mrf.mxu0  ;;  %11191 = vmatmul.mubr.bf16.gmra.mxu0 %v21814_v8  ;;  %v20211_v8 = vpop.f32.mrf.mxu1 }
 0x533   : > { %v20198_v41 = vadd.f32 %v10694_v51, %v10611_v56  ;;  %11301 = vmatpush2.bf16.msra.mxu0 %v15094_v32  ;;  %11316 = vmatprep.mubr.bf16.mxu0 %v21815_v17  ;;  %v15103_v32 = vld [vmem:[%s17665_s14 + $0x13a8] ss:$16 sps:$4 sm:$0xff]  }
 0x534   : > { %11230 = vmatpush2.bf16.msra.mxu1 %v15091_v54  ;;  %v10696_v14 = vpop.f32.mrf.mxu0  ;;  %11302 = vmatprep.subr.bf16.mxu0 %v15102_v5  ;;  %v15106_v51 = vld [vmem:[%s17665_s14 + $0x14e8] ss:$16 sps:$4 sm:$0xff]  }
 0x535   : > { %11231 = vmatprep.subr.bf16.mxu1 %v15099_v2  ;;  %v20204_v37 = vadd.f32 %v10696_v14, %v10613_v31  ;;  %v15111_v2 = vld [vmem:[%s17665_s14 + $0x138c] ss:$16 sps:$4 sm:$0xff]  }
 0x536   : > { %v10698_v56 = vpop.f32.mrf.mxu0  ;;  %v15114_v14 = vld [vmem:[%s17665_s14 + $0x14cc] ss:$16 sps:$4 sm:$0xff]  }
 0x537   : > { %v20207_v54 = vadd.f32 %v10698_v56, %v10615_v35  ;;  %11303 = vmatpush2.bf16.msra.mxu0 %v15100_v11  ;;  %v21816_v5 = vld [vmem:[#allocation70_spill] sm:$0xff] }
 0x538   : > { %11232 = vmatpush2.bf16.msra.mxu1 %v15097_v30  ;;  %11304 = vmatprep.subr.bf16.mxu0 %v15105_v62  ;;  %v15109_v30 = vld [vmem:[%s17665_s14 + $0x1388] ss:$16 sps:$4 sm:$0xff]   ;;  %v15117_v62 = vld [vmem:[%s17665_s14 + $0x136c] ss:$16 sps:$4 sm:$0xff]  }
 0x539   : > { %11367 = vmatprep.subr.bf16.mxu1 %v15108_v45  ;;  %v15112_v11 = vld [vmem:[%s17665_s14 + $0x14c8] ss:$16 sps:$4 sm:$0xff]   ;;  %v15120_v45 = vld [vmem:[%s17665_s14 + $0x14ac] ss:$16 sps:$4 sm:$0xff]  }
 0x53b   : > { %v10737_v31 = vpop.f32.mrf.mxu1  ;;  %11234 = vmatmul.mubr.bf16.vlgmr.msra.gmra.mxu1 %v21816_v5  ;;  %11305 = vmatpush2.bf16.msra.mxu0 %v15103_v32  ;;  %v21817_v5 = vld [vmem:[#allocation74_spill] sm:$0xff] }
 0x53c   : > { %v20217_v17 = vadd.f32 %v10737_v31, %v20112_v53  ;;  %11368 = vmatpush1.bf16.msra.mxu1 %v15106_v51  ;;  %11306 = vmatprep.subr.bf16.mxu0 %v15111_v2  ;;  %v15115_v51 = vld [vmem:[%s17665_s14 + $0x1368] ss:$16 sps:$4 sm:$0xff]  }
 0x53d   : > { %v10739_v35 = vpop.f32.mrf.mxu1  ;;  %11369 = vmatprep.subr.bf16.mxu1 %v15114_v14  ;;  %11243 = vmatprep.mubr.bf16.mxu1 %v21817_v5  ;;  %v15118_v31 = vld [vmem:[%s17665_s14 + $0x14a8] ss:$16 sps:$4 sm:$0xff]   ;;  %v15126_v14 = vld [vmem:[%s17665_s14 + $0x148c] ss:$16 sps:$4 sm:$0xff]  }
 0x53e   : > { %v20224_v56 = vadd.f32 %v10739_v35, %v20119_v55  ;;  %v15123_v55 = vld [vmem:[%s17665_s14 + $0x134c] ss:$16 sps:$4 sm:$0xff]  }
 0x53f   : > { %v10741_v53 = vpop.f32.mrf.mxu1  ;;  %11307 = vmatpush2.bf16.msra.mxu0 %v15109_v30  ;;  %v21819_v5 = vld [vmem:[#allocation76_spill] sm:$0xff] }
 0x540   : > { %v20228_v32 = vadd.f32 %v10741_v53, %v20124_v43  ;;  %11370 = vmatpush1.bf16.msra.mxu1 %v15112_v11  ;;  %11308 = vmatprep.subr.bf16.mxu0 %v15117_v62  ;;  %v15121_v43 = vld [vmem:[%s17665_s14 + $0x1348] ss:$16 sps:$4 sm:$0xff]   ;;  %v15129_v62 = vld [vmem:[%s17665_s14 + $0x132c] ss:$16 sps:$4 sm:$0xff]  }
 0x541   : > { %v20232_v2 = vpop.f32.mrf.mxu1  ;;  %11371 = vmatprep.subr.bf16.mxu1 %v15120_v45  ;;  %v15124_v30 = vld [vmem:[%s17665_s14 + $0x1488] ss:$16 sps:$4 sm:$0xff]   ;;  %v15132_v45 = vld [vmem:[%s17665_s14 + $0x146c] ss:$16 sps:$4 sm:$0xff]  }
 0x542   : > { %21818 = vst [vmem:[#allocation42_spill] sm:$0xff] %v20232_v2 }
 0x543   : > { %v10747_v35 = vpop.f32.mrf.mxu1  ;;  %11244 = vmatmul.mubr.bf16.gmra.mxu1 %v21819_v5  ;;  %11309 = vmatpush2.bf16.msra.mxu0 %v15115_v51  ;;  %v21820_v5 = vld [vmem:[#allocation80_spill] sm:$0xff] }
 0x544   : > { %v20238_v63 = vadd.f32 %v10747_v35, %v20137_v47  ;;  %11372 = vmatpush1.bf16.msra.mxu1 %v15118_v31  ;;  %11310 = vmatprep.subr.bf16.mxu0 %v15123_v55  ;;  %v15127_v31 = vld [vmem:[%s17665_s14 + $0x1328] ss:$16 sps:$4 sm:$0xff]  }
 0x545   : > { %v10749_v11 = vpop.f32.mrf.mxu1  ;;  %11373 = vmatprep.subr.bf16.mxu1 %v15126_v14  ;;  %11253 = vmatprep.mubr.bf16.mxu1 %v21820_v5  ;;  %v15130_v35 = vld [vmem:[%s17665_s14 + $0x1468] ss:$16 sps:$4 sm:$0xff]   ;;  %v15138_v14 = vld [vmem:[%s17665_s14 + $0x144c] ss:$16 sps:$4 sm:$0xff]  }
 0x546   : > { %v20245_v53 = vadd.f32 %v10749_v11, %v20144_v19  ;;  %v15135_v19 = vld [vmem:[%s17665_s14 + $0x130c] ss:$16 sps:$4 sm:$0xff]  }
 0x547   : > { %v10751_v47 = vpop.f32.mrf.mxu1  ;;  %11311 = vmatpush2.bf16.msra.mxu0 %v15121_v43  ;;  %v21822_v5 = vld [vmem:[#allocation82_spill] sm:$0xff] }
 0x548   : > { %v20249_v51 = vadd.f32 %v10751_v47, %v20149_v12  ;;  %11374 = vmatpush1.bf16.msra.mxu1 %v15124_v30  ;;  %11312 = vmatprep.subr.bf16.mxu0 %v15129_v62  ;;  %v15133_v12 = vld [vmem:[%s17665_s14 + $0x1308] ss:$16 sps:$4 sm:$0xff]   ;;  %v15141_v62 = vld [vmem:[%s17665_s14 + $0x142c] ss:$16 sps:$4 sm:$0xff]  }
 0x549   : > { %v20253_v55 = vpop.f32.mrf.mxu1  ;;  %11375 = vmatprep.subr.bf16.mxu1 %v15132_v45  ;;  %v15136_v43 = vld [vmem:[%s17665_s14 + $0x1448] ss:$16 sps:$4 sm:$0xff]   ;;  %v15144_v45 = vld [vmem:[%s17665_s14 + $0x16ec] ss:$16 sps:$4 sm:$0xff]  }
 0x54a   : > { %21821 = vst [vmem:[#allocation44_spill] sm:$0xff] %v20253_v55 }
 0x54b   : > { %v10757_v11 = vpop.f32.mrf.mxu1  ;;  %11254 = vmatmul.mubr.bf16.gmra.mxu1 %v21822_v5  ;;  %11313 = vmatpush2.bf16.msra.mxu0 %v15127_v31  ;;  %v21823_v5 = vld [vmem:[#allocation86_spill] sm:$0xff] }
 0x54c   : > { %v20259_v2 = vadd.f32 %v10757_v11, %v20159_v60  ;;  %11376 = vmatpush1.bf16.msra.mxu1 %v15130_v35  ;;  %11314 = vmatprep.subr.bf16.mxu0 %v15135_v19  ;;  %v15139_v31 = vld [vmem:[%s17665_s14 + $0x1428] ss:$16 sps:$4 sm:$0xff]   ;;  %v20274_v19 = vpop.f32.mrf.mxu0 }
 0x54d   : > { %v10759_v30 = vpop.f32.mrf.mxu1  ;;  %11377 = vmatprep.subr.bf16.mxu1 %v15138_v14  ;;  %11263 = vmatprep.mubr.bf16.mxu1 %v21823_v5  ;;  %v15142_v35 = vld [vmem:[%s17665_s14 + $0x16e8] ss:$16 sps:$4 sm:$0xff]  }
 0x54e   : > { %v20266_v47 = vadd.f32 %v10759_v30, %v20166_v24  ;;  %v15147_v24 = vld [vmem:[%s17665_s14 + $0x140c] ss:$16 sps:$4 sm:$0xff]  }
 0x54f   : > { %v10761_v60 = vpop.f32.mrf.mxu1  ;;  %11315 = vmatpush2.bf16.msra.mxu0 %v15133_v12  ;;  %v15150_v30 = vld [vmem:[%s17665_s14 + $0x16cc] ss:$16 sps:$4 sm:$0xff]   ;;  %v21826_v12 = vld [vmem:[#allocation71_spill] sm:$0xff] }
 0x550   : > { %v20270_v11 = vadd.f32 %v10761_v60, %v20169_v46  ;;  %11378 = vmatpush1.bf16.msra.mxu1 %v15136_v43  ;;  %11450 = vmatprep.subr.bf16.mxu0 %v15144_v45  ;;  %v21825_v46 = vld [vmem:[#allocation88_spill] sm:$0xff] }
 0x551   : > { %v20276_v14 = vpop.f32.mrf.mxu1  ;;  %11379 = vmatprep.subr.bf16.mxu1 %v15141_v62  ;;  %v15145_v62 = vld [vmem:[%s17665_s14 + $0x1408] ss:$16 sps:$4 sm:$0xff]  }
 0x552   : > { %21824 = vst [vmem:[#allocation46_spill] sm:$0xff] %v20276_v14  ;;  %v10820_v55 = vpop.f32.mrf.mxu0  ;;  %11317 = vmatmul.mubr.bf16.vlgmr.msra.gmra.mxu0 %v21826_v12  ;;  %v15148_v45 = vld [vmem:[%s17665_s14 + $0x16c8] ss:$16 sps:$4 sm:$0xff]  }
 0x553   : > { %v10767_v5 = vpop.f32.mrf.mxu1  ;;  %11264 = vmatmul.mubr.bf16.gmra.mxu1 %v21825_v46  ;;  %v20286_v60 = vadd.f32 %v10820_v55, %v20217_v17  ;;  %11451 = vmatpush1.bf16.msra.mxu0 %v15142_v35  ;;  %v15156_v46 = vld [vmem:[%s17665_s14 + $0x16ac] ss:$16 sps:$4 sm:$0xff]   ;;  %v21828_v55 = vld [vmem:[#allocation75_spill] sm:$0xff] }
 0x554   : > { %v20283_v43 = vadd.f32 %v10767_v5, %v20180_v49  ;;  %11380 = vmatpush1.bf16.msra.mxu1 %v15139_v31  ;;  %v10822_v13 = vpop.f32.mrf.mxu0  ;;  %11452 = vmatprep.subr.bf16.mxu0 %v15150_v30  ;;  %v21827_v17 = vld [vmem:[#allocation92_spill] sm:$0xff] }
 0x555   : > { %v10769_v14 = vpop.f32.mrf.mxu1  ;;  %11381 = vmatprep.subr.bf16.mxu1 %v15147_v24  ;;  %v20296_v49 = vadd.f32 %v10822_v13, %v20224_v56  ;;  %11273 = vmatprep.mubr.bf16.mxu1 %v21827_v17  ;;  %v15159_v30 = vld [vmem:[%s17665_s14 + $0x15cc] ss:$16 sps:$4 sm:$0xff]  }
 0x556   : > { %v20293_v12 = vadd.f32 %v10769_v14, %v20186_v50  ;;  %11326 = vmatprep.mubr.bf16.mxu0 %v21828_v55  ;;  %v10824_v35 = vpop.f32.mrf.mxu0  ;;  %v15151_v50 = vld [vmem:[%s17665_s14 + $0x15e8] ss:$16 sps:$4 sm:$0xff]   ;;  %v15162_v17 = vld [vmem:[%s17665_s14 + $0x168c] ss:$16 sps:$4 sm:$0xff]  }
 0x557   : > { %v10771_v31 = vpop.f32.mrf.mxu1  ;;  %v20304_v24 = vadd.f32 %v10824_v35, %v20228_v32  ;;  %11453 = vmatpush1.bf16.msra.mxu0 %v15148_v45  ;;  %v15154_v14 = vld [vmem:[%s17665_s14 + $0x16a8] ss:$16 sps:$4 sm:$0xff]  }
 0x558   : > { %v20301_v5 = vadd.f32 %v10771_v31, %v20189_v4  ;;  %11382 = vmatpush1.bf16.msra.mxu1 %v15145_v62  ;;  %v20310_v56 = vpop.f32.mrf.mxu0  ;;  %11454 = vmatprep.subr.bf16.mxu0 %v15156_v46  ;;  %v21830_v32 = vld [vmem:[#allocation94_spill] sm:$0xff]  ;;  %v21831_v62 = vld [vmem:[#allocation77_spill] sm:$0xff] }
 0x559   : > { %v20308_v13 = vpop.f32.mrf.mxu1  ;;  %21829 = vst [vmem:[#allocation50_spill] sm:$0xff] %v20310_v56  ;;  %11383 = vmatprep.subr.bf16.mxu1 %v15153_v1  ;;  %v15157_v1 = vld [vmem:[%s17665_s14 + $0x15c8] ss:$16 sps:$4 sm:$0xff]  }
 0x55a   : > { %v10830_v55 = vpop.f32.mrf.mxu0  ;;  %11327 = vmatmul.mubr.bf16.gmra.mxu0 %v21831_v62  ;;  %v15160_v46 = vld [vmem:[%s17665_s14 + $0x1688] ss:$16 sps:$4 sm:$0xff]  }
 0x55b   : > { %v10777_v4 = vpop.f32.mrf.mxu1  ;;  %11274 = vmatmul.mubr.bf16.gmra.mxu1 %v21830_v32  ;;  %v20320_v31 = vadd.f32 %v10830_v55, %v20238_v63  ;;  %11455 = vmatpush1.bf16.msra.mxu0 %v15154_v14  ;;  %v15168_v32 = vld [vmem:[%s17665_s14 + $0x166c] ss:$16 sps:$4 sm:$0xff]  }
 0x55c   : > { %v20317_v45 = vadd.f32 %v10777_v4, %v20198_v41  ;;  %11384 = vmatpush2.bf16.msra.mxu1 %v15151_v50  ;;  %v10832_v56 = vpop.f32.mrf.mxu0  ;;  %11456 = vmatprep.subr.bf16.mxu0 %v15162_v17  ;;  %v21832_v41 = vld [vmem:[#allocation81_spill] sm:$0xff]  ;;  %v21833_v50 = vld [vmem:[#allocation98_spill] sm:$0xff] }
 0x55d   : > { %v10779_v35 = vpop.f32.mrf.mxu1  ;;  %11385 = vmatprep.subr.bf16.mxu1 %v15159_v30  ;;  %v20330_v63 = vadd.f32 %v10832_v56, %v20245_v53  ;;  %11336 = vmatprep.mubr.bf16.mxu0 %v21832_v41  ;;  %v15166_v17 = vld [vmem:[%s17665_s14 + $0x1668] ss:$16 sps:$4 sm:$0xff]   ;;  %v15171_v56 = vld [vmem:[%s17665_s14 + $0x158c] ss:$16 sps:$4 sm:$0xff]  }
 0x55e   : > { %v20327_v62 = vadd.f32 %v10779_v35, %v20204_v37  ;;  %11399 = vmatprep.mubr.bf16.mxu1 %v21833_v50  ;;  %v10834_v4 = vpop.f32.mrf.mxu0  ;;  %v15163_v37 = vld [vmem:[%s17665_s14 + $0x15a8] ss:$16 sps:$4 sm:$0xff]   ;;  %v15174_v35 = vld [vmem:[%s17665_s14 + $0x164c] ss:$16 sps:$4 sm:$0xff]  }
 0x55f   : > { %v10781_v14 = vpop.f32.mrf.mxu1  ;;  %v20338_v30 = vadd.f32 %v10834_v4, %v20249_v51  ;;  %11457 = vmatpush1.bf16.msra.mxu0 %v15160_v46  ;;  %v15169_v51 = vld [vmem:[%s17665_s14 + $0x1588] ss:$16 sps:$4 sm:$0xff]   ;;  %v21837_v4 = vld [vmem:[#allocation87_spill] sm:$0xff] }
 0x560   : > { %v20335_v55 = vadd.f32 %v10781_v14, %v20207_v54  ;;  %11386 = vmatpush2.bf16.msra.mxu1 %v15157_v1  ;;  %v20342_v53 = vpop.f32.mrf.mxu0  ;;  %11458 = vmatprep.subr.bf16.mxu0 %v15168_v32  ;;  %v21835_v54 = vld [vmem:[#allocation83_spill] sm:$0xff]  ;;  %v15172_v1 = vld [vmem:[%s17665_s14 + $0x1648] ss:$16 sps:$4 sm:$0xff]   ;;  %v15180_v32 = vld [vmem:[%s17665_s14 + $0x162c] ss:$16 sps:$4 sm:$0xff]  }
 0x561   : > { %21834 = vst [vmem:[#allocation52_spill] sm:$0xff] %v20342_v53  ;;  %11387 = vmatprep.subr.bf16.mxu1 %v15165_v25  ;;  %v15177_v25 = vld [vmem:[%s17665_s14 + $0x156c] ss:$16 sps:$4 sm:$0xff]  }
 0x562   : > { %v10840_v41 = vpop.f32.mrf.mxu0  ;;  %11337 = vmatmul.mubr.bf16.gmra.mxu0 %v21835_v54 }
 0x563   : > { %v20348_v50 = vadd.f32 %v10840_v41, %v20259_v2  ;;  %11459 = vmatpush1.bf16.msra.mxu0 %v15166_v17  ;;  %11346 = vmatprep.mubr.bf16.mxu0 %v21837_v4  ;;  %v15175_v17 = vld [vmem:[%s17665_s14 + $0x1568] ss:$16 sps:$4 sm:$0xff]  }
 0x564   : > { %11388 = vmatpush2.bf16.msra.mxu1 %v15163_v37  ;;  %v10842_v46 = vpop.f32.mrf.mxu0  ;;  %11460 = vmatprep.subr.bf16.mxu0 %v15174_v35  ;;  %v15178_v41 = vld [vmem:[%s17665_s14 + $0x1628] ss:$16 sps:$4 sm:$0xff]   ;;  %v15186_v35 = vld [vmem:[%s17665_s14 + $0x160c] ss:$16 sps:$4 sm:$0xff]  }
 0x565   : > { %11389 = vmatprep.subr.bf16.mxu1 %v15171_v56  ;;  %v20355_v14 = vadd.f32 %v10842_v46, %v20266_v47  ;;  %v15183_v47 = vld [vmem:[%s17665_s14 + $0x154c] ss:$16 sps:$4 sm:$0xff]   ;;  %v21839_v46 = vld [vmem:[#allocation89_spill] sm:$0xff] }
 0x566   : > { %v10844_v2 = vpop.f32.mrf.mxu0 }
 0x567   : > { %21836 = vst [vmem:[#allocation56_spill] sm:$0xff] %v20355_v14  ;;  %v20359_v37 = vadd.f32 %v10844_v2, %v20270_v11  ;;  %11461 = vmatpush1.bf16.msra.mxu0 %v15172_v1  ;;  %v15181_v11 = vld [vmem:[%s17665_s14 + $0x1548] ss:$16 sps:$4 sm:$0xff]   ;;  %v15249_v14 = vld [vmem:[%s17665_s14 + $0x19ec] ss:$16 sps:$4 sm:$0xff]  }
 0x568   : > { %11390 = vmatpush2.bf16.msra.mxu1 %v15169_v51  ;;  %v20363_v56 = vpop.f32.mrf.mxu0  ;;  %11462 = vmatprep.subr.bf16.mxu0 %v15180_v32  ;;  %v15184_v51 = vld [vmem:[%s17665_s14 + $0x1608] ss:$16 sps:$4 sm:$0xff]   ;;  %v15192_v32 = vld [vmem:[%s17665_s14 + $0x17ec] ss:$16 sps:$4 sm:$0xff]  }
 0x569   : > { %21838 = vst [vmem:[#allocation58_spill] sm:$0xff] %v20363_v56  ;;  %11391 = vmatprep.subr.bf16.mxu1 %v15177_v25  ;;  %v15189_v25 = vld [vmem:[%s17665_s14 + $0x152c] ss:$16 sps:$4 sm:$0xff]  }
 0x56a   : > { %v10850_v54 = vpop.f32.mrf.mxu0  ;;  %11347 = vmatmul.mubr.bf16.gmra.mxu0 %v21839_v46  ;;  %v21840_v46 = vld [vmem:[#allocation93_spill] sm:$0xff] }
 0x56b   : > { %v20369_v4 = vadd.f32 %v10850_v54, %v20283_v43  ;;  %11463 = vmatpush1.bf16.msra.mxu0 %v15178_v41  ;;  %11356 = vmatprep.mubr.bf16.mxu0 %v21840_v46  ;;  %v15187_v41 = vld [vmem:[%s17665_s14 + $0x1528] ss:$16 sps:$4 sm:$0xff]   ;;  %v21841_v46 = vld [vmem:[#allocation95_spill] sm:$0xff] }
 0x56c   : > { %11392 = vmatpush2.bf16.msra.mxu1 %v15175_v17  ;;  %v10852_v1 = vpop.f32.mrf.mxu0  ;;  %11464 = vmatprep.subr.bf16.mxu0 %v15186_v35  ;;  %v15190_v54 = vld [vmem:[%s17665_s14 + $0x17e8] ss:$16 sps:$4 sm:$0xff]   ;;  %v15198_v35 = vld [vmem:[%s17665_s14 + $0x17cc] ss:$16 sps:$4 sm:$0xff]  }
 0x56d   : > { %11393 = vmatprep.subr.bf16.mxu1 %v15183_v47  ;;  %v20376_v2 = vadd.f32 %v10852_v1, %v20293_v12  ;;  %v15195_v12 = vld [vmem:[%s17665_s14 + $0x150c] ss:$16 sps:$4 sm:$0xff]  }
 0x56e   : > { %v10854_v43 = vpop.f32.mrf.mxu0 }
 0x56f   : > { %v20380_v17 = vadd.f32 %v10854_v43, %v20301_v5  ;;  %11465 = vmatpush1.bf16.msra.mxu0 %v15184_v51  ;;  %v15193_v5 = vld [vmem:[%s17665_s14 + $0x1508] ss:$16 sps:$4 sm:$0xff]  }
 0x570   : > { %11394 = vmatpush2.bf16.msra.mxu1 %v15181_v11  ;;  %v20384_v47 = vpop.f32.mrf.mxu0  ;;  %11466 = vmatprep.subr.bf16.mxu0 %v15192_v32  ;;  %v15196_v11 = vld [vmem:[%s17665_s14 + $0x17c8] ss:$16 sps:$4 sm:$0xff]   ;;  %v15204_v32 = vld [vmem:[%s17665_s14 + $0x18ec] ss:$16 sps:$4 sm:$0xff]  }
 0x571   : > { %11395 = vmatprep.subr.bf16.mxu1 %v15189_v25  ;;  %v15201_v25 = vld [vmem:[%s17665_s14 + $0x17ac] ss:$16 sps:$4 sm:$0xff]  }
 0x572   : > { %v10860_v1 = vpop.f32.mrf.mxu0  ;;  %11357 = vmatmul.mubr.bf16.gmra.mxu0 %v21841_v46  ;;  %v21842_v46 = vld [vmem:[#allocation99_spill] sm:$0xff] }
 0x573   : > { %v20390_v56 = vadd.f32 %v10860_v1, %v20317_v45  ;;  %11467 = vmatpush2.bf16.msra.mxu0 %v15190_v54  ;;  %11482 = vmatprep.mubr.bf16.mxu0 %v21842_v46  ;;  %v15199_v54 = vld [vmem:[%s17665_s14 + $0x17a8] ss:$16 sps:$4 sm:$0xff]  }
 0x574   : > { %11396 = vmatpush2.bf16.msra.mxu1 %v15187_v41  ;;  %v10862_v51 = vpop.f32.mrf.mxu0  ;;  %11468 = vmatprep.subr.bf16.mxu0 %v15198_v35  ;;  %v15202_v1 = vld [vmem:[%s17665_s14 + $0x18e8] ss:$16 sps:$4 sm:$0xff]   ;;  %v15210_v35 = vld [vmem:[%s17665_s14 + $0x18cc] ss:$16 sps:$4 sm:$0xff]  }
 0x575   : > { %11397 = vmatprep.subr.bf16.mxu1 %v15195_v12  ;;  %v20397_v43 = vadd.f32 %v10862_v51, %v20327_v62  ;;  %v20405_v12 = vpop.f32.mrf.mxu1  ;;  %v15207_v62 = vld [vmem:[%s17665_s14 + $0x178c] ss:$16 sps:$4 sm:$0xff]  }
 0x576   : > { %v10864_v45 = vpop.f32.mrf.mxu0  ;;  %v21843_v46 = vld [vmem:[#allocation100_spill] sm:$0xff] }
 0x577   : > { %v20401_v41 = vadd.f32 %v10864_v45, %v20335_v55  ;;  %11469 = vmatpush2.bf16.msra.mxu0 %v15196_v11  ;;  %v15205_v55 = vld [vmem:[%s17665_s14 + $0x1788] ss:$16 sps:$4 sm:$0xff]  }
 0x578   : > { %11398 = vmatpush2.bf16.msra.mxu1 %v15193_v5  ;;  %11470 = vmatprep.subr.bf16.mxu0 %v15201_v25  ;;  %v15208_v5 = vld [vmem:[%s17665_s14 + $0x18c8] ss:$16 sps:$4 sm:$0xff]   ;;  %v15213_v25 = vld [vmem:[%s17665_s14 + $0x176c] ss:$16 sps:$4 sm:$0xff]  }
 0x579   : > { %11533 = vmatprep.subr.bf16.mxu1 %v15204_v32  ;;  %v15216_v32 = vld [vmem:[%s17665_s14 + $0x18ac] ss:$16 sps:$4 sm:$0xff]  }
 0x57b   : > { %v10903_v51 = vpop.f32.mrf.mxu1  ;;  %11400 = vmatmul.mubr.bf16.vlgmr.msra.gmra.mxu1 %v21843_v46  ;;  %11471 = vmatpush2.bf16.msra.mxu0 %v15199_v54  ;;  %v21844_v46 = vld [vmem:[#allocation104_spill] sm:$0xff] }
 0x57c   : > { %v20411_v53 = vadd.f32 %v10903_v51, %v20286_v60  ;;  %11534 = vmatpush1.bf16.msra.mxu1 %v15202_v1  ;;  %11472 = vmatprep.subr.bf16.mxu0 %v15207_v62  ;;  %v15211_v1 = vld [vmem:[%s17665_s14 + $0x1768] ss:$16 sps:$4 sm:$0xff]  }
 0x57d   : > { %v10905_v11 = vpop.f32.mrf.mxu1  ;;  %11535 = vmatprep.subr.bf16.mxu1 %v15210_v35  ;;  %11409 = vmatprep.mubr.bf16.mxu1 %v21844_v46  ;;  %v15214_v51 = vld [vmem:[%s17665_s14 + $0x18a8] ss:$16 sps:$4 sm:$0xff]   ;;  %v15222_v35 = vld [vmem:[%s17665_s14 + $0x188c] ss:$16 sps:$4 sm:$0xff]  }
 0x57e   : > { %v20418_v45 = vadd.f32 %v10905_v11, %v20296_v49  ;;  %v15219_v49 = vld [vmem:[%s17665_s14 + $0x174c] ss:$16 sps:$4 sm:$0xff]  }
 0x57f   : > { %v10907_v60 = vpop.f32.mrf.mxu1  ;;  %11473 = vmatpush2.bf16.msra.mxu0 %v15205_v55  ;;  %v21846_v46 = vld [vmem:[#allocation106_spill] sm:$0xff] }
 0x580   : > { %v20422_v54 = vadd.f32 %v10907_v60, %v20304_v24  ;;  %11536 = vmatpush1.bf16.msra.mxu1 %v15208_v5  ;;  %11474 = vmatprep.subr.bf16.mxu0 %v15213_v25  ;;  %v15217_v24 = vld [vmem:[%s17665_s14 + $0x1748] ss:$16 sps:$4 sm:$0xff]   ;;  %v15225_v25 = vld [vmem:[%s17665_s14 + $0x172c] ss:$16 sps:$4 sm:$0xff]  }
 0x581   : > { %v20426_v62 = vpop.f32.mrf.mxu1  ;;  %11537 = vmatprep.subr.bf16.mxu1 %v15216_v32  ;;  %v15220_v55 = vld [vmem:[%s17665_s14 + $0x1888] ss:$16 sps:$4 sm:$0xff]   ;;  %v15228_v32 = vld [vmem:[%s17665_s14 + $0x186c] ss:$16 sps:$4 sm:$0xff]  }
 0x582   : > { %21845 = vst [vmem:[#allocation43_spill] sm:$0xff] %v20426_v62 }
 0x583   : > { %v10913_v11 = vpop.f32.mrf.mxu1  ;;  %11410 = vmatmul.mubr.bf16.gmra.mxu1 %v21846_v46  ;;  %11475 = vmatpush2.bf16.msra.mxu0 %v15211_v1  ;;  %v21847_v46 = vld [vmem:[#allocation110_spill] sm:$0xff] }
 0x584   : > { %v20432_v44 = vadd.f32 %v10913_v11, %v20320_v31  ;;  %11538 = vmatpush1.bf16.msra.mxu1 %v15214_v51  ;;  %11476 = vmatprep.subr.bf16.mxu0 %v15219_v49  ;;  %v15223_v51 = vld [vmem:[%s17665_s14 + $0x1728] ss:$16 sps:$4 sm:$0xff]  }
 0x585   : > { %v10915_v5 = vpop.f32.mrf.mxu1  ;;  %11539 = vmatprep.subr.bf16.mxu1 %v15222_v35  ;;  %11419 = vmatprep.mubr.bf16.mxu1 %v21847_v46  ;;  %v15226_v11 = vld [vmem:[%s17665_s14 + $0x1868] ss:$16 sps:$4 sm:$0xff]   ;;  %v15234_v35 = vld [vmem:[%s17665_s14 + $0x184c] ss:$16 sps:$4 sm:$0xff]  }
 0x586   : > { %v20439_v60 = vadd.f32 %v10915_v5, %v20330_v63  ;;  %v15231_v63 = vld [vmem:[%s17665_s14 + $0x170c] ss:$16 sps:$4 sm:$0xff]  }
 0x587   : > { %v10917_v31 = vpop.f32.mrf.mxu1  ;;  %11477 = vmatpush2.bf16.msra.mxu0 %v15217_v24  ;;  %v21849_v46 = vld [vmem:[#allocation112_spill] sm:$0xff] }
 0x588   : > { %v20443_v1 = vadd.f32 %v10917_v31, %v20338_v30  ;;  %11540 = vmatpush1.bf16.msra.mxu1 %v15220_v55  ;;  %11478 = vmatprep.subr.bf16.mxu0 %v15225_v25  ;;  %v15229_v24 = vld [vmem:[%s17665_s14 + $0x1708] ss:$16 sps:$4 sm:$0xff]   ;;  %v15237_v25 = vld [vmem:[%s17665_s14 + $0x182c] ss:$16 sps:$4 sm:$0xff]  }
 0x589   : > { %v20447_v49 = vpop.f32.mrf.mxu1  ;;  %11541 = vmatprep.subr.bf16.mxu1 %v15228_v32  ;;  %v15232_v55 = vld [vmem:[%s17665_s14 + $0x1848] ss:$16 sps:$4 sm:$0xff]   ;;  %v15240_v32 = vld [vmem:[%s17665_s14 + $0x1aec] ss:$16 sps:$4 sm:$0xff]  }
 0x58a   : > { %21848 = vst [vmem:[#allocation62_spill] sm:$0xff] %v20447_v49  ;;  %v21851_v49 = vld [vmem:[#allocation116_spill] sm:$0xff] }
 0x58b   : > { %v10923_v5 = vpop.f32.mrf.mxu1  ;;  %11420 = vmatmul.mubr.bf16.gmra.mxu1 %v21849_v46  ;;  %11479 = vmatpush2.bf16.msra.mxu0 %v15223_v51  ;;  %v15238_v51 = vld [vmem:[%s17665_s14 + $0x1ae8] ss:$16 sps:$4 sm:$0xff]  }
 0x58c   : > { %v20453_v30 = vadd.f32 %v10923_v5, %v20348_v50  ;;  %11542 = vmatpush1.bf16.msra.mxu1 %v15226_v11  ;;  %11480 = vmatprep.subr.bf16.mxu0 %v15231_v63  ;;  %v15235_v50 = vld [vmem:[%s17665_s14 + $0x1828] ss:$16 sps:$4 sm:$0xff]   ;;  %v20467_v11 = vpop.f32.mrf.mxu0  ;;  %v15243_v63 = vld [vmem:[%s17665_s14 + $0x180c] ss:$16 sps:$4 sm:$0xff]  }
 0x58d   : > { %v20457_v31 = vpop.f32.mrf.mxu1  ;;  %11543 = vmatprep.subr.bf16.mxu1 %v15234_v35  ;;  %11429 = vmatprep.mubr.bf16.mxu1 %v21851_v49  ;;  %v15246_v35 = vld [vmem:[%s17665_s14 + $0x1acc] ss:$16 sps:$4 sm:$0xff]  }
 0x58e   : > { %21850 = vst [vmem:[#allocation45_spill] sm:$0xff] %v20457_v31 }
 0x58f   : > { %v10927_v46 = vpop.f32.mrf.mxu1  ;;  %11481 = vmatpush2.bf16.msra.mxu0 %v15229_v24  ;;  %v21854_v24 = vld [vmem:[#allocation101_spill] sm:$0xff] }
 0x590   : > { %v20463_v62 = vadd.f32 %v10927_v46, %v20359_v37  ;;  %11544 = vmatpush1.bf16.msra.mxu1 %v15232_v55  ;;  %11616 = vmatprep.subr.bf16.mxu0 %v15240_v32  ;;  %v21853_v37 = vld [vmem:[#allocation118_spill] sm:$0xff] }
 0x591   : > { %v20469_v5 = vpop.f32.mrf.mxu1  ;;  %11545 = vmatprep.subr.bf16.mxu1 %v15237_v25  ;;  %v15241_v25 = vld [vmem:[%s17665_s14 + $0x1808] ss:$16 sps:$4 sm:$0xff]  }
 0x592   : > { %21852 = vst [vmem:[#allocation64_spill] sm:$0xff] %v20469_v5  ;;  %v10986_v59 = vpop.f32.mrf.mxu0  ;;  %11483 = vmatmul.mubr.bf16.vlgmr.msra.gmra.mxu0 %v21854_v24  ;;  %v15244_v32 = vld [vmem:[%s17665_s14 + $0x1ac8] ss:$16 sps:$4 sm:$0xff]  }
 0x593   : > { %v10933_v49 = vpop.f32.mrf.mxu1  ;;  %11430 = vmatmul.mubr.bf16.gmra.mxu1 %v21853_v37  ;;  %v20479_v46 = vadd.f32 %v10986_v59, %v20411_v53  ;;  %11617 = vmatpush1.bf16.msra.mxu0 %v15238_v51  ;;  %v15252_v37 = vld [vmem:[%s17665_s14 + $0x1aac] ss:$16 sps:$4 sm:$0xff]   ;;  %v21856_v53 = vld [vmem:[#allocation105_spill] sm:$0xff] }
 0x594   : > { %v20476_v55 = vadd.f32 %v10933_v49, %v20369_v4  ;;  %11546 = vmatpush1.bf16.msra.mxu1 %v15235_v50  ;;  %v10988_v31 = vpop.f32.mrf.mxu0  ;;  %11618 = vmatprep.subr.bf16.mxu0 %v15246_v35  ;;  %v21855_v59 = vld [vmem:[#allocation122_spill] sm:$0xff] }
 0x595   : > { %v10935_v5 = vpop.f32.mrf.mxu1  ;;  %11547 = vmatprep.subr.bf16.mxu1 %v15243_v63  ;;  %v20489_v4 = vadd.f32 %v10988_v31, %v20418_v45  ;;  %11439 = vmatprep.mubr.bf16.mxu1 %v21855_v59  ;;  %v15255_v35 = vld [vmem:[%s17665_s14 + $0x19cc] ss:$16 sps:$4 sm:$0xff]  }
 0x596   : > { %v20486_v24 = vadd.f32 %v10935_v5, %v20376_v2  ;;  %11492 = vmatprep.mubr.bf16.mxu0 %v21856_v53  ;;  %v10990_v51 = vpop.f32.mrf.mxu0  ;;  %v15247_v2 = vld [vmem:[%s17665_s14 + $0x19e8] ss:$16 sps:$4 sm:$0xff]   ;;  %v15258_v59 = vld [vmem:[%s17665_s14 + $0x1a8c] ss:$16 sps:$4 sm:$0xff]  }
 0x597   : > { %v10937_v50 = vpop.f32.mrf.mxu1  ;;  %v20497_v63 = vadd.f32 %v10990_v51, %v20422_v54  ;;  %11619 = vmatpush1.bf16.msra.mxu0 %v15244_v32  ;;  %v15250_v5 = vld [vmem:[%s17665_s14 + $0x1aa8] ss:$16 sps:$4 sm:$0xff]  }
 0x598   : > { %v20494_v49 = vadd.f32 %v10937_v50, %v20380_v17  ;;  %11548 = vmatpush1.bf16.msra.mxu1 %v15241_v25  ;;  %v20503_v31 = vpop.f32.mrf.mxu0  ;;  %11620 = vmatprep.subr.bf16.mxu0 %v15252_v37  ;;  %v21858_v54 = vld [vmem:[#allocation124_spill] sm:$0xff]  ;;  %v21859_v25 = vld [vmem:[#allocation107_spill] sm:$0xff] }
 0x599   : > { %v20501_v45 = vpop.f32.mrf.mxu1  ;;  %21857 = vst [vmem:[#allocation47_spill] sm:$0xff] %v20503_v31  ;;  %11549 = vmatprep.subr.bf16.mxu1 %v15249_v14  ;;  %v15253_v14 = vld [vmem:[%s17665_s14 + $0x19c8] ss:$16 sps:$4 sm:$0xff]  }
 0x59a   : > { %v10996_v53 = vpop.f32.mrf.mxu0  ;;  %11493 = vmatmul.mubr.bf16.gmra.mxu0 %v21859_v25  ;;  %v15256_v37 = vld [vmem:[%s17665_s14 + $0x1a88] ss:$16 sps:$4 sm:$0xff]  }
 0x59b   : > { %v10943_v17 = vpop.f32.mrf.mxu1  ;;  %11440 = vmatmul.mubr.bf16.gmra.mxu1 %v21858_v54  ;;  %v20513_v50 = vadd.f32 %v10996_v53, %v20432_v44  ;;  %11621 = vmatpush1.bf16.msra.mxu0 %v15250_v5  ;;  %v15264_v54 = vld [vmem:[%s17665_s14 + $0x1a6c] ss:$16 sps:$4 sm:$0xff]   ;;  %v21861_v44 = vld [vmem:[#allocation111_spill] sm:$0xff] }
 0x59c   : > { %v20510_v32 = vadd.f32 %v10943_v17, %v20390_v56  ;;  %11550 = vmatpush2.bf16.msra.mxu1 %v15247_v2  ;;  %v10998_v31 = vpop.f32.mrf.mxu0  ;;  %11622 = vmatprep.subr.bf16.mxu0 %v15258_v59  ;;  %v21862_v2 = vld [vmem:[#allocation128_spill] sm:$0xff]  ;;  %v21865_v59 = vld [vmem:[#allocation73_spill] sm:$0xff] }
 0x59d   : > { %v10945_v51 = vpop.f32.mrf.mxu1  ;;  %11551 = vmatprep.subr.bf16.mxu1 %v15255_v35  ;;  %v20523_v56 = vadd.f32 %v10998_v31, %v20439_v60  ;;  %11502 = vmatprep.mubr.bf16.mxu0 %v21861_v44  ;;  %v15262_v60 = vld [vmem:[%s17665_s14 + $0x1a68] ss:$16 sps:$4 sm:$0xff]  }
 0x59e   : > { %v20520_v25 = vadd.f32 %v10945_v51, %v20397_v43  ;;  %11565 = vmatprep.mubr.bf16.mxu1 %v21862_v2  ;;  %v11000_v17 = vpop.f32.mrf.mxu0  ;;  %v15259_v43 = vld [vmem:[%s17665_s14 + $0x19a8] ss:$16 sps:$4 sm:$0xff]   ;;  %v15270_v2 = vld [vmem:[%s17665_s14 + $0x1a4c] ss:$16 sps:$4 sm:$0xff]  }
 0x59f   : > { %21860 = vst [vmem:[#allocation51_spill] sm:$0xff] %v20523_v56  ;;  %v10947_v5 = vpop.f32.mrf.mxu1  ;;  %v20531_v35 = vadd.f32 %v11000_v17, %v20443_v1  ;;  %11623 = vmatpush1.bf16.msra.mxu0 %v15256_v37  ;;  %v21864_v31 = vld [vmem:[#allocation72_spill] sm:$0xff] }
 0x5a0   : > { %v20528_v53 = vadd.f32 %v10947_v5, %v20401_v41  ;;  %11552 = vmatpush2.bf16.msra.mxu1 %v15253_v14  ;;  %v9373_v51 = vadd.f32 %v21865_v59, %v21864_v31  ;;  %v20537_v44 = vpop.f32.mrf.mxu0  ;;  %11624 = vmatprep.subr.bf16.mxu0 %v15264_v54  ;;  %v15267_v41 = vld [vmem:[%s17665_s14 + $0x198c] ss:$16 sps:$4 sm:$0xff]   ;;  %v21868_v14 = vld [vmem:[#allocation113_spill] sm:$0xff]  ;;  %v15268_v31 = vld [vmem:[%s17665_s14 + $0x1a48] ss:$16 sps:$4 sm:$0xff]  }
 0x5a1   : > { %21863 = vst [vmem:[#allocation68_spill] sm:$0xff] %v20531_v35  ;;  %21866 = vst [vmem:[#allocation53_spill] sm:$0xff] %v20537_v44  ;;  %11553 = vmatprep.subr.bf16.mxu1 %v15261_v6  ;;  %v21867_v5 = vld [vmem:[#allocation102_spill] sm:$0xff]  ;;  %v21870_v59 = vld [vmem:[#allocation48_spill] sm:$0xff] }
 0x5a2   : > { %v9456_v1 = vadd.f32 %v21867_v5, %v9373_v51  ;;  %v11006_v17 = vpop.f32.mrf.mxu0  ;;  %11503 = vmatmul.mubr.bf16.gmra.mxu0 %v21868_v14  ;;  %v21871_v6 = vld [vmem:[#allocation49_spill] sm:$0xff]  ;;  %v15273_v51 = vld [vmem:[%s17665_s14 + $0x196c] ss:$16 sps:$4 sm:$0xff]  }
 0x5a3   : > { %v20544_v37 = vadd.f32 %v11006_v17, %v20453_v30  ;;  %11625 = vmatpush1.bf16.msra.mxu0 %v15262_v60  ;;  %v9333_v54 = vadd.f32 %v21871_v6, %v21870_v59  ;;  %v15276_v5 = vld [vmem:[%s17665_s14 + $0x1a2c] ss:$16 sps:$4 sm:$0xff]   ;;  %v21873_v35 = vld [vmem:[#allocation117_spill] sm:$0xff]  ;;  %v21875_v30 = vld [vmem:[#allocation67_spill] sm:$0xff] }
 0x5a4   : > { %11554 = vmatpush2.bf16.msra.mxu1 %v15259_v43  ;;  %v20550_v44 = vpop.f32.mrf.mxu0  ;;  %11626 = vmatprep.subr.bf16.mxu0 %v15270_v2  ;;  %v21874_v14 = vld [vmem:[#allocation66_spill] sm:$0xff] }
 0x5a5   : > { %21869 = vst [vmem:[#allocation57_spill] sm:$0xff] %v20544_v37  ;;  %21872 = vst [vmem:[#allocation59_spill] sm:$0xff] %v20550_v44  ;;  %11555 = vmatprep.subr.bf16.mxu1 %v15267_v41  ;;  %11512 = vmatprep.mubr.bf16.mxu0 %v21873_v35  ;;  %v9363_v43 = vadd.f32 %v21875_v30, %v21874_v14  ;;  %v21876_v60 = vld [vmem:[#allocation78_spill] sm:$0xff]  ;;  %v21877_v37 = vld [vmem:[#allocation103_spill] sm:$0xff] }
 0x5a6   : > { %v9416_v17 = vadd.f32 %v21876_v60, %v9333_v54  ;;  %v9539_v15 = vadd.f32 %v21877_v37, %v9456_v1  ;;  %v11010_v39 = vpop.f32.mrf.mxu0  ;;  %v15271_v41 = vld [vmem:[%s17665_s14 + $0x1968] ss:$16 sps:$4 sm:$0xff]   ;;  %v21879_v44 = vld [vmem:[#allocation55_spill] sm:$0xff]  ;;  %v15279_v1 = vld [vmem:[%s17665_s14 + $0x194c] ss:$16 sps:$4 sm:$0xff]  }
 0x5a7   : > { %v20560_v59 = vadd.f32 %v11010_v39, %v20463_v62  ;;  %11627 = vmatpush1.bf16.msra.mxu0 %v15268_v31  ;;  %v15274_v2 = vld [vmem:[%s17665_s14 + $0x1a28] ss:$16 sps:$4 sm:$0xff]   ;;  %v9446_v56 = vadd.f32 %v21880_v3, %v9363_v43  ;;  %v15282_v39 = vld [vmem:[%s17665_s14 + $0x1a0c] ss:$16 sps:$4 sm:$0xff]   ;;  %v10691_v31 = vadd.f32 %v20193_v38, %v20175_v52  ;;  %v21885_v54 = vld [vmem:[#allocation79_spill] sm:$0xff] }
 0x5a8   : > { %11556 = vmatpush2.bf16.msra.mxu1 %v15265_v20  ;;  %v21878_v6 = vld [vmem:[#allocation54_spill] sm:$0xff]  ;;  %v9622_v14 = vadd.f32 %v21881_v28, %v9539_v15  ;;  %v20568_v30 = vpop.f32.mrf.mxu0  ;;  %11628 = vmatprep.subr.bf16.mxu0 %v15276_v5  ;;  %v21883_v62 = vld [vmem:[#allocation60_spill] sm:$0xff]  ;;  %v21884_v20 = vld [vmem:[#allocation61_spill] sm:$0xff] }
 0x5a9   : > { %v9343_v35 = vadd.f32 %v21879_v44, %v21878_v6  ;;  %21882 = vst [vmem:[#allocation63_spill] sm:$0xff] %v20568_v30  ;;  %11557 = vmatprep.subr.bf16.mxu1 %v15273_v51  ;;  %v9353_v37 = vadd.f32 %v21884_v20, %v21883_v62  ;;  %v9499_v44 = vadd.f32 %v21885_v54, %v9416_v17  ;;  %v21886_v60 = vld [vmem:[#allocation84_spill] sm:$0xff]  ;;  %v21887_v28 = vld [vmem:[#allocation119_spill] sm:$0xff]  ;;  %v21888_v51 = vld [vmem:[#allocation90_spill] sm:$0xff] }
 0x5aa   : > { %v11016_v15 = vpop.f32.mrf.mxu0  ;;  %11513 = vmatmul.mubr.bf16.gmra.mxu0 %v21887_v28  ;;  %v10774_v5 = vadd.f32 %v20308_v13, %v10691_v31  ;;  %v15277_v62 = vld [vmem:[%s17665_s14 + $0x1948] ss:$16 sps:$4 sm:$0xff]   ;;  %v21889_v38 = vld [vmem:[#allocation97_spill] sm:$0xff]  ;;  %v15288_v13 = vld [vmem:[%s17665_s14 + $0x1bec] ss:$16 sps:$4 sm:$0xff]  }
 0x5ab   : > { %v9426_v3 = vadd.f32 %v21886_v60, %v9343_v35  ;;  %v9436_v43 = vadd.f32 %v21888_v51, %v9353_v37  ;;  %v20582_v6 = vadd.f32 %v11016_v15, %v20476_v55  ;;  %11629 = vmatpush1.bf16.msra.mxu0 %v15274_v2  ;;  %v15280_v52 = vld [vmem:[%s17665_s14 + $0x1a08] ss:$16 sps:$4 sm:$0xff]   ;;  %v9529_v17 = vadd.f32 %v21889_v38, %v9446_v56  ;;  %v21891_v54 = vld [vmem:[#allocation133_spill] sm:$0xff]  ;;  %v15285_v37 = vld [vmem:[%s17665_s14 + $0x192c] ss:$16 sps:$4 sm:$0xff]  }
 0x5ac   : > { %11558 = vmatpush2.bf16.msra.mxu1 %v15271_v41  ;;  %v21890_v20 = vld [vmem:[#allocation108_spill] sm:$0xff]  ;;  %v9705_v60 = vadd.f32 %v21891_v54, %v9622_v14  ;;  %v11018_v30 = vpop.f32.mrf.mxu0  ;;  %11630 = vmatprep.subr.bf16.mxu0 %v15282_v39  ;;  %v10857_v55 = vadd.f32 %v20384_v47, %v10774_v5  ;;  %v21892_v2 = vld [vmem:[#allocation123_spill] sm:$0xff]  ;;  %v21893_v31 = vld [vmem:[#allocation85_spill] sm:$0xff] }
 0x5ad   : > { %v9582_v35 = vadd.f32 %v21890_v20, %v9499_v44  ;;  %11559 = vmatprep.subr.bf16.mxu1 %v15279_v1  ;;  %v20593_v41 = vadd.f32 %v11018_v30, %v20486_v24  ;;  %11522 = vmatprep.mubr.bf16.mxu0 %v21892_v2  ;;  %v9509_v56 = vadd.f32 %v21893_v31, %v9426_v3  ;;  %v21894_v15 = vld [vmem:[#allocation126_spill] sm:$0xff]  ;;  %v21895_v39 = vld [vmem:[#allocation91_spill] sm:$0xff]  ;;  %v21896_v5 = vld [vmem:[#allocation109_spill] sm:$0xff] }
 0x5ae   : > { %v9612_v44 = vadd.f32 %v21894_v15, %v9529_v17  ;;  %v9788_v14 = vadd.f32 %v19421_v33, %v9705_v60  ;;  %v11020_v1 = vpop.f32.mrf.mxu0  ;;  %v9519_v28 = vadd.f32 %v21895_v39, %v9436_v43  ;;  %v10940_v51 = vadd.f32 %v20501_v45, %v10857_v55  ;;  %v15283_v24 = vld [vmem:[%s17665_s14 + $0x1928] ss:$16 sps:$4 sm:$0xff]   ;;  %v15291_v33 = vld [vmem:[%s17665_s14 + $0x190c] ss:$16 sps:$4 sm:$0xff]   ;;  %v21901_v31 = vld [vmem:[#allocation125_spill] sm:$0xff] }
 0x5af   : > { %v20602_v47 = vadd.f32 %v11020_v1, %v20494_v49  ;;  %11631 = vmatpush1.bf16.msra.mxu0 %v15280_v52  ;;  %v15286_v30 = vld [vmem:[%s17665_s14 + $0x1be8] ss:$16 sps:$4 sm:$0xff]   ;;  %v9665_v3 = vadd.f32 %v21896_v5, %v9582_v35  ;;  %v15294_v43 = vld [vmem:[%s17665_s14 + $0x1bcc] ss:$16 sps:$4 sm:$0xff]   ;;  %v10701_v49 = vadd.f32 %v20274_v19, %v20211_v8  ;;  %v21899_v52 = vld [vmem:[#allocation127_spill] sm:$0xff] }
 0x5b0   : > { %11560 = vmatpush2.bf16.msra.mxu1 %v15277_v62  ;;  %v21897_v38 = vld [vmem:[#allocation114_spill] sm:$0xff]  ;;  %v11022_v17 = vpop.f32.mrf.mxu0  ;;  %11632 = vmatprep.subr.bf16.mxu0 %v15288_v13  ;;  %v21898_v54 = vld [vmem:[#allocation120_spill] sm:$0xff]  ;;  %v9695_v60 = vadd.f32 %v21899_v52, %v9612_v44  ;;  %v9871_v2 = vadd.f32 %v19423_v26, %v9788_v14  ;;  %v21902_v15 = vld [vmem:[#allocation115_spill] sm:$0xff]  ;;  %v10949_v14 = vpop.f32.mrf.mxu1 }
 0x5b1   : > { %v9592_v20 = vadd.f32 %v21897_v38, %v9509_v56  ;;  %11561 = vmatprep.subr.bf16.mxu1 %v15285_v37  ;;  %v9602_v45 = vadd.f32 %v21898_v54, %v9519_v28  ;;  %v20613_v62 = vadd.f32 %v11022_v17, %v10940_v51  ;;  %v21900_v55 = vld [vmem:[#allocation138_spill] sm:$0xff]  ;;  %v10784_v13 = vadd.f32 %v20405_v12, %v10701_v49  ;;  %v21903_v1 = vld [vmem:[#allocation156_spill] sm:$0xff]  ;;  %v21906_v38 = vld [vmem:[#allocation139_spill] sm:$0xff] }
 0x5b2   : > { %v9748_v35 = vadd.f32 %v21900_v55, %v9665_v3  ;;  %v11026_v37 = vpop.f32.mrf.mxu0  ;;  %11523 = vmatmul.mubr.bf16.gmra.mxu0 %v21901_v31  ;;  %v15289_v8 = vld [vmem:[%s17665_s14 + $0x1908] ss:$16 sps:$4 sm:$0xff]   ;;  %v9778_v39 = vadd.f32 %v21903_v1, %v9695_v60  ;;  %v9954_v26 = vadd.f32 %v19609_v21, %v9871_v2  ;;  %v15297_v12 = vld [vmem:[%s17665_s14 + $0x1bac] ss:$16 sps:$4 sm:$0xff]   ;;  %v21905_v3 = vld [vmem:[#allocation129_spill] sm:$0xff] }
 0x5b3   : > { %v20621_v56 = vadd.f32 %v11026_v37, %v20510_v32  ;;  %11633 = vmatpush2.bf16.msra.mxu0 %v15286_v30  ;;  %v15292_v19 = vld [vmem:[%s17665_s14 + $0x1bc8] ss:$16 sps:$4 sm:$0xff]   ;;  %v9675_v44 = vadd.f32 %v21902_v15, %v9592_v20  ;;  %v15300_v51 = vld [vmem:[%s17665_s14 + $0x1cec] ss:$16 sps:$4 sm:$0xff]   ;;  %v21904_v32 = vld [vmem:[#allocation121_spill] sm:$0xff]  ;;  %11648 = vmatprep.mubr.bf16.mxu0 %v21905_v3 }
 0x5b4   : > { %11562 = vmatpush2.bf16.msra.mxu1 %v15283_v24  ;;  %v11028_v28 = vpop.f32.mrf.mxu0  ;;  %11634 = vmatprep.subr.bf16.mxu0 %v15294_v43  ;;  %v9685_v5 = vadd.f32 %v21904_v32, %v9602_v45  ;;  %v10867_v24 = vadd.f32 %v20467_v11, %v10784_v13  ;;  %v9831_v20 = vadd.f32 %v21906_v38, %v9748_v35  ;;  %v21907_v21 = vld [vmem:[#allocation144_spill] sm:$0xff]  ;;  %v21908_v43 = vld [vmem:[#allocation150_spill] sm:$0xff]  ;;  %v21909_v45 = vld [vmem:[#allocation157_spill] sm:$0xff] }
 0x5b5   : > { %11563 = vmatprep.subr.bf16.mxu1 %v15291_v33  ;;  %v20633_v30 = vadd.f32 %v11028_v28, %v20520_v25  ;;  %v9758_v17 = vadd.f32 %v21907_v21, %v9675_v44  ;;  %v15295_v11 = vld [vmem:[%s17665_s14 + $0x1ba8] ss:$16 sps:$4 sm:$0xff]   ;;  %v9861_v60 = vadd.f32 %v21909_v45, %v9778_v39  ;;  %v10037_v35 = vadd.f32 %v19611_v23, %v9954_v26  ;;  %v15303_v37 = vld [vmem:[%s17665_s14 + $0x1b8c] ss:$16 sps:$4 sm:$0xff]   ;;  %v21912_v44 = vld [vmem:[#allocation151_spill] sm:$0xff] }
 0x5b6   : > { %v11030_v33 = vpop.f32.mrf.mxu0  ;;  %v9768_v54 = vadd.f32 %v21908_v43, %v9685_v5  ;;  %v10950_v49 = vadd.f32 %v10949_v14, %v10867_v24  ;;  %v15298_v25 = vld [vmem:[%s17665_s14 + $0x1ce8] ss:$16 sps:$4 sm:$0xff]   ;;  %v9914_v55 = vadd.f32 %v19459_v58, %v9831_v20  ;;  %v15306_v31 = vld [vmem:[%s17665_s14 + $0x1ccc] ss:$16 sps:$4 sm:$0xff]   ;;  %v21911_v58 = vld [vmem:[#allocation145_spill] sm:$0xff] }
 0x5b7   : > { %v20640_v52 = vadd.f32 %v11030_v33, %v20528_v53  ;;  %11635 = vmatpush2.bf16.msra.mxu0 %v15292_v19  ;;  %v9944_v53 = vadd.f32 %v19554_v42, %v9861_v60  ;;  %v21910_v15 = vld [vmem:[#allocation130_spill] sm:$0xff]  ;;  %v9841_v23 = vadd.f32 %v21911_v58, %v9758_v17  ;;  %v21916_v60 = vld [vmem:[#allocation16_spill] sm:$0xff] }
 0x5b8   : > { %11564 = vmatpush2.bf16.msra.mxu1 %v15289_v8  ;;  %v11032_v2 = vpop.f32.mrf.mxu0  ;;  %11636 = vmatprep.subr.bf16.mxu0 %v15297_v12  ;;  %v10120_v8 = vadd.f32 %v19758_v27, %v10037_v35  ;;  %v9851_v1 = vadd.f32 %v21912_v44, %v9768_v54  ;;  %v15301_v26 = vld [vmem:[%s17665_s14 + $0x1b88] ss:$16 sps:$4 sm:$0xff]   ;;  %v9997_v28 = vadd.f32 %v19461_v10, %v9914_v55  ;;  %v15309_v27 = vld [vmem:[%s17665_s14 + $0x1b6c] ss:$16 sps:$4 sm:$0xff]  }
 0x5b9   : > { %11699 = vmatprep.subr.bf16.mxu1 %v15300_v51  ;;  %v20649_v13 = vadd.f32 %v11032_v2, %v10950_v49  ;;  %v15304_v14 = vld [vmem:[%s17665_s14 + $0x1cc8] ss:$16 sps:$4 sm:$0xff]   ;;  %v15312_v12 = vld [vmem:[%s17665_s14 + $0x1cac] ss:$16 sps:$4 sm:$0xff]   ;;  %v9924_v51 = vadd.f32 %v19494_v16, %v9841_v23  ;;  %v10027_v10 = vadd.f32 %v19556_v9, %v9944_v53  ;;  %v21917_v2 = vld [vmem:[#allocation51_spill] sm:$0xff] }
 0x5ba   : > { %v9934_v32 = vadd.f32 %v19527_v61, %v9851_v1  ;;  %v21913_v5 = vld [vmem:[#allocation134_spill] sm:$0xff]  ;;  %v10080_v24 = vadd.f32 %v19632_v34, %v9997_v28  ;;  %v10203_v3 = vadd.f32 %v19760_v22, %v10120_v8  ;;  %v21915_v49 = vld [vmem:[#allocation136_spill] sm:$0xff]  ;;  %v21920_v53 = vld [vmem:[#allocation33_spill] sm:$0xff] }
 0x5bb   : > { %v11069_v19 = vpop.f32.mrf.mxu1  ;;  %11566 = vmatmul.mubr.bf16.vlgmr.msra.gmra.mxu1 %v21910_v15  ;;  %11637 = vmatpush2.bf16.msra.mxu0 %v15295_v11  ;;  %v15307_v16 = vld [vmem:[%s17665_s14 + $0x1b68] ss:$16 sps:$4 sm:$0xff]   ;;  %v15315_v9 = vld [vmem:[%s17665_s14 + $0x1b4c] ss:$16 sps:$4 sm:$0xff]  }
 0x5bc   : > { %v20657_v39 = vadd.f32 %v11069_v19, %v20479_v46  ;;  %11700 = vmatpush1.bf16.msra.mxu1 %v15298_v25  ;;  %11638 = vmatprep.subr.bf16.mxu0 %v15303_v37  ;;  %v15310_v61 = vld [vmem:[%s17665_s14 + $0x1ca8] ss:$16 sps:$4 sm:$0xff]   ;;  %v10286_v21 = vadd.f32 %v19927_v57, %v10203_v3  ;;  %v15318_v34 = vld [vmem:[%s17665_s14 + $0x1c8c] ss:$16 sps:$4 sm:$0xff]   ;;  %v10163_v43 = vadd.f32 %v19634_v48, %v10080_v24  ;;  %v21921_v19 = vld [vmem:[#allocation179_spill] sm:$0xff] }
 0x5bd   : > { %v11071_v42 = vpop.f32.mrf.mxu1  ;;  %11701 = vmatprep.subr.bf16.mxu1 %v15306_v31  ;;  %11575 = vmatprep.mubr.bf16.mxu1 %v21913_v5  ;;  %v21914_v22 = vld [vmem:[#allocation174_spill] sm:$0xff]  ;;  %v21918_v37 = vld [vmem:[#allocation140_spill] sm:$0xff]  ;;  %v21927_v24 = vld [vmem:[#allocation45_spill] sm:$0xff] }
 0x5be   : > { %v20667_v46 = vadd.f32 %v11071_v42, %v20489_v4  ;;  %v10110_v4 = vadd.f32 %v19705_v29, %v10027_v10  ;;  %v10007_v33 = vadd.f32 %v21914_v22, %v9924_v51  ;;  %v15313_v25 = vld [vmem:[%s17665_s14 + $0x1b48] ss:$16 sps:$4 sm:$0xff]   ;;  %v10246_v48 = vadd.f32 %v19781_v7, %v10163_v43  ;;  %v15330_v51 = vld [vmem:[%s17665_s14 + $0x1c4c] ss:$16 sps:$4 sm:$0xff]   ;;  %v21933_v43 = vld [vmem:[#allocation59_spill] sm:$0xff] }
 0x5bf   : > { %v11073_v38 = vpop.f32.mrf.mxu1  ;;  %11639 = vmatpush2.bf16.msra.mxu0 %v15301_v26  ;;  %v15316_v45 = vld [vmem:[%s17665_s14 + $0x1c88] ss:$16 sps:$4 sm:$0xff]   ;;  %v10369_v55 = vadd.f32 %v21916_v60, %v10286_v21  ;;  %v15333_v60 = vld [vmem:[%s17665_s14 + $0x1c2c] ss:$16 sps:$4 sm:$0xff]  }
 0x5c0   : > { %v20674_v20 = vadd.f32 %v11073_v38, %v20497_v63  ;;  %11702 = vmatpush1.bf16.msra.mxu1 %v15304_v14  ;;  %11640 = vmatprep.subr.bf16.mxu0 %v15309_v27  ;;  %v10017_v63 = vadd.f32 %v19529_v36, %v9934_v32  ;;  %v10090_v29 = vadd.f32 %v19659_v40, %v10007_v33  ;;  %v15321_v40 = vld [vmem:[%s17665_s14 + $0x1b2c] ss:$16 sps:$4 sm:$0xff]   ;;  %v15319_v44 = vld [vmem:[%s17665_s14 + $0x1b28] ss:$16 sps:$4 sm:$0xff]  }
 0x5c1   : > { %v20680_v17 = vpop.f32.mrf.mxu1  ;;  %11703 = vmatprep.subr.bf16.mxu1 %v15312_v12  ;;  %v10193_v36 = vadd.f32 %v19707_v18, %v10110_v4  ;;  %v21919_v31 = vld [vmem:[#allocation14_spill] sm:$0xff]  ;;  %v10452_v7 = vadd.f32 %v21920_v53, %v10369_v55  ;;  %v21922_v58 = vld [vmem:[#allocation68_spill] sm:$0xff] }
 0x5c2   : > { %v10100_v57 = vadd.f32 %v19682_v0, %v10017_v63  ;;  %v15324_v0 = vld [vmem:[%s17665_s14 + $0x1c6c] ss:$16 sps:$4 sm:$0xff]   ;;  %v10173_v15 = vadd.f32 %v21921_v19, %v10090_v29  ;;  %v15322_v1 = vld [vmem:[%s17665_s14 + $0x1c68] ss:$16 sps:$4 sm:$0xff]  }
 0x5c3   : > { %v11079_v54 = vpop.f32.mrf.mxu1  ;;  %11576 = vmatmul.mubr.bf16.gmra.mxu1 %v21915_v49  ;;  %11641 = vmatpush2.bf16.msra.mxu0 %v15307_v16  ;;  %v10276_v18 = vadd.f32 %v21919_v31, %v10193_v36  ;;  %v21923_v26 = vld [vmem:[#allocation180_spill] sm:$0xff]  ;;  %v21925_v32 = vld [vmem:[#allocation6_spill] sm:$0xff]  ;;  %v21934_v49 = vld [vmem:[#allocation57_spill] sm:$0xff] }
 0x5c4   : > { %v20691_v11 = vadd.f32 %v11079_v54, %v20513_v50  ;;  %11704 = vmatpush1.bf16.msra.mxu1 %v15310_v61  ;;  %11642 = vmatprep.subr.bf16.mxu0 %v15315_v9  ;;  %v10183_v14 = vadd.f32 %v21923_v26, %v10100_v57  ;;  %v21924_v28 = vld [vmem:[#allocation4_spill] sm:$0xff]  ;;  %v10256_v5 = vadd.f32 %v21925_v32, %v10173_v15  ;;  %v21928_v38 = vld [vmem:[#allocation10_spill] sm:$0xff]  ;;  %v21929_v61 = vld [vmem:[#allocation3_spill] sm:$0xff] }
 0x5c5   : > { %v11081_v35 = vpop.f32.mrf.mxu1  ;;  %11705 = vmatprep.subr.bf16.mxu1 %v15318_v34  ;;  %11585 = vmatprep.mubr.bf16.mxu1 %v21918_v37  ;;  %v10329_v42 = vadd.f32 %v21924_v28, %v10246_v48  ;;  %v15327_v12 = vld [vmem:[%s17665_s14 + $0x1b0c] ss:$16 sps:$4 sm:$0xff]   ;;  %v10359_v4 = vadd.f32 %v21929_v61, %v10276_v18  ;;  %v21931_v34 = vld [vmem:[#allocation27_spill] sm:$0xff]  ;;  %v15325_v57 = vld [vmem:[%s17665_s14 + $0x1b08] ss:$16 sps:$4 sm:$0xff]  }
 0x5c6   : > { %v20701_v50 = vadd.f32 %v11081_v35, %v21917_v2  ;;  %v21926_v10 = vld [vmem:[#allocation56_spill] sm:$0xff]  ;;  %v10266_v16 = vadd.f32 %v21928_v38, %v10183_v14  ;;  %v20725_v22 = vadd.f32 %v21931_v34, %v10452_v7  ;;  %v21932_v63 = vld [vmem:[#allocation142_spill] sm:$0xff]  ;;  %v21947_v61 = vld [vmem:[#allocation29_spill] sm:$0xff] }
 0x5c7   : > { %v11083_v8 = vpop.f32.mrf.mxu1  ;;  %11643 = vmatpush2.bf16.msra.mxu0 %v15313_v25  ;;  %v10926_v3 = vadd.f32 %v21927_v24, %v21926_v10  ;;  %v21930_v21 = vld [vmem:[#allocation20_spill] sm:$0xff]  ;;  %v21938_v37 = vld [vmem:[#allocation146_spill] sm:$0xff] }
 0x5c8   : > { %v20708_v23 = vadd.f32 %v11083_v8, %v21922_v58  ;;  %11706 = vmatpush1.bf16.msra.mxu1 %v15316_v45  ;;  %11644 = vmatprep.subr.bf16.mxu0 %v15321_v40  ;;  %v10412_v9 = vadd.f32 %v21930_v21, %v10329_v42  ;;  %v15328_v25 = vld [vmem:[%s17665_s14 + $0x1c48] ss:$16 sps:$4 sm:$0xff]   ;;  %v21935_v45 = vld [vmem:[#allocation23_spill] sm:$0xff]  ;;  %v15336_v55 = vld [vmem:[%s17665_s14 + $0x1eec] ss:$16 sps:$4 sm:$0xff]  }
 0x5c9   : > { %v20714_v27 = vpop.f32.mrf.mxu1  ;;  %11707 = vmatprep.subr.bf16.mxu1 %v15324_v0  ;;  %v11009_v54 = vadd.f32 %v21933_v43, %v10926_v3  ;;  %v10442_v36 = vadd.f32 %v21935_v45, %v10359_v4  ;;  %v21936_v35 = vld [vmem:[#allocation40_spill] sm:$0xff]  ;;  %v21937_v40 = vld [vmem:[#allocation35_spill] sm:$0xff]  ;;  %v21941_v8 = vld [vmem:[#allocation5_spill] sm:$0xff]  ;;  %v13786_v15 = vmul.f32 -1.442695, %v20725_v22 }
 0x5ca   : > { %v10661_v0 = vadd.f32 %v21937_v40, %v21936_v35  ;;  %v21939_v31 = vld [vmem:[#allocation8_spill] sm:$0xff]  ;;  %v20745_v19 = vadd.f32 %v21941_v8, %v10412_v9  ;;  %v21943_v42 = vld [vmem:[#allocation19_spill] sm:$0xff]  ;;  %v13785_v4 = vmul.f32 -1.442695, %v21947_v61  ;;  %v21948_v21 = vld [vmem:[#allocation50_spill] sm:$0xff] }
 0x5cb   : > { %v11089_v33 = vpop.f32.mrf.mxu1  ;;  %11586 = vmatmul.mubr.bf16.gmra.mxu1 %v21932_v63  ;;  %11645 = vmatpush2.bf16.msra.mxu0 %v15319_v44  ;;  %v10339_v18 = vadd.f32 %v21939_v31, %v10256_v5  ;;  %v21940_v53 = vld [vmem:[#allocation12_spill] sm:$0xff]  ;;  %v21942_v44 = vld [vmem:[#allocation42_spill] sm:$0xff]  ;;  %15391 = vpow2.f32 %v13786_v15  ;;  %v21952_v45 = vld [vmem:[#allocation131_spill] sm:$0xff] }
 0x5cc   : > { %v20730_v29 = vadd.f32 %v11089_v33, %v21934_v49  ;;  %11708 = vmatpush1.bf16.msra.mxu1 %v15322_v1  ;;  %11646 = vmatprep.subr.bf16.mxu0 %v15327_v12  ;;  %v10349_v7 = vadd.f32 %v21940_v53, %v10266_v16  ;;  %v10744_v1 = vadd.f32 %v21942_v44, %v10661_v0  ;;  %v15331_v14 = vld [vmem:[%s17665_s14 + $0x1c28] ss:$16 sps:$4 sm:$0xff]   ;;  %v15339_v3 = vld [vmem:[%s17665_s14 + $0x1c0c] ss:$16 sps:$4 sm:$0xff]   ;;  %v21946_v16 = vld [vmem:[#allocation13_spill] sm:$0xff]  ;;  %15393 = vpow2.f32 %v13785_v4 }
 0x5cd   : > { %v11091_v48 = vpop.f32.mrf.mxu1  ;;  %11709 = vmatprep.subr.bf16.mxu1 %v15330_v51  ;;  %11595 = vmatprep.mubr.bf16.mxu1 %v21938_v37  ;;  %v15334_v28 = vld [vmem:[%s17665_s14 + $0x1ee8] ss:$16 sps:$4 sm:$0xff]   ;;  %v10422_v12 = vadd.f32 %v21943_v42, %v10339_v18  ;;  %v15342_v38 = vld [vmem:[%s17665_s14 + $0x1ecc] ss:$16 sps:$4 sm:$0xff]   ;;  %v20769_v34 = vmul.f32 -1.442695, %v20745_v19 }
 0x5ce   : > { %v20739_v2 = vadd.f32 %v11091_v48, %v11009_v54  ;;  %v21944_v51 = vld [vmem:[#allocation26_spill] sm:$0xff]  ;;  %v21945_v5 = vld [vmem:[#allocation28_spill] sm:$0xff]  ;;  %v10827_v9 = vadd.f32 %v21948_v21, %v10744_v1  ;;  %v21956_v53 = vld [vmem:[#allocation11_spill] sm:$0xff] }
 0x5cf   : > { %v11093_v58 = vpop.f32.mrf.mxu1  ;;  %11647 = vmatpush2.bf16.msra.mxu0 %v15325_v57  ;;  %v10432_v32 = vadd.f32 %v21944_v51, %v10349_v7  ;;  %v20757_v10 = vadd.f32 %v21945_v5, %v10442_v36  ;;  %v21949_v33 = vld [vmem:[#allocation36_spill] sm:$0xff]  ;;  %v21950_v43 = vld [vmem:[#allocation38_spill] sm:$0xff]  ;;  %v21953_v36 = vld [vmem:[#allocation25_spill] sm:$0xff] }
 0x5d0   : > { %v20750_v26 = vadd.f32 %v11093_v58, %v20560_v59  ;;  %11710 = vmatpush1.bf16.msra.mxu1 %v15328_v25  ;;  %11782 = vmatprep.subr.bf16.mxu0 %v15336_v55  ;;  %v20764_v59 = vmul.f32 -1.442695, %v21946_v16  ;;  %v13777_v63 = vmul.f32 -1.442695, %v21949_v33  ;;  %v13782_v54 = vmul.f32 -1.442695, %v21950_v43 }
 0x5d1   : > { %v20759_v24 = vpop.f32.mrf.mxu1  ;;  %11711 = vmatprep.subr.bf16.mxu1 %v15333_v60  ;;  %v21951_v25 = vld [vmem:[#allocation148_spill] sm:$0xff]  ;;  %v13781_v48 = vmul.f32 -1.442695, %v21953_v36  ;;  %v21954_v60 = vld [vmem:[#allocation43_spill] sm:$0xff]  ;;  %v21955_v31 = vld [vmem:[#allocation18_spill] sm:$0xff]  ;;  %v20789_v7 = vadd.f32 %v21956_v53, %v10432_v32 }
 0x5d2   : > { %v11152_v57 = vpop.f32.mrf.mxu0  ;;  %11649 = vmatmul.mubr.bf16.vlgmr.msra.gmra.mxu0 %v21952_v45  ;;  %v10910_v55 = vadd.f32 %v21954_v60, %v10827_v9  ;;  %v15337_v0 = vld [vmem:[%s17665_s14 + $0x1c08] ss:$16 sps:$4 sm:$0xff]   ;;  %v20786_v18 = vadd.f32 %v21955_v31, %v10422_v12  ;;  %v13778_v8 = vmul.f32 -1.442695, %v20757_v10  ;;  %v21957_v15 = vld [vmem:[#allocation31_spill] sm:$0xff]  ;;  %15395 = vpow2.f32 %v13782_v54 }
 0x5d3   : > { %v11099_v49 = vpop.f32.mrf.mxu1  ;;  %11596 = vmatmul.mubr.bf16.gmra.mxu1 %v21951_v25  ;;  %v20781_v40 = vadd.f32 %v11152_v57, %v20657_v39  ;;  %11783 = vmatpush1.bf16.msra.mxu0 %v15334_v28  ;;  %v15340_v37 = vld [vmem:[%s17665_s14 + $0x1ec8] ss:$16 sps:$4 sm:$0xff]   ;;  %v21958_v58 = vld [vmem:[#allocation39_spill] sm:$0xff]  ;;  %v15345_v39 = vld [vmem:[%s17665_s14 + $0x1dec] ss:$16 sps:$4 sm:$0xff]   ;;  %15397 = vpow2.f32 %v13781_v48 }
 0x5d4   : > { %v20778_v35 = vadd.f32 %v11099_v49, %v20582_v6  ;;  %11712 = vmatpush1.bf16.msra.mxu1 %v15331_v14  ;;  %v10671_v44 = vadd.f32 %v21958_v58, %v21957_v15  ;;  %v11154_v1 = vpop.f32.mrf.mxu0  ;;  %11784 = vmatprep.subr.bf16.mxu0 %v15342_v38  ;;  %v15348_v14 = vld [vmem:[%s17665_s14 + $0x1eac] ss:$16 sps:$4 sm:$0xff]   ;;  %v21959_v28 = vld [vmem:[#allocation47_spill] sm:$0xff]  ;;  %v15343_v60 = vld [vmem:[%s17665_s14 + $0x1de8] ss:$16 sps:$4 sm:$0xff]   ;;  %15399 = vpow2.f32 %v13778_v8 }
 0x5d5   : > { %v11101_v6 = vpop.f32.mrf.mxu1  ;;  %11713 = vmatprep.subr.bf16.mxu1 %v15339_v3  ;;  %v10993_v42 = vadd.f32 %v21959_v28, %v10910_v55  ;;  %v20801_v51 = vadd.f32 %v11154_v1, %v20667_v46  ;;  %v21960_v32 = vld [vmem:[#allocation152_spill] sm:$0xff]  ;;  %v21961_v5 = vld [vmem:[#allocation135_spill] sm:$0xff]  ;;  %v21963_v38 = vld [vmem:[#allocation34_spill] sm:$0xff]  ;;  %v13770_v54 = vmul.f32 -1.442695, %v20789_v7  ;;  %15401 = vpow2.f32 %v13777_v63 }
 0x5d6   : > { %v20798_v12 = vadd.f32 %v11101_v6, %v20593_v41  ;;  %11605 = vmatprep.mubr.bf16.mxu1 %v21960_v32  ;;  %11658 = vmatprep.mubr.bf16.mxu0 %v21961_v5  ;;  %v21962_v21 = vld [vmem:[#allocation32_spill] sm:$0xff]  ;;  %v13774_v9 = vmul.f32 -1.442695, %v21963_v38  ;;  %v11156_v41 = vpop.f32.mrf.mxu0  ;;  %v21969_v63 = vld [vmem:[#allocation137_spill] sm:$0xff] }
 0x5d7   : > { %v13773_v3 = vmul.f32 -1.442695, %v21962_v21  ;;  %v21964_v4 = vld [vmem:[#allocation44_spill] sm:$0xff]  ;;  %v11103_v57 = vpop.f32.mrf.mxu1  ;;  %v11076_v46 = vadd.f32 %v20680_v17, %v10993_v42  ;;  %v20813_v45 = vadd.f32 %v11156_v41, %v20674_v20  ;;  %11785 = vmatpush1.bf16.msra.mxu0 %v15340_v37  ;;  %v21973_v41 = vld [vmem:[#allocation41_spill] sm:$0xff] }
 0x5d8   : > { %v10754_v49 = vadd.f32 %v21964_v4, %v10671_v44  ;;  %v20810_v25 = vadd.f32 %v11103_v57, %v20602_v47  ;;  %11714 = vmatpush1.bf16.msra.mxu1 %v15337_v0  ;;  %v15346_v55 = vld [vmem:[%s17665_s14 + $0x1ea8] ss:$16 sps:$4 sm:$0xff]   ;;  %v11158_v53 = vpop.f32.mrf.mxu0  ;;  %11786 = vmatprep.subr.bf16.mxu0 %v15348_v14  ;;  %v15351_v48 = vld [vmem:[%s17665_s14 + $0x1dcc] ss:$16 sps:$4 sm:$0xff]   ;;  %v13762_v0 = vmul.f32 -1.442695, %v20786_v18  ;;  %15403 = vpow2.f32 %v13774_v9 }
 0x5d9   : > { %v11105_v31 = vpop.f32.mrf.mxu1  ;;  %11715 = vmatprep.subr.bf16.mxu1 %v15345_v39  ;;  %v15354_v15 = vld [vmem:[%s17665_s14 + $0x1e8c] ss:$16 sps:$4 sm:$0xff]   ;;  %v20824_v20 = vadd.f32 %v11158_v53, %v11076_v46  ;;  %15405 = vpow2.f32 %v13773_v3  ;;  %v15349_v5 = vld [vmem:[%s17665_s14 + $0x1dc8] ss:$16 sps:$4 sm:$0xff]   ;;  %v21972_v57 = vld [vmem:[#allocation37_spill] sm:$0xff] }
 0x5da   : > { %v21965_v17 = vld [vmem:[#allocation52_spill] sm:$0xff]  ;;  %v20822_v58 = vadd.f32 %v11105_v31, %v20613_v62  ;;  %v21967_v44 = vld [vmem:[#allocation30_spill] sm:$0xff]  ;;  %v11162_v39 = vpop.f32.mrf.mxu0  ;;  %11659 = vmatmul.mubr.bf16.gmra.mxu0 %v21969_v63  ;;  %15407 = vpow2.f32 %v20764_v59  ;;  %v10681_v3 = vadd.f32 %v21973_v41, %v21972_v57  ;;  %v21975_v59 = vld [vmem:[#allocation141_spill] sm:$0xff] }
 0x5db   : > { %v10837_v47 = vadd.f32 %v21965_v17, %v10754_v49  ;;  %v21966_v37 = vld [vmem:[#allocation24_spill] sm:$0xff]  ;;  %v13769_v6 = vmul.f32 -1.442695, %v21967_v44  ;;  %v11109_v1 = vpop.f32.mrf.mxu1  ;;  %v21968_v14 = vld [vmem:[#allocation154_spill] sm:$0xff]  ;;  %v20836_v32 = vadd.f32 %v11162_v39, %v20691_v11  ;;  %11787 = vmatpush1.bf16.msra.mxu0 %v15346_v55  ;;  %15409 = vpow2.f32 %v13770_v54  ;;  %v21974_v11 = vld [vmem:[#allocation53_spill] sm:$0xff]  ;;  %11668 = vmatprep.mubr.bf16.mxu0 %v21975_v59 }
 0x5dc   : > { %v13766_v8 = vmul.f32 -1.442695, %v21966_v37  ;;  %11606 = vmatmul.mubr.bf16.gmra.mxu1 %v21968_v14  ;;  %v21970_v62 = vld [vmem:[#allocation62_spill] sm:$0xff]  ;;  %v20833_v42 = vadd.f32 %v11109_v1, %v20621_v56  ;;  %v11164_v31 = vpop.f32.mrf.mxu0  ;;  %11788 = vmatprep.subr.bf16.mxu0 %v15354_v15  ;;  %v21977_v1 = vld [vmem:[#allocation17_spill] sm:$0xff] }
 0x5dd   : > { %v10920_v28 = vadd.f32 %v21970_v62, %v10837_v47  ;;  %11716 = vmatpush2.bf16.msra.mxu1 %v15343_v60  ;;  %v15352_v9 = vld [vmem:[%s17665_s14 + $0x1e88] ss:$16 sps:$4 sm:$0xff]   ;;  %v11111_v46 = vpop.f32.mrf.mxu1  ;;  %v15357_v56 = vld [vmem:[%s17665_s14 + $0x1dac] ss:$16 sps:$4 sm:$0xff]   ;;  %v20851_v55 = vadd.f32 %v11164_v31, %v20701_v50  ;;  %v21976_v47 = vld [vmem:[#allocation159_spill] sm:$0xff]  ;;  %15411 = vpow2.f32 %v13769_v6 }
 0x5de   : > { %v21971_v4 = vld [vmem:[#allocation22_spill] sm:$0xff]  ;;  %11717 = vmatprep.subr.bf16.mxu1 %v15351_v48  ;;  %v20848_v60 = vadd.f32 %v11111_v46, %v20633_v30  ;;  %11731 = vmatprep.mubr.bf16.mxu1 %v21976_v47  ;;  %v13758_v48 = vmul.f32 -1.442695, %v21977_v1  ;;  %v21978_v15 = vld [vmem:[#allocation21_spill] sm:$0xff]  ;;  %v11166_v62 = vpop.f32.mrf.mxu0  ;;  %v15392_v30 = vpop.eup %15391  ;;  %15413 = vpow2.f32 %v13766_v8  ;;  %v21980_v46 = vld [vmem:[#allocation15_spill] sm:$0xff] }
 0x5df   : > { %v13765_v49 = vmul.f32 -1.442695, %v21971_v4  ;;  %v15360_v53 = vld [vmem:[%s17665_s14 + $0x1e6c] ss:$16 sps:$4 sm:$0xff]   ;;  %v11003_v17 = vadd.f32 %v21974_v11, %v10920_v28  ;;  %v13761_v39 = vmul.f32 -1.442695, %v21978_v15  ;;  %v11113_v63 = vpop.f32.mrf.mxu1  ;;  %v20863_v57 = vadd.f32 %v11166_v62, %v20708_v23  ;;  %11789 = vmatpush1.bf16.msra.mxu0 %v15352_v9  ;;  %v15394_v9 = vpop.eup %15393 }
 0x5e0   : > { %v21979_v54 = vld [vmem:[#allocation46_spill] sm:$0xff]  ;;  %v20860_v28 = vadd.f32 %v11113_v63, %v20640_v52  ;;  %v11168_v11 = vpop.f32.mrf.mxu0  ;;  %11790 = vmatprep.subr.bf16.mxu0 %v15360_v53  ;;  %v21982_v47 = vld [vmem:[#allocation143_spill] sm:$0xff]  ;;  %v21983_v53 = vld [vmem:[#allocation9_spill] sm:$0xff] }
 0x5e1   : > { %v10764_v14 = vadd.f32 %v21979_v54, %v10681_v3  ;;  %v11086_v50 = vadd.f32 %v20714_v27, %v11003_v17  ;;  %11718 = vmatpush2.bf16.msra.mxu1 %v15349_v5  ;;  %v15355_v41 = vld [vmem:[%s17665_s14 + $0x1da8] ss:$16 sps:$4 sm:$0xff]   ;;  %v13757_v3 = vmul.f32 -1.442695, %v21980_v46  ;;  %15415 = vpow2.f32 %v13765_v49  ;;  %v11115_v31 = vpop.f32.mrf.mxu1  ;;  %v15363_v8 = vld [vmem:[%s17665_s14 + $0x1d8c] ss:$16 sps:$4 sm:$0xff]  }
 0x5e2   : > { %v15358_v6 = vld [vmem:[%s17665_s14 + $0x1e68] ss:$16 sps:$4 sm:$0xff]   ;;  %11719 = vmatprep.subr.bf16.mxu1 %v15357_v56  ;;  %v15366_v59 = vld [vmem:[%s17665_s14 + $0x1e4c] ss:$16 sps:$4 sm:$0xff]   ;;  %15417 = vpow2.f32 %v13762_v0  ;;  %v20872_v23 = vadd.f32 %v11115_v31, %v20649_v13  ;;  %v12022_v17 = vadd.f32 1.0, %v15392_v30  ;;  %v11172_v49 = vpop.f32.mrf.mxu0  ;;  %11669 = vmatmul.mubr.bf16.gmra.mxu0 %v21982_v47  ;;  %v15396_v56 = vpop.eup %15395  ;;  %v21985_v30 = vld [vmem:[#allocation7_spill] sm:$0xff] }
 0x5e3   : > { %v21981_v27 = vld [vmem:[#allocation58_spill] sm:$0xff]  ;;  %v20874_v5 = vadd.f32 %v11168_v11, %v11086_v50  ;;  %15419 = vpow2.f32 %v13761_v39  ;;  %v13750_v0 = vmul.f32 -1.442695, %v21983_v53  ;;  %v21984_v54 = vld [vmem:[#allocation64_spill] sm:$0xff]  ;;  %v20880_v63 = vadd.f32 %v11172_v49, %v20730_v29  ;;  %11791 = vmatpush1.bf16.msra.mxu0 %v15358_v6  ;;  %v15398_v39 = vpop.eup %15397  ;;  %v21986_v29 = vld [vmem:[#allocation63_spill] sm:$0xff] }
 0x5e4   : > { %v10847_v52 = vadd.f32 %v21981_v27, %v10764_v14  ;;  %15421 = vpow2.f32 %v13758_v48  ;;  %v15361_v13 = vld [vmem:[%s17665_s14 + $0x1d88] ss:$16 sps:$4 sm:$0xff]   ;;  %v13749_v50 = vmul.f32 -1.442695, %v21985_v30  ;;  %v11174_v31 = vpop.f32.mrf.mxu0  ;;  %11792 = vmatprep.subr.bf16.mxu0 %v15366_v59  ;;  %v15369_v11 = vld [vmem:[%s17665_s14 + $0x1d6c] ss:$16 sps:$4 sm:$0xff]   ;;  %v15400_v47 = vpop.eup %15399 }
 0x5e5   : > { %11720 = vmatpush2.bf16.msra.mxu1 %v15355_v41  ;;  %v15364_v62 = vld [vmem:[%s17665_s14 + $0x1e48] ss:$16 sps:$4 sm:$0xff]   ;;  %15423 = vpow2.f32 %v13757_v3  ;;  %v15372_v27 = vld [vmem:[%s17665_s14 + $0x1e2c] ss:$16 sps:$4 sm:$0xff]   ;;  %v12021_v48 = vadd.f32 1.0, %v15394_v9  ;;  %v20890_v6 = vadd.f32 %v11174_v31, %v20739_v2  ;;  %v15402_v49 = vpop.eup %15401  ;;  %v12018_v3 = vadd.f32 1.0, %v15396_v56 }
 0x5e6   : > { %v10930_v14 = vadd.f32 %v21984_v54, %v10847_v52  ;;  %11721 = vmatprep.subr.bf16.mxu1 %v15363_v8  ;;  %15425 = vpow2.f32 %v20769_v34  ;;  %v21987_v52 = vld [vmem:[#allocation147_spill] sm:$0xff]  ;;  %v11176_v8 = vpop.f32.mrf.mxu0  ;;  %v15404_v59 = vpop.eup %15403  ;;  %v12017_v54 = vadd.f32 1.0, %v15398_v39  ;;  %v15367_v2 = vld [vmem:[%s17665_s14 + $0x1d68] ss:$16 sps:$4 sm:$0xff]  }
 0x5e7   : > { %11678 = vmatprep.mubr.bf16.mxu0 %v21987_v52  ;;  %15427 = vrcp.f32 %v12022_v17  ;;  %v20895_v9 = vadd.f32 %v11176_v8, %v20750_v26  ;;  %11793 = vmatpush1.bf16.msra.mxu0 %v15364_v62  ;;  %v15406_v31 = vpop.eup %15405  ;;  %v15375_v17 = vld [vmem:[%s17665_s14 + $0x1d4c] ss:$16 sps:$4 sm:$0xff]   ;;  %v12010_v62 = vadd.f32 1.0, %v15404_v59 }
 0x5e8   : > { %v11013_v41 = vadd.f32 %v21986_v29, %v10930_v14  ;;  %15429 = vpow2.f32 %v13750_v0  ;;  %v15370_v14 = vld [vmem:[%s17665_s14 + $0x1e28] ss:$16 sps:$4 sm:$0xff]   ;;  %v12014_v29 = vadd.f32 1.0, %v15400_v47  ;;  %v11178_v56 = vpop.f32.mrf.mxu0  ;;  %11794 = vmatprep.subr.bf16.mxu0 %v15372_v27  ;;  %v15378_v52 = vld [vmem:[%s17665_s14 + $0x1e0c] ss:$16 sps:$4 sm:$0xff]   ;;  %v20901_v0 = vpop.eup %15407  ;;  %v12009_v27 = vadd.f32 1.0, %v15406_v31 }
 0x5e9   : > { %11722 = vmatpush2.bf16.msra.mxu1 %v15361_v13  ;;  %15431 = vpow2.f32 %v13749_v50  ;;  %v15410_v13 = vpop.eup %15409  ;;  %v21988_v50 = vld [vmem:[#allocation149_spill] sm:$0xff]  ;;  %v15384_v59 = vld [vmem:[%s17665_s14 + $0x1f2c] ss:$16 sps:$4 sm:$0xff]  }
 0x5ea   : > { %v11096_v34 = vadd.f32 %v20759_v24, %v11013_v41  ;;  %11723 = vmatprep.subr.bf16.mxu1 %v15369_v11  ;;  %v12013_v24 = vadd.f32 1.0, %v15402_v49  ;;  %15433 = vrcp.f32 %v12021_v48  ;;  %v11182_v39 = vpop.f32.mrf.mxu0  ;;  %11679 = vmatmul.mubr.bf16.gmra.mxu0 %v21988_v50  ;;  %v15412_v11 = vpop.eup %15411  ;;  %v15373_v41 = vld [vmem:[%s17665_s14 + $0x1d48] ss:$16 sps:$4 sm:$0xff]  }
 0x5eb   : > { %15435 = vrcp.f32 %v12018_v3  ;;  %v20907_v47 = vadd.f32 %v11182_v39, %v20778_v35  ;;  %11795 = vmatpush1.bf16.msra.mxu0 %v15370_v14  ;;  %v15376_v48 = vld [vmem:[%s17665_s14 + $0x1e08] ss:$16 sps:$4 sm:$0xff]   ;;  %v15414_v49 = vpop.eup %15413  ;;  %v15381_v3 = vld [vmem:[%s17665_s14 + $0x1d2c] ss:$16 sps:$4 sm:$0xff]   ;;  %v21989_v35 = vld [vmem:[#allocation153_spill] sm:$0xff]  ;;  %v12005_v14 = vadd.f32 1.0, %v15412_v11 }
 0x5ec   : > { %v20903_v26 = vadd.f32 %v11178_v56, %v11096_v34  ;;  %15437 = vrcp.f32 %v12017_v54  ;;  %v11184_v8 = vpop.f32.mrf.mxu0  ;;  %11796 = vmatprep.subr.bf16.mxu0 %v15378_v52  ;;  %v12006_v56 = vadd.f32 1.0, %v15410_v13  ;;  %11688 = vmatprep.mubr.bf16.mxu0 %v21989_v35  ;;  %v15382_v13 = vld [vmem:[%s17665_s14 + $0x1f28] ss:$16 sps:$4 sm:$0xff]   ;;  %v15387_v11 = vld [vmem:[%s17665_s14 + $0x1d0c] ss:$16 sps:$4 sm:$0xff]  }
 0x5ed   : > { %11724 = vmatpush2.bf16.msra.mxu1 %v15367_v2  ;;  %15439 = vrcp.f32 %v12014_v29  ;;  %v20914_v54 = vadd.f32 %v11184_v8, %v20798_v12  ;;  %v15390_v8 = vld [vmem:[%s17665_s14 + $0x1f0c] ss:$16 sps:$4 sm:$0xff]  }
 0x5ee   : > { %11725 = vmatprep.subr.bf16.mxu1 %v15375_v17  ;;  %v15416_v34 = vpop.eup %15415  ;;  %15441 = vrcp.f32 %v12013_v24  ;;  %v11186_v31 = vpop.f32.mrf.mxu0  ;;  %v12002_v17 = vadd.f32 1.0, %v15414_v49  ;;  %v15379_v24 = vld [vmem:[%s17665_s14 + $0x1d28] ss:$16 sps:$4 sm:$0xff]   ;;  %v21991_v49 = vld [vmem:[#allocation155_spill] sm:$0xff] }
 0x5ef   : > { %v15418_v2 = vpop.eup %15417  ;;  %15443 = vrcp.f32 %v12010_v62  ;;  %v20918_v52 = vadd.f32 %v11186_v31, %v20810_v25  ;;  %11797 = vmatpush1.bf16.msra.mxu0 %v15376_v48  ;;  %v12001_v39 = vadd.f32 1.0, %v15416_v34 }
 0x5f0   : > { %v15420_v29 = vpop.eup %15419  ;;  %15445 = vrcp.f32 %v12009_v27  ;;  %v11188_v50 = vpop.f32.mrf.mxu0  ;;  %11810 = vmatprep.subr.bf16.mxu0 %v15384_v59  ;;  %v11998_v35 = vadd.f32 1.0, %v15418_v2  ;;  %v15385_v59 = vld [vmem:[%s17665_s14 + $0x1d08] ss:$16 sps:$4 sm:$0xff]  }
 0x5f1   : > { %21990 = vst [vmem:[#allocation65_spill] sm:$0xff] %v20918_v52  ;;  %11726 = vmatpush2.bf16.msra.mxu1 %v15373_v41  ;;  %v15422_v12 = vpop.eup %15421  ;;  %15447 = vrcp.f32 %v12006_v56  ;;  %v20925_v27 = vadd.f32 %v11188_v50, %v20822_v58  ;;  %v11997_v41 = vadd.f32 1.0, %v15420_v29  ;;  %v15388_v2 = vld [vmem:[%s17665_s14 + $0x1f08] ss:$16 sps:$4 sm:$0xff]  }
 0x5f2   : > { %11727 = vmatprep.subr.bf16.mxu1 %v15381_v3  ;;  %v15424_v62 = vpop.eup %15423  ;;  %15449 = vrcp.f32 %v12005_v14  ;;  %v11192_v48 = vpop.f32.mrf.mxu0  ;;  %11689 = vmatmul.mubr.bf16.gmra.mxu0 %v21991_v49  ;;  %v11994_v31 = vadd.f32 1.0, %v15422_v12  ;;  %v21993_v49 = vld [vmem:[#allocation166_spill] sm:$0xff] }
 0x5f3   : > { %v15426_v25 = vpop.eup %15425  ;;  %15451 = vrcp.f32 %v12002_v17  ;;  %v20929_v3 = vadd.f32 %v11192_v48, %v20833_v42  ;;  %11811 = vmatpush2.bf16.msra.mxu0 %v15382_v13  ;;  %v11993_v52 = vadd.f32 1.0, %v15424_v62  ;;  %v21992_v17 = vld [vmem:[#allocation158_spill] sm:$0xff] }
 0x5f4   : > { %v15428_v34 = vpop.eup %15427  ;;  %15453 = vrcp.f32 %v12001_v39  ;;  %v11194_v58 = vpop.f32.mrf.mxu0  ;;  %11812 = vmatprep.subr.bf16.mxu0 %v15390_v8  ;;  %v11990_v29 = vadd.f32 1.0, %v15426_v25  ;;  %13744 = vmatprep.mubr.msk.bf16.mxu0 %vm9193_vm0, %v21992_v17 }
 0x5f5   : > { %11728 = vmatpush2.bf16.msra.mxu1 %v15379_v24  ;;  %v15430_v56 = vpop.eup %15429  ;;  %15455 = vrcp.f32 %v11998_v35  ;;  %v20934_v50 = vadd.f32 %v11194_v58, %v20848_v60  ;;  %v11989_v24 = vadd.f32 1.0, %v20901_v0  ;;  %v12142_v12 = vmul.f32 %v15428_v34, %v20725_v22  ;;  %v21996_v58 = vld [vmem:[#allocation161_spill] sm:$0xff] }
 0x5f6   : > { %11729 = vmatprep.subr.bf16.mxu1 %v15387_v11  ;;  %v15432_v14 = vpop.eup %15431  ;;  %15457 = vrcp.f32 %v11997_v41  ;;  %v11196_v13 = vpop.f32.mrf.mxu0  ;;  %v11986_v62 = vadd.f32 1.0, %v15430_v56 }
 0x5f7   : > { %v15434_v42 = vpop.eup %15433  ;;  %15459 = vrcp.f32 %v11994_v31  ;;  %v20941_v11 = vadd.f32 %v11196_v13, %v20860_v28  ;;  %11813 = vmatpush2.bf16.msra.mxu0 %v15388_v2  ;;  %v11985_v8 = vadd.f32 1.0, %v15432_v14  ;;  %v21994_v28 = vld [vmem:[#allocation160_spill] sm:$0xff] }
 0x5f8   : > { %v15436_v39 = vpop.eup %15435  ;;  %15461 = vrcp.f32 %v11993_v52  ;;  %v11198_v35 = vpop.f32.mrf.mxu0  ;;  %12162 = vmatprep.subr.mxu0 %v12142_v12  ;;  %v12141_v0 = vmul.f32 %v15434_v42, %v21947_v61  ;;  %v21995_v61 = vld [vmem:[#allocation168_spill] sm:$0xff] }
 0x5f9   : > { %11730 = vmatpush2.bf16.msra.mxu1 %v15385_v59  ;;  %v15438_v60 = vpop.eup %15437  ;;  %15463 = vrcp.f32 %v11990_v29  ;;  %v20945_v41 = vadd.f32 %v11198_v35, %v20872_v23  ;;  %v12138_v34 = vmul.f32 %v15436_v39, %v21950_v43 }
 0x5fa   : > { %v15440_v25 = vpop.eup %15439  ;;  %15465 = vrcp.f32 %v11989_v24  ;;  %11815 = vmatmul.mubr.bf16.vlgmr.msra.gmra.mxu0 %v21994_v28  ;;  %v12137_v52 = vmul.f32 %v15438_v60, %v21953_v36  ;;  %v21997_v60 = vld [vmem:[#allocation170_spill] sm:$0xff] }
 0x5fb   : > { %v15442_v22 = vpop.eup %15441  ;;  %v11235_v48 = vpop.f32.mrf.mxu1  ;;  %15467 = vrcp.f32 %v11986_v62  ;;  %12163 = vmatpush1.msra.mxu0 %v12141_v0  ;;  %v12134_v56 = vmul.f32 %v15440_v25, %v20757_v10  ;;  %13745 = vmatprep.mubr.msk.bf16.mxu0 %vm9193_vm0, %v21996_v58 }
 0x5fc   : > { %11732 = vmatmul.mubr.bf16.vlgmr.msra.gmra.mxu1 %v21993_v49  ;;  %v15444_v31 = vpop.eup %15443  ;;  %v20952_v59 = vadd.f32 %v11235_v48, %v20781_v40  ;;  %15469 = vrcp.f32 %v11985_v8  ;;  %12164 = vmatprep.subr.mxu0 %v12138_v34  ;;  %v12133_v43 = vmul.f32 %v15442_v22, %v21949_v33 }
 0x5fd   : > { %11741 = vmatprep.mubr.bf16.mxu1 %v21995_v61  ;;  %v15446_v23 = vpop.eup %15445  ;;  %v11237_v2 = vpop.f32.mrf.mxu1  ;;  %12165 = vmatpush1.msra.mxu0 %v12137_v52  ;;  %v12130_v29 = vmul.f32 %v15444_v31, %v21963_v38 }
 0x5fe   : > { %v20960_v14 = vadd.f32 %v11237_v2, %v20801_v51  ;;  %v15448_v36 = vpop.eup %15447  ;;  %12166 = vmatprep.subr.mxu0 %v12134_v56  ;;  %v12129_v42 = vmul.f32 %v15446_v23, %v21962_v21  ;;  %v21998_v21 = vld [vmem:[#allocation162_spill] sm:$0xff] }
 0x5ff   : > { %v11239_v40 = vpop.f32.mrf.mxu1  ;;  %v15450_v17 = vpop.eup %15449  ;;  %12167 = vmatpush1.msra.mxu0 %v12133_v43  ;;  %v12126_v12 = vmul.f32 %v15448_v36, %v20789_v7  ;;  %v22003_v36 = vld [vmem:[#allocation175_spill] sm:$0xff] }
 0x600   : > { %v20965_v24 = vadd.f32 %v11239_v40, %v20813_v45  ;;  %v15452_v10 = vpop.eup %15451  ;;  %12168 = vmatprep.subr.mxu0 %v12130_v29  ;;  %v12125_v38 = vmul.f32 %v15450_v17, %v21967_v44  ;;  %v22000_v44 = vld [vmem:[#allocation163_spill] sm:$0xff] }
 0x601   : > { %v11241_v13 = vpop.f32.mrf.mxu1  ;;  %v15454_v33 = vpop.eup %15453  ;;  %12169 = vmatpush1.msra.mxu0 %v12129_v42  ;;  %v12122_v35 = vmul.f32 %v15452_v10, %v21966_v37 }
 0x602   : > { %v20968_v51 = vadd.f32 %v11241_v13, %v20824_v20  ;;  %v15456_v39 = vpop.eup %15455  ;;  %11825 = vmatmul.mubr.bf16.gmra.mxu0 %v21998_v21  ;;  %12170 = vmatprep.subr.mxu0 %v12126_v12  ;;  %v21999_v20 = vld [vmem:[#allocation172_spill] sm:$0xff]  ;;  %v12121_v7 = vmul.f32 %v15454_v33, %v21971_v4  ;;  %v22007_v33 = vld [vmem:[#allocation177_spill] sm:$0xff] }
 0x603   : > { %v11245_v62 = vpop.f32.mrf.mxu1  ;;  %v15458_v45 = vpop.eup %15457  ;;  %12171 = vmatpush1.msra.mxu0 %v12125_v38  ;;  %13746 = vmatprep.mubr.msk.bf16.mxu0 %vm9193_vm0, %v22000_v44  ;;  %v22008_v38 = vld [vmem:[#allocation169_spill] sm:$0xff]  ;;  %v22010_v44 = vld [vmem:[#allocation178_spill] sm:$0xff] }
 0x604   : > { %11742 = vmatmul.mubr.bf16.gmra.mxu1 %v21997_v60  ;;  %v20975_v8 = vadd.f32 %v11245_v62, %v20836_v32  ;;  %v15460_v25 = vpop.eup %15459  ;;  %12172 = vmatprep.subr.mxu0 %v12122_v35  ;;  %v12118_v32 = vmul.f32 %v15456_v39, %v20786_v18  ;;  %v12117_v37 = vmul.f32 %v15458_v45, %v21978_v15  ;;  %v22009_v21 = vld [vmem:[#allocation65_spill] sm:$0xff] }
 0x605   : > { %11751 = vmatprep.mubr.bf16.mxu1 %v21999_v20  ;;  %v11247_v0 = vpop.f32.mrf.mxu1  ;;  %v15462_v22 = vpop.eup %15461  ;;  %12173 = vmatpush1.msra.mxu0 %v12121_v7  ;;  %v12114_v31 = vmul.f32 %v15460_v25, %v21977_v1  ;;  %v22002_v1 = vld [vmem:[#allocation164_spill] sm:$0xff] }
 0x606   : > { %v20983_v48 = vadd.f32 %v11247_v0, %v20851_v55  ;;  %v15464_v49 = vpop.eup %15463  ;;  %12174 = vmatprep.subr.mxu0 %v12118_v32  ;;  %v12113_v61 = vmul.f32 %v15462_v22, %v21980_v46  ;;  %v22011_v22 = vld [vmem:[#allocation171_spill] sm:$0xff] }
 0x607   : > { %v11249_v28 = vpop.f32.mrf.mxu1  ;;  %v15466_v34 = vpop.eup %15465  ;;  %12175 = vmatpush1.msra.mxu0 %v12117_v37  ;;  %v12110_v15 = vmul.f32 %v15464_v49, %v20745_v19 }
 0x608   : > { %v20988_v4 = vadd.f32 %v11249_v28, %v20863_v57  ;;  %v15468_v52 = vpop.eup %15467  ;;  %12176 = vmatprep.subr.mxu0 %v12114_v31  ;;  %v12109_v2 = vmul.f32 %v15466_v34, %v21946_v16  ;;  %v22001_v57 = vld [vmem:[#allocation173_spill] sm:$0xff] }
 0x609   : > { %v11251_v55 = vpop.f32.mrf.mxu1  ;;  %v15470_v23 = vpop.eup %15469  ;;  %12177 = vmatpush1.msra.mxu0 %v12113_v61  ;;  %v12106_v46 = vmul.f32 %v15468_v52, %v21983_v53  ;;  %v22004_v16 = vld [vmem:[#allocation165_spill] sm:$0xff] }
 0x60a   : > { %v11252_v18 = vadd.f32 %v11251_v55, %v20874_v5  ;;  %11835 = vmatmul.mubr.bf16.gmra.mxu0 %v22002_v1  ;;  %12178 = vmatprep.subr.mxu0 %v12110_v15  ;;  %v12105_v43 = vmul.f32 %v15470_v23, %v21985_v30  ;;  %v22005_v30 = vld [vmem:[#allocation176_spill] sm:$0xff] }
 0x60b   : > { %v11255_v56 = vpop.f32.mrf.mxu1  ;;  %12179 = vmatpush1.msra.mxu0 %v12109_v2  ;;  %13747 = vmatprep.mubr.msk.bf16.mxu0 %vm9193_vm0, %v22004_v16 }
 0x60c   : > { %11752 = vmatmul.mubr.bf16.gmra.mxu1 %v22001_v57  ;;  %v11256_v58 = vadd.f32 %v11255_v56, %v20880_v63  ;;  %12180 = vmatprep.subr.mxu0 %v12106_v46 }
 0x60d   : > { %v11257_v5 = vpop.f32.mrf.mxu1  ;;  %11761 = vmatprep.mubr.bf16.mxu1 %v22003_v36  ;;  %12181 = vmatpush1.msra.mxu0 %v12105_v43 }
 0x60e   : > { %v11258_v19 = vadd.f32 %v11257_v5, %v20890_v6  ;;  %v22006_v6 = vld [vmem:[#allocation167_spill] sm:$0xff] }
 0x60f   : > { %v11259_v40 = vpop.f32.mrf.mxu1 }
 0x610   : > { %v11260_v63 = vadd.f32 %v11259_v40, %v20895_v9 }
 0x611   : > { %v11261_v29 = vpop.f32.mrf.mxu1 }
 0x612   : > { %v11262_v17 = vadd.f32 %v11261_v29, %v20903_v26  ;;  %v11318_v42 = vpop.f32.mrf.mxu0  ;;  %11845 = vmatmul.mubr.bf16.gmra.mxu0 %v22006_v6 }
 0x613   : > { %v11265_v53 = vpop.f32.mrf.mxu1  ;;  %v11319_v13 = vadd.f32 %v11318_v42, %v20952_v59  ;;  %13748 = vmatprep.mubr.msk.bf16.mxu0 %vm9193_vm0, %v22008_v38 }
 0x614   : > { %11762 = vmatmul.mubr.bf16.gmra.mxu1 %v22005_v30  ;;  %v11266_v10 = vadd.f32 %v11265_v53, %v20907_v47  ;;  %v11320_v39 = vpop.f32.mrf.mxu0 }
 0x615   : > { %11771 = vmatprep.mubr.bf16.mxu1 %v22007_v33  ;;  %v11267_v12 = vpop.f32.mrf.mxu1  ;;  %v11321_v26 = vadd.f32 %v11320_v39, %v20960_v14 }
 0x616   : > { %v11268_v9 = vadd.f32 %v11267_v12, %v20914_v54  ;;  %v11322_v60 = vpop.f32.mrf.mxu0 }
 0x617   : > { %v11269_v62 = vpop.f32.mrf.mxu1  ;;  %v11323_v47 = vadd.f32 %v11322_v60, %v20965_v24 }
 0x618   : > { %v11270_v45 = vadd.f32 %v11269_v62, %v22009_v21  ;;  %v11324_v35 = vpop.f32.mrf.mxu0 }
 0x619   : > { %v11271_v59 = vpop.f32.mrf.mxu1  ;;  %v11325_v25 = vadd.f32 %v11324_v35, %v20968_v51 }
 0x61a   : > { %v11272_v20 = vadd.f32 %v11271_v59, %v20925_v27  ;;  %v11328_v0 = vpop.f32.mrf.mxu0  ;;  %11855 = vmatmul.mubr.bf16.gmra.mxu0 %v22011_v22 }
 0x61b   : > { %v11275_v7 = vpop.f32.mrf.mxu1  ;;  %v11329_v14 = vadd.f32 %v11328_v0, %v20975_v8 }
 0x61c   : > { %11772 = vmatmul.mubr.bf16.gmra.mxu1 %v22010_v44  ;;  %v11276_v54 = vadd.f32 %v11275_v7, %v20929_v3  ;;  %v11330_v49 = vpop.f32.mrf.mxu0 }
 0x61d   : > { %v11277_v32 = vpop.f32.mrf.mxu1  ;;  %v11331_v37 = vadd.f32 %v11330_v49, %v20983_v48 }
 0x61e   : > { %v11278_v24 = vadd.f32 %v11277_v32, %v20934_v50  ;;  %v11332_v27 = vpop.f32.mrf.mxu0 }
 0x61f   : > { %v11279_v28 = vpop.f32.mrf.mxu1  ;;  %v11333_v34 = vadd.f32 %v11332_v27, %v20988_v4 }
 0x620   : > { %v11280_v51 = vadd.f32 %v11279_v28, %v20941_v11  ;;  %v11334_v52 = vpop.f32.mrf.mxu0 }
 0x621   : > { %v11281_v31 = vpop.f32.mrf.mxu1  ;;  %v11335_v61 = vadd.f32 %v11334_v52, %v11252_v18 }
 0x622   : > { %v11282_v3 = vadd.f32 %v11281_v31, %v20945_v41  ;;  %v11338_v8 = vpop.f32.mrf.mxu0 }
 0x623   : > { %v11339_v55 = vadd.f32 %v11338_v8, %v11256_v58 }
 0x624   : > { %v11340_v23 = vpop.f32.mrf.mxu0 }
 0x625   : > { %v11341_v15 = vadd.f32 %v11340_v23, %v11258_v19 }
 0x626   : > { %v11342_v2 = vpop.f32.mrf.mxu0 }
 0x627   : > { %v11343_v56 = vadd.f32 %v11342_v2, %v11260_v63 }
 0x628   : > { %v11344_v50 = vpop.f32.mrf.mxu0 }
 0x629   : > { %v11345_v57 = vadd.f32 %v11344_v50, %v11262_v17 }
 0x62a   : > { %v11348_v48 = vpop.f32.mrf.mxu0 }
 0x62b   : > { %v11349_v1 = vadd.f32 %v11348_v48, %v11266_v10 }
 0x62c   : > { %v11350_v46 = vpop.f32.mrf.mxu0 }
 0x62d   : > { %v11351_v43 = vadd.f32 %v11350_v46, %v11268_v9 }
 0x62e   : > { %v11352_v11 = vpop.f32.mrf.mxu0 }
 0x62f   : > { %v11353_v5 = vadd.f32 %v11352_v11, %v11270_v45 }
 0x630   : > { %v11354_v4 = vpop.f32.mrf.mxu0 }
 0x631   : > { %v11355_v36 = vadd.f32 %v11354_v4, %v11272_v20 }
 0x632   : > { %v11358_v16 = vpop.f32.mrf.mxu0 }
 0x633   : > { %v11359_v40 = vadd.f32 %v11358_v16, %v11276_v54 }
 0x634   : > { %v11360_v41 = vpop.f32.mrf.mxu0 }
 0x635   : > { %v11361_v18 = vadd.f32 %v11360_v41, %v11278_v24 }
 0x636   : > { %v11362_v29 = vpop.f32.mrf.mxu0 }
 0x637   : > { %v11363_v58 = vadd.f32 %v11362_v29, %v11280_v51 }
 0x638   : > { %v11364_v53 = vpop.f32.mrf.mxu0 }
 0x639   : > { %v11365_v19 = vadd.f32 %v11364_v53, %v11282_v3 }
 0x63b   : > { %v11401_v42 = vpop.f32.mrf.mxu1 }
 0x63c   : > { %v11402_v63 = vadd.f32 %v11401_v42, %v11319_v13 }
 0x63d   : > { %v11403_v30 = vpop.f32.mrf.mxu1 }
 0x63e   : > { %v11404_v17 = vadd.f32 %v11403_v30, %v11321_v26 }
 0x63f   : > { %v11405_v6 = vpop.f32.mrf.mxu1 }
 0x640   : > { %v11406_v10 = vadd.f32 %v11405_v6, %v11323_v47 }
 0x641   : > { %v11407_v33 = vpop.f32.mrf.mxu1 }
 0x642   : > { %v11408_v12 = vadd.f32 %v11407_v33, %v11325_v25 }
 0x643   : > { %v11411_v39 = vpop.f32.mrf.mxu1 }
 0x644   : > { %v11412_v38 = vadd.f32 %v11411_v39, %v11329_v14 }
 0x645   : > { %v11413_v9 = vpop.f32.mrf.mxu1 }
 0x646   : > { %v11414_v62 = vadd.f32 %v11413_v9, %v11331_v37 }
 0x647   : > { %v11415_v60 = vpop.f32.mrf.mxu1 }
 0x648   : > { %v11416_v21 = vadd.f32 %v11415_v60, %v11333_v34 }
 0x649   : > { %v11417_v45 = vpop.f32.mrf.mxu1 }
 0x64a   : > { %v11418_v59 = vadd.f32 %v11417_v45, %v11335_v61 }
 0x64b   : > { %v11421_v35 = vpop.f32.mrf.mxu1 }
 0x64c   : > { %v11422_v20 = vadd.f32 %v11421_v35, %v11339_v55 }
 0x64d   : > { %v11423_v7 = vpop.f32.mrf.mxu1 }
 0x64e   : > { %v11424_v0 = vadd.f32 %v11423_v7, %v11341_v15 }
 0x64f   : > { %v11425_v44 = vpop.f32.mrf.mxu1 }
 0x650   : > { %v11426_v13 = vadd.f32 %v11425_v44, %v11343_v56 }
 0x651   : > { %v11427_v54 = vpop.f32.mrf.mxu1 }
 0x652   : > { %v11428_v26 = vadd.f32 %v11427_v54, %v11345_v57  ;;  %v11484_v47 = vpop.f32.mrf.mxu0 }
 0x653   : > { %v11431_v22 = vpop.f32.mrf.mxu1  ;;  %v11485_v25 = vadd.f32 %v11484_v47, %v11402_v63 }
 0x654   : > { %v11432_v32 = vadd.f32 %v11431_v22, %v11349_v1  ;;  %v11486_v14 = vpop.f32.mrf.mxu0 }
 0x655   : > { %v11433_v49 = vpop.f32.mrf.mxu1  ;;  %v11487_v37 = vadd.f32 %v11486_v14, %v11404_v17 }
 0x656   : > { %v11434_v24 = vadd.f32 %v11433_v49, %v11351_v43  ;;  %v11488_v27 = vpop.f32.mrf.mxu0 }
 0x657   : > { %v11435_v28 = vpop.f32.mrf.mxu1  ;;  %v11489_v34 = vadd.f32 %v11488_v27, %v11406_v10 }
 0x658   : > { %v11436_v51 = vadd.f32 %v11435_v28, %v11353_v5  ;;  %v11490_v52 = vpop.f32.mrf.mxu0 }
 0x659   : > { %v11437_v31 = vpop.f32.mrf.mxu1  ;;  %v11491_v61 = vadd.f32 %v11490_v52, %v11408_v12 }
 0x65a   : > { %v11438_v3 = vadd.f32 %v11437_v31, %v11355_v36  ;;  %v11494_v55 = vpop.f32.mrf.mxu0 }
 0x65b   : > { %v11441_v8 = vpop.f32.mrf.mxu1  ;;  %v11495_v15 = vadd.f32 %v11494_v55, %v11412_v38 }
 0x65c   : > { %v11442_v23 = vadd.f32 %v11441_v8, %v11359_v40  ;;  %v11496_v56 = vpop.f32.mrf.mxu0 }
 0x65d   : > { %v11443_v2 = vpop.f32.mrf.mxu1  ;;  %v11497_v57 = vadd.f32 %v11496_v56, %v11414_v62 }
 0x65e   : > { %v11444_v50 = vadd.f32 %v11443_v2, %v11361_v18  ;;  %v11498_v1 = vpop.f32.mrf.mxu0  ;;  %v21059_v2 = vld [vmem:[%s21384_s2] sm:$0x3] }
 0x65f   : > { %v11445_v48 = vpop.f32.mrf.mxu1  ;;  %v11499_v43 = vadd.f32 %v11498_v1, %v11416_v21  ;;  %22015 = vst [vmem:[#allocation76_spill] sm:$0xff] %v21059_v2 }
 0x660   : > { %v11446_v46 = vadd.f32 %v11445_v48, %v11363_v58  ;;  %v11500_v4 = vpop.f32.mrf.mxu0 }
 0x661   : > { %v11447_v11 = vpop.f32.mrf.mxu1  ;;  %v11501_v16 = vadd.f32 %v11500_v4, %v11418_v59 }
 0x662   : > { %v11448_v5 = vadd.f32 %v11447_v11, %v11365_v19  ;;  %v11504_v41 = vpop.f32.mrf.mxu0 }
 0x663   : > { %v11505_v29 = vadd.f32 %v11504_v41, %v11422_v20 }
 0x664   : > { %v11506_v36 = vpop.f32.mrf.mxu0 }
 0x665   : > { %v11507_v53 = vadd.f32 %v11506_v36, %v11424_v0 }
 0x666   : > { %v11508_v42 = vpop.f32.mrf.mxu0 }
 0x667   : > { %v21028_v63 = vadd.f32 %v11508_v42, %v11426_v13 }
 0x668   : > { %v11510_v40 = vpop.f32.mrf.mxu0 }
 0x669   : > { %v21030_v30 = vadd.f32 %v11510_v40, %v11428_v26 }
 0x66a   : > { %v11514_v18 = vpop.f32.mrf.mxu0 }
 0x66b   : > { %v21032_v17 = vadd.f32 %v11514_v18, %v11432_v32  ;;  %v12323_v18 = vld [vmem:[%s21085_s20 + $0xf8] sm:$0xff] }
 0x66c   : > { %v11516_v6 = vpop.f32.mrf.mxu0  ;;  %13794 = vmatprep.subr.mxu0 %v12323_v18  ;;  %v12296_v18 = vld [vmem:[%s21085_s20 + $0x20] sm:$0xff] }
 0x66d   : > { %v21034_v58 = vadd.f32 %v11516_v6, %v11434_v24  ;;  %v12307_v6 = vld [vmem:[%s21085_s20 + $0x78] sm:$0xff] }
 0x66e   : > { %v11518_v10 = vpop.f32.mrf.mxu0 }
 0x66f   : > { %v21036_v33 = vadd.f32 %v11518_v10, %v11436_v51 }
 0x670   : > { %v11520_v19 = vpop.f32.mrf.mxu0 }
 0x671   : > { %v21038_v12 = vadd.f32 %v11520_v19, %v11438_v3  ;;  %v12322_v19 = vld [vmem:[%s21085_s20 + $0xf0] sm:$0xff] }
 0x672   : > { %v11524_v39 = vpop.f32.mrf.mxu0 }
 0x673   : > { %v21040_v38 = vadd.f32 %v11524_v39, %v11442_v23 }
 0x674   : > { %v11526_v9 = vpop.f32.mrf.mxu0 }
 0x675   : > { %v21042_v62 = vadd.f32 %v11526_v9, %v11444_v50  ;;  %v12306_v9 = vld [vmem:[%s21085_s20 + $0x70] sm:$0xff] }
 0x676   : > { %v11528_v60 = vpop.f32.mrf.mxu0 }
 0x677   : > { %v21044_v21 = vadd.f32 %v11528_v60, %v11446_v46  ;;  %v12321_v60 = vld [vmem:[%s21085_s20 + $0xe8] sm:$0xff] }
 0x678   : > { %v11530_v45 = vpop.f32.mrf.mxu0 }
 0x679   : > { %v21046_v59 = vadd.f32 %v11530_v45, %v11448_v5  ;;  %v12305_v45 = vld [vmem:[%s21085_s20 + $0x68] sm:$0xff] }
 0x67b   : > { %v11567_v35 = vpop.f32.mrf.mxu1 }
 0x67c   : > { %v11568_v20 = vadd.f32 %v11567_v35, %v11485_v25 }
 0x67d   : > { %v11569_v7 = vpop.f32.mrf.mxu1 }
 0x67e   : > { %v11570_v0 = vadd.f32 %v11569_v7, %v11487_v37  ;;  %v12320_v7 = vld [vmem:[%s21085_s20 + $0xe0] sm:$0xff] }
 0x67f   : > { %v11571_v44 = vpop.f32.mrf.mxu1 }
 0x680   : > { %v11572_v13 = vadd.f32 %v11571_v44, %v11489_v34 }
 0x681   : > { %v11573_v54 = vpop.f32.mrf.mxu1 }
 0x682   : > { %v11574_v26 = vadd.f32 %v11573_v54, %v11491_v61  ;;  %v12303_v54 = vld [vmem:[%s21085_s20 + $0x58] sm:$0xff] }
 0x683   : > { %v11577_v22 = vpop.f32.mrf.mxu1 }
 0x684   : > { %v11578_v47 = vadd.f32 %v11577_v22, %v11495_v15  ;;  %v15575_v15 = vmov 0.0  }
 0x685   : > { %v11579_v32 = vpop.f32.mrf.mxu1  ;;  %12214 = vmatprep.mubr.f32.mxu0 %v15575_v15  ;;  %12285 = vmatprep.mubr.f32.mxu1 %v15575_v15  ;;  %v12314_v15 = vld [vmem:[%s21085_s20 + $0xb0] sm:$0xff] }
 0x686   : > { %v11580_v49 = vadd.f32 %v11579_v32, %v11497_v57  ;;  %13789 = vmatmul.mubr.msk.f32.vlgmr.msra.gmra.mxu0 %vm12146_vm1, %v21059_v2  ;;  %v12302_v32 = vld [vmem:[%s21085_s20 + $0x50] sm:$0xff] }
 0x687   : > { %v11581_v14 = vpop.f32.mrf.mxu1  ;;  %13795 = vmatpush3.msra.mxu0 %v12307_v6 }
 0x688   : > { %v11582_v24 = vadd.f32 %v11581_v14, %v11499_v43  ;;  %13796 = vmatprep.subr.mxu0 %v12322_v19  ;;  %v12317_v14 = vld [vmem:[%s21085_s20 + $0xc8] sm:$0xff] }
 0x689   : > { %v11583_v28 = vpop.f32.mrf.mxu1  ;;  %13797 = vmatpush3.msra.mxu0 %v12306_v9  ;;  %v12311_v9 = vld [vmem:[%s21085_s20 + $0x98] sm:$0xff] }
 0x68a   : > { %v11584_v27 = vadd.f32 %v11583_v28, %v11501_v16  ;;  %13798 = vmatprep.subr.mxu0 %v12321_v60  ;;  %v12295_v60 = vld [vmem:[%s21085_s20 + $0x18] sm:$0xff] }
 0x68b   : > { %v11587_v51 = vpop.f32.mrf.mxu1  ;;  %13799 = vmatpush3.msra.mxu0 %v12305_v45 }
 0x68c   : > { %v11588_v31 = vadd.f32 %v11587_v51, %v11505_v29  ;;  %13800 = vmatprep.subr.mxu0 %v12320_v7  ;;  %v12316_v51 = vld [vmem:[%s21085_s20 + $0xc0] sm:$0xff] }
 0x68d   : > { %v11589_v52 = vpop.f32.mrf.mxu1 }
 0x68e   : > { %v11590_v3 = vadd.f32 %v11589_v52, %v11507_v53 }
 0x68f   : > { %v21050_v37 = vpop.f32.mrf.mxu1 }
 0x691   : > { %v21061_v56 = vpop.f32.mrf.mxu1 }
 0x692   : > { %v11650_v8 = vpop.f32.mrf.mxu0 }
 0x693   : > { %v21048_v25 = vadd.f32 %v11650_v8, %v11568_v20  ;;  %v21069_v46 = vpop.f32.mrf.mxu1  ;;  %v12299_v8 = vld [vmem:[%s21085_s20 + $0x38] sm:$0xff] }
 0x694   : > { %v11652_v34 = vpop.f32.mrf.mxu0 }
 0x695   : > { %22012 = vst [vmem:[#allocation69_spill] sm:$0xff] %v21048_v25  ;;  %v21052_v55 = vadd.f32 %v11652_v34, %v11570_v0  ;;  %v21076_v16 = vpop.f32.mrf.mxu1  ;;  %v12304_v0 = vld [vmem:[%s21085_s20 + $0x60] sm:$0xff] }
 0x696   : > { %v11654_v61 = vpop.f32.mrf.mxu0  ;;  %13801 = vmatpush3.msra.mxu0 %v12304_v0  ;;  %v12310_v0 = vld [vmem:[%s21085_s20 + $0x90] sm:$0xff] }
 0x697   : > { %22013 = vst [vmem:[#allocation70_spill] sm:$0xff] %v21052_v55  ;;  %v21054_v23 = vadd.f32 %v11654_v61, %v11572_v13  ;;  %v21087_v42 = vpop.f32.mrf.mxu1  ;;  %v12319_v13 = vld [vmem:[%s21085_s20 + $0xd8] sm:$0xff] }
 0x698   : > { %v11656_v50 = vpop.f32.mrf.mxu0  ;;  %13802 = vmatprep.subr.mxu0 %v12319_v13  ;;  %v12294_v13 = vld [vmem:[%s21085_s20 + $0x10] sm:$0xff] }
 0x699   : > { %22014 = vst [vmem:[#allocation74_spill] sm:$0xff] %v21054_v23  ;;  %v21065_v57 = vadd.f32 %v11656_v50, %v11574_v26  ;;  %v21099_v35 = vpop.f32.mrf.mxu1  ;;  %13803 = vmatpush3.msra.mxu0 %v12303_v54  ;;  %v12298_v50 = vld [vmem:[%s21085_s20 + $0x30] sm:$0xff] }
 0x69a   : > { %v11660_v48 = vpop.f32.mrf.mxu0 }
 0x69b   : > { %v21067_v1 = vadd.f32 %v11660_v48, %v11578_v47  ;;  %v12318_v47 = vld [vmem:[%s21085_s20 + $0xd0] sm:$0xff] }
 0x69c   : > { %v11662_v43 = vpop.f32.mrf.mxu0  ;;  %v21109_v26 = vpop.f32.mrf.mxu1  ;;  %13804 = vmatprep.subr.mxu0 %v12318_v47 }
 0x69d   : > { %v21071_v11 = vadd.f32 %v11662_v43, %v11580_v49  ;;  %13805 = vmatpush3.msra.mxu0 %v12302_v32  ;;  %v12313_v43 = vld [vmem:[%s21085_s20 + $0xa8] sm:$0xff]  ;;  %v11608_v23 = vadd.f32 %v21109_v26, %v21040_v38 }
 0x69e   : > { %v11664_v4 = vpop.f32.mrf.mxu0  ;;  %v21119_v28 = vpop.f32.mrf.mxu1  ;;  %13806 = vmatprep.subr.mxu0 %v12317_v14 }
 0x69f   : > { %v21074_v5 = vadd.f32 %v11664_v4, %v11582_v24  ;;  %v12301_v24 = vld [vmem:[%s21085_s20 + $0x48] sm:$0xff] }
 0x6a0   : > { %v11666_v41 = vpop.f32.mrf.mxu0  ;;  %13807 = vmatpush3.msra.mxu0 %v12301_v24  ;;  %v21129_v34 = vpop.f32.mrf.mxu1  ;;  %v12297_v4 = vld [vmem:[%s21085_s20 + $0x28] sm:$0xff] }
 0x6a1   : > { %v21078_v29 = vadd.f32 %v11666_v41, %v11584_v27  ;;  %13808 = vmatprep.subr.mxu0 %v12316_v51  ;;  %v11612_v26 = vadd.f32 %v21129_v34, %v21044_v21 }
 0x6a2   : > { %v11670_v36 = vpop.f32.mrf.mxu0  ;;  %v21139_v41 = vpop.f32.mrf.mxu1 }
 0x6a3   : > { %v21080_v53 = vadd.f32 %v11670_v36, %v11588_v31  ;;  %v12300_v31 = vld [vmem:[%s21085_s20 + $0x40] sm:$0xff] }
 0x6a4   : > { %v11672_v40 = vpop.f32.mrf.mxu0  ;;  %13809 = vmatpush3.msra.mxu0 %v12300_v31 }
 0x6a5   : > { %v21091_v10 = vadd.f32 %v11672_v40, %v11590_v3  ;;  %v12315_v3 = vld [vmem:[%s21085_s20 + $0xb8] sm:$0xff]  ;;  %v12312_v40 = vld [vmem:[%s21085_s20 + $0xa0] sm:$0xff] }
 0x6a6   : > { %v21094_v39 = vpop.f32.mrf.mxu0  ;;  %13810 = vmatprep.subr.mxu0 %v12315_v3 }
 0x6a7   : > { %13811 = vmatpush3.msra.mxu0 %v12299_v8 }
 0x6a8   : > { %v21101_v20 = vpop.f32.mrf.mxu0  ;;  %13812 = vmatprep.subr.mxu0 %v12314_v15 }
 0x6a9   : > { %13813 = vmatpush3.msra.mxu0 %v12298_v50 }
 0x6aa   : > { %v21105_v44 = vpop.f32.mrf.mxu0  ;;  %13814 = vmatprep.subr.mxu0 %v12313_v43 }
 0x6ab   : > { %13815 = vmatpush3.msra.mxu0 %v12297_v4 }
 0x6ac   : > { %v21111_v22 = vpop.f32.mrf.mxu0  ;;  %13816 = vmatprep.subr.mxu0 %v12312_v40 }
 0x6ad   : > { %13817 = vmatpush3.msra.mxu0 %v12296_v18 }
 0x6ae   : > { %v21115_v49 = vpop.f32.mrf.mxu0  ;;  %13818 = vmatprep.subr.mxu0 %v12311_v9 }
 0x6af   : > { %13819 = vmatpush3.msra.mxu0 %v12295_v60 }
 0x6b0   : > { %v21121_v27 = vpop.f32.mrf.mxu0  ;;  %13820 = vmatprep.subr.mxu0 %v12310_v0 }
 0x6b1   : > { %13821 = vmatpush3.msra.mxu0 %v12294_v13 }
 0x6b2   : > { %v21125_v52 = vpop.f32.mrf.mxu0 }
 0x6b4   : > { %v21131_v61 = vpop.f32.mrf.mxu0 }
 0x6b6   : > { %v21135_v48 = vpop.f32.mrf.mxu0 }
 0x6b8   : > { %v21141_v36 = vpop.f32.mrf.mxu0 }
 0x6ba   : > { %v21147_v19 = vpop.f32.mrf.mxu0 }
 0x6bb   : > { %22017 = vst [vmem:[#allocation82_spill] sm:$0xff] %v21147_v19 }
 0x6bc   : > { %v21145_v6 = vpop.f32.mrf.mxu1  ;;  %v21153_v7 = vpop.f32.mrf.mxu0 }
 0x6bd   : > { %22016 = vst [vmem:[#allocation80_spill] sm:$0xff] %v21145_v6  ;;  %22019 = vst [vmem:[#allocation88_spill] sm:$0xff] %v21153_v7  ;;  %v11600_v7 = vadd.f32 %v21076_v16, %v21034_v58  ;;  %v11592_v16 = vadd.f32 %v21050_v37, %v21028_v63  ;;  %v11614_v63 = vadd.f32 %v21139_v41, %v21046_v59 }
 0x6be   : > { %v21151_v45 = vpop.f32.mrf.mxu1  ;;  %v21159_v47 = vpop.f32.mrf.mxu0 }
 0x6bf   : > { %22018 = vst [vmem:[#allocation86_spill] sm:$0xff] %v21151_v45  ;;  %22021 = vst [vmem:[#allocation92_spill] sm:$0xff] %v21159_v47  ;;  %v11683_v6 = vadd.f32 %v21111_v22, %v11600_v7  ;;  %v11675_v59 = vadd.f32 %v21094_v39, %v11592_v16 }
 0x6c0   : > { %v21157_v54 = vpop.f32.mrf.mxu1  ;;  %v21163_v14 = vpop.f32.mrf.mxu0 }
 0x6c1   : > { %22020 = vst [vmem:[#allocation71_spill] sm:$0xff] %v21157_v54  ;;  %22022 = vst [vmem:[#allocation75_spill] sm:$0xff] %v21163_v14  ;;  %v11602_v54 = vadd.f32 %v21087_v42, %v21036_v33  ;;  %v11691_v42 = vadd.f32 %v21125_v52, %v11608_v23  ;;  %v11695_v52 = vadd.f32 %v21135_v48, %v11612_v26 }
 0x6c2   : > { %v21161_v32 = vpop.f32.mrf.mxu1  ;;  %v21167_v51 = vpop.f32.mrf.mxu0 }
 0x6c3   : > { %22023 = vst [vmem:[#allocation94_spill] sm:$0xff] %v21167_v51  ;;  %v11604_v51 = vadd.f32 %v21099_v35, %v21038_v12  ;;  %v11610_v12 = vadd.f32 %v21119_v28, %v21042_v62  ;;  %v11685_v33 = vadd.f32 %v21115_v49, %v11602_v54 }
 0x6c4   : > { %v21165_v24 = vpop.f32.mrf.mxu1  ;;  %v21171_v3 = vpop.f32.mrf.mxu0 }
 0x6c5   : > { %22024 = vst [vmem:[#allocation77_spill] sm:$0xff] %v21171_v3  ;;  %v11687_v45 = vadd.f32 %v21121_v27, %v11604_v51  ;;  %v11594_v27 = vadd.f32 %v21061_v56, %v21030_v30  ;;  %v11693_v62 = vadd.f32 %v21131_v61, %v11610_v12  ;;  %v11697_v61 = vadd.f32 %v21141_v36, %v11614_v63  ;;  %v22033_v63 = vld [vmem:[#allocation80_spill] sm:$0xff] }
 0x6c6   : > { %v21169_v31 = vpop.f32.mrf.mxu1  ;;  %v21175_v15 = vpop.f32.mrf.mxu0 }
 0x6c7   : > { %22025 = vst [vmem:[#allocation81_spill] sm:$0xff] %v21175_v15  ;;  %v11677_v23 = vadd.f32 %v21101_v20, %v11594_v27 }
 0x6c8   : > { %v21173_v8 = vpop.f32.mrf.mxu1  ;;  %v21179_v43 = vpop.f32.mrf.mxu0  ;;  %v22027_v27 = vld [vmem:[#allocation71_spill] sm:$0xff] }
 0x6ca   : > { %v21177_v50 = vpop.f32.mrf.mxu1  ;;  %v21183_v40 = vpop.f32.mrf.mxu0 }
 0x6cc   : > { %v21181_v4 = vpop.f32.mrf.mxu1  ;;  %v21185_v9 = vpop.f32.mrf.mxu0  ;;  %v22031_v26 = vld [vmem:[#allocation77_spill] sm:$0xff] }
 0x6cd   : > { %v11754_v16 = vadd.f32 %v21181_v4, %v21080_v53  ;;  %v11744_v4 = vadd.f32 %v21165_v24, %v21067_v1 }
 0x6ce   : > { %v11755_v18 = vpop.f32.mrf.mxu1  ;;  %v21187_v0 = vpop.f32.mrf.mxu0 }
 0x6cf   : > { %v11756_v39 = vadd.f32 %v11755_v18, %v21091_v10 }
 0x6d0   : > { %v11757_v60 = vpop.f32.mrf.mxu1  ;;  %v11842_v2 = vpop.f32.mrf.mxu0 }
 0x6d1   : > { %v11758_v20 = vadd.f32 %v11757_v60, %v11675_v59  ;;  %v22037_v59 = vld [vmem:[#allocation88_spill] sm:$0xff] }
 0x6d2   : > { %v11759_v13 = vpop.f32.mrf.mxu1  ;;  %v11846_v47 = vpop.f32.mrf.mxu0 }
 0x6d4   : > { %v11763_v19 = vpop.f32.mrf.mxu1  ;;  %v11848_v25 = vpop.f32.mrf.mxu0 }
 0x6d6   : > { %v11765_v14 = vpop.f32.mrf.mxu1  ;;  %v11850_v15 = vpop.f32.mrf.mxu0 }
 0x6d7   : > { %v11766_v55 = vadd.f32 %v11765_v14, %v11683_v6  ;;  %v11598_v6 = vadd.f32 %v21069_v46, %v21032_v17 }
 0x6d8   : > { %v11767_v3 = vpop.f32.mrf.mxu1  ;;  %v11852_v22 = vpop.f32.mrf.mxu0 }
 0x6d9   : > { %v21214_v37 = vadd.f32 %v11848_v25, %v11766_v55  ;;  %v11681_v30 = vadd.f32 %v21105_v44, %v11598_v6  ;;  %v11768_v56 = vadd.f32 %v11767_v3, %v11685_v33  ;;  %v11760_v44 = vadd.f32 %v11759_v13, %v11677_v23  ;;  %v22028_v33 = vld [vmem:[#allocation81_spill] sm:$0xff] }
 0x6da   : > { %v11769_v58 = vpop.f32.mrf.mxu1  ;;  %v11856_v28 = vpop.f32.mrf.mxu0  ;;  %v11750_v13 = vadd.f32 %v21177_v50, %v21078_v29  ;;  %v21250_v29 = vadd.f32 %v21187_v0, %v11758_v20  ;;  %v11740_v0 = vadd.f32 %v21161_v32, %v21065_v57 }
 0x6db   : > { %v11770_v35 = vadd.f32 %v11769_v58, %v11687_v45  ;;  %v11764_v25 = vadd.f32 %v11763_v19, %v11681_v30  ;;  %v13776_v45 = vmul.f32 -1.442695, %v21214_v37  ;;  %v21228_v51 = vadd.f32 %v11850_v15, %v11768_v56 }
 0x6dc   : > { %v11773_v38 = vpop.f32.mrf.mxu1  ;;  %v11858_v34 = vpop.f32.mrf.mxu0  ;;  %v13771_v24 = vmul.f32 -1.442695, %v21250_v29 }
 0x6dd   : > { %v21217_v17 = vadd.f32 %v11852_v22, %v11770_v35  ;;  %v11774_v46 = vadd.f32 %v11773_v38, %v11691_v42  ;;  %v21239_v12 = vadd.f32 %v11846_v47, %v11764_v25  ;;  %v21242_v35 = vadd.f32 %v11842_v2, %v11760_v44  ;;  %v22030_v42 = vld [vmem:[#allocation86_spill] sm:$0xff] }
 0x6de   : > { %v11775_v49 = vpop.f32.mrf.mxu1  ;;  %v11860_v14 = vpop.f32.mrf.mxu0  ;;  %15471 = vpow2.f32 %v13776_v45  ;;  %v11748_v22 = vadd.f32 %v21173_v8, %v21074_v5  ;;  %v13779_v53 = vmul.f32 -1.442695, %v21228_v51  ;;  %v11746_v47 = vadd.f32 %v21169_v31, %v21071_v11 }
 0x6df   : > { %v11776_v21 = vadd.f32 %v11775_v49, %v11693_v62  ;;  %v21223_v55 = vadd.f32 %v11856_v28, %v11774_v46  ;;  %v13780_v48 = vmul.f32 -1.442695, %v21217_v17  ;;  %v21256_v2 = vadd.f32 %v21185_v9, %v11756_v39  ;;  %v22026_v9 = vld [vmem:[#allocation74_spill] sm:$0xff]  ;;  %v22035_v46 = vld [vmem:[#allocation75_spill] sm:$0xff] }
 0x6e0   : > { %v11777_v41 = vpop.f32.mrf.mxu1  ;;  %v11862_v60 = vpop.f32.mrf.mxu0  ;;  %v21262_v5 = vadd.f32 %v21183_v40, %v11754_v16  ;;  %v13775_v8 = vmul.f32 -1.442695, %v21239_v12  ;;  %v21268_v11 = vadd.f32 %v21179_v43, %v11750_v13  ;;  %v13772_v31 = vmul.f32 -1.442695, %v21242_v35  ;;  %v22029_v40 = vld [vmem:[#allocation70_spill] sm:$0xff]  ;;  %v22032_v43 = vld [vmem:[#allocation69_spill] sm:$0xff] }
 0x6e1   : > { %v21226_v7 = vadd.f32 %v11858_v34, %v11776_v21  ;;  %v11778_v54 = vadd.f32 %v11777_v41, %v11695_v52  ;;  %v13783_v15 = vmul.f32 -1.442695, %v21223_v55  ;;  %15473 = vpow2.f32 %v13780_v48  ;;  %v22034_v28 = vld [vmem:[#allocation94_spill] sm:$0xff]  ;;  %v22036_v52 = vld [vmem:[#allocation92_spill] sm:$0xff] }
 0x6e2   : > { %v11779_v3 = vpop.f32.mrf.mxu1  ;;  %v11738_v6 = vadd.f32 %v22027_v27, %v22026_v9  ;;  %v21274_v1 = vadd.f32 %v22028_v33, %v11748_v22  ;;  %v11736_v38 = vadd.f32 %v22030_v42, %v22029_v40  ;;  %v21280_v57 = vadd.f32 %v22031_v26, %v11746_v47  ;;  %v22038_v41 = vld [vmem:[#allocation82_spill] sm:$0xff] }
 0x6e3   : > { %v13784_v36 = vmul.f32 -1.442695, %v21226_v7  ;;  %v21233_v19 = vadd.f32 %v11860_v14, %v11778_v54  ;;  %v11780_v58 = vadd.f32 %v11779_v3, %v11697_v61  ;;  %v13768_v32 = vmul.f32 -1.442695, %v21256_v2 }
 0x6e4   : > { %v11734_v62 = vadd.f32 %v22033_v63, %v22032_v43  ;;  %v21286_v30 = vadd.f32 %v22034_v28, %v11744_v4  ;;  %v13767_v56 = vmul.f32 -1.442695, %v21262_v5  ;;  %v21290_v49 = vadd.f32 %v22035_v46, %v11740_v0 }
 0x6e5   : > { %v13787_v10 = vmul.f32 -1.442695, %v21233_v19  ;;  %v21245_v18 = vadd.f32 %v11862_v60, %v11780_v58  ;;  %15475 = vpow2.f32 %v13784_v36  ;;  %v13764_v23 = vmul.f32 -1.442695, %v21268_v11 }
 0x6e6   : > { %15477 = vpow2.f32 %v13783_v15  ;;  %v21294_v21 = vadd.f32 %v22036_v52, %v11738_v6  ;;  %v13763_v34 = vmul.f32 -1.442695, %v21274_v1  ;;  %v21298_v61 = vadd.f32 %v22037_v59, %v11736_v38 }
 0x6e7   : > { %v13788_v50 = vmul.f32 -1.442695, %v21245_v18  ;;  %15479 = vpow2.f32 %v13787_v10  ;;  %v13760_v25 = vmul.f32 -1.442695, %v21280_v57  ;;  %v21302_v44 = vadd.f32 %v22038_v41, %v11734_v62 }
 0x6e8   : > { %15481 = vpow2.f32 %v13779_v53  ;;  %v13759_v45 = vmul.f32 -1.442695, %v21286_v30  ;;  %v13756_v54 = vmul.f32 -1.442695, %v21290_v49  ;;  %v13755_v20 = vmul.f32 -1.442695, %v21294_v21 }
 0x6e9   : > { %15483 = vpow2.f32 %v13788_v50  ;;  %v13752_v3 = vmul.f32 -1.442695, %v21298_v61  ;;  %v13751_v36 = vmul.f32 -1.442695, %v21302_v44 }
 0x6ea   : > { %15485 = vpow2.f32 %v13775_v8 }
 0x6eb   : > { %15487 = vpow2.f32 %v13772_v31  ;;  %v15472_v14 = vpop.eup %15471 }
 0x6ec   : > { %15489 = vpow2.f32 %v13771_v24  ;;  %v12012_v31 = vadd.f32 1.0, %v15472_v14 }
 0x6ed   : > { %15491 = vpow2.f32 %v13768_v32 }
 0x6ee   : > { %15493 = vpow2.f32 %v13767_v56  ;;  %v15474_v48 = vpop.eup %15473 }
 0x6ef   : > { %15495 = vpow2.f32 %v13764_v23  ;;  %v12016_v47 = vadd.f32 1.0, %v15474_v48 }
 0x6f0   : > { %15497 = vpow2.f32 %v13763_v34 }
 0x6f1   : > { %15499 = vpow2.f32 %v13760_v25 }
 0x6f2   : > { %v15476_v39 = vpop.eup %15475  ;;  %15501 = vpow2.f32 %v13759_v45 }
 0x6f3   : > { %v15478_v58 = vpop.eup %15477  ;;  %15503 = vpow2.f32 %v13756_v54  ;;  %v12020_v13 = vadd.f32 1.0, %v15476_v39 }
 0x6f4   : > { %v15480_v16 = vpop.eup %15479  ;;  %15505 = vpow2.f32 %v13755_v20  ;;  %v12019_v22 = vadd.f32 1.0, %v15478_v58 }
 0x6f5   : > { %v15482_v15 = vpop.eup %15481  ;;  %15507 = vpow2.f32 %v13752_v3  ;;  %v12023_v60 = vadd.f32 1.0, %v15480_v16 }
 0x6f6   : > { %v15484_v10 = vpop.eup %15483  ;;  %15509 = vpow2.f32 %v13751_v36  ;;  %v12015_v8 = vadd.f32 1.0, %v15482_v15 }
 0x6f7   : > { %v15486_v53 = vpop.eup %15485  ;;  %15511 = vrcp.f32 %v12020_v13  ;;  %v12024_v50 = vadd.f32 1.0, %v15484_v10 }
 0x6f8   : > { %v15488_v4 = vpop.eup %15487  ;;  %15513 = vrcp.f32 %v12023_v60  ;;  %v12011_v27 = vadd.f32 1.0, %v15486_v53 }
 0x6f9   : > { %v15490_v0 = vpop.eup %15489  ;;  %15515 = vrcp.f32 %v12024_v50  ;;  %v12008_v33 = vadd.f32 1.0, %v15488_v4 }
 0x6fa   : > { %v15492_v9 = vpop.eup %15491  ;;  %15517 = vrcp.f32 %v12019_v22  ;;  %v12007_v40 = vadd.f32 1.0, %v15490_v0 }
 0x6fb   : > { %v15494_v6 = vpop.eup %15493  ;;  %15519 = vrcp.f32 %v12016_v47  ;;  %v12004_v38 = vadd.f32 1.0, %v15492_v9 }
 0x6fc   : > { %v15496_v24 = vpop.eup %15495  ;;  %15521 = vrcp.f32 %v12015_v8  ;;  %v12003_v32 = vadd.f32 1.0, %v15494_v6 }
 0x6fd   : > { %v15498_v42 = vpop.eup %15497  ;;  %15523 = vrcp.f32 %v12012_v31  ;;  %v12000_v63 = vadd.f32 1.0, %v15496_v24  ;;  %v12339_v24 = vld [vmem:[%s21085_s20 + $0x178] sm:$0xff] }
 0x6fe   : > { %v15500_v26 = vpop.eup %15499  ;;  %15525 = vrcp.f32 %v12011_v27  ;;  %v11999_v28 = vadd.f32 1.0, %v15498_v42  ;;  %v12352_v42 = vld [vmem:[%s21085_s20 + $0x1e0] sm:$0xff] }
 0x6ff   : > { %v15502_v43 = vpop.eup %15501  ;;  %15527 = vrcp.f32 %v12008_v33  ;;  %v11996_v46 = vadd.f32 1.0, %v15500_v26  ;;  %v12351_v26 = vld [vmem:[%s21085_s20 + $0x1d8] sm:$0xff] }
 0x700   : > { %v15504_v62 = vpop.eup %15503  ;;  %15529 = vrcp.f32 %v12007_v40  ;;  %v11995_v52 = vadd.f32 1.0, %v15502_v43  ;;  %v22039_v40 = vld [vmem:[#allocation76_spill] sm:$0xff]  ;;  %v12350_v43 = vld [vmem:[%s21085_s20 + $0x1d0] sm:$0xff] }
 0x701   : > { %v15506_v56 = vpop.eup %15505  ;;  %15531 = vrcp.f32 %v12004_v38  ;;  %v11992_v59 = vadd.f32 1.0, %v15504_v62  ;;  %v12336_v38 = vld [vmem:[%s21085_s20 + $0x160] sm:$0xff]  ;;  %v12349_v62 = vld [vmem:[%s21085_s20 + $0x1c8] sm:$0xff] }
 0x702   : > { %v15508_v23 = vpop.eup %15507  ;;  %15533 = vrcp.f32 %v12003_v32  ;;  %v11991_v41 = vadd.f32 1.0, %v15506_v56  ;;  %v12335_v32 = vld [vmem:[%s21085_s20 + $0x158] sm:$0xff]  ;;  %v12348_v56 = vld [vmem:[%s21085_s20 + $0x1c0] sm:$0xff] }
 0x703   : > { %v15510_v34 = vpop.eup %15509  ;;  %15535 = vrcp.f32 %v12000_v63  ;;  %v11988_v54 = vadd.f32 1.0, %v15508_v23  ;;  %v12334_v63 = vld [vmem:[%s21085_s20 + $0x150] sm:$0xff]  ;;  %v12347_v23 = vld [vmem:[%s21085_s20 + $0x1b8] sm:$0xff] }
 0x704   : > { %v15512_v25 = vpop.eup %15511  ;;  %15537 = vrcp.f32 %v11999_v28  ;;  %v11987_v20 = vadd.f32 1.0, %v15510_v34  ;;  %v12333_v28 = vld [vmem:[%s21085_s20 + $0x148] sm:$0xff]  ;;  %v12346_v34 = vld [vmem:[%s21085_s20 + $0x1b0] sm:$0xff] }
 0x705   : > { %v15514_v45 = vpop.eup %15513  ;;  %15539 = vrcp.f32 %v11996_v46  ;;  %v12140_v13 = vmul.f32 %v15512_v25, %v21226_v7  ;;  %v12332_v46 = vld [vmem:[%s21085_s20 + $0x140] sm:$0xff]  ;;  %v12345_v25 = vld [vmem:[%s21085_s20 + $0x1a8] sm:$0xff] }
 0x706   : > { %v15516_v14 = vpop.eup %15515  ;;  %15541 = vrcp.f32 %v11995_v52  ;;  %v12143_v36 = vmul.f32 %v15514_v45, %v21233_v19  ;;  %v12331_v52 = vld [vmem:[%s21085_s20 + $0x138] sm:$0xff]  ;;  %v12344_v45 = vld [vmem:[%s21085_s20 + $0x1a0] sm:$0xff] }
 0x707   : > { %v15518_v48 = vpop.eup %15517  ;;  %15543 = vrcp.f32 %v11992_v59  ;;  %v12144_v3 = vmul.f32 %v15516_v14, %v21245_v18  ;;  %v12330_v59 = vld [vmem:[%s21085_s20 + $0x130] sm:$0xff]  ;;  %v12343_v14 = vld [vmem:[%s21085_s20 + $0x198] sm:$0xff] }
 0x708   : > { %v15520_v39 = vpop.eup %15519  ;;  %15545 = vrcp.f32 %v11991_v41  ;;  %v12139_v15 = vmul.f32 %v15518_v48, %v21223_v55  ;;  %v12329_v41 = vld [vmem:[%s21085_s20 + $0x128] sm:$0xff]  ;;  %v12342_v48 = vld [vmem:[%s21085_s20 + $0x190] sm:$0xff] }
 0x709   : > { %v15522_v58 = vpop.eup %15521  ;;  %15547 = vrcp.f32 %v11988_v54  ;;  %12233 = vmatprep.subr.mxu1 %v12144_v3  ;;  %v12136_v10 = vmul.f32 %v15520_v39, %v21217_v17  ;;  %v12328_v54 = vld [vmem:[%s21085_s20 + $0x120] sm:$0xff]  ;;  %v12326_v3 = vld [vmem:[%s21085_s20 + $0x110] sm:$0xff]  ;;  %v12309_v39 = vld [vmem:[%s21085_s20 + $0x88] sm:$0xff] }
 0x70a   : > { %v15524_v16 = vpop.eup %15523  ;;  %15549 = vrcp.f32 %v11987_v20  ;;  %12234 = vmatpush1.msra.mxu1 %v12143_v36  ;;  %v12135_v18 = vmul.f32 %v15522_v58, %v21228_v51  ;;  %v12327_v20 = vld [vmem:[%s21085_s20 + $0x118] sm:$0xff]  ;;  %13822 = vmatprep.subr.mxu0 %v12309_v39  ;;  %v12293_v58 = vld [vmem:[%s21085_s20 + $0x8] sm:$0xff] }
 0x70b   : > { %v15526_v60 = vpop.eup %15525  ;;  %12235 = vmatprep.subr.mxu1 %v12140_v13  ;;  %v12132_v19 = vmul.f32 %v15524_v16, %v21214_v37  ;;  %13823 = vmatpush3.msra.mxu0 %v12293_v58  ;;  %v12308_v13 = vld [vmem:[%s21085_s20 + $0x80] sm:$0xff] }
 0x70c   : > { %v15528_v22 = vpop.eup %15527  ;;  %12236 = vmatpush1.msra.mxu1 %v12139_v15  ;;  %v12131_v7 = vmul.f32 %v15526_v60, %v21239_v12  ;;  %13824 = vmatprep.subr.mxu0 %v12308_v13  ;;  %v12292_v15 = vld [vmem:[%s21085_s20] sm:$0xff]  ;;  %v12341_v60 = vld [vmem:[%s21085_s20 + $0x188] sm:$0xff] }
 0x70d   : > { %v15530_v53 = vpop.eup %15529  ;;  %12237 = vmatprep.subr.mxu1 %v12136_v10  ;;  %v12128_v55 = vmul.f32 %v15528_v22, %v21242_v35  ;;  %13825 = vmatpush3.msra.mxu0 %v12292_v15  ;;  %v12325_v10 = vld [vmem:[%s21085_s20 + $0x108] sm:$0xff]  ;;  %v12340_v22 = vld [vmem:[%s21085_s20 + $0x180] sm:$0xff] }
 0x70e   : > { %v15532_v47 = vpop.eup %15531  ;;  %12238 = vmatpush1.msra.mxu1 %v12135_v18  ;;  %v12127_v17 = vmul.f32 %v15530_v53, %v21250_v29  ;;  %v12324_v18 = vld [vmem:[%s21085_s20 + $0x100] sm:$0xff] }
 0x70f   : > { %v15534_v50 = vpop.eup %15533  ;;  %12239 = vmatprep.subr.mxu1 %v12132_v19  ;;  %v12124_v51 = vmul.f32 %v15532_v47, %v21256_v2 }
 0x710   : > { %v15536_v4 = vpop.eup %15535  ;;  %12240 = vmatpush1.msra.mxu1 %v12131_v7  ;;  %v12123_v37 = vmul.f32 %v15534_v50, %v21262_v5 }
 0x711   : > { %v15538_v8 = vpop.eup %15537  ;;  %12241 = vmatprep.subr.mxu1 %v12128_v55  ;;  %v12120_v12 = vmul.f32 %v15536_v4, %v21268_v11 }
 0x712   : > { %v15540_v0 = vpop.eup %15539  ;;  %12242 = vmatpush1.msra.mxu1 %v12127_v17  ;;  %v12119_v35 = vmul.f32 %v15538_v8, %v21274_v1 }
 0x713   : > { %v15542_v31 = vpop.eup %15541  ;;  %12243 = vmatprep.subr.mxu1 %v12124_v51  ;;  %v12116_v29 = vmul.f32 %v15540_v0, %v21280_v57 }
 0x714   : > { %v15544_v9 = vpop.eup %15543  ;;  %12244 = vmatpush1.msra.mxu1 %v12123_v37  ;;  %v12115_v6 = vmul.f32 %v15542_v31, %v21286_v30  ;;  %v12355_v30 = vld [vmem:[%s21085_s20 + $0x1f8] sm:$0xff] }
 0x715   : > { %v15546_v27 = vpop.eup %15545  ;;  %12245 = vmatprep.subr.mxu1 %v12120_v12  ;;  %v12112_v11 = vmul.f32 %v15544_v9, %v21290_v49  ;;  %v12354_v49 = vld [vmem:[%s21085_s20 + $0x1f0] sm:$0xff] }
 0x716   : > { %v15548_v2 = vpop.eup %15547  ;;  %12246 = vmatpush1.msra.mxu1 %v12119_v35  ;;  %v12111_v1 = vmul.f32 %v15546_v27, %v21294_v21  ;;  %v12338_v21 = vld [vmem:[%s21085_s20 + $0x170] sm:$0xff] }
 0x717   : > { %v15550_v5 = vpop.eup %15549  ;;  %12247 = vmatprep.subr.mxu1 %v12116_v29  ;;  %v12108_v33 = vmul.f32 %v15548_v2, %v21298_v61  ;;  %v12353_v61 = vld [vmem:[%s21085_s20 + $0x1e8] sm:$0xff] }
 0x718   : > { %12248 = vmatpush1.msra.mxu1 %v12115_v6  ;;  %v12107_v57 = vmul.f32 %v15550_v5, %v21302_v44  ;;  %v12337_v44 = vld [vmem:[%s21085_s20 + $0x168] sm:$0xff] }
 0x719   : > { %12249 = vmatprep.subr.mxu1 %v12112_v11 }
 0x71a   : > { %12250 = vmatpush1.msra.mxu1 %v12111_v1 }
 0x71b   : > { %12251 = vmatprep.subr.mxu1 %v12108_v33 }
 0x71c   : > { %12252 = vmatpush1.msra.mxu1 %v12107_v57 }
 0x71d   : > { %13790 = vmatmul.mubr.msk.f32.vlgmr.msra.gmra.mxu1 %vm12146_vm1, %v22039_v40  ;;  %13829 = vmatprep.subr.mxu1 %v12355_v30 }
 0x71e   : > { %13830 = vmatpush3.msra.mxu1 %v12339_v24 }
 0x71f   : > { %13831 = vmatprep.subr.mxu1 %v12354_v49 }
 0x720   : > { %13832 = vmatpush3.msra.mxu1 %v12338_v21 }
 0x721   : > { %13833 = vmatprep.subr.mxu1 %v12353_v61 }
 0x722   : > { %13834 = vmatpush3.msra.mxu1 %v12337_v44 }
 0x723   : > { %13835 = vmatprep.subr.mxu1 %v12352_v42 }
 0x724   : > { %13836 = vmatpush3.msra.mxu1 %v12336_v38 }
 0x725   : > { %13837 = vmatprep.subr.mxu1 %v12351_v26 }
 0x726   : > { %13838 = vmatpush3.msra.mxu1 %v12335_v32 }
 0x727   : > { %13839 = vmatprep.subr.mxu1 %v12350_v43 }
 0x728   : > { %13840 = vmatpush3.msra.mxu1 %v12334_v63 }
 0x729   : > { %13841 = vmatprep.subr.mxu1 %v12349_v62 }
 0x72a   : > { %13842 = vmatpush3.msra.mxu1 %v12333_v28 }
 0x72b   : > { %13843 = vmatprep.subr.mxu1 %v12348_v56 }
 0x72c   : > { %13844 = vmatpush3.msra.mxu1 %v12332_v46 }
 0x72d   : > { %13845 = vmatprep.subr.mxu1 %v12347_v23 }
 0x72e   : > { %13846 = vmatpush3.msra.mxu1 %v12331_v52 }
 0x72f   : > { %13847 = vmatprep.subr.mxu1 %v12346_v34 }
 0x730   : > { %13848 = vmatpush3.msra.mxu1 %v12330_v59 }
 0x731   : > { %13849 = vmatprep.subr.mxu1 %v12345_v25 }
 0x732   : > { %13850 = vmatpush3.msra.mxu1 %v12329_v41 }
 0x733   : > { %13851 = vmatprep.subr.mxu1 %v12344_v45 }
 0x734   : > { %13852 = vmatpush3.msra.mxu1 %v12328_v54 }
 0x735   : > { %13853 = vmatprep.subr.mxu1 %v12343_v14 }
 0x736   : > { %13854 = vmatpush3.msra.mxu1 %v12327_v20 }
 0x737   : > { %13855 = vmatprep.subr.mxu1 %v12342_v48 }
 0x738   : > { %13856 = vmatpush3.msra.mxu1 %v12326_v3 }
 0x739   : > { %13857 = vmatprep.subr.mxu1 %v12341_v60 }
 0x73a   : > { %13858 = vmatpush3.msra.mxu1 %v12325_v10 }
 0x73b   : > { %13859 = vmatprep.subr.mxu1 %v12340_v22 }
 0x73c   : > { %13860 = vmatpush3.msra.mxu1 %v12324_v18 }
 0x746   : > { %v12216_v36 = vpop.f32.mrf.mxu0 }
 0x748   : > { %v12218_v16 = vpop.f32.mrf.mxu0 }
 0x749   : > { %12420 = vmatprep.mubr.f32.mxu0 %v12218_v16 }
 0x74a   : > { %12421 = vmatmul.mubr.f32.vlgmr.msra.gmra.mxu0 %v12216_v36 }
 0x7dd   : > { %v12287_v53 = vpop.f32.mrf.mxu1 }
 0x7df   : > { %v12289_v19 = vpop.f32.mrf.mxu1 }
 0x7e0   : > { %12490 = vmatprep.mubr.f32.mxu1 %v12289_v19 }
 0x7e1   : > { %12491 = vmatmul.mubr.f32.vlgmr.msra.gmra.mxu1 %v12287_v53 }
 0x80a   : > { %v13826_v47 = vpop.f32.mrf.mxu0 }
 0x80c   : > { %v13827_v50 = vpop.f32.mrf.mxu0 }
 0x80d   : > { %v13828_v4 = vadd.f32 %v13827_v50, %v13826_v47 }
 0x8a1   : > { %v13861_v7 = vpop.f32.mrf.mxu1 }
 0x8a3   : > { %v13862_v55 = vpop.f32.mrf.mxu1 }
 0x8a4   : > { %v13863_v17 = vadd.f32 %v13862_v55, %v13861_v7 }
 0x8a6   : > { %v12493_v8 = vadd.f32 %v13863_v17, %v13828_v4 }
 0x8a8   : > { %12497 = vst.msk [vmem:[%s2236_s25] sm:$0x3] %vm12496_vm2, %v12493_v8 }
 0x8a9 PF: > { %p11_p10 = scmp.ge.s32.totalorder %s15620_s19, 6   ;;  %s22040_s15 = smov %s15569_s16 }
 0x8aa   : > { %s22041_s16 = smov %s15629_s22  ;;  %s22042_s17 = smov %s15620_s19 }
 0x8ab   :  { %13 = sbr.rel (!%p11_p10) target bundleno = 2 (0x2), region = 97 }

</bundles_post_ra>
